<compile_context>
chip_gen: v5e
topology: v5e:2x2
jax: 0.10.0
libtpu: 0.0.40
codegen_flags: <defaults>
</compile_context>

<pallas_src>
import functools
import math

import jax
import jax.numpy as jnp
import numpy as np
from jax import lax
from jax.experimental import pallas as pl
from jax.experimental.pallas import tpu as pltpu


def _sigmoid(x):
    return 1.0 / (1.0 + jnp.exp(-x))


def _softplus(x):
    return jnp.log(1.0 + jnp.exp(-jnp.abs(x))) + jnp.maximum(x, 0.0)


def mamba_block_kernel(
    x_ref, w_in_ref, conv_w_ref, conv_b_ref, w_x_ref, w_dt_ref, b_dt_ref,
    a_t_ref, d_vec_ref, w_out_ref, o_ref,
    *, seq_len, b_tile, d_inner, d_state, dt_rank, d_conv):
    m = b_tile * seq_len                                      # rows = batch-tile * seq

    xb = x_ref[...].astype(jnp.bfloat16)                      # (m, d_model) bf16

    # ---- in_proj: single bf16 matmul, split into x / res branches ----
    xr = jnp.dot(xb, w_in_ref[...], preferred_element_type=jnp.float32)
    x1 = xr[:, :d_inner]                                      # (m, d_inner) f32
    res = xr[:, d_inner:]

    # position of each row inside its length-seq_len batch segment (hoisted, reused)
    t_local = lax.broadcasted_iota(jnp.int32, (m, 1), 0) % seq_len
    is_first = t_local == 0

    # ---- depthwise causal conv1d: XLU roll + row mask (no matmuls) ----
    acc = jnp.broadcast_to(conv_b_ref[...], (m, d_inner))
    for k in range(d_conv):
        s = d_conv - 1 - k                                    # row t picks x1[t - s]
        if s == 0:
            shifted = x1
        else:
            shifted = jnp.where(t_local >= s, pltpu.roll(x1, shift=s, axis=0), 0.0)
        acc = acc + shifted * conv_w_ref[k:k + 1, :]
    xc = acc * _sigmoid(acc)                                  # SiLU, (m, d_inner) f32

    # ---- x_proj (delta | B | C) and dt_proj + softplus ----
    x_dbl = jnp.dot(xc.astype(jnp.bfloat16), w_x_ref[...],
                    preferred_element_type=jnp.float32)        # (m, >=dt_rank+2*d_state)
    delta_r = x_dbl[:, :dt_rank].astype(jnp.bfloat16)
    dt = jnp.dot(delta_r, w_dt_ref[...],
                 preferred_element_type=jnp.float32) + b_dt_ref[...]
    dt = _softplus(dt)                                         # (m, d_inner)

    Bmat = x_dbl[:, dt_rank:dt_rank + d_state]                 # (m, d_state)
    Cmat = x_dbl[:, dt_rank + d_state:dt_rank + 2 * d_state]   # (m, d_state)
    dt_u = dt * xc
    a_t = a_t_ref[...]                                         # (d_state, d_inner) f32

    # Per-segment inclusive prefix sum along rows: Hillis-Steele with XLU rolls.
    # The t_local mask keeps rows of different batch segments from mixing.
    def seg_cumsum(v):
        shift = 1
        while shift < seq_len:
            v = v + jnp.where(t_local >= shift,
                              pltpu.roll(v, shift=shift, axis=0), 0.0)
            shift *= 2
        return v

    # ---- selective scan ('cumsum' mode), fori_loop over d_state ----
    def state_body(n, y):
        one_lane = (lax.broadcasted_iota(jnp.int32, (1, d_state), 1) == n
                    ).astype(jnp.float32)
        one_sub = (lax.broadcasted_iota(jnp.int32, (d_state, 1), 0) == n
                   ).astype(jnp.float32)
        a_row = jnp.sum(a_t * one_sub, axis=0, keepdims=True)        # (1, d_inner)
        b_col = jnp.sum(Bmat * one_lane, axis=1, keepdims=True)      # (m, 1)
        c_col = jnp.sum(Cmat * one_lane, axis=1, keepdims=True)      # (m, 1)

        dA = jnp.maximum(dt * a_row, -20.0)
        dA = jnp.where(is_first, 0.0, dA)                  # == F.pad(dA[:, 1:], ...)
        dA_cs = jnp.exp(seg_cumsum(dA))
        xs = (dt_u * b_col) * pl.reciprocal(dA_cs + 1e-12, approx=False)
        xs = seg_cumsum(xs) * dA_cs
        return y + xs * c_col

    y = lax.fori_loop(0, d_state, state_body,
                      jnp.zeros((m, d_inner), jnp.float32), unroll=True)
    y = y + xc * d_vec_ref[...]

    # ---- gate with silu(res), out_proj ----
    y = y * (res * _sigmoid(res))
    o_ref[...] = jnp.dot(y.astype(jnp.bfloat16), w_out_ref[...],
                         preferred_element_type=jnp.float32)   # (m, d_model)


def _pick_b_tile(b, l, target_m=512):
    """Divisor of b with b_tile*l near target_m, preferring >=2 grid steps (so both
    v7x TensorCores get work) and m % 8 == 0 (the (8,128) block-layout rule)."""
    valid = [c for c in range(1, b + 1)
             if b % c == 0 and ((c * l) % 8 == 0 or c == b)]
    if not valid:
        return b
    multi = [c for c in valid if b // c >= 2]
    pool = multi if multi else valid
    fitting = [c for c in pool if c * l <= max(target_m, min(pool) * l)]
    return max(fitting) if fitting else min(pool)


def _vmem_limit_bytes():
    """Generation-aware VMEM budget: ~85% of physical (~54 MiB v7x, ~109 MiB v5e/v6e)."""
    try:
        cap = pltpu.get_tpu_info().vmem_capacity_bytes
    except Exception:
        cap = 64 * 1024 * 1024
    return int(min(cap * 0.85, 112 * 1024 * 1024))


def mamba_block_forward(x, params):
    (w_in, conv_w, conv_b, w_x, w_dt, b_dt, a_t, d_vec, w_out) = params
    b, l, d_model = x.shape
    d_conv, d_inner = conv_w.shape
    d_state = a_t.shape[0]
    dt_rank = w_dt.shape[0]

    b_tile = _pick_b_tile(b, l)
    m = b_tile * l

    # activations as a lane-dense bf16 2-D slab (halves HBM traffic in)
    x2 = x.reshape(b * l, d_model).astype(jnp.bfloat16)

    # pad x_proj columns to a multiple of 128 so x_dbl is lane-dense
    # (extra zero columns are never read by the kernel)
    xp_pad = (-w_x.shape[1]) % 128
    w_x_p = jnp.pad(w_x, ((0, 0), (0, xp_pad))) if xp_pad else w_x

    kernel = functools.partial(
        mamba_block_kernel, seq_len=l, b_tile=b_tile, d_inner=d_inner,
        d_state=d_state, dt_rank=dt_rank, d_conv=d_conv)

    consts = (w_in, conv_w, conv_b, w_x_p, w_dt, b_dt, a_t, d_vec, w_out)

    def const_spec(p, single_buffer):
        nd = p.ndim
        if single_buffer:
            # grid-invariant constant: single-buffer it (halves weight VMEM on v7x)
            return pl.BlockSpec(p.shape, lambda i, _nd=nd: (0,) * _nd,
                                pipeline_mode=pl.Buffered(1))
        return pl.BlockSpec(p.shape, lambda i, _nd=nd: (0,) * _nd)

    def build(single_buffer):
        in_specs = [pl.BlockSpec((m, d_model), lambda i: (i, 0))]
        in_specs += [const_spec(p, single_buffer) for p in consts]
        return pl.pallas_call(
            kernel,
            grid=(b // b_tile,),
            in_specs=in_specs,
            out_specs=pl.BlockSpec((m, d_model), lambda i: (i, 0)),
            out_shape=jax.ShapeDtypeStruct((b * l, d_model), jnp.float32),
            compiler_params=pltpu.CompilerParams(
                dimension_semantics=("parallel",),        # independent batch tiles
                vmem_limit_bytes=_vmem_limit_bytes()),
        )

    try:
        out = build(True)(x2, *consts)
        out = jax.block_until_ready(out)
    except Exception:
        # fallback for builds where pipeline_mode=pl.Buffered(1) is unsupported
        out = build(False)(x2, *consts)
    return out.reshape(b, l, d_model)


def init_params(key, d_model, d_state=16, expand=2, d_conv=4):
    d_inner = expand * d_model
    dt_rank = math.ceil(d_model / 16)
    ks = jax.random.split(key, 7)

    def lin(k, fan_in, fan_out, dtype=jnp.bfloat16):
        lim = 1.0 / math.sqrt(fan_in)
        return jax.random.uniform(k, (fan_in, fan_out), jnp.float32, -lim, lim).astype(dtype)

    w_in = lin(ks[0], d_model, 2 * d_inner)                    # in_proj: [x | res]
    conv_w = jax.random.uniform(ks[1], (d_conv, d_inner), jnp.float32,
                                -1.0 / math.sqrt(d_conv), 1.0 / math.sqrt(d_conv))
    conv_b = jax.random.uniform(ks[2], (1, d_inner), jnp.float32, -0.5, 0.5)
    w_x = lin(ks[3], d_inner, dt_rank + 2 * d_state)           # x_proj: [dt | B | C]
    w_dt = lin(ks[4], dt_rank, d_inner)
    b_dt = jax.random.uniform(ks[5], (1, d_inner), jnp.float32, -2.5, -1.5)
    # A_log = log(arange(1..d_state)) per row; SSM uses A = -exp(A_log).  Pass A^T.
    a_t = -jnp.tile(jnp.arange(1, d_state + 1, dtype=jnp.float32)[:, None], (1, d_inner))
    d_vec = jnp.ones((1, d_inner), jnp.float32)
    w_out = lin(ks[6], d_inner, d_model)
    return (w_in, conv_w, conv_b, w_x, w_dt, b_dt, a_t, d_vec, w_out)


def mamba_ref(x, params):
    """Pure-JAX reference mirroring the PyTorch forward (scan_mode='cumsum'),
    with the same bf16-weight matmul casting as the kernel."""
    (w_in, conv_w, conv_b, w_x, w_dt, b_dt, a_t, d_vec, w_out) = params
    b, l, _ = x.shape
    d_conv, d_inner = conv_w.shape
    d_state = a_t.shape[0]
    dt_rank = w_dt.shape[0]
    f32 = jnp.float32

    xr = jnp.einsum('bld,de->ble', x.astype(jnp.bfloat16), w_in,
                    preferred_element_type=f32)
    x1, res = xr[..., :d_inner], xr[..., d_inner:]

    xp = jnp.pad(x1, ((0, 0), (d_conv - 1, 0), (0, 0)))
    xc = jnp.broadcast_to(conv_b[None], (b, l, d_inner)).astype(f32)
    for k in range(d_conv):
        xc = xc + xp[:, k:k + l, :] * conv_w[k][None, None, :]
    xc = xc * _sigmoid(xc)

    x_dbl = jnp.einsum('bld,de->ble', xc.astype(jnp.bfloat16), w_x,
                       preferred_element_type=f32)
    delta_r = x_dbl[..., :dt_rank]
    Bm = x_dbl[..., dt_rank:dt_rank + d_state]
    Cm = x_dbl[..., dt_rank + d_state:]
    dt = jnp.einsum('blr,rd->bld', delta_r.astype(jnp.bfloat16), w_dt,
                    preferred_element_type=f32) + b_dt[0]
    dt = _softplus(dt)

    A = a_t.T                                                  # (d_inner, d_state)
    dA = dt[..., None] * A[None, None, :, :]
    dB_u = (dt * xc)[..., None] * Bm[:, :, None, :]
    dA = jnp.maximum(dA, -20.0)
    dA = dA.at[:, 0].set(0.0)                                  # F.pad(dA[:, 1:], (...,1,0))
    dA_cumsum = jnp.exp(jnp.cumsum(dA, axis=1))
    xs = dB_u / (dA_cumsum + 1e-12)
    xs = jnp.cumsum(xs, axis=1) * dA_cumsum
    y = (xs * Cm[:, :, None, :]).sum(axis=-1)
    y = y + xc * d_vec[0]
    y = y * (res * _sigmoid(res))
    return jnp.einsum('bld,de->ble', y.astype(jnp.bfloat16), w_out,
                      preferred_element_type=f32)


if __name__ == "__main__":
    b, l, d_model = 2, 8, 32            # -> d_inner=64, d_state=16, dt_rank=2, d_conv=4
    key = jax.random.PRNGKey(0)
    kx, kp = jax.random.split(key)
    x = jax.random.normal(kx, (b, l, d_model), jnp.float32)
    params = init_params(kp, d_model)

    out = mamba_block_forward(x, params)
    jax.block_until_ready(out)

    ref = mamba_ref(x, params)
    np.testing.assert_allclose(np.asarray(out), np.asarray(ref), rtol=5e-3, atol=5e-3)
    print("KERNEL_OK")
</pallas_src>

<mosaic_0001>
module attributes {stable_mosaic.version = 11 : i64} {
  func.func @mamba_block_kernel(%arg0: i32, %arg1: memref<8x32xbf16, #tpu.memory_space<vmem>>, %arg2: memref<32x128xbf16, #tpu.memory_space<vmem>>, %arg3: memref<4x64xf32, #tpu.memory_space<vmem>>, %arg4: memref<1x64xf32, #tpu.memory_space<vmem>>, %arg5: memref<64x128xbf16, #tpu.memory_space<vmem>>, %arg6: memref<2x64xbf16, #tpu.memory_space<vmem>>, %arg7: memref<1x64xf32, #tpu.memory_space<vmem>>, %arg8: memref<16x64xf32, #tpu.memory_space<vmem>>, %arg9: memref<1x64xf32, #tpu.memory_space<vmem>>, %arg10: memref<64x32xbf16, #tpu.memory_space<vmem>>, %arg11: memref<8x32xf32, #tpu.memory_space<vmem>>) attributes {dimension_semantics = [#tpu.dimension_semantics<parallel>], iteration_bounds = array<i64: 2>, scalar_prefetch = 0 : i64, scratch_operands = 0 : i64, tpu.core_type = #tpu.core_type<tc>, window_params = [{transform_indices = @transform_0, window_bounds = array<i64: 8, 32>}, {pipeline_mode = #tpu.pipeline_mode<synchronous>, transform_indices = @transform_1, window_bounds = array<i64: 32, 128>}, {pipeline_mode = #tpu.pipeline_mode<synchronous>, transform_indices = @transform_2, window_bounds = array<i64: 4, 64>}, {pipeline_mode = #tpu.pipeline_mode<synchronous>, transform_indices = @transform_3, window_bounds = array<i64: 1, 64>}, {pipeline_mode = #tpu.pipeline_mode<synchronous>, transform_indices = @transform_4, window_bounds = array<i64: 64, 128>}, {pipeline_mode = #tpu.pipeline_mode<synchronous>, transform_indices = @transform_5, window_bounds = array<i64: 2, 64>}, {pipeline_mode = #tpu.pipeline_mode<synchronous>, transform_indices = @transform_6, window_bounds = array<i64: 1, 64>}, {pipeline_mode = #tpu.pipeline_mode<synchronous>, transform_indices = @transform_7, window_bounds = array<i64: 16, 64>}, {pipeline_mode = #tpu.pipeline_mode<synchronous>, transform_indices = @transform_8, window_bounds = array<i64: 1, 64>}, {pipeline_mode = #tpu.pipeline_mode<synchronous>, transform_indices = @transform_9, window_bounds = array<i64: 64, 32>}, {transform_indices = @transform_10, window_bounds = array<i64: 8, 32>}]} {
    %c0 = arith.constant 0 : index
    %c0_0 = arith.constant 0 : index
    %0 = vector.load %arg1[%c0, %c0_0] : memref<8x32xbf16, #tpu.memory_space<vmem>>, vector<8x32xbf16>
    %c0_1 = arith.constant 0 : index
    %c0_2 = arith.constant 0 : index
    %1 = vector.load %arg2[%c0_1, %c0_2] : memref<32x128xbf16, #tpu.memory_space<vmem>>, vector<32x128xbf16>
    %cst = arith.constant dense<0.000000e+00> : vector<8x128xf32>
    %2 = tpu.matmul %0, %1, %cst {dimension_numbers = #tpu.dot_dimension_numbers<[1], [0], [0], [1], [0, 0, 1, 1], [], []>} : vector<8x32xbf16>, vector<32x128xbf16>, vector<8x128xf32> -> vector<8x128xf32>
    %3 = vector.extract_strided_slice %2 {offsets = [0, 0], sizes = [8, 64], strides = [1, 1]} : vector<8x128xf32> to vector<8x64xf32>
    %4 = vector.extract_strided_slice %2 {offsets = [0, 64], sizes = [8, 64], strides = [1, 1]} : vector<8x128xf32> to vector<8x64xf32>
    %5 = tpu.iota {dimensions = array<i32: 0>} : vector<8x1xi32>
    %c8_i32 = arith.constant 8 : i32
    %c0_i32 = arith.constant 0 : i32
    %6 = arith.cmpi eq, %c8_i32, %c0_i32 : i32
    %c1_i32 = arith.constant 1 : i32
    %7 = arith.select %6, %c1_i32, %c8_i32 : i32
    %8 = vector.broadcast %7 : i32 to vector<8x1xi32>
    %9 = arith.remsi %5, %8 : vector<8x1xi32>
    %c0_i32_3 = arith.constant 0 : i32
    %10 = vector.broadcast %c0_i32_3 : i32 to vector<8x1xi32>
    %11 = arith.cmpi ne, %9, %10 : vector<8x1xi32>
    %c0_i32_4 = arith.constant 0 : i32
    %12 = vector.broadcast %c0_i32_4 : i32 to vector<8x1xi32>
    %13 = arith.cmpi slt, %9, %12 : vector<8x1xi32>
    %c0_i32_5 = arith.constant 0 : i32
    %14 = arith.cmpi slt, %7, %c0_i32_5 : i32
    %15 = vector.broadcast %14 : i1 to vector<8x1xi1>
    %16 = vector.broadcast %15 : vector<8x1xi1> to vector<8x1xi1>
    %17 = arith.xori %13, %16 : vector<8x1xi1>
    %18 = arith.andi %17, %11 : vector<8x1xi1>
    %19 = vector.broadcast %7 : i32 to vector<8x1xi32>
    %20 = arith.addi %9, %19 : vector<8x1xi32>
    %21 = arith.select %18, %20, %9 : vector<8x1xi1>, vector<8x1xi32>
    %c0_i32_6 = arith.constant 0 : i32
    %22 = vector.broadcast %c0_i32_6 : i32 to vector<8x1xi32>
    %23 = arith.cmpi eq, %21, %22 : vector<8x1xi32>
    %c0_7 = arith.constant 0 : index
    %c0_8 = arith.constant 0 : index
    %24 = vector.load %arg4[%c0_7, %c0_8] : memref<1x64xf32, #tpu.memory_space<vmem>>, vector<1x64xf32>
    %25 = vector.shape_cast %24 : vector<1x64xf32> to vector<1x64xf32>
    %26 = vector.broadcast %25 : vector<1x64xf32> to vector<8x64xf32>
    %c3_i32 = arith.constant 3 : i32
    %27 = vector.broadcast %c3_i32 : i32 to vector<8x1xi32>
    %28 = arith.cmpi sge, %21, %27 : vector<8x1xi32>
    %c3_i32_9 = arith.constant 3 : i32
    %29 = tpu.dynamic_rotate %3 by %c3_i32_9 dim 0 : vector<8x64xf32>, i32 -> vector<8x64xf32>
    %cst_10 = arith.constant 0.000000e+00 : f32
    %30 = vector.shape_cast %28 : vector<8x1xi1> to vector<8x1xi1>
    %31 = vector.broadcast %30 : vector<8x1xi1> to vector<8x64xi1>
    %32 = vector.broadcast %cst_10 : f32 to vector<8x64xf32>
    %33 = arith.select %31, %29, %32 : vector<8x64xi1>, vector<8x64xf32>
    %c0_11 = arith.constant 0 : index
    %c0_12 = arith.constant 0 : index
    %34 = vector.load %arg3[%c0_11, %c0_12] : memref<4x64xf32, #tpu.memory_space<vmem>>, vector<1x64xf32>
    %35 = vector.broadcast %34 : vector<1x64xf32> to vector<8x64xf32>
    %36 = arith.mulf %33, %35 : vector<8x64xf32>
    %37 = arith.addf %26, %36 : vector<8x64xf32>
    %c2_i32 = arith.constant 2 : i32
    %38 = vector.broadcast %c2_i32 : i32 to vector<8x1xi32>
    %39 = arith.cmpi sge, %21, %38 : vector<8x1xi32>
    %c2_i32_13 = arith.constant 2 : i32
    %40 = tpu.dynamic_rotate %3 by %c2_i32_13 dim 0 : vector<8x64xf32>, i32 -> vector<8x64xf32>
    %cst_14 = arith.constant 0.000000e+00 : f32
    %41 = vector.shape_cast %39 : vector<8x1xi1> to vector<8x1xi1>
    %42 = vector.broadcast %41 : vector<8x1xi1> to vector<8x64xi1>
    %43 = vector.broadcast %cst_14 : f32 to vector<8x64xf32>
    %44 = arith.select %42, %40, %43 : vector<8x64xi1>, vector<8x64xf32>
    %c1 = arith.constant 1 : index
    %c0_15 = arith.constant 0 : index
    %45 = vector.load %arg3[%c1, %c0_15] : memref<4x64xf32, #tpu.memory_space<vmem>>, vector<1x64xf32>
    %46 = vector.broadcast %45 : vector<1x64xf32> to vector<8x64xf32>
    %47 = arith.mulf %44, %46 : vector<8x64xf32>
    %48 = arith.addf %37, %47 : vector<8x64xf32>
    %c1_i32_16 = arith.constant 1 : i32
    %49 = vector.broadcast %c1_i32_16 : i32 to vector<8x1xi32>
    %50 = arith.cmpi sge, %21, %49 : vector<8x1xi32>
    %c1_i32_17 = arith.constant 1 : i32
    %51 = tpu.dynamic_rotate %3 by %c1_i32_17 dim 0 : vector<8x64xf32>, i32 -> vector<8x64xf32>
    %cst_18 = arith.constant 0.000000e+00 : f32
    %52 = vector.shape_cast %50 : vector<8x1xi1> to vector<8x1xi1>
    %53 = vector.broadcast %52 : vector<8x1xi1> to vector<8x64xi1>
    %54 = vector.broadcast %cst_18 : f32 to vector<8x64xf32>
    %55 = arith.select %53, %51, %54 : vector<8x64xi1>, vector<8x64xf32>
    %c2 = arith.constant 2 : index
    %c0_19 = arith.constant 0 : index
    %56 = vector.load %arg3[%c2, %c0_19] : memref<4x64xf32, #tpu.memory_space<vmem>>, vector<1x64xf32>
    %57 = vector.broadcast %56 : vector<1x64xf32> to vector<8x64xf32>
    %58 = arith.mulf %55, %57 : vector<8x64xf32>
    %59 = arith.addf %48, %58 : vector<8x64xf32>
    %c3 = arith.constant 3 : index
    %c0_20 = arith.constant 0 : index
    %60 = vector.load %arg3[%c3, %c0_20] : memref<4x64xf32, #tpu.memory_space<vmem>>, vector<1x64xf32>
    %61 = vector.broadcast %60 : vector<1x64xf32> to vector<8x64xf32>
    %62 = arith.mulf %3, %61 : vector<8x64xf32>
    %63 = arith.addf %59, %62 : vector<8x64xf32>
    %cst_21 = arith.constant 0.000000e+00 : f32
    %64 = vector.broadcast %cst_21 : f32 to vector<8x64xf32>
    %65 = arith.subf %64, %63 : vector<8x64xf32>
    %66 = math.exp %65 : vector<8x64xf32>
    %cst_22 = arith.constant 1.000000e+00 : f32
    %67 = vector.broadcast %cst_22 : f32 to vector<8x64xf32>
    %68 = arith.addf %67, %66 : vector<8x64xf32>
    %cst_23 = arith.constant 1.000000e+00 : f32
    %69 = vector.broadcast %cst_23 : f32 to vector<8x64xf32>
    %70 = arith.divf %69, %68 : vector<8x64xf32>
    %71 = arith.mulf %63, %70 : vector<8x64xf32>
    %72 = arith.truncf %71 : vector<8x64xf32> to vector<8x64xbf16>
    %c0_24 = arith.constant 0 : index
    %c0_25 = arith.constant 0 : index
    %73 = vector.load %arg5[%c0_24, %c0_25] : memref<64x128xbf16, #tpu.memory_space<vmem>>, vector<64x128xbf16>
    %cst_26 = arith.constant dense<0.000000e+00> : vector<8x128xf32>
    %74 = tpu.matmul %72, %73, %cst_26 {dimension_numbers = #tpu.dot_dimension_numbers<[1], [0], [0], [1], [0, 0, 1, 1], [], []>} : vector<8x64xbf16>, vector<64x128xbf16>, vector<8x128xf32> -> vector<8x128xf32>
    %75 = vector.extract_strided_slice %74 {offsets = [0, 0], sizes = [8, 2], strides = [1, 1]} : vector<8x128xf32> to vector<8x2xf32>
    %76 = arith.truncf %75 : vector<8x2xf32> to vector<8x2xbf16>
    %c0_27 = arith.constant 0 : index
    %c0_28 = arith.constant 0 : index
    %77 = vector.load %arg6[%c0_27, %c0_28] : memref<2x64xbf16, #tpu.memory_space<vmem>>, vector<2x64xbf16>
    %cst_29 = arith.constant dense<0.000000e+00> : vector<8x64xf32>
    %78 = tpu.matmul %76, %77, %cst_29 {dimension_numbers = #tpu.dot_dimension_numbers<[1], [0], [0], [1], [0, 0, 1, 1], [], []>} : vector<8x2xbf16>, vector<2x64xbf16>, vector<8x64xf32> -> vector<8x64xf32>
    %c0_30 = arith.constant 0 : index
    %c0_31 = arith.constant 0 : index
    %79 = vector.load %arg7[%c0_30, %c0_31] : memref<1x64xf32, #tpu.memory_space<vmem>>, vector<1x64xf32>
    %80 = vector.broadcast %79 : vector<1x64xf32> to vector<8x64xf32>
    %81 = arith.addf %78, %80 : vector<8x64xf32>
    %82 = math.absf %81 : vector<8x64xf32>
    %cst_32 = arith.constant 0.000000e+00 : f32
    %83 = vector.broadcast %cst_32 : f32 to vector<8x64xf32>
    %84 = arith.subf %83, %82 : vector<8x64xf32>
    %85 = math.exp %84 : vector<8x64xf32>
    %cst_33 = arith.constant 1.000000e+00 : f32
    %86 = vector.broadcast %cst_33 : f32 to vector<8x64xf32>
    %87 = arith.addf %86, %85 : vector<8x64xf32>
    %88 = math.log %87 : vector<8x64xf32>
    %cst_34 = arith.constant 0.000000e+00 : f32
    %89 = vector.broadcast %cst_34 : f32 to vector<8x64xf32>
    %90 = arith.maximumf %81, %89 : vector<8x64xf32>
    %91 = arith.addf %88, %90 : vector<8x64xf32>
    %92 = vector.extract_strided_slice %74 {offsets = [0, 2], sizes = [8, 16], strides = [1, 1]} : vector<8x128xf32> to vector<8x16xf32>
    %93 = vector.extract_strided_slice %74 {offsets = [0, 18], sizes = [8, 16], strides = [1, 1]} : vector<8x128xf32> to vector<8x16xf32>
    %94 = arith.mulf %91, %71 : vector<8x64xf32>
    %c0_35 = arith.constant 0 : index
    %c0_36 = arith.constant 0 : index
    %95 = vector.load %arg8[%c0_35, %c0_36] : memref<16x64xf32, #tpu.memory_space<vmem>>, vector<16x64xf32>
    %cst_37 = arith.constant 0.000000e+00 : f32
    %96 = vector.broadcast %cst_37 : f32 to vector<8x64xf32>
    %c0_i32_38 = arith.constant 0 : i32
    %97 = tpu.iota {dimensions = array<i32: 1>} : vector<1x16xi32>
    %98 = vector.broadcast %c0_i32_38 : i32 to vector<1x16xi32>
    %99 = arith.cmpi eq, %97, %98 : vector<1x16xi32>
    %100 = arith.extui %99 : vector<1x16xi1> to vector<1x16xi32>
    %101 = arith.sitofp %100 : vector<1x16xi32> to vector<1x16xf32>
    %102 = tpu.iota {dimensions = array<i32: 0>} : vector<16x1xi32>
    %103 = vector.broadcast %c0_i32_38 : i32 to vector<16x1xi32>
    %104 = arith.cmpi eq, %102, %103 : vector<16x1xi32>
    %105 = arith.extui %104 : vector<16x1xi1> to vector<16x1xi32>
    %106 = arith.sitofp %105 : vector<16x1xi32> to vector<16x1xf32>
    %107 = vector.broadcast %106 : vector<16x1xf32> to vector<16x64xf32>
    %108 = arith.mulf %95, %107 : vector<16x64xf32>
    %cst_39 = arith.constant dense<0.000000e+00> : vector<64xf32>
    %109 = vector.multi_reduction <add>, %108, %cst_39 [0] : vector<16x64xf32> to vector<64xf32>
    %110 = vector.shape_cast %109 : vector<64xf32> to vector<1x64xf32>
    %111 = vector.broadcast %101 : vector<1x16xf32> to vector<8x16xf32>
    %112 = arith.mulf %92, %111 : vector<8x16xf32>
    %cst_40 = arith.constant dense<0.000000e+00> : vector<8xf32>
    %113 = vector.multi_reduction <add>, %112, %cst_40 [1] : vector<8x16xf32> to vector<8xf32>
    %114 = vector.shape_cast %113 : vector<8xf32> to vector<8x1xf32>
    %115 = vector.broadcast %101 : vector<1x16xf32> to vector<8x16xf32>
    %116 = arith.mulf %93, %115 : vector<8x16xf32>
    %cst_41 = arith.constant dense<0.000000e+00> : vector<8xf32>
    %117 = vector.multi_reduction <add>, %116, %cst_41 [1] : vector<8x16xf32> to vector<8xf32>
    %118 = vector.shape_cast %117 : vector<8xf32> to vector<8x1xf32>
    %119 = vector.broadcast %110 : vector<1x64xf32> to vector<8x64xf32>
    %120 = arith.mulf %91, %119 : vector<8x64xf32>
    %cst_42 = arith.constant -2.000000e+01 : f32
    %121 = vector.broadcast %cst_42 : f32 to vector<8x64xf32>
    %122 = arith.maximumf %120, %121 : vector<8x64xf32>
    %cst_43 = arith.constant 0.000000e+00 : f32
    %123 = vector.shape_cast %23 : vector<8x1xi1> to vector<8x1xi1>
    %124 = vector.broadcast %123 : vector<8x1xi1> to vector<8x64xi1>
    %125 = vector.broadcast %cst_43 : f32 to vector<8x64xf32>
    %126 = arith.select %124, %125, %122 : vector<8x64xi1>, vector<8x64xf32>
    %c1_i32_44 = arith.constant 1 : i32
    %127 = vector.broadcast %c1_i32_44 : i32 to vector<8x1xi32>
    %128 = arith.cmpi sge, %21, %127 : vector<8x1xi32>
    %c1_i32_45 = arith.constant 1 : i32
    %129 = tpu.dynamic_rotate %126 by %c1_i32_45 dim 0 : vector<8x64xf32>, i32 -> vector<8x64xf32>
    %cst_46 = arith.constant 0.000000e+00 : f32
    %130 = vector.shape_cast %128 : vector<8x1xi1> to vector<8x1xi1>
    %131 = vector.broadcast %130 : vector<8x1xi1> to vector<8x64xi1>
    %132 = vector.broadcast %cst_46 : f32 to vector<8x64xf32>
    %133 = arith.select %131, %129, %132 : vector<8x64xi1>, vector<8x64xf32>
    %134 = arith.addf %126, %133 : vector<8x64xf32>
    %c2_i32_47 = arith.constant 2 : i32
    %135 = vector.broadcast %c2_i32_47 : i32 to vector<8x1xi32>
    %136 = arith.cmpi sge, %21, %135 : vector<8x1xi32>
    %c2_i32_48 = arith.constant 2 : i32
    %137 = tpu.dynamic_rotate %134 by %c2_i32_48 dim 0 : vector<8x64xf32>, i32 -> vector<8x64xf32>
    %cst_49 = arith.constant 0.000000e+00 : f32
    %138 = vector.shape_cast %136 : vector<8x1xi1> to vector<8x1xi1>
    %139 = vector.broadcast %138 : vector<8x1xi1> to vector<8x64xi1>
    %140 = vector.broadcast %cst_49 : f32 to vector<8x64xf32>
    %141 = arith.select %139, %137, %140 : vector<8x64xi1>, vector<8x64xf32>
    %142 = arith.addf %134, %141 : vector<8x64xf32>
    %c4_i32 = arith.constant 4 : i32
    %143 = vector.broadcast %c4_i32 : i32 to vector<8x1xi32>
    %144 = arith.cmpi sge, %21, %143 : vector<8x1xi32>
    %c4_i32_50 = arith.constant 4 : i32
    %145 = tpu.dynamic_rotate %142 by %c4_i32_50 dim 0 : vector<8x64xf32>, i32 -> vector<8x64xf32>
    %cst_51 = arith.constant 0.000000e+00 : f32
    %146 = vector.shape_cast %144 : vector<8x1xi1> to vector<8x1xi1>
    %147 = vector.broadcast %146 : vector<8x1xi1> to vector<8x64xi1>
    %148 = vector.broadcast %cst_51 : f32 to vector<8x64xf32>
    %149 = arith.select %147, %145, %148 : vector<8x64xi1>, vector<8x64xf32>
    %150 = arith.addf %142, %149 : vector<8x64xf32>
    %151 = math.exp %150 : vector<8x64xf32>
    %152 = vector.broadcast %114 : vector<8x1xf32> to vector<8x64xf32>
    %153 = arith.mulf %94, %152 : vector<8x64xf32>
    %cst_52 = arith.constant 9.99999996E-13 : f32
    %154 = vector.broadcast %cst_52 : f32 to vector<8x64xf32>
    %155 = arith.addf %151, %154 : vector<8x64xf32>
    %156 = tpu.reciprocal %155 : vector<8x64xf32> -> vector<8x64xf32>
    %157 = arith.mulf %153, %156 : vector<8x64xf32>
    %c1_i32_53 = arith.constant 1 : i32
    %158 = vector.broadcast %c1_i32_53 : i32 to vector<8x1xi32>
    %159 = arith.cmpi sge, %21, %158 : vector<8x1xi32>
    %c1_i32_54 = arith.constant 1 : i32
    %160 = tpu.dynamic_rotate %157 by %c1_i32_54 dim 0 : vector<8x64xf32>, i32 -> vector<8x64xf32>
    %cst_55 = arith.constant 0.000000e+00 : f32
    %161 = vector.shape_cast %159 : vector<8x1xi1> to vector<8x1xi1>
    %162 = vector.broadcast %161 : vector<8x1xi1> to vector<8x64xi1>
    %163 = vector.broadcast %cst_55 : f32 to vector<8x64xf32>
    %164 = arith.select %162, %160, %163 : vector<8x64xi1>, vector<8x64xf32>
    %165 = arith.addf %157, %164 : vector<8x64xf32>
    %c2_i32_56 = arith.constant 2 : i32
    %166 = vector.broadcast %c2_i32_56 : i32 to vector<8x1xi32>
    %167 = arith.cmpi sge, %21, %166 : vector<8x1xi32>
    %c2_i32_57 = arith.constant 2 : i32
    %168 = tpu.dynamic_rotate %165 by %c2_i32_57 dim 0 : vector<8x64xf32>, i32 -> vector<8x64xf32>
    %cst_58 = arith.constant 0.000000e+00 : f32
    %169 = vector.shape_cast %167 : vector<8x1xi1> to vector<8x1xi1>
    %170 = vector.broadcast %169 : vector<8x1xi1> to vector<8x64xi1>
    %171 = vector.broadcast %cst_58 : f32 to vector<8x64xf32>
    %172 = arith.select %170, %168, %171 : vector<8x64xi1>, vector<8x64xf32>
    %173 = arith.addf %165, %172 : vector<8x64xf32>
    %c4_i32_59 = arith.constant 4 : i32
    %174 = vector.broadcast %c4_i32_59 : i32 to vector<8x1xi32>
    %175 = arith.cmpi sge, %21, %174 : vector<8x1xi32>
    %c4_i32_60 = arith.constant 4 : i32
    %176 = tpu.dynamic_rotate %173 by %c4_i32_60 dim 0 : vector<8x64xf32>, i32 -> vector<8x64xf32>
    %cst_61 = arith.constant 0.000000e+00 : f32
    %177 = vector.shape_cast %175 : vector<8x1xi1> to vector<8x1xi1>
    %178 = vector.broadcast %177 : vector<8x1xi1> to vector<8x64xi1>
    %179 = vector.broadcast %cst_61 : f32 to vector<8x64xf32>
    %180 = arith.select %178, %176, %179 : vector<8x64xi1>, vector<8x64xf32>
    %181 = arith.addf %173, %180 : vector<8x64xf32>
    %182 = arith.mulf %181, %151 : vector<8x64xf32>
    %183 = vector.broadcast %118 : vector<8x1xf32> to vector<8x64xf32>
    %184 = arith.mulf %182, %183 : vector<8x64xf32>
    %185 = arith.addf %96, %184 : vector<8x64xf32>
    %c1_i32_62 = arith.constant 1 : i32
    %186 = tpu.iota {dimensions = array<i32: 1>} : vector<1x16xi32>
    %187 = vector.broadcast %c1_i32_62 : i32 to vector<1x16xi32>
    %188 = arith.cmpi eq, %186, %187 : vector<1x16xi32>
    %189 = arith.extui %188 : vector<1x16xi1> to vector<1x16xi32>
    %190 = arith.sitofp %189 : vector<1x16xi32> to vector<1x16xf32>
    %191 = tpu.iota {dimensions = array<i32: 0>} : vector<16x1xi32>
    %192 = vector.broadcast %c1_i32_62 : i32 to vector<16x1xi32>
    %193 = arith.cmpi eq, %191, %192 : vector<16x1xi32>
    %194 = arith.extui %193 : vector<16x1xi1> to vector<16x1xi32>
    %195 = arith.sitofp %194 : vector<16x1xi32> to vector<16x1xf32>
    %196 = vector.broadcast %195 : vector<16x1xf32> to vector<16x64xf32>
    %197 = arith.mulf %95, %196 : vector<16x64xf32>
    %cst_63 = arith.constant dense<0.000000e+00> : vector<64xf32>
    %198 = vector.multi_reduction <add>, %197, %cst_63 [0] : vector<16x64xf32> to vector<64xf32>
    %199 = vector.shape_cast %198 : vector<64xf32> to vector<1x64xf32>
    %200 = vector.broadcast %190 : vector<1x16xf32> to vector<8x16xf32>
    %201 = arith.mulf %92, %200 : vector<8x16xf32>
    %cst_64 = arith.constant dense<0.000000e+00> : vector<8xf32>
    %202 = vector.multi_reduction <add>, %201, %cst_64 [1] : vector<8x16xf32> to vector<8xf32>
    %203 = vector.shape_cast %202 : vector<8xf32> to vector<8x1xf32>
    %204 = vector.broadcast %190 : vector<1x16xf32> to vector<8x16xf32>
    %205 = arith.mulf %93, %204 : vector<8x16xf32>
    %cst_65 = arith.constant dense<0.000000e+00> : vector<8xf32>
    %206 = vector.multi_reduction <add>, %205, %cst_65 [1] : vector<8x16xf32> to vector<8xf32>
    %207 = vector.shape_cast %206 : vector<8xf32> to vector<8x1xf32>
    %208 = vector.broadcast %199 : vector<1x64xf32> to vector<8x64xf32>
    %209 = arith.mulf %91, %208 : vector<8x64xf32>
    %cst_66 = arith.constant -2.000000e+01 : f32
    %210 = vector.broadcast %cst_66 : f32 to vector<8x64xf32>
    %211 = arith.maximumf %209, %210 : vector<8x64xf32>
    %cst_67 = arith.constant 0.000000e+00 : f32
    %212 = vector.shape_cast %23 : vector<8x1xi1> to vector<8x1xi1>
    %213 = vector.broadcast %212 : vector<8x1xi1> to vector<8x64xi1>
    %214 = vector.broadcast %cst_67 : f32 to vector<8x64xf32>
    %215 = arith.select %213, %214, %211 : vector<8x64xi1>, vector<8x64xf32>
    %c1_i32_68 = arith.constant 1 : i32
    %216 = vector.broadcast %c1_i32_68 : i32 to vector<8x1xi32>
    %217 = arith.cmpi sge, %21, %216 : vector<8x1xi32>
    %c1_i32_69 = arith.constant 1 : i32
    %218 = tpu.dynamic_rotate %215 by %c1_i32_69 dim 0 : vector<8x64xf32>, i32 -> vector<8x64xf32>
    %cst_70 = arith.constant 0.000000e+00 : f32
    %219 = vector.shape_cast %217 : vector<8x1xi1> to vector<8x1xi1>
    %220 = vector.broadcast %219 : vector<8x1xi1> to vector<8x64xi1>
    %221 = vector.broadcast %cst_70 : f32 to vector<8x64xf32>
    %222 = arith.select %220, %218, %221 : vector<8x64xi1>, vector<8x64xf32>
    %223 = arith.addf %215, %222 : vector<8x64xf32>
    %c2_i32_71 = arith.constant 2 : i32
    %224 = vector.broadcast %c2_i32_71 : i32 to vector<8x1xi32>
    %225 = arith.cmpi sge, %21, %224 : vector<8x1xi32>
    %c2_i32_72 = arith.constant 2 : i32
    %226 = tpu.dynamic_rotate %223 by %c2_i32_72 dim 0 : vector<8x64xf32>, i32 -> vector<8x64xf32>
    %cst_73 = arith.constant 0.000000e+00 : f32
    %227 = vector.shape_cast %225 : vector<8x1xi1> to vector<8x1xi1>
    %228 = vector.broadcast %227 : vector<8x1xi1> to vector<8x64xi1>
    %229 = vector.broadcast %cst_73 : f32 to vector<8x64xf32>
    %230 = arith.select %228, %226, %229 : vector<8x64xi1>, vector<8x64xf32>
    %231 = arith.addf %223, %230 : vector<8x64xf32>
    %c4_i32_74 = arith.constant 4 : i32
    %232 = vector.broadcast %c4_i32_74 : i32 to vector<8x1xi32>
    %233 = arith.cmpi sge, %21, %232 : vector<8x1xi32>
    %c4_i32_75 = arith.constant 4 : i32
    %234 = tpu.dynamic_rotate %231 by %c4_i32_75 dim 0 : vector<8x64xf32>, i32 -> vector<8x64xf32>
    %cst_76 = arith.constant 0.000000e+00 : f32
    %235 = vector.shape_cast %233 : vector<8x1xi1> to vector<8x1xi1>
    %236 = vector.broadcast %235 : vector<8x1xi1> to vector<8x64xi1>
    %237 = vector.broadcast %cst_76 : f32 to vector<8x64xf32>
    %238 = arith.select %236, %234, %237 : vector<8x64xi1>, vector<8x64xf32>
    %239 = arith.addf %231, %238 : vector<8x64xf32>
    %240 = math.exp %239 : vector<8x64xf32>
    %241 = vector.broadcast %203 : vector<8x1xf32> to vector<8x64xf32>
    %242 = arith.mulf %94, %241 : vector<8x64xf32>
    %cst_77 = arith.constant 9.99999996E-13 : f32
    %243 = vector.broadcast %cst_77 : f32 to vector<8x64xf32>
    %244 = arith.addf %240, %243 : vector<8x64xf32>
    %245 = tpu.reciprocal %244 : vector<8x64xf32> -> vector<8x64xf32>
    %246 = arith.mulf %242, %245 : vector<8x64xf32>
    %c1_i32_78 = arith.constant 1 : i32
    %247 = vector.broadcast %c1_i32_78 : i32 to vector<8x1xi32>
    %248 = arith.cmpi sge, %21, %247 : vector<8x1xi32>
    %c1_i32_79 = arith.constant 1 : i32
    %249 = tpu.dynamic_rotate %246 by %c1_i32_79 dim 0 : vector<8x64xf32>, i32 -> vector<8x64xf32>
    %cst_80 = arith.constant 0.000000e+00 : f32
    %250 = vector.shape_cast %248 : vector<8x1xi1> to vector<8x1xi1>
    %251 = vector.broadcast %250 : vector<8x1xi1> to vector<8x64xi1>
    %252 = vector.broadcast %cst_80 : f32 to vector<8x64xf32>
    %253 = arith.select %251, %249, %252 : vector<8x64xi1>, vector<8x64xf32>
    %254 = arith.addf %246, %253 : vector<8x64xf32>
    %c2_i32_81 = arith.constant 2 : i32
    %255 = vector.broadcast %c2_i32_81 : i32 to vector<8x1xi32>
    %256 = arith.cmpi sge, %21, %255 : vector<8x1xi32>
    %c2_i32_82 = arith.constant 2 : i32
    %257 = tpu.dynamic_rotate %254 by %c2_i32_82 dim 0 : vector<8x64xf32>, i32 -> vector<8x64xf32>
    %cst_83 = arith.constant 0.000000e+00 : f32
    %258 = vector.shape_cast %256 : vector<8x1xi1> to vector<8x1xi1>
    %259 = vector.broadcast %258 : vector<8x1xi1> to vector<8x64xi1>
    %260 = vector.broadcast %cst_83 : f32 to vector<8x64xf32>
    %261 = arith.select %259, %257, %260 : vector<8x64xi1>, vector<8x64xf32>
    %262 = arith.addf %254, %261 : vector<8x64xf32>
    %c4_i32_84 = arith.constant 4 : i32
    %263 = vector.broadcast %c4_i32_84 : i32 to vector<8x1xi32>
    %264 = arith.cmpi sge, %21, %263 : vector<8x1xi32>
    %c4_i32_85 = arith.constant 4 : i32
    %265 = tpu.dynamic_rotate %262 by %c4_i32_85 dim 0 : vector<8x64xf32>, i32 -> vector<8x64xf32>
    %cst_86 = arith.constant 0.000000e+00 : f32
    %266 = vector.shape_cast %264 : vector<8x1xi1> to vector<8x1xi1>
    %267 = vector.broadcast %266 : vector<8x1xi1> to vector<8x64xi1>
    %268 = vector.broadcast %cst_86 : f32 to vector<8x64xf32>
    %269 = arith.select %267, %265, %268 : vector<8x64xi1>, vector<8x64xf32>
    %270 = arith.addf %262, %269 : vector<8x64xf32>
    %271 = arith.mulf %270, %240 : vector<8x64xf32>
    %272 = vector.broadcast %207 : vector<8x1xf32> to vector<8x64xf32>
    %273 = arith.mulf %271, %272 : vector<8x64xf32>
    %274 = arith.addf %185, %273 : vector<8x64xf32>
    %c2_i32_87 = arith.constant 2 : i32
    %275 = tpu.iota {dimensions = array<i32: 1>} : vector<1x16xi32>
    %276 = vector.broadcast %c2_i32_87 : i32 to vector<1x16xi32>
    %277 = arith.cmpi eq, %275, %276 : vector<1x16xi32>
    %278 = arith.extui %277 : vector<1x16xi1> to vector<1x16xi32>
    %279 = arith.sitofp %278 : vector<1x16xi32> to vector<1x16xf32>
    %280 = tpu.iota {dimensions = array<i32: 0>} : vector<16x1xi32>
    %281 = vector.broadcast %c2_i32_87 : i32 to vector<16x1xi32>
    %282 = arith.cmpi eq, %280, %281 : vector<16x1xi32>
    %283 = arith.extui %282 : vector<16x1xi1> to vector<16x1xi32>
    %284 = arith.sitofp %283 : vector<16x1xi32> to vector<16x1xf32>
    %285 = vector.broadcast %284 : vector<16x1xf32> to vector<16x64xf32>
    %286 = arith.mulf %95, %285 : vector<16x64xf32>
    %cst_88 = arith.constant dense<0.000000e+00> : vector<64xf32>
    %287 = vector.multi_reduction <add>, %286, %cst_88 [0] : vector<16x64xf32> to vector<64xf32>
    %288 = vector.shape_cast %287 : vector<64xf32> to vector<1x64xf32>
    %289 = vector.broadcast %279 : vector<1x16xf32> to vector<8x16xf32>
    %290 = arith.mulf %92, %289 : vector<8x16xf32>
    %cst_89 = arith.constant dense<0.000000e+00> : vector<8xf32>
    %291 = vector.multi_reduction <add>, %290, %cst_89 [1] : vector<8x16xf32> to vector<8xf32>
    %292 = vector.shape_cast %291 : vector<8xf32> to vector<8x1xf32>
    %293 = vector.broadcast %279 : vector<1x16xf32> to vector<8x16xf32>
    %294 = arith.mulf %93, %293 : vector<8x16xf32>
    %cst_90 = arith.constant dense<0.000000e+00> : vector<8xf32>
    %295 = vector.multi_reduction <add>, %294, %cst_90 [1] : vector<8x16xf32> to vector<8xf32>
    %296 = vector.shape_cast %295 : vector<8xf32> to vector<8x1xf32>
    %297 = vector.broadcast %288 : vector<1x64xf32> to vector<8x64xf32>
    %298 = arith.mulf %91, %297 : vector<8x64xf32>
    %cst_91 = arith.constant -2.000000e+01 : f32
    %299 = vector.broadcast %cst_91 : f32 to vector<8x64xf32>
    %300 = arith.maximumf %298, %299 : vector<8x64xf32>
    %cst_92 = arith.constant 0.000000e+00 : f32
    %301 = vector.shape_cast %23 : vector<8x1xi1> to vector<8x1xi1>
    %302 = vector.broadcast %301 : vector<8x1xi1> to vector<8x64xi1>
    %303 = vector.broadcast %cst_92 : f32 to vector<8x64xf32>
    %304 = arith.select %302, %303, %300 : vector<8x64xi1>, vector<8x64xf32>
    %c1_i32_93 = arith.constant 1 : i32
    %305 = vector.broadcast %c1_i32_93 : i32 to vector<8x1xi32>
    %306 = arith.cmpi sge, %21, %305 : vector<8x1xi32>
    %c1_i32_94 = arith.constant 1 : i32
    %307 = tpu.dynamic_rotate %304 by %c1_i32_94 dim 0 : vector<8x64xf32>, i32 -> vector<8x64xf32>
    %cst_95 = arith.constant 0.000000e+00 : f32
    %308 = vector.shape_cast %306 : vector<8x1xi1> to vector<8x1xi1>
    %309 = vector.broadcast %308 : vector<8x1xi1> to vector<8x64xi1>
    %310 = vector.broadcast %cst_95 : f32 to vector<8x64xf32>
    %311 = arith.select %309, %307, %310 : vector<8x64xi1>, vector<8x64xf32>
    %312 = arith.addf %304, %311 : vector<8x64xf32>
    %c2_i32_96 = arith.constant 2 : i32
    %313 = vector.broadcast %c2_i32_96 : i32 to vector<8x1xi32>
    %314 = arith.cmpi sge, %21, %313 : vector<8x1xi32>
    %c2_i32_97 = arith.constant 2 : i32
    %315 = tpu.dynamic_rotate %312 by %c2_i32_97 dim 0 : vector<8x64xf32>, i32 -> vector<8x64xf32>
    %cst_98 = arith.constant 0.000000e+00 : f32
    %316 = vector.shape_cast %314 : vector<8x1xi1> to vector<8x1xi1>
    %317 = vector.broadcast %316 : vector<8x1xi1> to vector<8x64xi1>
    %318 = vector.broadcast %cst_98 : f32 to vector<8x64xf32>
    %319 = arith.select %317, %315, %318 : vector<8x64xi1>, vector<8x64xf32>
    %320 = arith.addf %312, %319 : vector<8x64xf32>
    %c4_i32_99 = arith.constant 4 : i32
    %321 = vector.broadcast %c4_i32_99 : i32 to vector<8x1xi32>
    %322 = arith.cmpi sge, %21, %321 : vector<8x1xi32>
    %c4_i32_100 = arith.constant 4 : i32
    %323 = tpu.dynamic_rotate %320 by %c4_i32_100 dim 0 : vector<8x64xf32>, i32 -> vector<8x64xf32>
    %cst_101 = arith.constant 0.000000e+00 : f32
    %324 = vector.shape_cast %322 : vector<8x1xi1> to vector<8x1xi1>
    %325 = vector.broadcast %324 : vector<8x1xi1> to vector<8x64xi1>
    %326 = vector.broadcast %cst_101 : f32 to vector<8x64xf32>
    %327 = arith.select %325, %323, %326 : vector<8x64xi1>, vector<8x64xf32>
    %328 = arith.addf %320, %327 : vector<8x64xf32>
    %329 = math.exp %328 : vector<8x64xf32>
    %330 = vector.broadcast %292 : vector<8x1xf32> to vector<8x64xf32>
    %331 = arith.mulf %94, %330 : vector<8x64xf32>
    %cst_102 = arith.constant 9.99999996E-13 : f32
    %332 = vector.broadcast %cst_102 : f32 to vector<8x64xf32>
    %333 = arith.addf %329, %332 : vector<8x64xf32>
    %334 = tpu.reciprocal %333 : vector<8x64xf32> -> vector<8x64xf32>
    %335 = arith.mulf %331, %334 : vector<8x64xf32>
    %c1_i32_103 = arith.constant 1 : i32
    %336 = vector.broadcast %c1_i32_103 : i32 to vector<8x1xi32>
    %337 = arith.cmpi sge, %21, %336 : vector<8x1xi32>
    %c1_i32_104 = arith.constant 1 : i32
    %338 = tpu.dynamic_rotate %335 by %c1_i32_104 dim 0 : vector<8x64xf32>, i32 -> vector<8x64xf32>
    %cst_105 = arith.constant 0.000000e+00 : f32
    %339 = vector.shape_cast %337 : vector<8x1xi1> to vector<8x1xi1>
    %340 = vector.broadcast %339 : vector<8x1xi1> to vector<8x64xi1>
    %341 = vector.broadcast %cst_105 : f32 to vector<8x64xf32>
    %342 = arith.select %340, %338, %341 : vector<8x64xi1>, vector<8x64xf32>
    %343 = arith.addf %335, %342 : vector<8x64xf32>
    %c2_i32_106 = arith.constant 2 : i32
    %344 = vector.broadcast %c2_i32_106 : i32 to vector<8x1xi32>
    %345 = arith.cmpi sge, %21, %344 : vector<8x1xi32>
    %c2_i32_107 = arith.constant 2 : i32
    %346 = tpu.dynamic_rotate %343 by %c2_i32_107 dim 0 : vector<8x64xf32>, i32 -> vector<8x64xf32>
    %cst_108 = arith.constant 0.000000e+00 : f32
    %347 = vector.shape_cast %345 : vector<8x1xi1> to vector<8x1xi1>
    %348 = vector.broadcast %347 : vector<8x1xi1> to vector<8x64xi1>
    %349 = vector.broadcast %cst_108 : f32 to vector<8x64xf32>
    %350 = arith.select %348, %346, %349 : vector<8x64xi1>, vector<8x64xf32>
    %351 = arith.addf %343, %350 : vector<8x64xf32>
    %c4_i32_109 = arith.constant 4 : i32
    %352 = vector.broadcast %c4_i32_109 : i32 to vector<8x1xi32>
    %353 = arith.cmpi sge, %21, %352 : vector<8x1xi32>
    %c4_i32_110 = arith.constant 4 : i32
    %354 = tpu.dynamic_rotate %351 by %c4_i32_110 dim 0 : vector<8x64xf32>, i32 -> vector<8x64xf32>
    %cst_111 = arith.constant 0.000000e+00 : f32
    %355 = vector.shape_cast %353 : vector<8x1xi1> to vector<8x1xi1>
    %356 = vector.broadcast %355 : vector<8x1xi1> to vector<8x64xi1>
    %357 = vector.broadcast %cst_111 : f32 to vector<8x64xf32>
    %358 = arith.select %356, %354, %357 : vector<8x64xi1>, vector<8x64xf32>
    %359 = arith.addf %351, %358 : vector<8x64xf32>
    %360 = arith.mulf %359, %329 : vector<8x64xf32>
    %361 = vector.broadcast %296 : vector<8x1xf32> to vector<8x64xf32>
    %362 = arith.mulf %360, %361 : vector<8x64xf32>
    %363 = arith.addf %274, %362 : vector<8x64xf32>
    %c3_i32_112 = arith.constant 3 : i32
    %364 = tpu.iota {dimensions = array<i32: 1>} : vector<1x16xi32>
    %365 = vector.broadcast %c3_i32_112 : i32 to vector<1x16xi32>
    %366 = arith.cmpi eq, %364, %365 : vector<1x16xi32>
    %367 = arith.extui %366 : vector<1x16xi1> to vector<1x16xi32>
    %368 = arith.sitofp %367 : vector<1x16xi32> to vector<1x16xf32>
    %369 = tpu.iota {dimensions = array<i32: 0>} : vector<16x1xi32>
    %370 = vector.broadcast %c3_i32_112 : i32 to vector<16x1xi32>
    %371 = arith.cmpi eq, %369, %370 : vector<16x1xi32>
    %372 = arith.extui %371 : vector<16x1xi1> to vector<16x1xi32>
    %373 = arith.sitofp %372 : vector<16x1xi32> to vector<16x1xf32>
    %374 = vector.broadcast %373 : vector<16x1xf32> to vector<16x64xf32>
    %375 = arith.mulf %95, %374 : vector<16x64xf32>
    %cst_113 = arith.constant dense<0.000000e+00> : vector<64xf32>
    %376 = vector.multi_reduction <add>, %375, %cst_113 [0] : vector<16x64xf32> to vector<64xf32>
    %377 = vector.shape_cast %376 : vector<64xf32> to vector<1x64xf32>
    %378 = vector.broadcast %368 : vector<1x16xf32> to vector<8x16xf32>
    %379 = arith.mulf %92, %378 : vector<8x16xf32>
    %cst_114 = arith.constant dense<0.000000e+00> : vector<8xf32>
    %380 = vector.multi_reduction <add>, %379, %cst_114 [1] : vector<8x16xf32> to vector<8xf32>
    %381 = vector.shape_cast %380 : vector<8xf32> to vector<8x1xf32>
    %382 = vector.broadcast %368 : vector<1x16xf32> to vector<8x16xf32>
    %383 = arith.mulf %93, %382 : vector<8x16xf32>
    %cst_115 = arith.constant dense<0.000000e+00> : vector<8xf32>
    %384 = vector.multi_reduction <add>, %383, %cst_115 [1] : vector<8x16xf32> to vector<8xf32>
    %385 = vector.shape_cast %384 : vector<8xf32> to vector<8x1xf32>
    %386 = vector.broadcast %377 : vector<1x64xf32> to vector<8x64xf32>
    %387 = arith.mulf %91, %386 : vector<8x64xf32>
    %cst_116 = arith.constant -2.000000e+01 : f32
    %388 = vector.broadcast %cst_116 : f32 to vector<8x64xf32>
    %389 = arith.maximumf %387, %388 : vector<8x64xf32>
    %cst_117 = arith.constant 0.000000e+00 : f32
    %390 = vector.shape_cast %23 : vector<8x1xi1> to vector<8x1xi1>
    %391 = vector.broadcast %390 : vector<8x1xi1> to vector<8x64xi1>
    %392 = vector.broadcast %cst_117 : f32 to vector<8x64xf32>
    %393 = arith.select %391, %392, %389 : vector<8x64xi1>, vector<8x64xf32>
    %c1_i32_118 = arith.constant 1 : i32
    %394 = vector.broadcast %c1_i32_118 : i32 to vector<8x1xi32>
    %395 = arith.cmpi sge, %21, %394 : vector<8x1xi32>
    %c1_i32_119 = arith.constant 1 : i32
    %396 = tpu.dynamic_rotate %393 by %c1_i32_119 dim 0 : vector<8x64xf32>, i32 -> vector<8x64xf32>
    %cst_120 = arith.constant 0.000000e+00 : f32
    %397 = vector.shape_cast %395 : vector<8x1xi1> to vector<8x1xi1>
    %398 = vector.broadcast %397 : vector<8x1xi1> to vector<8x64xi1>
    %399 = vector.broadcast %cst_120 : f32 to vector<8x64xf32>
    %400 = arith.select %398, %396, %399 : vector<8x64xi1>, vector<8x64xf32>
    %401 = arith.addf %393, %400 : vector<8x64xf32>
    %c2_i32_121 = arith.constant 2 : i32
    %402 = vector.broadcast %c2_i32_121 : i32 to vector<8x1xi32>
    %403 = arith.cmpi sge, %21, %402 : vector<8x1xi32>
    %c2_i32_122 = arith.constant 2 : i32
    %404 = tpu.dynamic_rotate %401 by %c2_i32_122 dim 0 : vector<8x64xf32>, i32 -> vector<8x64xf32>
    %cst_123 = arith.constant 0.000000e+00 : f32
    %405 = vector.shape_cast %403 : vector<8x1xi1> to vector<8x1xi1>
    %406 = vector.broadcast %405 : vector<8x1xi1> to vector<8x64xi1>
    %407 = vector.broadcast %cst_123 : f32 to vector<8x64xf32>
    %408 = arith.select %406, %404, %407 : vector<8x64xi1>, vector<8x64xf32>
    %409 = arith.addf %401, %408 : vector<8x64xf32>
    %c4_i32_124 = arith.constant 4 : i32
    %410 = vector.broadcast %c4_i32_124 : i32 to vector<8x1xi32>
    %411 = arith.cmpi sge, %21, %410 : vector<8x1xi32>
    %c4_i32_125 = arith.constant 4 : i32
    %412 = tpu.dynamic_rotate %409 by %c4_i32_125 dim 0 : vector<8x64xf32>, i32 -> vector<8x64xf32>
    %cst_126 = arith.constant 0.000000e+00 : f32
    %413 = vector.shape_cast %411 : vector<8x1xi1> to vector<8x1xi1>
    %414 = vector.broadcast %413 : vector<8x1xi1> to vector<8x64xi1>
    %415 = vector.broadcast %cst_126 : f32 to vector<8x64xf32>
    %416 = arith.select %414, %412, %415 : vector<8x64xi1>, vector<8x64xf32>
    %417 = arith.addf %409, %416 : vector<8x64xf32>
    %418 = math.exp %417 : vector<8x64xf32>
    %419 = vector.broadcast %381 : vector<8x1xf32> to vector<8x64xf32>
    %420 = arith.mulf %94, %419 : vector<8x64xf32>
    %cst_127 = arith.constant 9.99999996E-13 : f32
    %421 = vector.broadcast %cst_127 : f32 to vector<8x64xf32>
    %422 = arith.addf %418, %421 : vector<8x64xf32>
    %423 = tpu.reciprocal %422 : vector<8x64xf32> -> vector<8x64xf32>
    %424 = arith.mulf %420, %423 : vector<8x64xf32>
    %c1_i32_128 = arith.constant 1 : i32
    %425 = vector.broadcast %c1_i32_128 : i32 to vector<8x1xi32>
    %426 = arith.cmpi sge, %21, %425 : vector<8x1xi32>
    %c1_i32_129 = arith.constant 1 : i32
    %427 = tpu.dynamic_rotate %424 by %c1_i32_129 dim 0 : vector<8x64xf32>, i32 -> vector<8x64xf32>
    %cst_130 = arith.constant 0.000000e+00 : f32
    %428 = vector.shape_cast %426 : vector<8x1xi1> to vector<8x1xi1>
    %429 = vector.broadcast %428 : vector<8x1xi1> to vector<8x64xi1>
    %430 = vector.broadcast %cst_130 : f32 to vector<8x64xf32>
    %431 = arith.select %429, %427, %430 : vector<8x64xi1>, vector<8x64xf32>
    %432 = arith.addf %424, %431 : vector<8x64xf32>
    %c2_i32_131 = arith.constant 2 : i32
    %433 = vector.broadcast %c2_i32_131 : i32 to vector<8x1xi32>
    %434 = arith.cmpi sge, %21, %433 : vector<8x1xi32>
    %c2_i32_132 = arith.constant 2 : i32
    %435 = tpu.dynamic_rotate %432 by %c2_i32_132 dim 0 : vector<8x64xf32>, i32 -> vector<8x64xf32>
    %cst_133 = arith.constant 0.000000e+00 : f32
    %436 = vector.shape_cast %434 : vector<8x1xi1> to vector<8x1xi1>
    %437 = vector.broadcast %436 : vector<8x1xi1> to vector<8x64xi1>
    %438 = vector.broadcast %cst_133 : f32 to vector<8x64xf32>
    %439 = arith.select %437, %435, %438 : vector<8x64xi1>, vector<8x64xf32>
    %440 = arith.addf %432, %439 : vector<8x64xf32>
    %c4_i32_134 = arith.constant 4 : i32
    %441 = vector.broadcast %c4_i32_134 : i32 to vector<8x1xi32>
    %442 = arith.cmpi sge, %21, %441 : vector<8x1xi32>
    %c4_i32_135 = arith.constant 4 : i32
    %443 = tpu.dynamic_rotate %440 by %c4_i32_135 dim 0 : vector<8x64xf32>, i32 -> vector<8x64xf32>
    %cst_136 = arith.constant 0.000000e+00 : f32
    %444 = vector.shape_cast %442 : vector<8x1xi1> to vector<8x1xi1>
    %445 = vector.broadcast %444 : vector<8x1xi1> to vector<8x64xi1>
    %446 = vector.broadcast %cst_136 : f32 to vector<8x64xf32>
    %447 = arith.select %445, %443, %446 : vector<8x64xi1>, vector<8x64xf32>
    %448 = arith.addf %440, %447 : vector<8x64xf32>
    %449 = arith.mulf %448, %418 : vector<8x64xf32>
    %450 = vector.broadcast %385 : vector<8x1xf32> to vector<8x64xf32>
    %451 = arith.mulf %449, %450 : vector<8x64xf32>
    %452 = arith.addf %363, %451 : vector<8x64xf32>
    %c4_i32_137 = arith.constant 4 : i32
    %453 = tpu.iota {dimensions = array<i32: 1>} : vector<1x16xi32>
    %454 = vector.broadcast %c4_i32_137 : i32 to vector<1x16xi32>
    %455 = arith.cmpi eq, %453, %454 : vector<1x16xi32>
    %456 = arith.extui %455 : vector<1x16xi1> to vector<1x16xi32>
    %457 = arith.sitofp %456 : vector<1x16xi32> to vector<1x16xf32>
    %458 = tpu.iota {dimensions = array<i32: 0>} : vector<16x1xi32>
    %459 = vector.broadcast %c4_i32_137 : i32 to vector<16x1xi32>
    %460 = arith.cmpi eq, %458, %459 : vector<16x1xi32>
    %461 = arith.extui %460 : vector<16x1xi1> to vector<16x1xi32>
    %462 = arith.sitofp %461 : vector<16x1xi32> to vector<16x1xf32>
    %463 = vector.broadcast %462 : vector<16x1xf32> to vector<16x64xf32>
    %464 = arith.mulf %95, %463 : vector<16x64xf32>
    %cst_138 = arith.constant dense<0.000000e+00> : vector<64xf32>
    %465 = vector.multi_reduction <add>, %464, %cst_138 [0] : vector<16x64xf32> to vector<64xf32>
    %466 = vector.shape_cast %465 : vector<64xf32> to vector<1x64xf32>
    %467 = vector.broadcast %457 : vector<1x16xf32> to vector<8x16xf32>
    %468 = arith.mulf %92, %467 : vector<8x16xf32>
    %cst_139 = arith.constant dense<0.000000e+00> : vector<8xf32>
    %469 = vector.multi_reduction <add>, %468, %cst_139 [1] : vector<8x16xf32> to vector<8xf32>
    %470 = vector.shape_cast %469 : vector<8xf32> to vector<8x1xf32>
    %471 = vector.broadcast %457 : vector<1x16xf32> to vector<8x16xf32>
    %472 = arith.mulf %93, %471 : vector<8x16xf32>
    %cst_140 = arith.constant dense<0.000000e+00> : vector<8xf32>
    %473 = vector.multi_reduction <add>, %472, %cst_140 [1] : vector<8x16xf32> to vector<8xf32>
    %474 = vector.shape_cast %473 : vector<8xf32> to vector<8x1xf32>
    %475 = vector.broadcast %466 : vector<1x64xf32> to vector<8x64xf32>
    %476 = arith.mulf %91, %475 : vector<8x64xf32>
    %cst_141 = arith.constant -2.000000e+01 : f32
    %477 = vector.broadcast %cst_141 : f32 to vector<8x64xf32>
    %478 = arith.maximumf %476, %477 : vector<8x64xf32>
    %cst_142 = arith.constant 0.000000e+00 : f32
    %479 = vector.shape_cast %23 : vector<8x1xi1> to vector<8x1xi1>
    %480 = vector.broadcast %479 : vector<8x1xi1> to vector<8x64xi1>
    %481 = vector.broadcast %cst_142 : f32 to vector<8x64xf32>
    %482 = arith.select %480, %481, %478 : vector<8x64xi1>, vector<8x64xf32>
    %c1_i32_143 = arith.constant 1 : i32
    %483 = vector.broadcast %c1_i32_143 : i32 to vector<8x1xi32>
    %484 = arith.cmpi sge, %21, %483 : vector<8x1xi32>
    %c1_i32_144 = arith.constant 1 : i32
    %485 = tpu.dynamic_rotate %482 by %c1_i32_144 dim 0 : vector<8x64xf32>, i32 -> vector<8x64xf32>
    %cst_145 = arith.constant 0.000000e+00 : f32
    %486 = vector.shape_cast %484 : vector<8x1xi1> to vector<8x1xi1>
    %487 = vector.broadcast %486 : vector<8x1xi1> to vector<8x64xi1>
    %488 = vector.broadcast %cst_145 : f32 to vector<8x64xf32>
    %489 = arith.select %487, %485, %488 : vector<8x64xi1>, vector<8x64xf32>
    %490 = arith.addf %482, %489 : vector<8x64xf32>
    %c2_i32_146 = arith.constant 2 : i32
    %491 = vector.broadcast %c2_i32_146 : i32 to vector<8x1xi32>
    %492 = arith.cmpi sge, %21, %491 : vector<8x1xi32>
    %c2_i32_147 = arith.constant 2 : i32
    %493 = tpu.dynamic_rotate %490 by %c2_i32_147 dim 0 : vector<8x64xf32>, i32 -> vector<8x64xf32>
    %cst_148 = arith.constant 0.000000e+00 : f32
    %494 = vector.shape_cast %492 : vector<8x1xi1> to vector<8x1xi1>
    %495 = vector.broadcast %494 : vector<8x1xi1> to vector<8x64xi1>
    %496 = vector.broadcast %cst_148 : f32 to vector<8x64xf32>
    %497 = arith.select %495, %493, %496 : vector<8x64xi1>, vector<8x64xf32>
    %498 = arith.addf %490, %497 : vector<8x64xf32>
    %c4_i32_149 = arith.constant 4 : i32
    %499 = vector.broadcast %c4_i32_149 : i32 to vector<8x1xi32>
    %500 = arith.cmpi sge, %21, %499 : vector<8x1xi32>
    %c4_i32_150 = arith.constant 4 : i32
    %501 = tpu.dynamic_rotate %498 by %c4_i32_150 dim 0 : vector<8x64xf32>, i32 -> vector<8x64xf32>
    %cst_151 = arith.constant 0.000000e+00 : f32
    %502 = vector.shape_cast %500 : vector<8x1xi1> to vector<8x1xi1>
    %503 = vector.broadcast %502 : vector<8x1xi1> to vector<8x64xi1>
    %504 = vector.broadcast %cst_151 : f32 to vector<8x64xf32>
    %505 = arith.select %503, %501, %504 : vector<8x64xi1>, vector<8x64xf32>
    %506 = arith.addf %498, %505 : vector<8x64xf32>
    %507 = math.exp %506 : vector<8x64xf32>
    %508 = vector.broadcast %470 : vector<8x1xf32> to vector<8x64xf32>
    %509 = arith.mulf %94, %508 : vector<8x64xf32>
    %cst_152 = arith.constant 9.99999996E-13 : f32
    %510 = vector.broadcast %cst_152 : f32 to vector<8x64xf32>
    %511 = arith.addf %507, %510 : vector<8x64xf32>
    %512 = tpu.reciprocal %511 : vector<8x64xf32> -> vector<8x64xf32>
    %513 = arith.mulf %509, %512 : vector<8x64xf32>
    %c1_i32_153 = arith.constant 1 : i32
    %514 = vector.broadcast %c1_i32_153 : i32 to vector<8x1xi32>
    %515 = arith.cmpi sge, %21, %514 : vector<8x1xi32>
    %c1_i32_154 = arith.constant 1 : i32
    %516 = tpu.dynamic_rotate %513 by %c1_i32_154 dim 0 : vector<8x64xf32>, i32 -> vector<8x64xf32>
    %cst_155 = arith.constant 0.000000e+00 : f32
    %517 = vector.shape_cast %515 : vector<8x1xi1> to vector<8x1xi1>
    %518 = vector.broadcast %517 : vector<8x1xi1> to vector<8x64xi1>
    %519 = vector.broadcast %cst_155 : f32 to vector<8x64xf32>
    %520 = arith.select %518, %516, %519 : vector<8x64xi1>, vector<8x64xf32>
    %521 = arith.addf %513, %520 : vector<8x64xf32>
    %c2_i32_156 = arith.constant 2 : i32
    %522 = vector.broadcast %c2_i32_156 : i32 to vector<8x1xi32>
    %523 = arith.cmpi sge, %21, %522 : vector<8x1xi32>
    %c2_i32_157 = arith.constant 2 : i32
    %524 = tpu.dynamic_rotate %521 by %c2_i32_157 dim 0 : vector<8x64xf32>, i32 -> vector<8x64xf32>
    %cst_158 = arith.constant 0.000000e+00 : f32
    %525 = vector.shape_cast %523 : vector<8x1xi1> to vector<8x1xi1>
    %526 = vector.broadcast %525 : vector<8x1xi1> to vector<8x64xi1>
    %527 = vector.broadcast %cst_158 : f32 to vector<8x64xf32>
    %528 = arith.select %526, %524, %527 : vector<8x64xi1>, vector<8x64xf32>
    %529 = arith.addf %521, %528 : vector<8x64xf32>
    %c4_i32_159 = arith.constant 4 : i32
    %530 = vector.broadcast %c4_i32_159 : i32 to vector<8x1xi32>
    %531 = arith.cmpi sge, %21, %530 : vector<8x1xi32>
    %c4_i32_160 = arith.constant 4 : i32
    %532 = tpu.dynamic_rotate %529 by %c4_i32_160 dim 0 : vector<8x64xf32>, i32 -> vector<8x64xf32>
    %cst_161 = arith.constant 0.000000e+00 : f32
    %533 = vector.shape_cast %531 : vector<8x1xi1> to vector<8x1xi1>
    %534 = vector.broadcast %533 : vector<8x1xi1> to vector<8x64xi1>
    %535 = vector.broadcast %cst_161 : f32 to vector<8x64xf32>
    %536 = arith.select %534, %532, %535 : vector<8x64xi1>, vector<8x64xf32>
    %537 = arith.addf %529, %536 : vector<8x64xf32>
    %538 = arith.mulf %537, %507 : vector<8x64xf32>
    %539 = vector.broadcast %474 : vector<8x1xf32> to vector<8x64xf32>
    %540 = arith.mulf %538, %539 : vector<8x64xf32>
    %541 = arith.addf %452, %540 : vector<8x64xf32>
    %c5_i32 = arith.constant 5 : i32
    %542 = tpu.iota {dimensions = array<i32: 1>} : vector<1x16xi32>
    %543 = vector.broadcast %c5_i32 : i32 to vector<1x16xi32>
    %544 = arith.cmpi eq, %542, %543 : vector<1x16xi32>
    %545 = arith.extui %544 : vector<1x16xi1> to vector<1x16xi32>
    %546 = arith.sitofp %545 : vector<1x16xi32> to vector<1x16xf32>
    %547 = tpu.iota {dimensions = array<i32: 0>} : vector<16x1xi32>
    %548 = vector.broadcast %c5_i32 : i32 to vector<16x1xi32>
    %549 = arith.cmpi eq, %547, %548 : vector<16x1xi32>
    %550 = arith.extui %549 : vector<16x1xi1> to vector<16x1xi32>
    %551 = arith.sitofp %550 : vector<16x1xi32> to vector<16x1xf32>
    %552 = vector.broadcast %551 : vector<16x1xf32> to vector<16x64xf32>
    %553 = arith.mulf %95, %552 : vector<16x64xf32>
    %cst_162 = arith.constant dense<0.000000e+00> : vector<64xf32>
    %554 = vector.multi_reduction <add>, %553, %cst_162 [0] : vector<16x64xf32> to vector<64xf32>
    %555 = vector.shape_cast %554 : vector<64xf32> to vector<1x64xf32>
    %556 = vector.broadcast %546 : vector<1x16xf32> to vector<8x16xf32>
    %557 = arith.mulf %92, %556 : vector<8x16xf32>
    %cst_163 = arith.constant dense<0.000000e+00> : vector<8xf32>
    %558 = vector.multi_reduction <add>, %557, %cst_163 [1] : vector<8x16xf32> to vector<8xf32>
    %559 = vector.shape_cast %558 : vector<8xf32> to vector<8x1xf32>
    %560 = vector.broadcast %546 : vector<1x16xf32> to vector<8x16xf32>
    %561 = arith.mulf %93, %560 : vector<8x16xf32>
    %cst_164 = arith.constant dense<0.000000e+00> : vector<8xf32>
    %562 = vector.multi_reduction <add>, %561, %cst_164 [1] : vector<8x16xf32> to vector<8xf32>
    %563 = vector.shape_cast %562 : vector<8xf32> to vector<8x1xf32>
    %564 = vector.broadcast %555 : vector<1x64xf32> to vector<8x64xf32>
    %565 = arith.mulf %91, %564 : vector<8x64xf32>
    %cst_165 = arith.constant -2.000000e+01 : f32
    %566 = vector.broadcast %cst_165 : f32 to vector<8x64xf32>
    %567 = arith.maximumf %565, %566 : vector<8x64xf32>
    %cst_166 = arith.constant 0.000000e+00 : f32
    %568 = vector.shape_cast %23 : vector<8x1xi1> to vector<8x1xi1>
    %569 = vector.broadcast %568 : vector<8x1xi1> to vector<8x64xi1>
    %570 = vector.broadcast %cst_166 : f32 to vector<8x64xf32>
    %571 = arith.select %569, %570, %567 : vector<8x64xi1>, vector<8x64xf32>
    %c1_i32_167 = arith.constant 1 : i32
    %572 = vector.broadcast %c1_i32_167 : i32 to vector<8x1xi32>
    %573 = arith.cmpi sge, %21, %572 : vector<8x1xi32>
    %c1_i32_168 = arith.constant 1 : i32
    %574 = tpu.dynamic_rotate %571 by %c1_i32_168 dim 0 : vector<8x64xf32>, i32 -> vector<8x64xf32>
    %cst_169 = arith.constant 0.000000e+00 : f32
    %575 = vector.shape_cast %573 : vector<8x1xi1> to vector<8x1xi1>
    %576 = vector.broadcast %575 : vector<8x1xi1> to vector<8x64xi1>
    %577 = vector.broadcast %cst_169 : f32 to vector<8x64xf32>
    %578 = arith.select %576, %574, %577 : vector<8x64xi1>, vector<8x64xf32>
    %579 = arith.addf %571, %578 : vector<8x64xf32>
    %c2_i32_170 = arith.constant 2 : i32
    %580 = vector.broadcast %c2_i32_170 : i32 to vector<8x1xi32>
    %581 = arith.cmpi sge, %21, %580 : vector<8x1xi32>
    %c2_i32_171 = arith.constant 2 : i32
    %582 = tpu.dynamic_rotate %579 by %c2_i32_171 dim 0 : vector<8x64xf32>, i32 -> vector<8x64xf32>
    %cst_172 = arith.constant 0.000000e+00 : f32
    %583 = vector.shape_cast %581 : vector<8x1xi1> to vector<8x1xi1>
    %584 = vector.broadcast %583 : vector<8x1xi1> to vector<8x64xi1>
    %585 = vector.broadcast %cst_172 : f32 to vector<8x64xf32>
    %586 = arith.select %584, %582, %585 : vector<8x64xi1>, vector<8x64xf32>
    %587 = arith.addf %579, %586 : vector<8x64xf32>
    %c4_i32_173 = arith.constant 4 : i32
    %588 = vector.broadcast %c4_i32_173 : i32 to vector<8x1xi32>
    %589 = arith.cmpi sge, %21, %588 : vector<8x1xi32>
    %c4_i32_174 = arith.constant 4 : i32
    %590 = tpu.dynamic_rotate %587 by %c4_i32_174 dim 0 : vector<8x64xf32>, i32 -> vector<8x64xf32>
    %cst_175 = arith.constant 0.000000e+00 : f32
    %591 = vector.shape_cast %589 : vector<8x1xi1> to vector<8x1xi1>
    %592 = vector.broadcast %591 : vector<8x1xi1> to vector<8x64xi1>
    %593 = vector.broadcast %cst_175 : f32 to vector<8x64xf32>
    %594 = arith.select %592, %590, %593 : vector<8x64xi1>, vector<8x64xf32>
    %595 = arith.addf %587, %594 : vector<8x64xf32>
    %596 = math.exp %595 : vector<8x64xf32>
    %597 = vector.broadcast %559 : vector<8x1xf32> to vector<8x64xf32>
    %598 = arith.mulf %94, %597 : vector<8x64xf32>
    %cst_176 = arith.constant 9.99999996E-13 : f32
    %599 = vector.broadcast %cst_176 : f32 to vector<8x64xf32>
    %600 = arith.addf %596, %599 : vector<8x64xf32>
    %601 = tpu.reciprocal %600 : vector<8x64xf32> -> vector<8x64xf32>
    %602 = arith.mulf %598, %601 : vector<8x64xf32>
    %c1_i32_177 = arith.constant 1 : i32
    %603 = vector.broadcast %c1_i32_177 : i32 to vector<8x1xi32>
    %604 = arith.cmpi sge, %21, %603 : vector<8x1xi32>
    %c1_i32_178 = arith.constant 1 : i32
    %605 = tpu.dynamic_rotate %602 by %c1_i32_178 dim 0 : vector<8x64xf32>, i32 -> vector<8x64xf32>
    %cst_179 = arith.constant 0.000000e+00 : f32
    %606 = vector.shape_cast %604 : vector<8x1xi1> to vector<8x1xi1>
    %607 = vector.broadcast %606 : vector<8x1xi1> to vector<8x64xi1>
    %608 = vector.broadcast %cst_179 : f32 to vector<8x64xf32>
    %609 = arith.select %607, %605, %608 : vector<8x64xi1>, vector<8x64xf32>
    %610 = arith.addf %602, %609 : vector<8x64xf32>
    %c2_i32_180 = arith.constant 2 : i32
    %611 = vector.broadcast %c2_i32_180 : i32 to vector<8x1xi32>
    %612 = arith.cmpi sge, %21, %611 : vector<8x1xi32>
    %c2_i32_181 = arith.constant 2 : i32
    %613 = tpu.dynamic_rotate %610 by %c2_i32_181 dim 0 : vector<8x64xf32>, i32 -> vector<8x64xf32>
    %cst_182 = arith.constant 0.000000e+00 : f32
    %614 = vector.shape_cast %612 : vector<8x1xi1> to vector<8x1xi1>
    %615 = vector.broadcast %614 : vector<8x1xi1> to vector<8x64xi1>
    %616 = vector.broadcast %cst_182 : f32 to vector<8x64xf32>
    %617 = arith.select %615, %613, %616 : vector<8x64xi1>, vector<8x64xf32>
    %618 = arith.addf %610, %617 : vector<8x64xf32>
    %c4_i32_183 = arith.constant 4 : i32
    %619 = vector.broadcast %c4_i32_183 : i32 to vector<8x1xi32>
    %620 = arith.cmpi sge, %21, %619 : vector<8x1xi32>
    %c4_i32_184 = arith.constant 4 : i32
    %621 = tpu.dynamic_rotate %618 by %c4_i32_184 dim 0 : vector<8x64xf32>, i32 -> vector<8x64xf32>
    %cst_185 = arith.constant 0.000000e+00 : f32
    %622 = vector.shape_cast %620 : vector<8x1xi1> to vector<8x1xi1>
    %623 = vector.broadcast %622 : vector<8x1xi1> to vector<8x64xi1>
    %624 = vector.broadcast %cst_185 : f32 to vector<8x64xf32>
    %625 = arith.select %623, %621, %624 : vector<8x64xi1>, vector<8x64xf32>
    %626 = arith.addf %618, %625 : vector<8x64xf32>
    %627 = arith.mulf %626, %596 : vector<8x64xf32>
    %628 = vector.broadcast %563 : vector<8x1xf32> to vector<8x64xf32>
    %629 = arith.mulf %627, %628 : vector<8x64xf32>
    %630 = arith.addf %541, %629 : vector<8x64xf32>
    %c6_i32 = arith.constant 6 : i32
    %631 = tpu.iota {dimensions = array<i32: 1>} : vector<1x16xi32>
    %632 = vector.broadcast %c6_i32 : i32 to vector<1x16xi32>
    %633 = arith.cmpi eq, %631, %632 : vector<1x16xi32>
    %634 = arith.extui %633 : vector<1x16xi1> to vector<1x16xi32>
    %635 = arith.sitofp %634 : vector<1x16xi32> to vector<1x16xf32>
    %636 = tpu.iota {dimensions = array<i32: 0>} : vector<16x1xi32>
    %637 = vector.broadcast %c6_i32 : i32 to vector<16x1xi32>
    %638 = arith.cmpi eq, %636, %637 : vector<16x1xi32>
    %639 = arith.extui %638 : vector<16x1xi1> to vector<16x1xi32>
    %640 = arith.sitofp %639 : vector<16x1xi32> to vector<16x1xf32>
    %641 = vector.broadcast %640 : vector<16x1xf32> to vector<16x64xf32>
    %642 = arith.mulf %95, %641 : vector<16x64xf32>
    %cst_186 = arith.constant dense<0.000000e+00> : vector<64xf32>
    %643 = vector.multi_reduction <add>, %642, %cst_186 [0] : vector<16x64xf32> to vector<64xf32>
    %644 = vector.shape_cast %643 : vector<64xf32> to vector<1x64xf32>
    %645 = vector.broadcast %635 : vector<1x16xf32> to vector<8x16xf32>
    %646 = arith.mulf %92, %645 : vector<8x16xf32>
    %cst_187 = arith.constant dense<0.000000e+00> : vector<8xf32>
    %647 = vector.multi_reduction <add>, %646, %cst_187 [1] : vector<8x16xf32> to vector<8xf32>
    %648 = vector.shape_cast %647 : vector<8xf32> to vector<8x1xf32>
    %649 = vector.broadcast %635 : vector<1x16xf32> to vector<8x16xf32>
    %650 = arith.mulf %93, %649 : vector<8x16xf32>
    %cst_188 = arith.constant dense<0.000000e+00> : vector<8xf32>
    %651 = vector.multi_reduction <add>, %650, %cst_188 [1] : vector<8x16xf32> to vector<8xf32>
    %652 = vector.shape_cast %651 : vector<8xf32> to vector<8x1xf32>
    %653 = vector.broadcast %644 : vector<1x64xf32> to vector<8x64xf32>
    %654 = arith.mulf %91, %653 : vector<8x64xf32>
    %cst_189 = arith.constant -2.000000e+01 : f32
    %655 = vector.broadcast %cst_189 : f32 to vector<8x64xf32>
    %656 = arith.maximumf %654, %655 : vector<8x64xf32>
    %cst_190 = arith.constant 0.000000e+00 : f32
    %657 = vector.shape_cast %23 : vector<8x1xi1> to vector<8x1xi1>
    %658 = vector.broadcast %657 : vector<8x1xi1> to vector<8x64xi1>
    %659 = vector.broadcast %cst_190 : f32 to vector<8x64xf32>
    %660 = arith.select %658, %659, %656 : vector<8x64xi1>, vector<8x64xf32>
    %c1_i32_191 = arith.constant 1 : i32
    %661 = vector.broadcast %c1_i32_191 : i32 to vector<8x1xi32>
    %662 = arith.cmpi sge, %21, %661 : vector<8x1xi32>
    %c1_i32_192 = arith.constant 1 : i32
    %663 = tpu.dynamic_rotate %660 by %c1_i32_192 dim 0 : vector<8x64xf32>, i32 -> vector<8x64xf32>
    %cst_193 = arith.constant 0.000000e+00 : f32
    %664 = vector.shape_cast %662 : vector<8x1xi1> to vector<8x1xi1>
    %665 = vector.broadcast %664 : vector<8x1xi1> to vector<8x64xi1>
    %666 = vector.broadcast %cst_193 : f32 to vector<8x64xf32>
    %667 = arith.select %665, %663, %666 : vector<8x64xi1>, vector<8x64xf32>
    %668 = arith.addf %660, %667 : vector<8x64xf32>
    %c2_i32_194 = arith.constant 2 : i32
    %669 = vector.broadcast %c2_i32_194 : i32 to vector<8x1xi32>
    %670 = arith.cmpi sge, %21, %669 : vector<8x1xi32>
    %c2_i32_195 = arith.constant 2 : i32
    %671 = tpu.dynamic_rotate %668 by %c2_i32_195 dim 0 : vector<8x64xf32>, i32 -> vector<8x64xf32>
    %cst_196 = arith.constant 0.000000e+00 : f32
    %672 = vector.shape_cast %670 : vector<8x1xi1> to vector<8x1xi1>
    %673 = vector.broadcast %672 : vector<8x1xi1> to vector<8x64xi1>
    %674 = vector.broadcast %cst_196 : f32 to vector<8x64xf32>
    %675 = arith.select %673, %671, %674 : vector<8x64xi1>, vector<8x64xf32>
    %676 = arith.addf %668, %675 : vector<8x64xf32>
    %c4_i32_197 = arith.constant 4 : i32
    %677 = vector.broadcast %c4_i32_197 : i32 to vector<8x1xi32>
    %678 = arith.cmpi sge, %21, %677 : vector<8x1xi32>
    %c4_i32_198 = arith.constant 4 : i32
    %679 = tpu.dynamic_rotate %676 by %c4_i32_198 dim 0 : vector<8x64xf32>, i32 -> vector<8x64xf32>
    %cst_199 = arith.constant 0.000000e+00 : f32
    %680 = vector.shape_cast %678 : vector<8x1xi1> to vector<8x1xi1>
    %681 = vector.broadcast %680 : vector<8x1xi1> to vector<8x64xi1>
    %682 = vector.broadcast %cst_199 : f32 to vector<8x64xf32>
    %683 = arith.select %681, %679, %682 : vector<8x64xi1>, vector<8x64xf32>
    %684 = arith.addf %676, %683 : vector<8x64xf32>
    %685 = math.exp %684 : vector<8x64xf32>
    %686 = vector.broadcast %648 : vector<8x1xf32> to vector<8x64xf32>
    %687 = arith.mulf %94, %686 : vector<8x64xf32>
    %cst_200 = arith.constant 9.99999996E-13 : f32
    %688 = vector.broadcast %cst_200 : f32 to vector<8x64xf32>
    %689 = arith.addf %685, %688 : vector<8x64xf32>
    %690 = tpu.reciprocal %689 : vector<8x64xf32> -> vector<8x64xf32>
    %691 = arith.mulf %687, %690 : vector<8x64xf32>
    %c1_i32_201 = arith.constant 1 : i32
    %692 = vector.broadcast %c1_i32_201 : i32 to vector<8x1xi32>
    %693 = arith.cmpi sge, %21, %692 : vector<8x1xi32>
    %c1_i32_202 = arith.constant 1 : i32
    %694 = tpu.dynamic_rotate %691 by %c1_i32_202 dim 0 : vector<8x64xf32>, i32 -> vector<8x64xf32>
    %cst_203 = arith.constant 0.000000e+00 : f32
    %695 = vector.shape_cast %693 : vector<8x1xi1> to vector<8x1xi1>
    %696 = vector.broadcast %695 : vector<8x1xi1> to vector<8x64xi1>
    %697 = vector.broadcast %cst_203 : f32 to vector<8x64xf32>
    %698 = arith.select %696, %694, %697 : vector<8x64xi1>, vector<8x64xf32>
    %699 = arith.addf %691, %698 : vector<8x64xf32>
    %c2_i32_204 = arith.constant 2 : i32
    %700 = vector.broadcast %c2_i32_204 : i32 to vector<8x1xi32>
    %701 = arith.cmpi sge, %21, %700 : vector<8x1xi32>
    %c2_i32_205 = arith.constant 2 : i32
    %702 = tpu.dynamic_rotate %699 by %c2_i32_205 dim 0 : vector<8x64xf32>, i32 -> vector<8x64xf32>
    %cst_206 = arith.constant 0.000000e+00 : f32
    %703 = vector.shape_cast %701 : vector<8x1xi1> to vector<8x1xi1>
    %704 = vector.broadcast %703 : vector<8x1xi1> to vector<8x64xi1>
    %705 = vector.broadcast %cst_206 : f32 to vector<8x64xf32>
    %706 = arith.select %704, %702, %705 : vector<8x64xi1>, vector<8x64xf32>
    %707 = arith.addf %699, %706 : vector<8x64xf32>
    %c4_i32_207 = arith.constant 4 : i32
    %708 = vector.broadcast %c4_i32_207 : i32 to vector<8x1xi32>
    %709 = arith.cmpi sge, %21, %708 : vector<8x1xi32>
    %c4_i32_208 = arith.constant 4 : i32
    %710 = tpu.dynamic_rotate %707 by %c4_i32_208 dim 0 : vector<8x64xf32>, i32 -> vector<8x64xf32>
    %cst_209 = arith.constant 0.000000e+00 : f32
    %711 = vector.shape_cast %709 : vector<8x1xi1> to vector<8x1xi1>
    %712 = vector.broadcast %711 : vector<8x1xi1> to vector<8x64xi1>
    %713 = vector.broadcast %cst_209 : f32 to vector<8x64xf32>
    %714 = arith.select %712, %710, %713 : vector<8x64xi1>, vector<8x64xf32>
    %715 = arith.addf %707, %714 : vector<8x64xf32>
    %716 = arith.mulf %715, %685 : vector<8x64xf32>
    %717 = vector.broadcast %652 : vector<8x1xf32> to vector<8x64xf32>
    %718 = arith.mulf %716, %717 : vector<8x64xf32>
    %719 = arith.addf %630, %718 : vector<8x64xf32>
    %c7_i32 = arith.constant 7 : i32
    %720 = tpu.iota {dimensions = array<i32: 1>} : vector<1x16xi32>
    %721 = vector.broadcast %c7_i32 : i32 to vector<1x16xi32>
    %722 = arith.cmpi eq, %720, %721 : vector<1x16xi32>
    %723 = arith.extui %722 : vector<1x16xi1> to vector<1x16xi32>
    %724 = arith.sitofp %723 : vector<1x16xi32> to vector<1x16xf32>
    %725 = tpu.iota {dimensions = array<i32: 0>} : vector<16x1xi32>
    %726 = vector.broadcast %c7_i32 : i32 to vector<16x1xi32>
    %727 = arith.cmpi eq, %725, %726 : vector<16x1xi32>
    %728 = arith.extui %727 : vector<16x1xi1> to vector<16x1xi32>
    %729 = arith.sitofp %728 : vector<16x1xi32> to vector<16x1xf32>
    %730 = vector.broadcast %729 : vector<16x1xf32> to vector<16x64xf32>
    %731 = arith.mulf %95, %730 : vector<16x64xf32>
    %cst_210 = arith.constant dense<0.000000e+00> : vector<64xf32>
    %732 = vector.multi_reduction <add>, %731, %cst_210 [0] : vector<16x64xf32> to vector<64xf32>
    %733 = vector.shape_cast %732 : vector<64xf32> to vector<1x64xf32>
    %734 = vector.broadcast %724 : vector<1x16xf32> to vector<8x16xf32>
    %735 = arith.mulf %92, %734 : vector<8x16xf32>
    %cst_211 = arith.constant dense<0.000000e+00> : vector<8xf32>
    %736 = vector.multi_reduction <add>, %735, %cst_211 [1] : vector<8x16xf32> to vector<8xf32>
    %737 = vector.shape_cast %736 : vector<8xf32> to vector<8x1xf32>
    %738 = vector.broadcast %724 : vector<1x16xf32> to vector<8x16xf32>
    %739 = arith.mulf %93, %738 : vector<8x16xf32>
    %cst_212 = arith.constant dense<0.000000e+00> : vector<8xf32>
    %740 = vector.multi_reduction <add>, %739, %cst_212 [1] : vector<8x16xf32> to vector<8xf32>
    %741 = vector.shape_cast %740 : vector<8xf32> to vector<8x1xf32>
    %742 = vector.broadcast %733 : vector<1x64xf32> to vector<8x64xf32>
    %743 = arith.mulf %91, %742 : vector<8x64xf32>
    %cst_213 = arith.constant -2.000000e+01 : f32
    %744 = vector.broadcast %cst_213 : f32 to vector<8x64xf32>
    %745 = arith.maximumf %743, %744 : vector<8x64xf32>
    %cst_214 = arith.constant 0.000000e+00 : f32
    %746 = vector.shape_cast %23 : vector<8x1xi1> to vector<8x1xi1>
    %747 = vector.broadcast %746 : vector<8x1xi1> to vector<8x64xi1>
    %748 = vector.broadcast %cst_214 : f32 to vector<8x64xf32>
    %749 = arith.select %747, %748, %745 : vector<8x64xi1>, vector<8x64xf32>
    %c1_i32_215 = arith.constant 1 : i32
    %750 = vector.broadcast %c1_i32_215 : i32 to vector<8x1xi32>
    %751 = arith.cmpi sge, %21, %750 : vector<8x1xi32>
    %c1_i32_216 = arith.constant 1 : i32
    %752 = tpu.dynamic_rotate %749 by %c1_i32_216 dim 0 : vector<8x64xf32>, i32 -> vector<8x64xf32>
    %cst_217 = arith.constant 0.000000e+00 : f32
    %753 = vector.shape_cast %751 : vector<8x1xi1> to vector<8x1xi1>
    %754 = vector.broadcast %753 : vector<8x1xi1> to vector<8x64xi1>
    %755 = vector.broadcast %cst_217 : f32 to vector<8x64xf32>
    %756 = arith.select %754, %752, %755 : vector<8x64xi1>, vector<8x64xf32>
    %757 = arith.addf %749, %756 : vector<8x64xf32>
    %c2_i32_218 = arith.constant 2 : i32
    %758 = vector.broadcast %c2_i32_218 : i32 to vector<8x1xi32>
    %759 = arith.cmpi sge, %21, %758 : vector<8x1xi32>
    %c2_i32_219 = arith.constant 2 : i32
    %760 = tpu.dynamic_rotate %757 by %c2_i32_219 dim 0 : vector<8x64xf32>, i32 -> vector<8x64xf32>
    %cst_220 = arith.constant 0.000000e+00 : f32
    %761 = vector.shape_cast %759 : vector<8x1xi1> to vector<8x1xi1>
    %762 = vector.broadcast %761 : vector<8x1xi1> to vector<8x64xi1>
    %763 = vector.broadcast %cst_220 : f32 to vector<8x64xf32>
    %764 = arith.select %762, %760, %763 : vector<8x64xi1>, vector<8x64xf32>
    %765 = arith.addf %757, %764 : vector<8x64xf32>
    %c4_i32_221 = arith.constant 4 : i32
    %766 = vector.broadcast %c4_i32_221 : i32 to vector<8x1xi32>
    %767 = arith.cmpi sge, %21, %766 : vector<8x1xi32>
    %c4_i32_222 = arith.constant 4 : i32
    %768 = tpu.dynamic_rotate %765 by %c4_i32_222 dim 0 : vector<8x64xf32>, i32 -> vector<8x64xf32>
    %cst_223 = arith.constant 0.000000e+00 : f32
    %769 = vector.shape_cast %767 : vector<8x1xi1> to vector<8x1xi1>
    %770 = vector.broadcast %769 : vector<8x1xi1> to vector<8x64xi1>
    %771 = vector.broadcast %cst_223 : f32 to vector<8x64xf32>
    %772 = arith.select %770, %768, %771 : vector<8x64xi1>, vector<8x64xf32>
    %773 = arith.addf %765, %772 : vector<8x64xf32>
    %774 = math.exp %773 : vector<8x64xf32>
    %775 = vector.broadcast %737 : vector<8x1xf32> to vector<8x64xf32>
    %776 = arith.mulf %94, %775 : vector<8x64xf32>
    %cst_224 = arith.constant 9.99999996E-13 : f32
    %777 = vector.broadcast %cst_224 : f32 to vector<8x64xf32>
    %778 = arith.addf %774, %777 : vector<8x64xf32>
    %779 = tpu.reciprocal %778 : vector<8x64xf32> -> vector<8x64xf32>
    %780 = arith.mulf %776, %779 : vector<8x64xf32>
    %c1_i32_225 = arith.constant 1 : i32
    %781 = vector.broadcast %c1_i32_225 : i32 to vector<8x1xi32>
    %782 = arith.cmpi sge, %21, %781 : vector<8x1xi32>
    %c1_i32_226 = arith.constant 1 : i32
    %783 = tpu.dynamic_rotate %780 by %c1_i32_226 dim 0 : vector<8x64xf32>, i32 -> vector<8x64xf32>
    %cst_227 = arith.constant 0.000000e+00 : f32
    %784 = vector.shape_cast %782 : vector<8x1xi1> to vector<8x1xi1>
    %785 = vector.broadcast %784 : vector<8x1xi1> to vector<8x64xi1>
    %786 = vector.broadcast %cst_227 : f32 to vector<8x64xf32>
    %787 = arith.select %785, %783, %786 : vector<8x64xi1>, vector<8x64xf32>
    %788 = arith.addf %780, %787 : vector<8x64xf32>
    %c2_i32_228 = arith.constant 2 : i32
    %789 = vector.broadcast %c2_i32_228 : i32 to vector<8x1xi32>
    %790 = arith.cmpi sge, %21, %789 : vector<8x1xi32>
    %c2_i32_229 = arith.constant 2 : i32
    %791 = tpu.dynamic_rotate %788 by %c2_i32_229 dim 0 : vector<8x64xf32>, i32 -> vector<8x64xf32>
    %cst_230 = arith.constant 0.000000e+00 : f32
    %792 = vector.shape_cast %790 : vector<8x1xi1> to vector<8x1xi1>
    %793 = vector.broadcast %792 : vector<8x1xi1> to vector<8x64xi1>
    %794 = vector.broadcast %cst_230 : f32 to vector<8x64xf32>
    %795 = arith.select %793, %791, %794 : vector<8x64xi1>, vector<8x64xf32>
    %796 = arith.addf %788, %795 : vector<8x64xf32>
    %c4_i32_231 = arith.constant 4 : i32
    %797 = vector.broadcast %c4_i32_231 : i32 to vector<8x1xi32>
    %798 = arith.cmpi sge, %21, %797 : vector<8x1xi32>
    %c4_i32_232 = arith.constant 4 : i32
    %799 = tpu.dynamic_rotate %796 by %c4_i32_232 dim 0 : vector<8x64xf32>, i32 -> vector<8x64xf32>
    %cst_233 = arith.constant 0.000000e+00 : f32
    %800 = vector.shape_cast %798 : vector<8x1xi1> to vector<8x1xi1>
    %801 = vector.broadcast %800 : vector<8x1xi1> to vector<8x64xi1>
    %802 = vector.broadcast %cst_233 : f32 to vector<8x64xf32>
    %803 = arith.select %801, %799, %802 : vector<8x64xi1>, vector<8x64xf32>
    %804 = arith.addf %796, %803 : vector<8x64xf32>
    %805 = arith.mulf %804, %774 : vector<8x64xf32>
    %806 = vector.broadcast %741 : vector<8x1xf32> to vector<8x64xf32>
    %807 = arith.mulf %805, %806 : vector<8x64xf32>
    %808 = arith.addf %719, %807 : vector<8x64xf32>
    %c8_i32_234 = arith.constant 8 : i32
    %809 = tpu.iota {dimensions = array<i32: 1>} : vector<1x16xi32>
    %810 = vector.broadcast %c8_i32_234 : i32 to vector<1x16xi32>
    %811 = arith.cmpi eq, %809, %810 : vector<1x16xi32>
    %812 = arith.extui %811 : vector<1x16xi1> to vector<1x16xi32>
    %813 = arith.sitofp %812 : vector<1x16xi32> to vector<1x16xf32>
    %814 = tpu.iota {dimensions = array<i32: 0>} : vector<16x1xi32>
    %815 = vector.broadcast %c8_i32_234 : i32 to vector<16x1xi32>
    %816 = arith.cmpi eq, %814, %815 : vector<16x1xi32>
    %817 = arith.extui %816 : vector<16x1xi1> to vector<16x1xi32>
    %818 = arith.sitofp %817 : vector<16x1xi32> to vector<16x1xf32>
    %819 = vector.broadcast %818 : vector<16x1xf32> to vector<16x64xf32>
    %820 = arith.mulf %95, %819 : vector<16x64xf32>
    %cst_235 = arith.constant dense<0.000000e+00> : vector<64xf32>
    %821 = vector.multi_reduction <add>, %820, %cst_235 [0] : vector<16x64xf32> to vector<64xf32>
    %822 = vector.shape_cast %821 : vector<64xf32> to vector<1x64xf32>
    %823 = vector.broadcast %813 : vector<1x16xf32> to vector<8x16xf32>
    %824 = arith.mulf %92, %823 : vector<8x16xf32>
    %cst_236 = arith.constant dense<0.000000e+00> : vector<8xf32>
    %825 = vector.multi_reduction <add>, %824, %cst_236 [1] : vector<8x16xf32> to vector<8xf32>
    %826 = vector.shape_cast %825 : vector<8xf32> to vector<8x1xf32>
    %827 = vector.broadcast %813 : vector<1x16xf32> to vector<8x16xf32>
    %828 = arith.mulf %93, %827 : vector<8x16xf32>
    %cst_237 = arith.constant dense<0.000000e+00> : vector<8xf32>
    %829 = vector.multi_reduction <add>, %828, %cst_237 [1] : vector<8x16xf32> to vector<8xf32>
    %830 = vector.shape_cast %829 : vector<8xf32> to vector<8x1xf32>
    %831 = vector.broadcast %822 : vector<1x64xf32> to vector<8x64xf32>
    %832 = arith.mulf %91, %831 : vector<8x64xf32>
    %cst_238 = arith.constant -2.000000e+01 : f32
    %833 = vector.broadcast %cst_238 : f32 to vector<8x64xf32>
    %834 = arith.maximumf %832, %833 : vector<8x64xf32>
    %cst_239 = arith.constant 0.000000e+00 : f32
    %835 = vector.shape_cast %23 : vector<8x1xi1> to vector<8x1xi1>
    %836 = vector.broadcast %835 : vector<8x1xi1> to vector<8x64xi1>
    %837 = vector.broadcast %cst_239 : f32 to vector<8x64xf32>
    %838 = arith.select %836, %837, %834 : vector<8x64xi1>, vector<8x64xf32>
    %c1_i32_240 = arith.constant 1 : i32
    %839 = vector.broadcast %c1_i32_240 : i32 to vector<8x1xi32>
    %840 = arith.cmpi sge, %21, %839 : vector<8x1xi32>
    %c1_i32_241 = arith.constant 1 : i32
    %841 = tpu.dynamic_rotate %838 by %c1_i32_241 dim 0 : vector<8x64xf32>, i32 -> vector<8x64xf32>
    %cst_242 = arith.constant 0.000000e+00 : f32
    %842 = vector.shape_cast %840 : vector<8x1xi1> to vector<8x1xi1>
    %843 = vector.broadcast %842 : vector<8x1xi1> to vector<8x64xi1>
    %844 = vector.broadcast %cst_242 : f32 to vector<8x64xf32>
    %845 = arith.select %843, %841, %844 : vector<8x64xi1>, vector<8x64xf32>
    %846 = arith.addf %838, %845 : vector<8x64xf32>
    %c2_i32_243 = arith.constant 2 : i32
    %847 = vector.broadcast %c2_i32_243 : i32 to vector<8x1xi32>
    %848 = arith.cmpi sge, %21, %847 : vector<8x1xi32>
    %c2_i32_244 = arith.constant 2 : i32
    %849 = tpu.dynamic_rotate %846 by %c2_i32_244 dim 0 : vector<8x64xf32>, i32 -> vector<8x64xf32>
    %cst_245 = arith.constant 0.000000e+00 : f32
    %850 = vector.shape_cast %848 : vector<8x1xi1> to vector<8x1xi1>
    %851 = vector.broadcast %850 : vector<8x1xi1> to vector<8x64xi1>
    %852 = vector.broadcast %cst_245 : f32 to vector<8x64xf32>
    %853 = arith.select %851, %849, %852 : vector<8x64xi1>, vector<8x64xf32>
    %854 = arith.addf %846, %853 : vector<8x64xf32>
    %c4_i32_246 = arith.constant 4 : i32
    %855 = vector.broadcast %c4_i32_246 : i32 to vector<8x1xi32>
    %856 = arith.cmpi sge, %21, %855 : vector<8x1xi32>
    %c4_i32_247 = arith.constant 4 : i32
    %857 = tpu.dynamic_rotate %854 by %c4_i32_247 dim 0 : vector<8x64xf32>, i32 -> vector<8x64xf32>
    %cst_248 = arith.constant 0.000000e+00 : f32
    %858 = vector.shape_cast %856 : vector<8x1xi1> to vector<8x1xi1>
    %859 = vector.broadcast %858 : vector<8x1xi1> to vector<8x64xi1>
    %860 = vector.broadcast %cst_248 : f32 to vector<8x64xf32>
    %861 = arith.select %859, %857, %860 : vector<8x64xi1>, vector<8x64xf32>
    %862 = arith.addf %854, %861 : vector<8x64xf32>
    %863 = math.exp %862 : vector<8x64xf32>
    %864 = vector.broadcast %826 : vector<8x1xf32> to vector<8x64xf32>
    %865 = arith.mulf %94, %864 : vector<8x64xf32>
    %cst_249 = arith.constant 9.99999996E-13 : f32
    %866 = vector.broadcast %cst_249 : f32 to vector<8x64xf32>
    %867 = arith.addf %863, %866 : vector<8x64xf32>
    %868 = tpu.reciprocal %867 : vector<8x64xf32> -> vector<8x64xf32>
    %869 = arith.mulf %865, %868 : vector<8x64xf32>
    %c1_i32_250 = arith.constant 1 : i32
    %870 = vector.broadcast %c1_i32_250 : i32 to vector<8x1xi32>
    %871 = arith.cmpi sge, %21, %870 : vector<8x1xi32>
    %c1_i32_251 = arith.constant 1 : i32
    %872 = tpu.dynamic_rotate %869 by %c1_i32_251 dim 0 : vector<8x64xf32>, i32 -> vector<8x64xf32>
    %cst_252 = arith.constant 0.000000e+00 : f32
    %873 = vector.shape_cast %871 : vector<8x1xi1> to vector<8x1xi1>
    %874 = vector.broadcast %873 : vector<8x1xi1> to vector<8x64xi1>
    %875 = vector.broadcast %cst_252 : f32 to vector<8x64xf32>
    %876 = arith.select %874, %872, %875 : vector<8x64xi1>, vector<8x64xf32>
    %877 = arith.addf %869, %876 : vector<8x64xf32>
    %c2_i32_253 = arith.constant 2 : i32
    %878 = vector.broadcast %c2_i32_253 : i32 to vector<8x1xi32>
    %879 = arith.cmpi sge, %21, %878 : vector<8x1xi32>
    %c2_i32_254 = arith.constant 2 : i32
    %880 = tpu.dynamic_rotate %877 by %c2_i32_254 dim 0 : vector<8x64xf32>, i32 -> vector<8x64xf32>
    %cst_255 = arith.constant 0.000000e+00 : f32
    %881 = vector.shape_cast %879 : vector<8x1xi1> to vector<8x1xi1>
    %882 = vector.broadcast %881 : vector<8x1xi1> to vector<8x64xi1>
    %883 = vector.broadcast %cst_255 : f32 to vector<8x64xf32>
    %884 = arith.select %882, %880, %883 : vector<8x64xi1>, vector<8x64xf32>
    %885 = arith.addf %877, %884 : vector<8x64xf32>
    %c4_i32_256 = arith.constant 4 : i32
    %886 = vector.broadcast %c4_i32_256 : i32 to vector<8x1xi32>
    %887 = arith.cmpi sge, %21, %886 : vector<8x1xi32>
    %c4_i32_257 = arith.constant 4 : i32
    %888 = tpu.dynamic_rotate %885 by %c4_i32_257 dim 0 : vector<8x64xf32>, i32 -> vector<8x64xf32>
    %cst_258 = arith.constant 0.000000e+00 : f32
    %889 = vector.shape_cast %887 : vector<8x1xi1> to vector<8x1xi1>
    %890 = vector.broadcast %889 : vector<8x1xi1> to vector<8x64xi1>
    %891 = vector.broadcast %cst_258 : f32 to vector<8x64xf32>
    %892 = arith.select %890, %888, %891 : vector<8x64xi1>, vector<8x64xf32>
    %893 = arith.addf %885, %892 : vector<8x64xf32>
    %894 = arith.mulf %893, %863 : vector<8x64xf32>
    %895 = vector.broadcast %830 : vector<8x1xf32> to vector<8x64xf32>
    %896 = arith.mulf %894, %895 : vector<8x64xf32>
    %897 = arith.addf %808, %896 : vector<8x64xf32>
    %c9_i32 = arith.constant 9 : i32
    %898 = tpu.iota {dimensions = array<i32: 1>} : vector<1x16xi32>
    %899 = vector.broadcast %c9_i32 : i32 to vector<1x16xi32>
    %900 = arith.cmpi eq, %898, %899 : vector<1x16xi32>
    %901 = arith.extui %900 : vector<1x16xi1> to vector<1x16xi32>
    %902 = arith.sitofp %901 : vector<1x16xi32> to vector<1x16xf32>
    %903 = tpu.iota {dimensions = array<i32: 0>} : vector<16x1xi32>
    %904 = vector.broadcast %c9_i32 : i32 to vector<16x1xi32>
    %905 = arith.cmpi eq, %903, %904 : vector<16x1xi32>
    %906 = arith.extui %905 : vector<16x1xi1> to vector<16x1xi32>
    %907 = arith.sitofp %906 : vector<16x1xi32> to vector<16x1xf32>
    %908 = vector.broadcast %907 : vector<16x1xf32> to vector<16x64xf32>
    %909 = arith.mulf %95, %908 : vector<16x64xf32>
    %cst_259 = arith.constant dense<0.000000e+00> : vector<64xf32>
    %910 = vector.multi_reduction <add>, %909, %cst_259 [0] : vector<16x64xf32> to vector<64xf32>
    %911 = vector.shape_cast %910 : vector<64xf32> to vector<1x64xf32>
    %912 = vector.broadcast %902 : vector<1x16xf32> to vector<8x16xf32>
    %913 = arith.mulf %92, %912 : vector<8x16xf32>
    %cst_260 = arith.constant dense<0.000000e+00> : vector<8xf32>
    %914 = vector.multi_reduction <add>, %913, %cst_260 [1] : vector<8x16xf32> to vector<8xf32>
    %915 = vector.shape_cast %914 : vector<8xf32> to vector<8x1xf32>
    %916 = vector.broadcast %902 : vector<1x16xf32> to vector<8x16xf32>
    %917 = arith.mulf %93, %916 : vector<8x16xf32>
    %cst_261 = arith.constant dense<0.000000e+00> : vector<8xf32>
    %918 = vector.multi_reduction <add>, %917, %cst_261 [1] : vector<8x16xf32> to vector<8xf32>
    %919 = vector.shape_cast %918 : vector<8xf32> to vector<8x1xf32>
    %920 = vector.broadcast %911 : vector<1x64xf32> to vector<8x64xf32>
    %921 = arith.mulf %91, %920 : vector<8x64xf32>
    %cst_262 = arith.constant -2.000000e+01 : f32
    %922 = vector.broadcast %cst_262 : f32 to vector<8x64xf32>
    %923 = arith.maximumf %921, %922 : vector<8x64xf32>
    %cst_263 = arith.constant 0.000000e+00 : f32
    %924 = vector.shape_cast %23 : vector<8x1xi1> to vector<8x1xi1>
    %925 = vector.broadcast %924 : vector<8x1xi1> to vector<8x64xi1>
    %926 = vector.broadcast %cst_263 : f32 to vector<8x64xf32>
    %927 = arith.select %925, %926, %923 : vector<8x64xi1>, vector<8x64xf32>
    %c1_i32_264 = arith.constant 1 : i32
    %928 = vector.broadcast %c1_i32_264 : i32 to vector<8x1xi32>
    %929 = arith.cmpi sge, %21, %928 : vector<8x1xi32>
    %c1_i32_265 = arith.constant 1 : i32
    %930 = tpu.dynamic_rotate %927 by %c1_i32_265 dim 0 : vector<8x64xf32>, i32 -> vector<8x64xf32>
    %cst_266 = arith.constant 0.000000e+00 : f32
    %931 = vector.shape_cast %929 : vector<8x1xi1> to vector<8x1xi1>
    %932 = vector.broadcast %931 : vector<8x1xi1> to vector<8x64xi1>
    %933 = vector.broadcast %cst_266 : f32 to vector<8x64xf32>
    %934 = arith.select %932, %930, %933 : vector<8x64xi1>, vector<8x64xf32>
    %935 = arith.addf %927, %934 : vector<8x64xf32>
    %c2_i32_267 = arith.constant 2 : i32
    %936 = vector.broadcast %c2_i32_267 : i32 to vector<8x1xi32>
    %937 = arith.cmpi sge, %21, %936 : vector<8x1xi32>
    %c2_i32_268 = arith.constant 2 : i32
    %938 = tpu.dynamic_rotate %935 by %c2_i32_268 dim 0 : vector<8x64xf32>, i32 -> vector<8x64xf32>
    %cst_269 = arith.constant 0.000000e+00 : f32
    %939 = vector.shape_cast %937 : vector<8x1xi1> to vector<8x1xi1>
    %940 = vector.broadcast %939 : vector<8x1xi1> to vector<8x64xi1>
    %941 = vector.broadcast %cst_269 : f32 to vector<8x64xf32>
    %942 = arith.select %940, %938, %941 : vector<8x64xi1>, vector<8x64xf32>
    %943 = arith.addf %935, %942 : vector<8x64xf32>
    %c4_i32_270 = arith.constant 4 : i32
    %944 = vector.broadcast %c4_i32_270 : i32 to vector<8x1xi32>
    %945 = arith.cmpi sge, %21, %944 : vector<8x1xi32>
    %c4_i32_271 = arith.constant 4 : i32
    %946 = tpu.dynamic_rotate %943 by %c4_i32_271 dim 0 : vector<8x64xf32>, i32 -> vector<8x64xf32>
    %cst_272 = arith.constant 0.000000e+00 : f32
    %947 = vector.shape_cast %945 : vector<8x1xi1> to vector<8x1xi1>
    %948 = vector.broadcast %947 : vector<8x1xi1> to vector<8x64xi1>
    %949 = vector.broadcast %cst_272 : f32 to vector<8x64xf32>
    %950 = arith.select %948, %946, %949 : vector<8x64xi1>, vector<8x64xf32>
    %951 = arith.addf %943, %950 : vector<8x64xf32>
    %952 = math.exp %951 : vector<8x64xf32>
    %953 = vector.broadcast %915 : vector<8x1xf32> to vector<8x64xf32>
    %954 = arith.mulf %94, %953 : vector<8x64xf32>
    %cst_273 = arith.constant 9.99999996E-13 : f32
    %955 = vector.broadcast %cst_273 : f32 to vector<8x64xf32>
    %956 = arith.addf %952, %955 : vector<8x64xf32>
    %957 = tpu.reciprocal %956 : vector<8x64xf32> -> vector<8x64xf32>
    %958 = arith.mulf %954, %957 : vector<8x64xf32>
    %c1_i32_274 = arith.constant 1 : i32
    %959 = vector.broadcast %c1_i32_274 : i32 to vector<8x1xi32>
    %960 = arith.cmpi sge, %21, %959 : vector<8x1xi32>
    %c1_i32_275 = arith.constant 1 : i32
    %961 = tpu.dynamic_rotate %958 by %c1_i32_275 dim 0 : vector<8x64xf32>, i32 -> vector<8x64xf32>
    %cst_276 = arith.constant 0.000000e+00 : f32
    %962 = vector.shape_cast %960 : vector<8x1xi1> to vector<8x1xi1>
    %963 = vector.broadcast %962 : vector<8x1xi1> to vector<8x64xi1>
    %964 = vector.broadcast %cst_276 : f32 to vector<8x64xf32>
    %965 = arith.select %963, %961, %964 : vector<8x64xi1>, vector<8x64xf32>
    %966 = arith.addf %958, %965 : vector<8x64xf32>
    %c2_i32_277 = arith.constant 2 : i32
    %967 = vector.broadcast %c2_i32_277 : i32 to vector<8x1xi32>
    %968 = arith.cmpi sge, %21, %967 : vector<8x1xi32>
    %c2_i32_278 = arith.constant 2 : i32
    %969 = tpu.dynamic_rotate %966 by %c2_i32_278 dim 0 : vector<8x64xf32>, i32 -> vector<8x64xf32>
    %cst_279 = arith.constant 0.000000e+00 : f32
    %970 = vector.shape_cast %968 : vector<8x1xi1> to vector<8x1xi1>
    %971 = vector.broadcast %970 : vector<8x1xi1> to vector<8x64xi1>
    %972 = vector.broadcast %cst_279 : f32 to vector<8x64xf32>
    %973 = arith.select %971, %969, %972 : vector<8x64xi1>, vector<8x64xf32>
    %974 = arith.addf %966, %973 : vector<8x64xf32>
    %c4_i32_280 = arith.constant 4 : i32
    %975 = vector.broadcast %c4_i32_280 : i32 to vector<8x1xi32>
    %976 = arith.cmpi sge, %21, %975 : vector<8x1xi32>
    %c4_i32_281 = arith.constant 4 : i32
    %977 = tpu.dynamic_rotate %974 by %c4_i32_281 dim 0 : vector<8x64xf32>, i32 -> vector<8x64xf32>
    %cst_282 = arith.constant 0.000000e+00 : f32
    %978 = vector.shape_cast %976 : vector<8x1xi1> to vector<8x1xi1>
    %979 = vector.broadcast %978 : vector<8x1xi1> to vector<8x64xi1>
    %980 = vector.broadcast %cst_282 : f32 to vector<8x64xf32>
    %981 = arith.select %979, %977, %980 : vector<8x64xi1>, vector<8x64xf32>
    %982 = arith.addf %974, %981 : vector<8x64xf32>
    %983 = arith.mulf %982, %952 : vector<8x64xf32>
    %984 = vector.broadcast %919 : vector<8x1xf32> to vector<8x64xf32>
    %985 = arith.mulf %983, %984 : vector<8x64xf32>
    %986 = arith.addf %897, %985 : vector<8x64xf32>
    %c10_i32 = arith.constant 10 : i32
    %987 = tpu.iota {dimensions = array<i32: 1>} : vector<1x16xi32>
    %988 = vector.broadcast %c10_i32 : i32 to vector<1x16xi32>
    %989 = arith.cmpi eq, %987, %988 : vector<1x16xi32>
    %990 = arith.extui %989 : vector<1x16xi1> to vector<1x16xi32>
    %991 = arith.sitofp %990 : vector<1x16xi32> to vector<1x16xf32>
    %992 = tpu.iota {dimensions = array<i32: 0>} : vector<16x1xi32>
    %993 = vector.broadcast %c10_i32 : i32 to vector<16x1xi32>
    %994 = arith.cmpi eq, %992, %993 : vector<16x1xi32>
    %995 = arith.extui %994 : vector<16x1xi1> to vector<16x1xi32>
    %996 = arith.sitofp %995 : vector<16x1xi32> to vector<16x1xf32>
    %997 = vector.broadcast %996 : vector<16x1xf32> to vector<16x64xf32>
    %998 = arith.mulf %95, %997 : vector<16x64xf32>
    %cst_283 = arith.constant dense<0.000000e+00> : vector<64xf32>
    %999 = vector.multi_reduction <add>, %998, %cst_283 [0] : vector<16x64xf32> to vector<64xf32>
    %1000 = vector.shape_cast %999 : vector<64xf32> to vector<1x64xf32>
    %1001 = vector.broadcast %991 : vector<1x16xf32> to vector<8x16xf32>
    %1002 = arith.mulf %92, %1001 : vector<8x16xf32>
    %cst_284 = arith.constant dense<0.000000e+00> : vector<8xf32>
    %1003 = vector.multi_reduction <add>, %1002, %cst_284 [1] : vector<8x16xf32> to vector<8xf32>
    %1004 = vector.shape_cast %1003 : vector<8xf32> to vector<8x1xf32>
    %1005 = vector.broadcast %991 : vector<1x16xf32> to vector<8x16xf32>
    %1006 = arith.mulf %93, %1005 : vector<8x16xf32>
    %cst_285 = arith.constant dense<0.000000e+00> : vector<8xf32>
    %1007 = vector.multi_reduction <add>, %1006, %cst_285 [1] : vector<8x16xf32> to vector<8xf32>
    %1008 = vector.shape_cast %1007 : vector<8xf32> to vector<8x1xf32>
    %1009 = vector.broadcast %1000 : vector<1x64xf32> to vector<8x64xf32>
    %1010 = arith.mulf %91, %1009 : vector<8x64xf32>
    %cst_286 = arith.constant -2.000000e+01 : f32
    %1011 = vector.broadcast %cst_286 : f32 to vector<8x64xf32>
    %1012 = arith.maximumf %1010, %1011 : vector<8x64xf32>
    %cst_287 = arith.constant 0.000000e+00 : f32
    %1013 = vector.shape_cast %23 : vector<8x1xi1> to vector<8x1xi1>
    %1014 = vector.broadcast %1013 : vector<8x1xi1> to vector<8x64xi1>
    %1015 = vector.broadcast %cst_287 : f32 to vector<8x64xf32>
    %1016 = arith.select %1014, %1015, %1012 : vector<8x64xi1>, vector<8x64xf32>
    %c1_i32_288 = arith.constant 1 : i32
    %1017 = vector.broadcast %c1_i32_288 : i32 to vector<8x1xi32>
    %1018 = arith.cmpi sge, %21, %1017 : vector<8x1xi32>
    %c1_i32_289 = arith.constant 1 : i32
    %1019 = tpu.dynamic_rotate %1016 by %c1_i32_289 dim 0 : vector<8x64xf32>, i32 -> vector<8x64xf32>
    %cst_290 = arith.constant 0.000000e+00 : f32
    %1020 = vector.shape_cast %1018 : vector<8x1xi1> to vector<8x1xi1>
    %1021 = vector.broadcast %1020 : vector<8x1xi1> to vector<8x64xi1>
    %1022 = vector.broadcast %cst_290 : f32 to vector<8x64xf32>
    %1023 = arith.select %1021, %1019, %1022 : vector<8x64xi1>, vector<8x64xf32>
    %1024 = arith.addf %1016, %1023 : vector<8x64xf32>
    %c2_i32_291 = arith.constant 2 : i32
    %1025 = vector.broadcast %c2_i32_291 : i32 to vector<8x1xi32>
    %1026 = arith.cmpi sge, %21, %1025 : vector<8x1xi32>
    %c2_i32_292 = arith.constant 2 : i32
    %1027 = tpu.dynamic_rotate %1024 by %c2_i32_292 dim 0 : vector<8x64xf32>, i32 -> vector<8x64xf32>
    %cst_293 = arith.constant 0.000000e+00 : f32
    %1028 = vector.shape_cast %1026 : vector<8x1xi1> to vector<8x1xi1>
    %1029 = vector.broadcast %1028 : vector<8x1xi1> to vector<8x64xi1>
    %1030 = vector.broadcast %cst_293 : f32 to vector<8x64xf32>
    %1031 = arith.select %1029, %1027, %1030 : vector<8x64xi1>, vector<8x64xf32>
    %1032 = arith.addf %1024, %1031 : vector<8x64xf32>
    %c4_i32_294 = arith.constant 4 : i32
    %1033 = vector.broadcast %c4_i32_294 : i32 to vector<8x1xi32>
    %1034 = arith.cmpi sge, %21, %1033 : vector<8x1xi32>
    %c4_i32_295 = arith.constant 4 : i32
    %1035 = tpu.dynamic_rotate %1032 by %c4_i32_295 dim 0 : vector<8x64xf32>, i32 -> vector<8x64xf32>
    %cst_296 = arith.constant 0.000000e+00 : f32
    %1036 = vector.shape_cast %1034 : vector<8x1xi1> to vector<8x1xi1>
    %1037 = vector.broadcast %1036 : vector<8x1xi1> to vector<8x64xi1>
    %1038 = vector.broadcast %cst_296 : f32 to vector<8x64xf32>
    %1039 = arith.select %1037, %1035, %1038 : vector<8x64xi1>, vector<8x64xf32>
    %1040 = arith.addf %1032, %1039 : vector<8x64xf32>
    %1041 = math.exp %1040 : vector<8x64xf32>
    %1042 = vector.broadcast %1004 : vector<8x1xf32> to vector<8x64xf32>
    %1043 = arith.mulf %94, %1042 : vector<8x64xf32>
    %cst_297 = arith.constant 9.99999996E-13 : f32
    %1044 = vector.broadcast %cst_297 : f32 to vector<8x64xf32>
    %1045 = arith.addf %1041, %1044 : vector<8x64xf32>
    %1046 = tpu.reciprocal %1045 : vector<8x64xf32> -> vector<8x64xf32>
    %1047 = arith.mulf %1043, %1046 : vector<8x64xf32>
    %c1_i32_298 = arith.constant 1 : i32
    %1048 = vector.broadcast %c1_i32_298 : i32 to vector<8x1xi32>
    %1049 = arith.cmpi sge, %21, %1048 : vector<8x1xi32>
    %c1_i32_299 = arith.constant 1 : i32
    %1050 = tpu.dynamic_rotate %1047 by %c1_i32_299 dim 0 : vector<8x64xf32>, i32 -> vector<8x64xf32>
    %cst_300 = arith.constant 0.000000e+00 : f32
    %1051 = vector.shape_cast %1049 : vector<8x1xi1> to vector<8x1xi1>
    %1052 = vector.broadcast %1051 : vector<8x1xi1> to vector<8x64xi1>
    %1053 = vector.broadcast %cst_300 : f32 to vector<8x64xf32>
    %1054 = arith.select %1052, %1050, %1053 : vector<8x64xi1>, vector<8x64xf32>
    %1055 = arith.addf %1047, %1054 : vector<8x64xf32>
    %c2_i32_301 = arith.constant 2 : i32
    %1056 = vector.broadcast %c2_i32_301 : i32 to vector<8x1xi32>
    %1057 = arith.cmpi sge, %21, %1056 : vector<8x1xi32>
    %c2_i32_302 = arith.constant 2 : i32
    %1058 = tpu.dynamic_rotate %1055 by %c2_i32_302 dim 0 : vector<8x64xf32>, i32 -> vector<8x64xf32>
    %cst_303 = arith.constant 0.000000e+00 : f32
    %1059 = vector.shape_cast %1057 : vector<8x1xi1> to vector<8x1xi1>
    %1060 = vector.broadcast %1059 : vector<8x1xi1> to vector<8x64xi1>
    %1061 = vector.broadcast %cst_303 : f32 to vector<8x64xf32>
    %1062 = arith.select %1060, %1058, %1061 : vector<8x64xi1>, vector<8x64xf32>
    %1063 = arith.addf %1055, %1062 : vector<8x64xf32>
    %c4_i32_304 = arith.constant 4 : i32
    %1064 = vector.broadcast %c4_i32_304 : i32 to vector<8x1xi32>
    %1065 = arith.cmpi sge, %21, %1064 : vector<8x1xi32>
    %c4_i32_305 = arith.constant 4 : i32
    %1066 = tpu.dynamic_rotate %1063 by %c4_i32_305 dim 0 : vector<8x64xf32>, i32 -> vector<8x64xf32>
    %cst_306 = arith.constant 0.000000e+00 : f32
    %1067 = vector.shape_cast %1065 : vector<8x1xi1> to vector<8x1xi1>
    %1068 = vector.broadcast %1067 : vector<8x1xi1> to vector<8x64xi1>
    %1069 = vector.broadcast %cst_306 : f32 to vector<8x64xf32>
    %1070 = arith.select %1068, %1066, %1069 : vector<8x64xi1>, vector<8x64xf32>
    %1071 = arith.addf %1063, %1070 : vector<8x64xf32>
    %1072 = arith.mulf %1071, %1041 : vector<8x64xf32>
    %1073 = vector.broadcast %1008 : vector<8x1xf32> to vector<8x64xf32>
    %1074 = arith.mulf %1072, %1073 : vector<8x64xf32>
    %1075 = arith.addf %986, %1074 : vector<8x64xf32>
    %c11_i32 = arith.constant 11 : i32
    %1076 = tpu.iota {dimensions = array<i32: 1>} : vector<1x16xi32>
    %1077 = vector.broadcast %c11_i32 : i32 to vector<1x16xi32>
    %1078 = arith.cmpi eq, %1076, %1077 : vector<1x16xi32>
    %1079 = arith.extui %1078 : vector<1x16xi1> to vector<1x16xi32>
    %1080 = arith.sitofp %1079 : vector<1x16xi32> to vector<1x16xf32>
    %1081 = tpu.iota {dimensions = array<i32: 0>} : vector<16x1xi32>
    %1082 = vector.broadcast %c11_i32 : i32 to vector<16x1xi32>
    %1083 = arith.cmpi eq, %1081, %1082 : vector<16x1xi32>
    %1084 = arith.extui %1083 : vector<16x1xi1> to vector<16x1xi32>
    %1085 = arith.sitofp %1084 : vector<16x1xi32> to vector<16x1xf32>
    %1086 = vector.broadcast %1085 : vector<16x1xf32> to vector<16x64xf32>
    %1087 = arith.mulf %95, %1086 : vector<16x64xf32>
    %cst_307 = arith.constant dense<0.000000e+00> : vector<64xf32>
    %1088 = vector.multi_reduction <add>, %1087, %cst_307 [0] : vector<16x64xf32> to vector<64xf32>
    %1089 = vector.shape_cast %1088 : vector<64xf32> to vector<1x64xf32>
    %1090 = vector.broadcast %1080 : vector<1x16xf32> to vector<8x16xf32>
    %1091 = arith.mulf %92, %1090 : vector<8x16xf32>
    %cst_308 = arith.constant dense<0.000000e+00> : vector<8xf32>
    %1092 = vector.multi_reduction <add>, %1091, %cst_308 [1] : vector<8x16xf32> to vector<8xf32>
    %1093 = vector.shape_cast %1092 : vector<8xf32> to vector<8x1xf32>
    %1094 = vector.broadcast %1080 : vector<1x16xf32> to vector<8x16xf32>
    %1095 = arith.mulf %93, %1094 : vector<8x16xf32>
    %cst_309 = arith.constant dense<0.000000e+00> : vector<8xf32>
    %1096 = vector.multi_reduction <add>, %1095, %cst_309 [1] : vector<8x16xf32> to vector<8xf32>
    %1097 = vector.shape_cast %1096 : vector<8xf32> to vector<8x1xf32>
    %1098 = vector.broadcast %1089 : vector<1x64xf32> to vector<8x64xf32>
    %1099 = arith.mulf %91, %1098 : vector<8x64xf32>
    %cst_310 = arith.constant -2.000000e+01 : f32
    %1100 = vector.broadcast %cst_310 : f32 to vector<8x64xf32>
    %1101 = arith.maximumf %1099, %1100 : vector<8x64xf32>
    %cst_311 = arith.constant 0.000000e+00 : f32
    %1102 = vector.shape_cast %23 : vector<8x1xi1> to vector<8x1xi1>
    %1103 = vector.broadcast %1102 : vector<8x1xi1> to vector<8x64xi1>
    %1104 = vector.broadcast %cst_311 : f32 to vector<8x64xf32>
    %1105 = arith.select %1103, %1104, %1101 : vector<8x64xi1>, vector<8x64xf32>
    %c1_i32_312 = arith.constant 1 : i32
    %1106 = vector.broadcast %c1_i32_312 : i32 to vector<8x1xi32>
    %1107 = arith.cmpi sge, %21, %1106 : vector<8x1xi32>
    %c1_i32_313 = arith.constant 1 : i32
    %1108 = tpu.dynamic_rotate %1105 by %c1_i32_313 dim 0 : vector<8x64xf32>, i32 -> vector<8x64xf32>
    %cst_314 = arith.constant 0.000000e+00 : f32
    %1109 = vector.shape_cast %1107 : vector<8x1xi1> to vector<8x1xi1>
    %1110 = vector.broadcast %1109 : vector<8x1xi1> to vector<8x64xi1>
    %1111 = vector.broadcast %cst_314 : f32 to vector<8x64xf32>
    %1112 = arith.select %1110, %1108, %1111 : vector<8x64xi1>, vector<8x64xf32>
    %1113 = arith.addf %1105, %1112 : vector<8x64xf32>
    %c2_i32_315 = arith.constant 2 : i32
    %1114 = vector.broadcast %c2_i32_315 : i32 to vector<8x1xi32>
    %1115 = arith.cmpi sge, %21, %1114 : vector<8x1xi32>
    %c2_i32_316 = arith.constant 2 : i32
    %1116 = tpu.dynamic_rotate %1113 by %c2_i32_316 dim 0 : vector<8x64xf32>, i32 -> vector<8x64xf32>
    %cst_317 = arith.constant 0.000000e+00 : f32
    %1117 = vector.shape_cast %1115 : vector<8x1xi1> to vector<8x1xi1>
    %1118 = vector.broadcast %1117 : vector<8x1xi1> to vector<8x64xi1>
    %1119 = vector.broadcast %cst_317 : f32 to vector<8x64xf32>
    %1120 = arith.select %1118, %1116, %1119 : vector<8x64xi1>, vector<8x64xf32>
    %1121 = arith.addf %1113, %1120 : vector<8x64xf32>
    %c4_i32_318 = arith.constant 4 : i32
    %1122 = vector.broadcast %c4_i32_318 : i32 to vector<8x1xi32>
    %1123 = arith.cmpi sge, %21, %1122 : vector<8x1xi32>
    %c4_i32_319 = arith.constant 4 : i32
    %1124 = tpu.dynamic_rotate %1121 by %c4_i32_319 dim 0 : vector<8x64xf32>, i32 -> vector<8x64xf32>
    %cst_320 = arith.constant 0.000000e+00 : f32
    %1125 = vector.shape_cast %1123 : vector<8x1xi1> to vector<8x1xi1>
    %1126 = vector.broadcast %1125 : vector<8x1xi1> to vector<8x64xi1>
    %1127 = vector.broadcast %cst_320 : f32 to vector<8x64xf32>
    %1128 = arith.select %1126, %1124, %1127 : vector<8x64xi1>, vector<8x64xf32>
    %1129 = arith.addf %1121, %1128 : vector<8x64xf32>
    %1130 = math.exp %1129 : vector<8x64xf32>
    %1131 = vector.broadcast %1093 : vector<8x1xf32> to vector<8x64xf32>
    %1132 = arith.mulf %94, %1131 : vector<8x64xf32>
    %cst_321 = arith.constant 9.99999996E-13 : f32
    %1133 = vector.broadcast %cst_321 : f32 to vector<8x64xf32>
    %1134 = arith.addf %1130, %1133 : vector<8x64xf32>
    %1135 = tpu.reciprocal %1134 : vector<8x64xf32> -> vector<8x64xf32>
    %1136 = arith.mulf %1132, %1135 : vector<8x64xf32>
    %c1_i32_322 = arith.constant 1 : i32
    %1137 = vector.broadcast %c1_i32_322 : i32 to vector<8x1xi32>
    %1138 = arith.cmpi sge, %21, %1137 : vector<8x1xi32>
    %c1_i32_323 = arith.constant 1 : i32
    %1139 = tpu.dynamic_rotate %1136 by %c1_i32_323 dim 0 : vector<8x64xf32>, i32 -> vector<8x64xf32>
    %cst_324 = arith.constant 0.000000e+00 : f32
    %1140 = vector.shape_cast %1138 : vector<8x1xi1> to vector<8x1xi1>
    %1141 = vector.broadcast %1140 : vector<8x1xi1> to vector<8x64xi1>
    %1142 = vector.broadcast %cst_324 : f32 to vector<8x64xf32>
    %1143 = arith.select %1141, %1139, %1142 : vector<8x64xi1>, vector<8x64xf32>
    %1144 = arith.addf %1136, %1143 : vector<8x64xf32>
    %c2_i32_325 = arith.constant 2 : i32
    %1145 = vector.broadcast %c2_i32_325 : i32 to vector<8x1xi32>
    %1146 = arith.cmpi sge, %21, %1145 : vector<8x1xi32>
    %c2_i32_326 = arith.constant 2 : i32
    %1147 = tpu.dynamic_rotate %1144 by %c2_i32_326 dim 0 : vector<8x64xf32>, i32 -> vector<8x64xf32>
    %cst_327 = arith.constant 0.000000e+00 : f32
    %1148 = vector.shape_cast %1146 : vector<8x1xi1> to vector<8x1xi1>
    %1149 = vector.broadcast %1148 : vector<8x1xi1> to vector<8x64xi1>
    %1150 = vector.broadcast %cst_327 : f32 to vector<8x64xf32>
    %1151 = arith.select %1149, %1147, %1150 : vector<8x64xi1>, vector<8x64xf32>
    %1152 = arith.addf %1144, %1151 : vector<8x64xf32>
    %c4_i32_328 = arith.constant 4 : i32
    %1153 = vector.broadcast %c4_i32_328 : i32 to vector<8x1xi32>
    %1154 = arith.cmpi sge, %21, %1153 : vector<8x1xi32>
    %c4_i32_329 = arith.constant 4 : i32
    %1155 = tpu.dynamic_rotate %1152 by %c4_i32_329 dim 0 : vector<8x64xf32>, i32 -> vector<8x64xf32>
    %cst_330 = arith.constant 0.000000e+00 : f32
    %1156 = vector.shape_cast %1154 : vector<8x1xi1> to vector<8x1xi1>
    %1157 = vector.broadcast %1156 : vector<8x1xi1> to vector<8x64xi1>
    %1158 = vector.broadcast %cst_330 : f32 to vector<8x64xf32>
    %1159 = arith.select %1157, %1155, %1158 : vector<8x64xi1>, vector<8x64xf32>
    %1160 = arith.addf %1152, %1159 : vector<8x64xf32>
    %1161 = arith.mulf %1160, %1130 : vector<8x64xf32>
    %1162 = vector.broadcast %1097 : vector<8x1xf32> to vector<8x64xf32>
    %1163 = arith.mulf %1161, %1162 : vector<8x64xf32>
    %1164 = arith.addf %1075, %1163 : vector<8x64xf32>
    %c12_i32 = arith.constant 12 : i32
    %1165 = tpu.iota {dimensions = array<i32: 1>} : vector<1x16xi32>
    %1166 = vector.broadcast %c12_i32 : i32 to vector<1x16xi32>
    %1167 = arith.cmpi eq, %1165, %1166 : vector<1x16xi32>
    %1168 = arith.extui %1167 : vector<1x16xi1> to vector<1x16xi32>
    %1169 = arith.sitofp %1168 : vector<1x16xi32> to vector<1x16xf32>
    %1170 = tpu.iota {dimensions = array<i32: 0>} : vector<16x1xi32>
    %1171 = vector.broadcast %c12_i32 : i32 to vector<16x1xi32>
    %1172 = arith.cmpi eq, %1170, %1171 : vector<16x1xi32>
    %1173 = arith.extui %1172 : vector<16x1xi1> to vector<16x1xi32>
    %1174 = arith.sitofp %1173 : vector<16x1xi32> to vector<16x1xf32>
    %1175 = vector.broadcast %1174 : vector<16x1xf32> to vector<16x64xf32>
    %1176 = arith.mulf %95, %1175 : vector<16x64xf32>
    %cst_331 = arith.constant dense<0.000000e+00> : vector<64xf32>
    %1177 = vector.multi_reduction <add>, %1176, %cst_331 [0] : vector<16x64xf32> to vector<64xf32>
    %1178 = vector.shape_cast %1177 : vector<64xf32> to vector<1x64xf32>
    %1179 = vector.broadcast %1169 : vector<1x16xf32> to vector<8x16xf32>
    %1180 = arith.mulf %92, %1179 : vector<8x16xf32>
    %cst_332 = arith.constant dense<0.000000e+00> : vector<8xf32>
    %1181 = vector.multi_reduction <add>, %1180, %cst_332 [1] : vector<8x16xf32> to vector<8xf32>
    %1182 = vector.shape_cast %1181 : vector<8xf32> to vector<8x1xf32>
    %1183 = vector.broadcast %1169 : vector<1x16xf32> to vector<8x16xf32>
    %1184 = arith.mulf %93, %1183 : vector<8x16xf32>
    %cst_333 = arith.constant dense<0.000000e+00> : vector<8xf32>
    %1185 = vector.multi_reduction <add>, %1184, %cst_333 [1] : vector<8x16xf32> to vector<8xf32>
    %1186 = vector.shape_cast %1185 : vector<8xf32> to vector<8x1xf32>
    %1187 = vector.broadcast %1178 : vector<1x64xf32> to vector<8x64xf32>
    %1188 = arith.mulf %91, %1187 : vector<8x64xf32>
    %cst_334 = arith.constant -2.000000e+01 : f32
    %1189 = vector.broadcast %cst_334 : f32 to vector<8x64xf32>
    %1190 = arith.maximumf %1188, %1189 : vector<8x64xf32>
    %cst_335 = arith.constant 0.000000e+00 : f32
    %1191 = vector.shape_cast %23 : vector<8x1xi1> to vector<8x1xi1>
    %1192 = vector.broadcast %1191 : vector<8x1xi1> to vector<8x64xi1>
    %1193 = vector.broadcast %cst_335 : f32 to vector<8x64xf32>
    %1194 = arith.select %1192, %1193, %1190 : vector<8x64xi1>, vector<8x64xf32>
    %c1_i32_336 = arith.constant 1 : i32
    %1195 = vector.broadcast %c1_i32_336 : i32 to vector<8x1xi32>
    %1196 = arith.cmpi sge, %21, %1195 : vector<8x1xi32>
    %c1_i32_337 = arith.constant 1 : i32
    %1197 = tpu.dynamic_rotate %1194 by %c1_i32_337 dim 0 : vector<8x64xf32>, i32 -> vector<8x64xf32>
    %cst_338 = arith.constant 0.000000e+00 : f32
    %1198 = vector.shape_cast %1196 : vector<8x1xi1> to vector<8x1xi1>
    %1199 = vector.broadcast %1198 : vector<8x1xi1> to vector<8x64xi1>
    %1200 = vector.broadcast %cst_338 : f32 to vector<8x64xf32>
    %1201 = arith.select %1199, %1197, %1200 : vector<8x64xi1>, vector<8x64xf32>
    %1202 = arith.addf %1194, %1201 : vector<8x64xf32>
    %c2_i32_339 = arith.constant 2 : i32
    %1203 = vector.broadcast %c2_i32_339 : i32 to vector<8x1xi32>
    %1204 = arith.cmpi sge, %21, %1203 : vector<8x1xi32>
    %c2_i32_340 = arith.constant 2 : i32
    %1205 = tpu.dynamic_rotate %1202 by %c2_i32_340 dim 0 : vector<8x64xf32>, i32 -> vector<8x64xf32>
    %cst_341 = arith.constant 0.000000e+00 : f32
    %1206 = vector.shape_cast %1204 : vector<8x1xi1> to vector<8x1xi1>
    %1207 = vector.broadcast %1206 : vector<8x1xi1> to vector<8x64xi1>
    %1208 = vector.broadcast %cst_341 : f32 to vector<8x64xf32>
    %1209 = arith.select %1207, %1205, %1208 : vector<8x64xi1>, vector<8x64xf32>
    %1210 = arith.addf %1202, %1209 : vector<8x64xf32>
    %c4_i32_342 = arith.constant 4 : i32
    %1211 = vector.broadcast %c4_i32_342 : i32 to vector<8x1xi32>
    %1212 = arith.cmpi sge, %21, %1211 : vector<8x1xi32>
    %c4_i32_343 = arith.constant 4 : i32
    %1213 = tpu.dynamic_rotate %1210 by %c4_i32_343 dim 0 : vector<8x64xf32>, i32 -> vector<8x64xf32>
    %cst_344 = arith.constant 0.000000e+00 : f32
    %1214 = vector.shape_cast %1212 : vector<8x1xi1> to vector<8x1xi1>
    %1215 = vector.broadcast %1214 : vector<8x1xi1> to vector<8x64xi1>
    %1216 = vector.broadcast %cst_344 : f32 to vector<8x64xf32>
    %1217 = arith.select %1215, %1213, %1216 : vector<8x64xi1>, vector<8x64xf32>
    %1218 = arith.addf %1210, %1217 : vector<8x64xf32>
    %1219 = math.exp %1218 : vector<8x64xf32>
    %1220 = vector.broadcast %1182 : vector<8x1xf32> to vector<8x64xf32>
    %1221 = arith.mulf %94, %1220 : vector<8x64xf32>
    %cst_345 = arith.constant 9.99999996E-13 : f32
    %1222 = vector.broadcast %cst_345 : f32 to vector<8x64xf32>
    %1223 = arith.addf %1219, %1222 : vector<8x64xf32>
    %1224 = tpu.reciprocal %1223 : vector<8x64xf32> -> vector<8x64xf32>
    %1225 = arith.mulf %1221, %1224 : vector<8x64xf32>
    %c1_i32_346 = arith.constant 1 : i32
    %1226 = vector.broadcast %c1_i32_346 : i32 to vector<8x1xi32>
    %1227 = arith.cmpi sge, %21, %1226 : vector<8x1xi32>
    %c1_i32_347 = arith.constant 1 : i32
    %1228 = tpu.dynamic_rotate %1225 by %c1_i32_347 dim 0 : vector<8x64xf32>, i32 -> vector<8x64xf32>
    %cst_348 = arith.constant 0.000000e+00 : f32
    %1229 = vector.shape_cast %1227 : vector<8x1xi1> to vector<8x1xi1>
    %1230 = vector.broadcast %1229 : vector<8x1xi1> to vector<8x64xi1>
    %1231 = vector.broadcast %cst_348 : f32 to vector<8x64xf32>
    %1232 = arith.select %1230, %1228, %1231 : vector<8x64xi1>, vector<8x64xf32>
    %1233 = arith.addf %1225, %1232 : vector<8x64xf32>
    %c2_i32_349 = arith.constant 2 : i32
    %1234 = vector.broadcast %c2_i32_349 : i32 to vector<8x1xi32>
    %1235 = arith.cmpi sge, %21, %1234 : vector<8x1xi32>
    %c2_i32_350 = arith.constant 2 : i32
    %1236 = tpu.dynamic_rotate %1233 by %c2_i32_350 dim 0 : vector<8x64xf32>, i32 -> vector<8x64xf32>
    %cst_351 = arith.constant 0.000000e+00 : f32
    %1237 = vector.shape_cast %1235 : vector<8x1xi1> to vector<8x1xi1>
    %1238 = vector.broadcast %1237 : vector<8x1xi1> to vector<8x64xi1>
    %1239 = vector.broadcast %cst_351 : f32 to vector<8x64xf32>
    %1240 = arith.select %1238, %1236, %1239 : vector<8x64xi1>, vector<8x64xf32>
    %1241 = arith.addf %1233, %1240 : vector<8x64xf32>
    %c4_i32_352 = arith.constant 4 : i32
    %1242 = vector.broadcast %c4_i32_352 : i32 to vector<8x1xi32>
    %1243 = arith.cmpi sge, %21, %1242 : vector<8x1xi32>
    %c4_i32_353 = arith.constant 4 : i32
    %1244 = tpu.dynamic_rotate %1241 by %c4_i32_353 dim 0 : vector<8x64xf32>, i32 -> vector<8x64xf32>
    %cst_354 = arith.constant 0.000000e+00 : f32
    %1245 = vector.shape_cast %1243 : vector<8x1xi1> to vector<8x1xi1>
    %1246 = vector.broadcast %1245 : vector<8x1xi1> to vector<8x64xi1>
    %1247 = vector.broadcast %cst_354 : f32 to vector<8x64xf32>
    %1248 = arith.select %1246, %1244, %1247 : vector<8x64xi1>, vector<8x64xf32>
    %1249 = arith.addf %1241, %1248 : vector<8x64xf32>
    %1250 = arith.mulf %1249, %1219 : vector<8x64xf32>
    %1251 = vector.broadcast %1186 : vector<8x1xf32> to vector<8x64xf32>
    %1252 = arith.mulf %1250, %1251 : vector<8x64xf32>
    %1253 = arith.addf %1164, %1252 : vector<8x64xf32>
    %c13_i32 = arith.constant 13 : i32
    %1254 = tpu.iota {dimensions = array<i32: 1>} : vector<1x16xi32>
    %1255 = vector.broadcast %c13_i32 : i32 to vector<1x16xi32>
    %1256 = arith.cmpi eq, %1254, %1255 : vector<1x16xi32>
    %1257 = arith.extui %1256 : vector<1x16xi1> to vector<1x16xi32>
    %1258 = arith.sitofp %1257 : vector<1x16xi32> to vector<1x16xf32>
    %1259 = tpu.iota {dimensions = array<i32: 0>} : vector<16x1xi32>
    %1260 = vector.broadcast %c13_i32 : i32 to vector<16x1xi32>
    %1261 = arith.cmpi eq, %1259, %1260 : vector<16x1xi32>
    %1262 = arith.extui %1261 : vector<16x1xi1> to vector<16x1xi32>
    %1263 = arith.sitofp %1262 : vector<16x1xi32> to vector<16x1xf32>
    %1264 = vector.broadcast %1263 : vector<16x1xf32> to vector<16x64xf32>
    %1265 = arith.mulf %95, %1264 : vector<16x64xf32>
    %cst_355 = arith.constant dense<0.000000e+00> : vector<64xf32>
    %1266 = vector.multi_reduction <add>, %1265, %cst_355 [0] : vector<16x64xf32> to vector<64xf32>
    %1267 = vector.shape_cast %1266 : vector<64xf32> to vector<1x64xf32>
    %1268 = vector.broadcast %1258 : vector<1x16xf32> to vector<8x16xf32>
    %1269 = arith.mulf %92, %1268 : vector<8x16xf32>
    %cst_356 = arith.constant dense<0.000000e+00> : vector<8xf32>
    %1270 = vector.multi_reduction <add>, %1269, %cst_356 [1] : vector<8x16xf32> to vector<8xf32>
    %1271 = vector.shape_cast %1270 : vector<8xf32> to vector<8x1xf32>
    %1272 = vector.broadcast %1258 : vector<1x16xf32> to vector<8x16xf32>
    %1273 = arith.mulf %93, %1272 : vector<8x16xf32>
    %cst_357 = arith.constant dense<0.000000e+00> : vector<8xf32>
    %1274 = vector.multi_reduction <add>, %1273, %cst_357 [1] : vector<8x16xf32> to vector<8xf32>
    %1275 = vector.shape_cast %1274 : vector<8xf32> to vector<8x1xf32>
    %1276 = vector.broadcast %1267 : vector<1x64xf32> to vector<8x64xf32>
    %1277 = arith.mulf %91, %1276 : vector<8x64xf32>
    %cst_358 = arith.constant -2.000000e+01 : f32
    %1278 = vector.broadcast %cst_358 : f32 to vector<8x64xf32>
    %1279 = arith.maximumf %1277, %1278 : vector<8x64xf32>
    %cst_359 = arith.constant 0.000000e+00 : f32
    %1280 = vector.shape_cast %23 : vector<8x1xi1> to vector<8x1xi1>
    %1281 = vector.broadcast %1280 : vector<8x1xi1> to vector<8x64xi1>
    %1282 = vector.broadcast %cst_359 : f32 to vector<8x64xf32>
    %1283 = arith.select %1281, %1282, %1279 : vector<8x64xi1>, vector<8x64xf32>
    %c1_i32_360 = arith.constant 1 : i32
    %1284 = vector.broadcast %c1_i32_360 : i32 to vector<8x1xi32>
    %1285 = arith.cmpi sge, %21, %1284 : vector<8x1xi32>
    %c1_i32_361 = arith.constant 1 : i32
    %1286 = tpu.dynamic_rotate %1283 by %c1_i32_361 dim 0 : vector<8x64xf32>, i32 -> vector<8x64xf32>
    %cst_362 = arith.constant 0.000000e+00 : f32
    %1287 = vector.shape_cast %1285 : vector<8x1xi1> to vector<8x1xi1>
    %1288 = vector.broadcast %1287 : vector<8x1xi1> to vector<8x64xi1>
    %1289 = vector.broadcast %cst_362 : f32 to vector<8x64xf32>
    %1290 = arith.select %1288, %1286, %1289 : vector<8x64xi1>, vector<8x64xf32>
    %1291 = arith.addf %1283, %1290 : vector<8x64xf32>
    %c2_i32_363 = arith.constant 2 : i32
    %1292 = vector.broadcast %c2_i32_363 : i32 to vector<8x1xi32>
    %1293 = arith.cmpi sge, %21, %1292 : vector<8x1xi32>
    %c2_i32_364 = arith.constant 2 : i32
    %1294 = tpu.dynamic_rotate %1291 by %c2_i32_364 dim 0 : vector<8x64xf32>, i32 -> vector<8x64xf32>
    %cst_365 = arith.constant 0.000000e+00 : f32
    %1295 = vector.shape_cast %1293 : vector<8x1xi1> to vector<8x1xi1>
    %1296 = vector.broadcast %1295 : vector<8x1xi1> to vector<8x64xi1>
    %1297 = vector.broadcast %cst_365 : f32 to vector<8x64xf32>
    %1298 = arith.select %1296, %1294, %1297 : vector<8x64xi1>, vector<8x64xf32>
    %1299 = arith.addf %1291, %1298 : vector<8x64xf32>
    %c4_i32_366 = arith.constant 4 : i32
    %1300 = vector.broadcast %c4_i32_366 : i32 to vector<8x1xi32>
    %1301 = arith.cmpi sge, %21, %1300 : vector<8x1xi32>
    %c4_i32_367 = arith.constant 4 : i32
    %1302 = tpu.dynamic_rotate %1299 by %c4_i32_367 dim 0 : vector<8x64xf32>, i32 -> vector<8x64xf32>
    %cst_368 = arith.constant 0.000000e+00 : f32
    %1303 = vector.shape_cast %1301 : vector<8x1xi1> to vector<8x1xi1>
    %1304 = vector.broadcast %1303 : vector<8x1xi1> to vector<8x64xi1>
    %1305 = vector.broadcast %cst_368 : f32 to vector<8x64xf32>
    %1306 = arith.select %1304, %1302, %1305 : vector<8x64xi1>, vector<8x64xf32>
    %1307 = arith.addf %1299, %1306 : vector<8x64xf32>
    %1308 = math.exp %1307 : vector<8x64xf32>
    %1309 = vector.broadcast %1271 : vector<8x1xf32> to vector<8x64xf32>
    %1310 = arith.mulf %94, %1309 : vector<8x64xf32>
    %cst_369 = arith.constant 9.99999996E-13 : f32
    %1311 = vector.broadcast %cst_369 : f32 to vector<8x64xf32>
    %1312 = arith.addf %1308, %1311 : vector<8x64xf32>
    %1313 = tpu.reciprocal %1312 : vector<8x64xf32> -> vector<8x64xf32>
    %1314 = arith.mulf %1310, %1313 : vector<8x64xf32>
    %c1_i32_370 = arith.constant 1 : i32
    %1315 = vector.broadcast %c1_i32_370 : i32 to vector<8x1xi32>
    %1316 = arith.cmpi sge, %21, %1315 : vector<8x1xi32>
    %c1_i32_371 = arith.constant 1 : i32
    %1317 = tpu.dynamic_rotate %1314 by %c1_i32_371 dim 0 : vector<8x64xf32>, i32 -> vector<8x64xf32>
    %cst_372 = arith.constant 0.000000e+00 : f32
    %1318 = vector.shape_cast %1316 : vector<8x1xi1> to vector<8x1xi1>
    %1319 = vector.broadcast %1318 : vector<8x1xi1> to vector<8x64xi1>
    %1320 = vector.broadcast %cst_372 : f32 to vector<8x64xf32>
    %1321 = arith.select %1319, %1317, %1320 : vector<8x64xi1>, vector<8x64xf32>
    %1322 = arith.addf %1314, %1321 : vector<8x64xf32>
    %c2_i32_373 = arith.constant 2 : i32
    %1323 = vector.broadcast %c2_i32_373 : i32 to vector<8x1xi32>
    %1324 = arith.cmpi sge, %21, %1323 : vector<8x1xi32>
    %c2_i32_374 = arith.constant 2 : i32
    %1325 = tpu.dynamic_rotate %1322 by %c2_i32_374 dim 0 : vector<8x64xf32>, i32 -> vector<8x64xf32>
    %cst_375 = arith.constant 0.000000e+00 : f32
    %1326 = vector.shape_cast %1324 : vector<8x1xi1> to vector<8x1xi1>
    %1327 = vector.broadcast %1326 : vector<8x1xi1> to vector<8x64xi1>
    %1328 = vector.broadcast %cst_375 : f32 to vector<8x64xf32>
    %1329 = arith.select %1327, %1325, %1328 : vector<8x64xi1>, vector<8x64xf32>
    %1330 = arith.addf %1322, %1329 : vector<8x64xf32>
    %c4_i32_376 = arith.constant 4 : i32
    %1331 = vector.broadcast %c4_i32_376 : i32 to vector<8x1xi32>
    %1332 = arith.cmpi sge, %21, %1331 : vector<8x1xi32>
    %c4_i32_377 = arith.constant 4 : i32
    %1333 = tpu.dynamic_rotate %1330 by %c4_i32_377 dim 0 : vector<8x64xf32>, i32 -> vector<8x64xf32>
    %cst_378 = arith.constant 0.000000e+00 : f32
    %1334 = vector.shape_cast %1332 : vector<8x1xi1> to vector<8x1xi1>
    %1335 = vector.broadcast %1334 : vector<8x1xi1> to vector<8x64xi1>
    %1336 = vector.broadcast %cst_378 : f32 to vector<8x64xf32>
    %1337 = arith.select %1335, %1333, %1336 : vector<8x64xi1>, vector<8x64xf32>
    %1338 = arith.addf %1330, %1337 : vector<8x64xf32>
    %1339 = arith.mulf %1338, %1308 : vector<8x64xf32>
    %1340 = vector.broadcast %1275 : vector<8x1xf32> to vector<8x64xf32>
    %1341 = arith.mulf %1339, %1340 : vector<8x64xf32>
    %1342 = arith.addf %1253, %1341 : vector<8x64xf32>
    %c14_i32 = arith.constant 14 : i32
    %1343 = tpu.iota {dimensions = array<i32: 1>} : vector<1x16xi32>
    %1344 = vector.broadcast %c14_i32 : i32 to vector<1x16xi32>
    %1345 = arith.cmpi eq, %1343, %1344 : vector<1x16xi32>
    %1346 = arith.extui %1345 : vector<1x16xi1> to vector<1x16xi32>
    %1347 = arith.sitofp %1346 : vector<1x16xi32> to vector<1x16xf32>
    %1348 = tpu.iota {dimensions = array<i32: 0>} : vector<16x1xi32>
    %1349 = vector.broadcast %c14_i32 : i32 to vector<16x1xi32>
    %1350 = arith.cmpi eq, %1348, %1349 : vector<16x1xi32>
    %1351 = arith.extui %1350 : vector<16x1xi1> to vector<16x1xi32>
    %1352 = arith.sitofp %1351 : vector<16x1xi32> to vector<16x1xf32>
    %1353 = vector.broadcast %1352 : vector<16x1xf32> to vector<16x64xf32>
    %1354 = arith.mulf %95, %1353 : vector<16x64xf32>
    %cst_379 = arith.constant dense<0.000000e+00> : vector<64xf32>
    %1355 = vector.multi_reduction <add>, %1354, %cst_379 [0] : vector<16x64xf32> to vector<64xf32>
    %1356 = vector.shape_cast %1355 : vector<64xf32> to vector<1x64xf32>
    %1357 = vector.broadcast %1347 : vector<1x16xf32> to vector<8x16xf32>
    %1358 = arith.mulf %92, %1357 : vector<8x16xf32>
    %cst_380 = arith.constant dense<0.000000e+00> : vector<8xf32>
    %1359 = vector.multi_reduction <add>, %1358, %cst_380 [1] : vector<8x16xf32> to vector<8xf32>
    %1360 = vector.shape_cast %1359 : vector<8xf32> to vector<8x1xf32>
    %1361 = vector.broadcast %1347 : vector<1x16xf32> to vector<8x16xf32>
    %1362 = arith.mulf %93, %1361 : vector<8x16xf32>
    %cst_381 = arith.constant dense<0.000000e+00> : vector<8xf32>
    %1363 = vector.multi_reduction <add>, %1362, %cst_381 [1] : vector<8x16xf32> to vector<8xf32>
    %1364 = vector.shape_cast %1363 : vector<8xf32> to vector<8x1xf32>
    %1365 = vector.broadcast %1356 : vector<1x64xf32> to vector<8x64xf32>
    %1366 = arith.mulf %91, %1365 : vector<8x64xf32>
    %cst_382 = arith.constant -2.000000e+01 : f32
    %1367 = vector.broadcast %cst_382 : f32 to vector<8x64xf32>
    %1368 = arith.maximumf %1366, %1367 : vector<8x64xf32>
    %cst_383 = arith.constant 0.000000e+00 : f32
    %1369 = vector.shape_cast %23 : vector<8x1xi1> to vector<8x1xi1>
    %1370 = vector.broadcast %1369 : vector<8x1xi1> to vector<8x64xi1>
    %1371 = vector.broadcast %cst_383 : f32 to vector<8x64xf32>
    %1372 = arith.select %1370, %1371, %1368 : vector<8x64xi1>, vector<8x64xf32>
    %c1_i32_384 = arith.constant 1 : i32
    %1373 = vector.broadcast %c1_i32_384 : i32 to vector<8x1xi32>
    %1374 = arith.cmpi sge, %21, %1373 : vector<8x1xi32>
    %c1_i32_385 = arith.constant 1 : i32
    %1375 = tpu.dynamic_rotate %1372 by %c1_i32_385 dim 0 : vector<8x64xf32>, i32 -> vector<8x64xf32>
    %cst_386 = arith.constant 0.000000e+00 : f32
    %1376 = vector.shape_cast %1374 : vector<8x1xi1> to vector<8x1xi1>
    %1377 = vector.broadcast %1376 : vector<8x1xi1> to vector<8x64xi1>
    %1378 = vector.broadcast %cst_386 : f32 to vector<8x64xf32>
    %1379 = arith.select %1377, %1375, %1378 : vector<8x64xi1>, vector<8x64xf32>
    %1380 = arith.addf %1372, %1379 : vector<8x64xf32>
    %c2_i32_387 = arith.constant 2 : i32
    %1381 = vector.broadcast %c2_i32_387 : i32 to vector<8x1xi32>
    %1382 = arith.cmpi sge, %21, %1381 : vector<8x1xi32>
    %c2_i32_388 = arith.constant 2 : i32
    %1383 = tpu.dynamic_rotate %1380 by %c2_i32_388 dim 0 : vector<8x64xf32>, i32 -> vector<8x64xf32>
    %cst_389 = arith.constant 0.000000e+00 : f32
    %1384 = vector.shape_cast %1382 : vector<8x1xi1> to vector<8x1xi1>
    %1385 = vector.broadcast %1384 : vector<8x1xi1> to vector<8x64xi1>
    %1386 = vector.broadcast %cst_389 : f32 to vector<8x64xf32>
    %1387 = arith.select %1385, %1383, %1386 : vector<8x64xi1>, vector<8x64xf32>
    %1388 = arith.addf %1380, %1387 : vector<8x64xf32>
    %c4_i32_390 = arith.constant 4 : i32
    %1389 = vector.broadcast %c4_i32_390 : i32 to vector<8x1xi32>
    %1390 = arith.cmpi sge, %21, %1389 : vector<8x1xi32>
    %c4_i32_391 = arith.constant 4 : i32
    %1391 = tpu.dynamic_rotate %1388 by %c4_i32_391 dim 0 : vector<8x64xf32>, i32 -> vector<8x64xf32>
    %cst_392 = arith.constant 0.000000e+00 : f32
    %1392 = vector.shape_cast %1390 : vector<8x1xi1> to vector<8x1xi1>
    %1393 = vector.broadcast %1392 : vector<8x1xi1> to vector<8x64xi1>
    %1394 = vector.broadcast %cst_392 : f32 to vector<8x64xf32>
    %1395 = arith.select %1393, %1391, %1394 : vector<8x64xi1>, vector<8x64xf32>
    %1396 = arith.addf %1388, %1395 : vector<8x64xf32>
    %1397 = math.exp %1396 : vector<8x64xf32>
    %1398 = vector.broadcast %1360 : vector<8x1xf32> to vector<8x64xf32>
    %1399 = arith.mulf %94, %1398 : vector<8x64xf32>
    %cst_393 = arith.constant 9.99999996E-13 : f32
    %1400 = vector.broadcast %cst_393 : f32 to vector<8x64xf32>
    %1401 = arith.addf %1397, %1400 : vector<8x64xf32>
    %1402 = tpu.reciprocal %1401 : vector<8x64xf32> -> vector<8x64xf32>
    %1403 = arith.mulf %1399, %1402 : vector<8x64xf32>
    %c1_i32_394 = arith.constant 1 : i32
    %1404 = vector.broadcast %c1_i32_394 : i32 to vector<8x1xi32>
    %1405 = arith.cmpi sge, %21, %1404 : vector<8x1xi32>
    %c1_i32_395 = arith.constant 1 : i32
    %1406 = tpu.dynamic_rotate %1403 by %c1_i32_395 dim 0 : vector<8x64xf32>, i32 -> vector<8x64xf32>
    %cst_396 = arith.constant 0.000000e+00 : f32
    %1407 = vector.shape_cast %1405 : vector<8x1xi1> to vector<8x1xi1>
    %1408 = vector.broadcast %1407 : vector<8x1xi1> to vector<8x64xi1>
    %1409 = vector.broadcast %cst_396 : f32 to vector<8x64xf32>
    %1410 = arith.select %1408, %1406, %1409 : vector<8x64xi1>, vector<8x64xf32>
    %1411 = arith.addf %1403, %1410 : vector<8x64xf32>
    %c2_i32_397 = arith.constant 2 : i32
    %1412 = vector.broadcast %c2_i32_397 : i32 to vector<8x1xi32>
    %1413 = arith.cmpi sge, %21, %1412 : vector<8x1xi32>
    %c2_i32_398 = arith.constant 2 : i32
    %1414 = tpu.dynamic_rotate %1411 by %c2_i32_398 dim 0 : vector<8x64xf32>, i32 -> vector<8x64xf32>
    %cst_399 = arith.constant 0.000000e+00 : f32
    %1415 = vector.shape_cast %1413 : vector<8x1xi1> to vector<8x1xi1>
    %1416 = vector.broadcast %1415 : vector<8x1xi1> to vector<8x64xi1>
    %1417 = vector.broadcast %cst_399 : f32 to vector<8x64xf32>
    %1418 = arith.select %1416, %1414, %1417 : vector<8x64xi1>, vector<8x64xf32>
    %1419 = arith.addf %1411, %1418 : vector<8x64xf32>
    %c4_i32_400 = arith.constant 4 : i32
    %1420 = vector.broadcast %c4_i32_400 : i32 to vector<8x1xi32>
    %1421 = arith.cmpi sge, %21, %1420 : vector<8x1xi32>
    %c4_i32_401 = arith.constant 4 : i32
    %1422 = tpu.dynamic_rotate %1419 by %c4_i32_401 dim 0 : vector<8x64xf32>, i32 -> vector<8x64xf32>
    %cst_402 = arith.constant 0.000000e+00 : f32
    %1423 = vector.shape_cast %1421 : vector<8x1xi1> to vector<8x1xi1>
    %1424 = vector.broadcast %1423 : vector<8x1xi1> to vector<8x64xi1>
    %1425 = vector.broadcast %cst_402 : f32 to vector<8x64xf32>
    %1426 = arith.select %1424, %1422, %1425 : vector<8x64xi1>, vector<8x64xf32>
    %1427 = arith.addf %1419, %1426 : vector<8x64xf32>
    %1428 = arith.mulf %1427, %1397 : vector<8x64xf32>
    %1429 = vector.broadcast %1364 : vector<8x1xf32> to vector<8x64xf32>
    %1430 = arith.mulf %1428, %1429 : vector<8x64xf32>
    %1431 = arith.addf %1342, %1430 : vector<8x64xf32>
    %c15_i32 = arith.constant 15 : i32
    %1432 = tpu.iota {dimensions = array<i32: 1>} : vector<1x16xi32>
    %1433 = vector.broadcast %c15_i32 : i32 to vector<1x16xi32>
    %1434 = arith.cmpi eq, %1432, %1433 : vector<1x16xi32>
    %1435 = arith.extui %1434 : vector<1x16xi1> to vector<1x16xi32>
    %1436 = arith.sitofp %1435 : vector<1x16xi32> to vector<1x16xf32>
    %1437 = tpu.iota {dimensions = array<i32: 0>} : vector<16x1xi32>
    %1438 = vector.broadcast %c15_i32 : i32 to vector<16x1xi32>
    %1439 = arith.cmpi eq, %1437, %1438 : vector<16x1xi32>
    %1440 = arith.extui %1439 : vector<16x1xi1> to vector<16x1xi32>
    %1441 = arith.sitofp %1440 : vector<16x1xi32> to vector<16x1xf32>
    %1442 = vector.broadcast %1441 : vector<16x1xf32> to vector<16x64xf32>
    %1443 = arith.mulf %95, %1442 : vector<16x64xf32>
    %cst_403 = arith.constant dense<0.000000e+00> : vector<64xf32>
    %1444 = vector.multi_reduction <add>, %1443, %cst_403 [0] : vector<16x64xf32> to vector<64xf32>
    %1445 = vector.shape_cast %1444 : vector<64xf32> to vector<1x64xf32>
    %1446 = vector.broadcast %1436 : vector<1x16xf32> to vector<8x16xf32>
    %1447 = arith.mulf %92, %1446 : vector<8x16xf32>
    %cst_404 = arith.constant dense<0.000000e+00> : vector<8xf32>
    %1448 = vector.multi_reduction <add>, %1447, %cst_404 [1] : vector<8x16xf32> to vector<8xf32>
    %1449 = vector.shape_cast %1448 : vector<8xf32> to vector<8x1xf32>
    %1450 = vector.broadcast %1436 : vector<1x16xf32> to vector<8x16xf32>
    %1451 = arith.mulf %93, %1450 : vector<8x16xf32>
    %cst_405 = arith.constant dense<0.000000e+00> : vector<8xf32>
    %1452 = vector.multi_reduction <add>, %1451, %cst_405 [1] : vector<8x16xf32> to vector<8xf32>
    %1453 = vector.shape_cast %1452 : vector<8xf32> to vector<8x1xf32>
    %1454 = vector.broadcast %1445 : vector<1x64xf32> to vector<8x64xf32>
    %1455 = arith.mulf %91, %1454 : vector<8x64xf32>
    %cst_406 = arith.constant -2.000000e+01 : f32
    %1456 = vector.broadcast %cst_406 : f32 to vector<8x64xf32>
    %1457 = arith.maximumf %1455, %1456 : vector<8x64xf32>
    %cst_407 = arith.constant 0.000000e+00 : f32
    %1458 = vector.shape_cast %23 : vector<8x1xi1> to vector<8x1xi1>
    %1459 = vector.broadcast %1458 : vector<8x1xi1> to vector<8x64xi1>
    %1460 = vector.broadcast %cst_407 : f32 to vector<8x64xf32>
    %1461 = arith.select %1459, %1460, %1457 : vector<8x64xi1>, vector<8x64xf32>
    %c1_i32_408 = arith.constant 1 : i32
    %1462 = vector.broadcast %c1_i32_408 : i32 to vector<8x1xi32>
    %1463 = arith.cmpi sge, %21, %1462 : vector<8x1xi32>
    %c1_i32_409 = arith.constant 1 : i32
    %1464 = tpu.dynamic_rotate %1461 by %c1_i32_409 dim 0 : vector<8x64xf32>, i32 -> vector<8x64xf32>
    %cst_410 = arith.constant 0.000000e+00 : f32
    %1465 = vector.shape_cast %1463 : vector<8x1xi1> to vector<8x1xi1>
    %1466 = vector.broadcast %1465 : vector<8x1xi1> to vector<8x64xi1>
    %1467 = vector.broadcast %cst_410 : f32 to vector<8x64xf32>
    %1468 = arith.select %1466, %1464, %1467 : vector<8x64xi1>, vector<8x64xf32>
    %1469 = arith.addf %1461, %1468 : vector<8x64xf32>
    %c2_i32_411 = arith.constant 2 : i32
    %1470 = vector.broadcast %c2_i32_411 : i32 to vector<8x1xi32>
    %1471 = arith.cmpi sge, %21, %1470 : vector<8x1xi32>
    %c2_i32_412 = arith.constant 2 : i32
    %1472 = tpu.dynamic_rotate %1469 by %c2_i32_412 dim 0 : vector<8x64xf32>, i32 -> vector<8x64xf32>
    %cst_413 = arith.constant 0.000000e+00 : f32
    %1473 = vector.shape_cast %1471 : vector<8x1xi1> to vector<8x1xi1>
    %1474 = vector.broadcast %1473 : vector<8x1xi1> to vector<8x64xi1>
    %1475 = vector.broadcast %cst_413 : f32 to vector<8x64xf32>
    %1476 = arith.select %1474, %1472, %1475 : vector<8x64xi1>, vector<8x64xf32>
    %1477 = arith.addf %1469, %1476 : vector<8x64xf32>
    %c4_i32_414 = arith.constant 4 : i32
    %1478 = vector.broadcast %c4_i32_414 : i32 to vector<8x1xi32>
    %1479 = arith.cmpi sge, %21, %1478 : vector<8x1xi32>
    %c4_i32_415 = arith.constant 4 : i32
    %1480 = tpu.dynamic_rotate %1477 by %c4_i32_415 dim 0 : vector<8x64xf32>, i32 -> vector<8x64xf32>
    %cst_416 = arith.constant 0.000000e+00 : f32
    %1481 = vector.shape_cast %1479 : vector<8x1xi1> to vector<8x1xi1>
    %1482 = vector.broadcast %1481 : vector<8x1xi1> to vector<8x64xi1>
    %1483 = vector.broadcast %cst_416 : f32 to vector<8x64xf32>
    %1484 = arith.select %1482, %1480, %1483 : vector<8x64xi1>, vector<8x64xf32>
    %1485 = arith.addf %1477, %1484 : vector<8x64xf32>
    %1486 = math.exp %1485 : vector<8x64xf32>
    %1487 = vector.broadcast %1449 : vector<8x1xf32> to vector<8x64xf32>
    %1488 = arith.mulf %94, %1487 : vector<8x64xf32>
    %cst_417 = arith.constant 9.99999996E-13 : f32
    %1489 = vector.broadcast %cst_417 : f32 to vector<8x64xf32>
    %1490 = arith.addf %1486, %1489 : vector<8x64xf32>
    %1491 = tpu.reciprocal %1490 : vector<8x64xf32> -> vector<8x64xf32>
    %1492 = arith.mulf %1488, %1491 : vector<8x64xf32>
    %c1_i32_418 = arith.constant 1 : i32
    %1493 = vector.broadcast %c1_i32_418 : i32 to vector<8x1xi32>
    %1494 = arith.cmpi sge, %21, %1493 : vector<8x1xi32>
    %c1_i32_419 = arith.constant 1 : i32
    %1495 = tpu.dynamic_rotate %1492 by %c1_i32_419 dim 0 : vector<8x64xf32>, i32 -> vector<8x64xf32>
    %cst_420 = arith.constant 0.000000e+00 : f32
    %1496 = vector.shape_cast %1494 : vector<8x1xi1> to vector<8x1xi1>
    %1497 = vector.broadcast %1496 : vector<8x1xi1> to vector<8x64xi1>
    %1498 = vector.broadcast %cst_420 : f32 to vector<8x64xf32>
    %1499 = arith.select %1497, %1495, %1498 : vector<8x64xi1>, vector<8x64xf32>
    %1500 = arith.addf %1492, %1499 : vector<8x64xf32>
    %c2_i32_421 = arith.constant 2 : i32
    %1501 = vector.broadcast %c2_i32_421 : i32 to vector<8x1xi32>
    %1502 = arith.cmpi sge, %21, %1501 : vector<8x1xi32>
    %c2_i32_422 = arith.constant 2 : i32
    %1503 = tpu.dynamic_rotate %1500 by %c2_i32_422 dim 0 : vector<8x64xf32>, i32 -> vector<8x64xf32>
    %cst_423 = arith.constant 0.000000e+00 : f32
    %1504 = vector.shape_cast %1502 : vector<8x1xi1> to vector<8x1xi1>
    %1505 = vector.broadcast %1504 : vector<8x1xi1> to vector<8x64xi1>
    %1506 = vector.broadcast %cst_423 : f32 to vector<8x64xf32>
    %1507 = arith.select %1505, %1503, %1506 : vector<8x64xi1>, vector<8x64xf32>
    %1508 = arith.addf %1500, %1507 : vector<8x64xf32>
    %c4_i32_424 = arith.constant 4 : i32
    %1509 = vector.broadcast %c4_i32_424 : i32 to vector<8x1xi32>
    %1510 = arith.cmpi sge, %21, %1509 : vector<8x1xi32>
    %c4_i32_425 = arith.constant 4 : i32
    %1511 = tpu.dynamic_rotate %1508 by %c4_i32_425 dim 0 : vector<8x64xf32>, i32 -> vector<8x64xf32>
    %cst_426 = arith.constant 0.000000e+00 : f32
    %1512 = vector.shape_cast %1510 : vector<8x1xi1> to vector<8x1xi1>
    %1513 = vector.broadcast %1512 : vector<8x1xi1> to vector<8x64xi1>
    %1514 = vector.broadcast %cst_426 : f32 to vector<8x64xf32>
    %1515 = arith.select %1513, %1511, %1514 : vector<8x64xi1>, vector<8x64xf32>
    %1516 = arith.addf %1508, %1515 : vector<8x64xf32>
    %1517 = arith.mulf %1516, %1486 : vector<8x64xf32>
    %1518 = vector.broadcast %1453 : vector<8x1xf32> to vector<8x64xf32>
    %1519 = arith.mulf %1517, %1518 : vector<8x64xf32>
    %1520 = arith.addf %1431, %1519 : vector<8x64xf32>
    %c16_i32 = arith.constant 16 : i32
    %c0_427 = arith.constant 0 : index
    %c0_428 = arith.constant 0 : index
    %1521 = vector.load %arg9[%c0_427, %c0_428] : memref<1x64xf32, #tpu.memory_space<vmem>>, vector<1x64xf32>
    %1522 = vector.broadcast %1521 : vector<1x64xf32> to vector<8x64xf32>
    %1523 = arith.mulf %71, %1522 : vector<8x64xf32>
    %1524 = arith.addf %1520, %1523 : vector<8x64xf32>
    %cst_429 = arith.constant 0.000000e+00 : f32
    %1525 = vector.broadcast %cst_429 : f32 to vector<8x64xf32>
    %1526 = arith.subf %1525, %4 : vector<8x64xf32>
    %1527 = math.exp %1526 : vector<8x64xf32>
    %cst_430 = arith.constant 1.000000e+00 : f32
    %1528 = vector.broadcast %cst_430 : f32 to vector<8x64xf32>
    %1529 = arith.addf %1528, %1527 : vector<8x64xf32>
    %cst_431 = arith.constant 1.000000e+00 : f32
    %1530 = vector.broadcast %cst_431 : f32 to vector<8x64xf32>
    %1531 = arith.divf %1530, %1529 : vector<8x64xf32>
    %1532 = arith.mulf %4, %1531 : vector<8x64xf32>
    %1533 = arith.mulf %1524, %1532 : vector<8x64xf32>
    %1534 = arith.truncf %1533 : vector<8x64xf32> to vector<8x64xbf16>
    %c0_432 = arith.constant 0 : index
    %c0_433 = arith.constant 0 : index
    %1535 = vector.load %arg10[%c0_432, %c0_433] : memref<64x32xbf16, #tpu.memory_space<vmem>>, vector<64x32xbf16>
    %cst_434 = arith.constant dense<0.000000e+00> : vector<8x32xf32>
    %1536 = tpu.matmul %1534, %1535, %cst_434 {dimension_numbers = #tpu.dot_dimension_numbers<[1], [0], [0], [1], [0, 0, 1, 1], [], []>} : vector<8x64xbf16>, vector<64x32xbf16>, vector<8x32xf32> -> vector<8x32xf32>
    %c0_435 = arith.constant 0 : index
    %c0_436 = arith.constant 0 : index
    %1537 = vector.load %arg11[%c0_435, %c0_436] : memref<8x32xf32, #tpu.memory_space<vmem>>, vector<8x32xf32>
    tpu.vector_store %arg11[%c0_435, %c0_436], %1536 {strides = array<i32>} : memref<8x32xf32, #tpu.memory_space<vmem>>, vector<8x32xf32>,
    return
  }
  func.func @transform_0(%arg0: i32) -> (i32, i32) {
    %c0_i32 = arith.constant 0 : i32
    %c0_i32_0 = arith.constant 0 : i32
    return %arg0, %c0_i32 : i32, i32
  }
  func.func @transform_1(%arg0: i32) -> (i32, i32) {
    %c0_i32 = arith.constant 0 : i32
    %c0_i32_0 = arith.constant 0 : i32
    %c0_i32_1 = arith.constant 0 : i32
    return %c0_i32, %c0_i32_0 : i32, i32
  }
  func.func @transform_2(%arg0: i32) -> (i32, i32) {
    %c0_i32 = arith.constant 0 : i32
    %c0_i32_0 = arith.constant 0 : i32
    %c0_i32_1 = arith.constant 0 : i32
    return %c0_i32, %c0_i32_0 : i32, i32
  }
  func.func @transform_3(%arg0: i32) -> (i32, i32) {
    %c0_i32 = arith.constant 0 : i32
    %c0_i32_0 = arith.constant 0 : i32
    %c0_i32_1 = arith.constant 0 : i32
    return %c0_i32, %c0_i32_0 : i32, i32
  }
  func.func @transform_4(%arg0: i32) -> (i32, i32) {
    %c0_i32 = arith.constant 0 : i32
    %c0_i32_0 = arith.constant 0 : i32
    %c0_i32_1 = arith.constant 0 : i32
    return %c0_i32, %c0_i32_0 : i32, i32
  }
  func.func @transform_5(%arg0: i32) -> (i32, i32) {
    %c0_i32 = arith.constant 0 : i32
    %c0_i32_0 = arith.constant 0 : i32
    %c0_i32_1 = arith.constant 0 : i32
    return %c0_i32, %c0_i32_0 : i32, i32
  }
  func.func @transform_6(%arg0: i32) -> (i32, i32) {
    %c0_i32 = arith.constant 0 : i32
    %c0_i32_0 = arith.constant 0 : i32
    %c0_i32_1 = arith.constant 0 : i32
    return %c0_i32, %c0_i32_0 : i32, i32
  }
  func.func @transform_7(%arg0: i32) -> (i32, i32) {
    %c0_i32 = arith.constant 0 : i32
    %c0_i32_0 = arith.constant 0 : i32
    %c0_i32_1 = arith.constant 0 : i32
    return %c0_i32, %c0_i32_0 : i32, i32
  }
  func.func @transform_8(%arg0: i32) -> (i32, i32) {
    %c0_i32 = arith.constant 0 : i32
    %c0_i32_0 = arith.constant 0 : i32
    %c0_i32_1 = arith.constant 0 : i32
    return %c0_i32, %c0_i32_0 : i32, i32
  }
  func.func @transform_9(%arg0: i32) -> (i32, i32) {
    %c0_i32 = arith.constant 0 : i32
    %c0_i32_0 = arith.constant 0 : i32
    %c0_i32_1 = arith.constant 0 : i32
    return %c0_i32, %c0_i32_0 : i32, i32
  }
  func.func @transform_10(%arg0: i32) -> (i32, i32) {
    %c0_i32 = arith.constant 0 : i32
    %c0_i32_0 = arith.constant 0 : i32
    return %arg0, %c0_i32 : i32, i32
  }
}

module attributes {stable_mosaic.version = 11 : i64} {
  func.func @mamba_block_kernel(%arg0: i32, %arg1: memref<8x32xbf16, #tpu.memory_space<vmem>>, %arg2: memref<32x128xbf16, #tpu.memory_space<vmem>>, %arg3: memref<4x64xf32, #tpu.memory_space<vmem>>, %arg4: memref<1x64xf32, #tpu.memory_space<vmem>>, %arg5: memref<64x128xbf16, #tpu.memory_space<vmem>>, %arg6: memref<2x64xbf16, #tpu.memory_space<vmem>>, %arg7: memref<1x64xf32, #tpu.memory_space<vmem>>, %arg8: memref<16x64xf32, #tpu.memory_space<vmem>>, %arg9: memref<1x64xf32, #tpu.memory_space<vmem>>, %arg10: memref<64x32xbf16, #tpu.memory_space<vmem>>, %arg11: memref<8x32xf32, #tpu.memory_space<vmem>>) attributes {dimension_semantics = [#tpu.dimension_semantics<parallel>], iteration_bounds = array<i64: 2>, scalar_prefetch = 0 : i64, scratch_operands = 0 : i64, tpu.core_type = #tpu.core_type<tc>, window_params = [{transform_indices = @transform_0, window_bounds = array<i64: 8, 32>}, {pipeline_mode = #tpu.pipeline_mode<synchronous>, transform_indices = @transform_1, window_bounds = array<i64: 32, 128>}, {pipeline_mode = #tpu.pipeline_mode<synchronous>, transform_indices = @transform_2, window_bounds = array<i64: 4, 64>}, {pipeline_mode = #tpu.pipeline_mode<synchronous>, transform_indices = @transform_3, window_bounds = array<i64: 1, 64>}, {pipeline_mode = #tpu.pipeline_mode<synchronous>, transform_indices = @transform_4, window_bounds = array<i64: 64, 128>}, {pipeline_mode = #tpu.pipeline_mode<synchronous>, transform_indices = @transform_5, window_bounds = array<i64: 2, 64>}, {pipeline_mode = #tpu.pipeline_mode<synchronous>, transform_indices = @transform_6, window_bounds = array<i64: 1, 64>}, {pipeline_mode = #tpu.pipeline_mode<synchronous>, transform_indices = @transform_7, window_bounds = array<i64: 16, 64>}, {pipeline_mode = #tpu.pipeline_mode<synchronous>, transform_indices = @transform_8, window_bounds = array<i64: 1, 64>}, {pipeline_mode = #tpu.pipeline_mode<synchronous>, transform_indices = @transform_9, window_bounds = array<i64: 64, 32>}, {transform_indices = @transform_10, window_bounds = array<i64: 8, 32>}]} {
    %c0 = arith.constant 0 : index
    %c0_0 = arith.constant 0 : index
    %0 = vector.load %arg1[%c0, %c0_0] : memref<8x32xbf16, #tpu.memory_space<vmem>>, vector<8x32xbf16>
    %c0_1 = arith.constant 0 : index
    %c0_2 = arith.constant 0 : index
    %1 = vector.load %arg2[%c0_1, %c0_2] : memref<32x128xbf16, #tpu.memory_space<vmem>>, vector<32x128xbf16>
    %cst = arith.constant dense<0.000000e+00> : vector<8x128xf32>
    %2 = tpu.matmul %0, %1, %cst {dimension_numbers = #tpu.dot_dimension_numbers<[1], [0], [0], [1], [0, 0, 1, 1], [], []>} : vector<8x32xbf16>, vector<32x128xbf16>, vector<8x128xf32> -> vector<8x128xf32>
    %3 = vector.extract_strided_slice %2 {offsets = [0, 0], sizes = [8, 64], strides = [1, 1]} : vector<8x128xf32> to vector<8x64xf32>
    %4 = vector.extract_strided_slice %2 {offsets = [0, 64], sizes = [8, 64], strides = [1, 1]} : vector<8x128xf32> to vector<8x64xf32>
    %5 = tpu.iota {dimensions = array<i32: 0>} : vector<8x1xi32>
    %c8_i32 = arith.constant 8 : i32
    %c0_i32 = arith.constant 0 : i32
    %6 = arith.cmpi eq, %c8_i32, %c0_i32 : i32
    %c1_i32 = arith.constant 1 : i32
    %7 = arith.select %6, %c1_i32, %c8_i32 : i32
    %8 = vector.broadcast %7 : i32 to vector<8x1xi32>
    %9 = arith.remsi %5, %8 : vector<8x1xi32>
    %c0_i32_3 = arith.constant 0 : i32
    %10 = vector.broadcast %c0_i32_3 : i32 to vector<8x1xi32>
    %11 = arith.cmpi ne, %9, %10 : vector<8x1xi32>
    %c0_i32_4 = arith.constant 0 : i32
    %12 = vector.broadcast %c0_i32_4 : i32 to vector<8x1xi32>
    %13 = arith.cmpi slt, %9, %12 : vector<8x1xi32>
    %c0_i32_5 = arith.constant 0 : i32
    %14 = arith.cmpi slt, %7, %c0_i32_5 : i32
    %15 = vector.broadcast %14 : i1 to vector<8x1xi1>
    %16 = vector.broadcast %15 : vector<8x1xi1> to vector<8x1xi1>
    %17 = arith.xori %13, %16 : vector<8x1xi1>
    %18 = arith.andi %17, %11 : vector<8x1xi1>
    %19 = vector.broadcast %7 : i32 to vector<8x1xi32>
    %20 = arith.addi %9, %19 : vector<8x1xi32>
    %21 = arith.select %18, %20, %9 : vector<8x1xi1>, vector<8x1xi32>
    %c0_i32_6 = arith.constant 0 : i32
    %22 = vector.broadcast %c0_i32_6 : i32 to vector<8x1xi32>
    %23 = arith.cmpi eq, %21, %22 : vector<8x1xi32>
    %c0_7 = arith.constant 0 : index
    %c0_8 = arith.constant 0 : index
    %24 = vector.load %arg4[%c0_7, %c0_8] : memref<1x64xf32, #tpu.memory_space<vmem>>, vector<1x64xf32>
    %25 = vector.shape_cast %24 : vector<1x64xf32> to vector<1x64xf32>
    %26 = vector.broadcast %25 : vector<1x64xf32> to vector<8x64xf32>
    %c3_i32 = arith.constant 3 : i32
    %27 = vector.broadcast %c3_i32 : i32 to vector<8x1xi32>
    %28 = arith.cmpi sge, %21, %27 : vector<8x1xi32>
    %c3_i32_9 = arith.constant 3 : i32
    %29 = tpu.dynamic_rotate %3 by %c3_i32_9 dim 0 : vector<8x64xf32>, i32 -> vector<8x64xf32>
    %cst_10 = arith.constant 0.000000e+00 : f32
    %30 = vector.shape_cast %28 : vector<8x1xi1> to vector<8x1xi1>
    %31 = vector.broadcast %30 : vector<8x1xi1> to vector<8x64xi1>
    %32 = vector.broadcast %cst_10 : f32 to vector<8x64xf32>
    %33 = arith.select %31, %29, %32 : vector<8x64xi1>, vector<8x64xf32>
    %c0_11 = arith.constant 0 : index
    %c0_12 = arith.constant 0 : index
    %34 = vector.load %arg3[%c0_11, %c0_12] : memref<4x64xf32, #tpu.memory_space<vmem>>, vector<1x64xf32>
    %35 = vector.broadcast %34 : vector<1x64xf32> to vector<8x64xf32>
    %36 = arith.mulf %33, %35 : vector<8x64xf32>
    %37 = arith.addf %26, %36 : vector<8x64xf32>
    %c2_i32 = arith.constant 2 : i32
    %38 = vector.broadcast %c2_i32 : i32 to vector<8x1xi32>
    %39 = arith.cmpi sge, %21, %38 : vector<8x1xi32>
    %c2_i32_13 = arith.constant 2 : i32
    %40 = tpu.dynamic_rotate %3 by %c2_i32_13 dim 0 : vector<8x64xf32>, i32 -> vector<8x64xf32>
    %cst_14 = arith.constant 0.000000e+00 : f32
    %41 = vector.shape_cast %39 : vector<8x1xi1> to vector<8x1xi1>
    %42 = vector.broadcast %41 : vector<8x1xi1> to vector<8x64xi1>
    %43 = vector.broadcast %cst_14 : f32 to vector<8x64xf32>
    %44 = arith.select %42, %40, %43 : vector<8x64xi1>, vector<8x64xf32>
    %c1 = arith.constant 1 : index
    %c0_15 = arith.constant 0 : index
    %45 = vector.load %arg3[%c1, %c0_15] : memref<4x64xf32, #tpu.memory_space<vmem>>, vector<1x64xf32>
    %46 = vector.broadcast %45 : vector<1x64xf32> to vector<8x64xf32>
    %47 = arith.mulf %44, %46 : vector<8x64xf32>
    %48 = arith.addf %37, %47 : vector<8x64xf32>
    %c1_i32_16 = arith.constant 1 : i32
    %49 = vector.broadcast %c1_i32_16 : i32 to vector<8x1xi32>
    %50 = arith.cmpi sge, %21, %49 : vector<8x1xi32>
    %c1_i32_17 = arith.constant 1 : i32
    %51 = tpu.dynamic_rotate %3 by %c1_i32_17 dim 0 : vector<8x64xf32>, i32 -> vector<8x64xf32>
    %cst_18 = arith.constant 0.000000e+00 : f32
    %52 = vector.shape_cast %50 : vector<8x1xi1> to vector<8x1xi1>
    %53 = vector.broadcast %52 : vector<8x1xi1> to vector<8x64xi1>
    %54 = vector.broadcast %cst_18 : f32 to vector<8x64xf32>
    %55 = arith.select %53, %51, %54 : vector<8x64xi1>, vector<8x64xf32>
    %c2 = arith.constant 2 : index
    %c0_19 = arith.constant 0 : index
    %56 = vector.load %arg3[%c2, %c0_19] : memref<4x64xf32, #tpu.memory_space<vmem>>, vector<1x64xf32>
    %57 = vector.broadcast %56 : vector<1x64xf32> to vector<8x64xf32>
    %58 = arith.mulf %55, %57 : vector<8x64xf32>
    %59 = arith.addf %48, %58 : vector<8x64xf32>
    %c3 = arith.constant 3 : index
    %c0_20 = arith.constant 0 : index
    %60 = vector.load %arg3[%c3, %c0_20] : memref<4x64xf32, #tpu.memory_space<vmem>>, vector<1x64xf32>
    %61 = vector.broadcast %60 : vector<1x64xf32> to vector<8x64xf32>
    %62 = arith.mulf %3, %61 : vector<8x64xf32>
    %63 = arith.addf %59, %62 : vector<8x64xf32>
    %cst_21 = arith.constant 0.000000e+00 : f32
    %64 = vector.broadcast %cst_21 : f32 to vector<8x64xf32>
    %65 = arith.subf %64, %63 : vector<8x64xf32>
    %66 = math.exp %65 : vector<8x64xf32>
    %cst_22 = arith.constant 1.000000e+00 : f32
    %67 = vector.broadcast %cst_22 : f32 to vector<8x64xf32>
    %68 = arith.addf %67, %66 : vector<8x64xf32>
    %cst_23 = arith.constant 1.000000e+00 : f32
    %69 = vector.broadcast %cst_23 : f32 to vector<8x64xf32>
    %70 = arith.divf %69, %68 : vector<8x64xf32>
    %71 = arith.mulf %63, %70 : vector<8x64xf32>
    %72 = arith.truncf %71 : vector<8x64xf32> to vector<8x64xbf16>
    %c0_24 = arith.constant 0 : index
    %c0_25 = arith.constant 0 : index
    %73 = vector.load %arg5[%c0_24, %c0_25] : memref<64x128xbf16, #tpu.memory_space<vmem>>, vector<64x128xbf16>
    %cst_26 = arith.constant dense<0.000000e+00> : vector<8x128xf32>
    %74 = tpu.matmul %72, %73, %cst_26 {dimension_numbers = #tpu.dot_dimension_numbers<[1], [0], [0], [1], [0, 0, 1, 1], [], []>} : vector<8x64xbf16>, vector<64x128xbf16>, vector<8x128xf32> -> vector<8x128xf32>
    %75 = vector.extract_strided_slice %74 {offsets = [0, 0], sizes = [8, 2], strides = [1, 1]} : vector<8x128xf32> to vector<8x2xf32>
    %76 = arith.truncf %75 : vector<8x2xf32> to vector<8x2xbf16>
    %c0_27 = arith.constant 0 : index
    %c0_28 = arith.constant 0 : index
    %77 = vector.load %arg6[%c0_27, %c0_28] : memref<2x64xbf16, #tpu.memory_space<vmem>>, vector<2x64xbf16>
    %cst_29 = arith.constant dense<0.000000e+00> : vector<8x64xf32>
    %78 = tpu.matmul %76, %77, %cst_29 {dimension_numbers = #tpu.dot_dimension_numbers<[1], [0], [0], [1], [0, 0, 1, 1], [], []>} : vector<8x2xbf16>, vector<2x64xbf16>, vector<8x64xf32> -> vector<8x64xf32>
    %c0_30 = arith.constant 0 : index
    %c0_31 = arith.constant 0 : index
    %79 = vector.load %arg7[%c0_30, %c0_31] : memref<1x64xf32, #tpu.memory_space<vmem>>, vector<1x64xf32>
    %80 = vector.broadcast %79 : vector<1x64xf32> to vector<8x64xf32>
    %81 = arith.addf %78, %80 : vector<8x64xf32>
    %82 = math.absf %81 : vector<8x64xf32>
    %cst_32 = arith.constant 0.000000e+00 : f32
    %83 = vector.broadcast %cst_32 : f32 to vector<8x64xf32>
    %84 = arith.subf %83, %82 : vector<8x64xf32>
    %85 = math.exp %84 : vector<8x64xf32>
    %cst_33 = arith.constant 1.000000e+00 : f32
    %86 = vector.broadcast %cst_33 : f32 to vector<8x64xf32>
    %87 = arith.addf %86, %85 : vector<8x64xf32>
    %88 = math.log %87 : vector<8x64xf32>
    %cst_34 = arith.constant 0.000000e+00 : f32
    %89 = vector.broadcast %cst_34 : f32 to vector<8x64xf32>
    %90 = arith.maximumf %81, %89 : vector<8x64xf32>
    %91 = arith.addf %88, %90 : vector<8x64xf32>
    %92 = vector.extract_strided_slice %74 {offsets = [0, 2], sizes = [8, 16], strides = [1, 1]} : vector<8x128xf32> to vector<8x16xf32>
    %93 = vector.extract_strided_slice %74 {offsets = [0, 18], sizes = [8, 16], strides = [1, 1]} : vector<8x128xf32> to vector<8x16xf32>
    %94 = arith.mulf %91, %71 : vector<8x64xf32>
    %c0_35 = arith.constant 0 : index
    %c0_36 = arith.constant 0 : index
    %95 = vector.load %arg8[%c0_35, %c0_36] : memref<16x64xf32, #tpu.memory_space<vmem>>, vector<16x64xf32>
    %cst_37 = arith.constant 0.000000e+00 : f32
    %96 = vector.broadcast %cst_37 : f32 to vector<8x64xf32>
    %c0_i32_38 = arith.constant 0 : i32
    %97 = tpu.iota {dimensions = array<i32: 1>} : vector<1x16xi32>
    %98 = vector.broadcast %c0_i32_38 : i32 to vector<1x16xi32>
    %99 = arith.cmpi eq, %97, %98 : vector<1x16xi32>
    %100 = arith.extui %99 : vector<1x16xi1> to vector<1x16xi32>
    %101 = arith.sitofp %100 : vector<1x16xi32> to vector<1x16xf32>
    %102 = tpu.iota {dimensions = array<i32: 0>} : vector<16x1xi32>
    %103 = vector.broadcast %c0_i32_38 : i32 to vector<16x1xi32>
    %104 = arith.cmpi eq, %102, %103 : vector<16x1xi32>
    %105 = arith.extui %104 : vector<16x1xi1> to vector<16x1xi32>
    %106 = arith.sitofp %105 : vector<16x1xi32> to vector<16x1xf32>
    %107 = vector.broadcast %106 : vector<16x1xf32> to vector<16x64xf32>
    %108 = arith.mulf %95, %107 : vector<16x64xf32>
    %cst_39 = arith.constant dense<0.000000e+00> : vector<64xf32>
    %109 = vector.multi_reduction <add>, %108, %cst_39 [0] : vector<16x64xf32> to vector<64xf32>
    %110 = vector.shape_cast %109 : vector<64xf32> to vector<1x64xf32>
    %111 = vector.broadcast %101 : vector<1x16xf32> to vector<8x16xf32>
    %112 = arith.mulf %92, %111 : vector<8x16xf32>
    %cst_40 = arith.constant dense<0.000000e+00> : vector<8xf32>
    %113 = vector.multi_reduction <add>, %112, %cst_40 [1] : vector<8x16xf32> to vector<8xf32>
    %114 = vector.shape_cast %113 : vector<8xf32> to vector<8x1xf32>
    %115 = vector.broadcast %101 : vector<1x16xf32> to vector<8x16xf32>
    %116 = arith.mulf %93, %115 : vector<8x16xf32>
    %cst_41 = arith.constant dense<0.000000e+00> : vector<8xf32>
    %117 = vector.multi_reduction <add>, %116, %cst_41 [1] : vector<8x16xf32> to vector<8xf32>
    %118 = vector.shape_cast %117 : vector<8xf32> to vector<8x1xf32>
    %119 = vector.broadcast %110 : vector<1x64xf32> to vector<8x64xf32>
    %120 = arith.mulf %91, %119 : vector<8x64xf32>
    %cst_42 = arith.constant -2.000000e+01 : f32
    %121 = vector.broadcast %cst_42 : f32 to vector<8x64xf32>
    %122 = arith.maximumf %120, %121 : vector<8x64xf32>
    %cst_43 = arith.constant 0.000000e+00 : f32
    %123 = vector.shape_cast %23 : vector<8x1xi1> to vector<8x1xi1>
    %124 = vector.broadcast %123 : vector<8x1xi1> to vector<8x64xi1>
    %125 = vector.broadcast %cst_43 : f32 to vector<8x64xf32>
    %126 = arith.select %124, %125, %122 : vector<8x64xi1>, vector<8x64xf32>
    %c1_i32_44 = arith.constant 1 : i32
    %127 = vector.broadcast %c1_i32_44 : i32 to vector<8x1xi32>
    %128 = arith.cmpi sge, %21, %127 : vector<8x1xi32>
    %c1_i32_45 = arith.constant 1 : i32
    %129 = tpu.dynamic_rotate %126 by %c1_i32_45 dim 0 : vector<8x64xf32>, i32 -> vector<8x64xf32>
    %cst_46 = arith.constant 0.000000e+00 : f32
    %130 = vector.shape_cast %128 : vector<8x1xi1> to vector<8x1xi1>
    %131 = vector.broadcast %130 : vector<8x1xi1> to vector<8x64xi1>
    %132 = vector.broadcast %cst_46 : f32 to vector<8x64xf32>
    %133 = arith.select %131, %129, %132 : vector<8x64xi1>, vector<8x64xf32>
    %134 = arith.addf %126, %133 : vector<8x64xf32>
    %c2_i32_47 = arith.constant 2 : i32
    %135 = vector.broadcast %c2_i32_47 : i32 to vector<8x1xi32>
    %136 = arith.cmpi sge, %21, %135 : vector<8x1xi32>
    %c2_i32_48 = arith.constant 2 : i32
    %137 = tpu.dynamic_rotate %134 by %c2_i32_48 dim 0 : vector<8x64xf32>, i32 -> vector<8x64xf32>
    %cst_49 = arith.constant 0.000000e+00 : f32
    %138 = vector.shape_cast %136 : vector<8x1xi1> to vector<8x1xi1>
    %139 = vector.broadcast %138 : vector<8x1xi1> to vector<8x64xi1>
    %140 = vector.broadcast %cst_49 : f32 to vector<8x64xf32>
    %141 = arith.select %139, %137, %140 : vector<8x64xi1>, vector<8x64xf32>
    %142 = arith.addf %134, %141 : vector<8x64xf32>
    %c4_i32 = arith.constant 4 : i32
    %143 = vector.broadcast %c4_i32 : i32 to vector<8x1xi32>
    %144 = arith.cmpi sge, %21, %143 : vector<8x1xi32>
    %c4_i32_50 = arith.constant 4 : i32
    %145 = tpu.dynamic_rotate %142 by %c4_i32_50 dim 0 : vector<8x64xf32>, i32 -> vector<8x64xf32>
    %cst_51 = arith.constant 0.000000e+00 : f32
    %146 = vector.shape_cast %144 : vector<8x1xi1> to vector<8x1xi1>
    %147 = vector.broadcast %146 : vector<8x1xi1> to vector<8x64xi1>
    %148 = vector.broadcast %cst_51 : f32 to vector<8x64xf32>
    %149 = arith.select %147, %145, %148 : vector<8x64xi1>, vector<8x64xf32>
    %150 = arith.addf %142, %149 : vector<8x64xf32>
    %151 = math.exp %150 : vector<8x64xf32>
    %152 = vector.broadcast %114 : vector<8x1xf32> to vector<8x64xf32>
    %153 = arith.mulf %94, %152 : vector<8x64xf32>
    %cst_52 = arith.constant 9.99999996E-13 : f32
    %154 = vector.broadcast %cst_52 : f32 to vector<8x64xf32>
    %155 = arith.addf %151, %154 : vector<8x64xf32>
    %156 = tpu.reciprocal %155 : vector<8x64xf32> -> vector<8x64xf32>
    %157 = arith.mulf %153, %156 : vector<8x64xf32>
    %c1_i32_53 = arith.constant 1 : i32
    %158 = vector.broadcast %c1_i32_53 : i32 to vector<8x1xi32>
    %159 = arith.cmpi sge, %21, %158 : vector<8x1xi32>
    %c1_i32_54 = arith.constant 1 : i32
    %160 = tpu.dynamic_rotate %157 by %c1_i32_54 dim 0 : vector<8x64xf32>, i32 -> vector<8x64xf32>
    %cst_55 = arith.constant 0.000000e+00 : f32
    %161 = vector.shape_cast %159 : vector<8x1xi1> to vector<8x1xi1>
    %162 = vector.broadcast %161 : vector<8x1xi1> to vector<8x64xi1>
    %163 = vector.broadcast %cst_55 : f32 to vector<8x64xf32>
    %164 = arith.select %162, %160, %163 : vector<8x64xi1>, vector<8x64xf32>
    %165 = arith.addf %157, %164 : vector<8x64xf32>
    %c2_i32_56 = arith.constant 2 : i32
    %166 = vector.broadcast %c2_i32_56 : i32 to vector<8x1xi32>
    %167 = arith.cmpi sge, %21, %166 : vector<8x1xi32>
    %c2_i32_57 = arith.constant 2 : i32
    %168 = tpu.dynamic_rotate %165 by %c2_i32_57 dim 0 : vector<8x64xf32>, i32 -> vector<8x64xf32>
    %cst_58 = arith.constant 0.000000e+00 : f32
    %169 = vector.shape_cast %167 : vector<8x1xi1> to vector<8x1xi1>
    %170 = vector.broadcast %169 : vector<8x1xi1> to vector<8x64xi1>
    %171 = vector.broadcast %cst_58 : f32 to vector<8x64xf32>
    %172 = arith.select %170, %168, %171 : vector<8x64xi1>, vector<8x64xf32>
    %173 = arith.addf %165, %172 : vector<8x64xf32>
    %c4_i32_59 = arith.constant 4 : i32
    %174 = vector.broadcast %c4_i32_59 : i32 to vector<8x1xi32>
    %175 = arith.cmpi sge, %21, %174 : vector<8x1xi32>
    %c4_i32_60 = arith.constant 4 : i32
    %176 = tpu.dynamic_rotate %173 by %c4_i32_60 dim 0 : vector<8x64xf32>, i32 -> vector<8x64xf32>
    %cst_61 = arith.constant 0.000000e+00 : f32
    %177 = vector.shape_cast %175 : vector<8x1xi1> to vector<8x1xi1>
    %178 = vector.broadcast %177 : vector<8x1xi1> to vector<8x64xi1>
    %179 = vector.broadcast %cst_61 : f32 to vector<8x64xf32>
    %180 = arith.select %178, %176, %179 : vector<8x64xi1>, vector<8x64xf32>
    %181 = arith.addf %173, %180 : vector<8x64xf32>
    %182 = arith.mulf %181, %151 : vector<8x64xf32>
    %183 = vector.broadcast %118 : vector<8x1xf32> to vector<8x64xf32>
    %184 = arith.mulf %182, %183 : vector<8x64xf32>
    %185 = arith.addf %96, %184 : vector<8x64xf32>
    %c1_i32_62 = arith.constant 1 : i32
    %186 = tpu.iota {dimensions = array<i32: 1>} : vector<1x16xi32>
    %187 = vector.broadcast %c1_i32_62 : i32 to vector<1x16xi32>
    %188 = arith.cmpi eq, %186, %187 : vector<1x16xi32>
    %189 = arith.extui %188 : vector<1x16xi1> to vector<1x16xi32>
    %190 = arith.sitofp %189 : vector<1x16xi32> to vector<1x16xf32>
    %191 = tpu.iota {dimensions = array<i32: 0>} : vector<16x1xi32>
    %192 = vector.broadcast %c1_i32_62 : i32 to vector<16x1xi32>
    %193 = arith.cmpi eq, %191, %192 : vector<16x1xi32>
    %194 = arith.extui %193 : vector<16x1xi1> to vector<16x1xi32>
    %195 = arith.sitofp %194 : vector<16x1xi32> to vector<16x1xf32>
    %196 = vector.broadcast %195 : vector<16x1xf32> to vector<16x64xf32>
    %197 = arith.mulf %95, %196 : vector<16x64xf32>
    %cst_63 = arith.constant dense<0.000000e+00> : vector<64xf32>
    %198 = vector.multi_reduction <add>, %197, %cst_63 [0] : vector<16x64xf32> to vector<64xf32>
    %199 = vector.shape_cast %198 : vector<64xf32> to vector<1x64xf32>
    %200 = vector.broadcast %190 : vector<1x16xf32> to vector<8x16xf32>
    %201 = arith.mulf %92, %200 : vector<8x16xf32>
    %cst_64 = arith.constant dense<0.000000e+00> : vector<8xf32>
    %202 = vector.multi_reduction <add>, %201, %cst_64 [1] : vector<8x16xf32> to vector<8xf32>
    %203 = vector.shape_cast %202 : vector<8xf32> to vector<8x1xf32>
    %204 = vector.broadcast %190 : vector<1x16xf32> to vector<8x16xf32>
    %205 = arith.mulf %93, %204 : vector<8x16xf32>
    %cst_65 = arith.constant dense<0.000000e+00> : vector<8xf32>
    %206 = vector.multi_reduction <add>, %205, %cst_65 [1] : vector<8x16xf32> to vector<8xf32>
    %207 = vector.shape_cast %206 : vector<8xf32> to vector<8x1xf32>
    %208 = vector.broadcast %199 : vector<1x64xf32> to vector<8x64xf32>
    %209 = arith.mulf %91, %208 : vector<8x64xf32>
    %cst_66 = arith.constant -2.000000e+01 : f32
    %210 = vector.broadcast %cst_66 : f32 to vector<8x64xf32>
    %211 = arith.maximumf %209, %210 : vector<8x64xf32>
    %cst_67 = arith.constant 0.000000e+00 : f32
    %212 = vector.shape_cast %23 : vector<8x1xi1> to vector<8x1xi1>
    %213 = vector.broadcast %212 : vector<8x1xi1> to vector<8x64xi1>
    %214 = vector.broadcast %cst_67 : f32 to vector<8x64xf32>
    %215 = arith.select %213, %214, %211 : vector<8x64xi1>, vector<8x64xf32>
    %c1_i32_68 = arith.constant 1 : i32
    %216 = vector.broadcast %c1_i32_68 : i32 to vector<8x1xi32>
    %217 = arith.cmpi sge, %21, %216 : vector<8x1xi32>
    %c1_i32_69 = arith.constant 1 : i32
    %218 = tpu.dynamic_rotate %215 by %c1_i32_69 dim 0 : vector<8x64xf32>, i32 -> vector<8x64xf32>
    %cst_70 = arith.constant 0.000000e+00 : f32
    %219 = vector.shape_cast %217 : vector<8x1xi1> to vector<8x1xi1>
    %220 = vector.broadcast %219 : vector<8x1xi1> to vector<8x64xi1>
    %221 = vector.broadcast %cst_70 : f32 to vector<8x64xf32>
    %222 = arith.select %220, %218, %221 : vector<8x64xi1>, vector<8x64xf32>
    %223 = arith.addf %215, %222 : vector<8x64xf32>
    %c2_i32_71 = arith.constant 2 : i32
    %224 = vector.broadcast %c2_i32_71 : i32 to vector<8x1xi32>
    %225 = arith.cmpi sge, %21, %224 : vector<8x1xi32>
    %c2_i32_72 = arith.constant 2 : i32
    %226 = tpu.dynamic_rotate %223 by %c2_i32_72 dim 0 : vector<8x64xf32>, i32 -> vector<8x64xf32>
    %cst_73 = arith.constant 0.000000e+00 : f32
    %227 = vector.shape_cast %225 : vector<8x1xi1> to vector<8x1xi1>
    %228 = vector.broadcast %227 : vector<8x1xi1> to vector<8x64xi1>
    %229 = vector.broadcast %cst_73 : f32 to vector<8x64xf32>
    %230 = arith.select %228, %226, %229 : vector<8x64xi1>, vector<8x64xf32>
    %231 = arith.addf %223, %230 : vector<8x64xf32>
    %c4_i32_74 = arith.constant 4 : i32
    %232 = vector.broadcast %c4_i32_74 : i32 to vector<8x1xi32>
    %233 = arith.cmpi sge, %21, %232 : vector<8x1xi32>
    %c4_i32_75 = arith.constant 4 : i32
    %234 = tpu.dynamic_rotate %231 by %c4_i32_75 dim 0 : vector<8x64xf32>, i32 -> vector<8x64xf32>
    %cst_76 = arith.constant 0.000000e+00 : f32
    %235 = vector.shape_cast %233 : vector<8x1xi1> to vector<8x1xi1>
    %236 = vector.broadcast %235 : vector<8x1xi1> to vector<8x64xi1>
    %237 = vector.broadcast %cst_76 : f32 to vector<8x64xf32>
    %238 = arith.select %236, %234, %237 : vector<8x64xi1>, vector<8x64xf32>
    %239 = arith.addf %231, %238 : vector<8x64xf32>
    %240 = math.exp %239 : vector<8x64xf32>
    %241 = vector.broadcast %203 : vector<8x1xf32> to vector<8x64xf32>
    %242 = arith.mulf %94, %241 : vector<8x64xf32>
    %cst_77 = arith.constant 9.99999996E-13 : f32
    %243 = vector.broadcast %cst_77 : f32 to vector<8x64xf32>
    %244 = arith.addf %240, %243 : vector<8x64xf32>
    %245 = tpu.reciprocal %244 : vector<8x64xf32> -> vector<8x64xf32>
    %246 = arith.mulf %242, %245 : vector<8x64xf32>
    %c1_i32_78 = arith.constant 1 : i32
    %247 = vector.broadcast %c1_i32_78 : i32 to vector<8x1xi32>
    %248 = arith.cmpi sge, %21, %247 : vector<8x1xi32>
    %c1_i32_79 = arith.constant 1 : i32
    %249 = tpu.dynamic_rotate %246 by %c1_i32_79 dim 0 : vector<8x64xf32>, i32 -> vector<8x64xf32>
    %cst_80 = arith.constant 0.000000e+00 : f32
    %250 = vector.shape_cast %248 : vector<8x1xi1> to vector<8x1xi1>
    %251 = vector.broadcast %250 : vector<8x1xi1> to vector<8x64xi1>
    %252 = vector.broadcast %cst_80 : f32 to vector<8x64xf32>
    %253 = arith.select %251, %249, %252 : vector<8x64xi1>, vector<8x64xf32>
    %254 = arith.addf %246, %253 : vector<8x64xf32>
    %c2_i32_81 = arith.constant 2 : i32
    %255 = vector.broadcast %c2_i32_81 : i32 to vector<8x1xi32>
    %256 = arith.cmpi sge, %21, %255 : vector<8x1xi32>
    %c2_i32_82 = arith.constant 2 : i32
    %257 = tpu.dynamic_rotate %254 by %c2_i32_82 dim 0 : vector<8x64xf32>, i32 -> vector<8x64xf32>
    %cst_83 = arith.constant 0.000000e+00 : f32
    %258 = vector.shape_cast %256 : vector<8x1xi1> to vector<8x1xi1>
    %259 = vector.broadcast %258 : vector<8x1xi1> to vector<8x64xi1>
    %260 = vector.broadcast %cst_83 : f32 to vector<8x64xf32>
    %261 = arith.select %259, %257, %260 : vector<8x64xi1>, vector<8x64xf32>
    %262 = arith.addf %254, %261 : vector<8x64xf32>
    %c4_i32_84 = arith.constant 4 : i32
    %263 = vector.broadcast %c4_i32_84 : i32 to vector<8x1xi32>
    %264 = arith.cmpi sge, %21, %263 : vector<8x1xi32>
    %c4_i32_85 = arith.constant 4 : i32
    %265 = tpu.dynamic_rotate %262 by %c4_i32_85 dim 0 : vector<8x64xf32>, i32 -> vector<8x64xf32>
    %cst_86 = arith.constant 0.000000e+00 : f32
    %266 = vector.shape_cast %264 : vector<8x1xi1> to vector<8x1xi1>
    %267 = vector.broadcast %266 : vector<8x1xi1> to vector<8x64xi1>
    %268 = vector.broadcast %cst_86 : f32 to vector<8x64xf32>
    %269 = arith.select %267, %265, %268 : vector<8x64xi1>, vector<8x64xf32>
    %270 = arith.addf %262, %269 : vector<8x64xf32>
    %271 = arith.mulf %270, %240 : vector<8x64xf32>
    %272 = vector.broadcast %207 : vector<8x1xf32> to vector<8x64xf32>
    %273 = arith.mulf %271, %272 : vector<8x64xf32>
    %274 = arith.addf %185, %273 : vector<8x64xf32>
    %c2_i32_87 = arith.constant 2 : i32
    %275 = tpu.iota {dimensions = array<i32: 1>} : vector<1x16xi32>
    %276 = vector.broadcast %c2_i32_87 : i32 to vector<1x16xi32>
    %277 = arith.cmpi eq, %275, %276 : vector<1x16xi32>
    %278 = arith.extui %277 : vector<1x16xi1> to vector<1x16xi32>
    %279 = arith.sitofp %278 : vector<1x16xi32> to vector<1x16xf32>
    %280 = tpu.iota {dimensions = array<i32: 0>} : vector<16x1xi32>
    %281 = vector.broadcast %c2_i32_87 : i32 to vector<16x1xi32>
    %282 = arith.cmpi eq, %280, %281 : vector<16x1xi32>
    %283 = arith.extui %282 : vector<16x1xi1> to vector<16x1xi32>
    %284 = arith.sitofp %283 : vector<16x1xi32> to vector<16x1xf32>
    %285 = vector.broadcast %284 : vector<16x1xf32> to vector<16x64xf32>
    %286 = arith.mulf %95, %285 : vector<16x64xf32>
    %cst_88 = arith.constant dense<0.000000e+00> : vector<64xf32>
    %287 = vector.multi_reduction <add>, %286, %cst_88 [0] : vector<16x64xf32> to vector<64xf32>
    %288 = vector.shape_cast %287 : vector<64xf32> to vector<1x64xf32>
    %289 = vector.broadcast %279 : vector<1x16xf32> to vector<8x16xf32>
    %290 = arith.mulf %92, %289 : vector<8x16xf32>
    %cst_89 = arith.constant dense<0.000000e+00> : vector<8xf32>
    %291 = vector.multi_reduction <add>, %290, %cst_89 [1] : vector<8x16xf32> to vector<8xf32>
    %292 = vector.shape_cast %291 : vector<8xf32> to vector<8x1xf32>
    %293 = vector.broadcast %279 : vector<1x16xf32> to vector<8x16xf32>
    %294 = arith.mulf %93, %293 : vector<8x16xf32>
    %cst_90 = arith.constant dense<0.000000e+00> : vector<8xf32>
    %295 = vector.multi_reduction <add>, %294, %cst_90 [1] : vector<8x16xf32> to vector<8xf32>
    %296 = vector.shape_cast %295 : vector<8xf32> to vector<8x1xf32>
    %297 = vector.broadcast %288 : vector<1x64xf32> to vector<8x64xf32>
    %298 = arith.mulf %91, %297 : vector<8x64xf32>
    %cst_91 = arith.constant -2.000000e+01 : f32
    %299 = vector.broadcast %cst_91 : f32 to vector<8x64xf32>
    %300 = arith.maximumf %298, %299 : vector<8x64xf32>
    %cst_92 = arith.constant 0.000000e+00 : f32
    %301 = vector.shape_cast %23 : vector<8x1xi1> to vector<8x1xi1>
    %302 = vector.broadcast %301 : vector<8x1xi1> to vector<8x64xi1>
    %303 = vector.broadcast %cst_92 : f32 to vector<8x64xf32>
    %304 = arith.select %302, %303, %300 : vector<8x64xi1>, vector<8x64xf32>
    %c1_i32_93 = arith.constant 1 : i32
    %305 = vector.broadcast %c1_i32_93 : i32 to vector<8x1xi32>
    %306 = arith.cmpi sge, %21, %305 : vector<8x1xi32>
    %c1_i32_94 = arith.constant 1 : i32
    %307 = tpu.dynamic_rotate %304 by %c1_i32_94 dim 0 : vector<8x64xf32>, i32 -> vector<8x64xf32>
    %cst_95 = arith.constant 0.000000e+00 : f32
    %308 = vector.shape_cast %306 : vector<8x1xi1> to vector<8x1xi1>
    %309 = vector.broadcast %308 : vector<8x1xi1> to vector<8x64xi1>
    %310 = vector.broadcast %cst_95 : f32 to vector<8x64xf32>
    %311 = arith.select %309, %307, %310 : vector<8x64xi1>, vector<8x64xf32>
    %312 = arith.addf %304, %311 : vector<8x64xf32>
    %c2_i32_96 = arith.constant 2 : i32
    %313 = vector.broadcast %c2_i32_96 : i32 to vector<8x1xi32>
    %314 = arith.cmpi sge, %21, %313 : vector<8x1xi32>
    %c2_i32_97 = arith.constant 2 : i32
    %315 = tpu.dynamic_rotate %312 by %c2_i32_97 dim 0 : vector<8x64xf32>, i32 -> vector<8x64xf32>
    %cst_98 = arith.constant 0.000000e+00 : f32
    %316 = vector.shape_cast %314 : vector<8x1xi1> to vector<8x1xi1>
    %317 = vector.broadcast %316 : vector<8x1xi1> to vector<8x64xi1>
    %318 = vector.broadcast %cst_98 : f32 to vector<8x64xf32>
    %319 = arith.select %317, %315, %318 : vector<8x64xi1>, vector<8x64xf32>
    %320 = arith.addf %312, %319 : vector<8x64xf32>
    %c4_i32_99 = arith.constant 4 : i32
    %321 = vector.broadcast %c4_i32_99 : i32 to vector<8x1xi32>
    %322 = arith.cmpi sge, %21, %321 : vector<8x1xi32>
    %c4_i32_100 = arith.constant 4 : i32
    %323 = tpu.dynamic_rotate %320 by %c4_i32_100 dim 0 : vector<8x64xf32>, i32 -> vector<8x64xf32>
    %cst_101 = arith.constant 0.000000e+00 : f32
    %324 = vector.shape_cast %322 : vector<8x1xi1> to vector<8x1xi1>
    %325 = vector.broadcast %324 : vector<8x1xi1> to vector<8x64xi1>
    %326 = vector.broadcast %cst_101 : f32 to vector<8x64xf32>
    %327 = arith.select %325, %323, %326 : vector<8x64xi1>, vector<8x64xf32>
    %328 = arith.addf %320, %327 : vector<8x64xf32>
    %329 = math.exp %328 : vector<8x64xf32>
    %330 = vector.broadcast %292 : vector<8x1xf32> to vector<8x64xf32>
    %331 = arith.mulf %94, %330 : vector<8x64xf32>
    %cst_102 = arith.constant 9.99999996E-13 : f32
    %332 = vector.broadcast %cst_102 : f32 to vector<8x64xf32>
    %333 = arith.addf %329, %332 : vector<8x64xf32>
    %334 = tpu.reciprocal %333 : vector<8x64xf32> -> vector<8x64xf32>
    %335 = arith.mulf %331, %334 : vector<8x64xf32>
    %c1_i32_103 = arith.constant 1 : i32
    %336 = vector.broadcast %c1_i32_103 : i32 to vector<8x1xi32>
    %337 = arith.cmpi sge, %21, %336 : vector<8x1xi32>
    %c1_i32_104 = arith.constant 1 : i32
    %338 = tpu.dynamic_rotate %335 by %c1_i32_104 dim 0 : vector<8x64xf32>, i32 -> vector<8x64xf32>
    %cst_105 = arith.constant 0.000000e+00 : f32
    %339 = vector.shape_cast %337 : vector<8x1xi1> to vector<8x1xi1>
    %340 = vector.broadcast %339 : vector<8x1xi1> to vector<8x64xi1>
    %341 = vector.broadcast %cst_105 : f32 to vector<8x64xf32>
    %342 = arith.select %340, %338, %341 : vector<8x64xi1>, vector<8x64xf32>
    %343 = arith.addf %335, %342 : vector<8x64xf32>
    %c2_i32_106 = arith.constant 2 : i32
    %344 = vector.broadcast %c2_i32_106 : i32 to vector<8x1xi32>
    %345 = arith.cmpi sge, %21, %344 : vector<8x1xi32>
    %c2_i32_107 = arith.constant 2 : i32
    %346 = tpu.dynamic_rotate %343 by %c2_i32_107 dim 0 : vector<8x64xf32>, i32 -> vector<8x64xf32>
    %cst_108 = arith.constant 0.000000e+00 : f32
    %347 = vector.shape_cast %345 : vector<8x1xi1> to vector<8x1xi1>
    %348 = vector.broadcast %347 : vector<8x1xi1> to vector<8x64xi1>
    %349 = vector.broadcast %cst_108 : f32 to vector<8x64xf32>
    %350 = arith.select %348, %346, %349 : vector<8x64xi1>, vector<8x64xf32>
    %351 = arith.addf %343, %350 : vector<8x64xf32>
    %c4_i32_109 = arith.constant 4 : i32
    %352 = vector.broadcast %c4_i32_109 : i32 to vector<8x1xi32>
    %353 = arith.cmpi sge, %21, %352 : vector<8x1xi32>
    %c4_i32_110 = arith.constant 4 : i32
    %354 = tpu.dynamic_rotate %351 by %c4_i32_110 dim 0 : vector<8x64xf32>, i32 -> vector<8x64xf32>
    %cst_111 = arith.constant 0.000000e+00 : f32
    %355 = vector.shape_cast %353 : vector<8x1xi1> to vector<8x1xi1>
    %356 = vector.broadcast %355 : vector<8x1xi1> to vector<8x64xi1>
    %357 = vector.broadcast %cst_111 : f32 to vector<8x64xf32>
    %358 = arith.select %356, %354, %357 : vector<8x64xi1>, vector<8x64xf32>
    %359 = arith.addf %351, %358 : vector<8x64xf32>
    %360 = arith.mulf %359, %329 : vector<8x64xf32>
    %361 = vector.broadcast %296 : vector<8x1xf32> to vector<8x64xf32>
    %362 = arith.mulf %360, %361 : vector<8x64xf32>
    %363 = arith.addf %274, %362 : vector<8x64xf32>
    %c3_i32_112 = arith.constant 3 : i32
    %364 = tpu.iota {dimensions = array<i32: 1>} : vector<1x16xi32>
    %365 = vector.broadcast %c3_i32_112 : i32 to vector<1x16xi32>
    %366 = arith.cmpi eq, %364, %365 : vector<1x16xi32>
    %367 = arith.extui %366 : vector<1x16xi1> to vector<1x16xi32>
    %368 = arith.sitofp %367 : vector<1x16xi32> to vector<1x16xf32>
    %369 = tpu.iota {dimensions = array<i32: 0>} : vector<16x1xi32>
    %370 = vector.broadcast %c3_i32_112 : i32 to vector<16x1xi32>
    %371 = arith.cmpi eq, %369, %370 : vector<16x1xi32>
    %372 = arith.extui %371 : vector<16x1xi1> to vector<16x1xi32>
    %373 = arith.sitofp %372 : vector<16x1xi32> to vector<16x1xf32>
    %374 = vector.broadcast %373 : vector<16x1xf32> to vector<16x64xf32>
    %375 = arith.mulf %95, %374 : vector<16x64xf32>
    %cst_113 = arith.constant dense<0.000000e+00> : vector<64xf32>
    %376 = vector.multi_reduction <add>, %375, %cst_113 [0] : vector<16x64xf32> to vector<64xf32>
    %377 = vector.shape_cast %376 : vector<64xf32> to vector<1x64xf32>
    %378 = vector.broadcast %368 : vector<1x16xf32> to vector<8x16xf32>
    %379 = arith.mulf %92, %378 : vector<8x16xf32>
    %cst_114 = arith.constant dense<0.000000e+00> : vector<8xf32>
    %380 = vector.multi_reduction <add>, %379, %cst_114 [1] : vector<8x16xf32> to vector<8xf32>
    %381 = vector.shape_cast %380 : vector<8xf32> to vector<8x1xf32>
    %382 = vector.broadcast %368 : vector<1x16xf32> to vector<8x16xf32>
    %383 = arith.mulf %93, %382 : vector<8x16xf32>
    %cst_115 = arith.constant dense<0.000000e+00> : vector<8xf32>
    %384 = vector.multi_reduction <add>, %383, %cst_115 [1] : vector<8x16xf32> to vector<8xf32>
    %385 = vector.shape_cast %384 : vector<8xf32> to vector<8x1xf32>
    %386 = vector.broadcast %377 : vector<1x64xf32> to vector<8x64xf32>
    %387 = arith.mulf %91, %386 : vector<8x64xf32>
    %cst_116 = arith.constant -2.000000e+01 : f32
    %388 = vector.broadcast %cst_116 : f32 to vector<8x64xf32>
    %389 = arith.maximumf %387, %388 : vector<8x64xf32>
    %cst_117 = arith.constant 0.000000e+00 : f32
    %390 = vector.shape_cast %23 : vector<8x1xi1> to vector<8x1xi1>
    %391 = vector.broadcast %390 : vector<8x1xi1> to vector<8x64xi1>
    %392 = vector.broadcast %cst_117 : f32 to vector<8x64xf32>
    %393 = arith.select %391, %392, %389 : vector<8x64xi1>, vector<8x64xf32>
    %c1_i32_118 = arith.constant 1 : i32
    %394 = vector.broadcast %c1_i32_118 : i32 to vector<8x1xi32>
    %395 = arith.cmpi sge, %21, %394 : vector<8x1xi32>
    %c1_i32_119 = arith.constant 1 : i32
    %396 = tpu.dynamic_rotate %393 by %c1_i32_119 dim 0 : vector<8x64xf32>, i32 -> vector<8x64xf32>
    %cst_120 = arith.constant 0.000000e+00 : f32
    %397 = vector.shape_cast %395 : vector<8x1xi1> to vector<8x1xi1>
    %398 = vector.broadcast %397 : vector<8x1xi1> to vector<8x64xi1>
    %399 = vector.broadcast %cst_120 : f32 to vector<8x64xf32>
    %400 = arith.select %398, %396, %399 : vector<8x64xi1>, vector<8x64xf32>
    %401 = arith.addf %393, %400 : vector<8x64xf32>
    %c2_i32_121 = arith.constant 2 : i32
    %402 = vector.broadcast %c2_i32_121 : i32 to vector<8x1xi32>
    %403 = arith.cmpi sge, %21, %402 : vector<8x1xi32>
    %c2_i32_122 = arith.constant 2 : i32
    %404 = tpu.dynamic_rotate %401 by %c2_i32_122 dim 0 : vector<8x64xf32>, i32 -> vector<8x64xf32>
    %cst_123 = arith.constant 0.000000e+00 : f32
    %405 = vector.shape_cast %403 : vector<8x1xi1> to vector<8x1xi1>
    %406 = vector.broadcast %405 : vector<8x1xi1> to vector<8x64xi1>
    %407 = vector.broadcast %cst_123 : f32 to vector<8x64xf32>
    %408 = arith.select %406, %404, %407 : vector<8x64xi1>, vector<8x64xf32>
    %409 = arith.addf %401, %408 : vector<8x64xf32>
    %c4_i32_124 = arith.constant 4 : i32
    %410 = vector.broadcast %c4_i32_124 : i32 to vector<8x1xi32>
    %411 = arith.cmpi sge, %21, %410 : vector<8x1xi32>
    %c4_i32_125 = arith.constant 4 : i32
    %412 = tpu.dynamic_rotate %409 by %c4_i32_125 dim 0 : vector<8x64xf32>, i32 -> vector<8x64xf32>
    %cst_126 = arith.constant 0.000000e+00 : f32
    %413 = vector.shape_cast %411 : vector<8x1xi1> to vector<8x1xi1>
    %414 = vector.broadcast %413 : vector<8x1xi1> to vector<8x64xi1>
    %415 = vector.broadcast %cst_126 : f32 to vector<8x64xf32>
    %416 = arith.select %414, %412, %415 : vector<8x64xi1>, vector<8x64xf32>
    %417 = arith.addf %409, %416 : vector<8x64xf32>
    %418 = math.exp %417 : vector<8x64xf32>
    %419 = vector.broadcast %381 : vector<8x1xf32> to vector<8x64xf32>
    %420 = arith.mulf %94, %419 : vector<8x64xf32>
    %cst_127 = arith.constant 9.99999996E-13 : f32
    %421 = vector.broadcast %cst_127 : f32 to vector<8x64xf32>
    %422 = arith.addf %418, %421 : vector<8x64xf32>
    %423 = tpu.reciprocal %422 : vector<8x64xf32> -> vector<8x64xf32>
    %424 = arith.mulf %420, %423 : vector<8x64xf32>
    %c1_i32_128 = arith.constant 1 : i32
    %425 = vector.broadcast %c1_i32_128 : i32 to vector<8x1xi32>
    %426 = arith.cmpi sge, %21, %425 : vector<8x1xi32>
    %c1_i32_129 = arith.constant 1 : i32
    %427 = tpu.dynamic_rotate %424 by %c1_i32_129 dim 0 : vector<8x64xf32>, i32 -> vector<8x64xf32>
    %cst_130 = arith.constant 0.000000e+00 : f32
    %428 = vector.shape_cast %426 : vector<8x1xi1> to vector<8x1xi1>
    %429 = vector.broadcast %428 : vector<8x1xi1> to vector<8x64xi1>
    %430 = vector.broadcast %cst_130 : f32 to vector<8x64xf32>
    %431 = arith.select %429, %427, %430 : vector<8x64xi1>, vector<8x64xf32>
    %432 = arith.addf %424, %431 : vector<8x64xf32>
    %c2_i32_131 = arith.constant 2 : i32
    %433 = vector.broadcast %c2_i32_131 : i32 to vector<8x1xi32>
    %434 = arith.cmpi sge, %21, %433 : vector<8x1xi32>
    %c2_i32_132 = arith.constant 2 : i32
    %435 = tpu.dynamic_rotate %432 by %c2_i32_132 dim 0 : vector<8x64xf32>, i32 -> vector<8x64xf32>
    %cst_133 = arith.constant 0.000000e+00 : f32
    %436 = vector.shape_cast %434 : vector<8x1xi1> to vector<8x1xi1>
    %437 = vector.broadcast %436 : vector<8x1xi1> to vector<8x64xi1>
    %438 = vector.broadcast %cst_133 : f32 to vector<8x64xf32>
    %439 = arith.select %437, %435, %438 : vector<8x64xi1>, vector<8x64xf32>
    %440 = arith.addf %432, %439 : vector<8x64xf32>
    %c4_i32_134 = arith.constant 4 : i32
    %441 = vector.broadcast %c4_i32_134 : i32 to vector<8x1xi32>
    %442 = arith.cmpi sge, %21, %441 : vector<8x1xi32>
    %c4_i32_135 = arith.constant 4 : i32
    %443 = tpu.dynamic_rotate %440 by %c4_i32_135 dim 0 : vector<8x64xf32>, i32 -> vector<8x64xf32>
    %cst_136 = arith.constant 0.000000e+00 : f32
    %444 = vector.shape_cast %442 : vector<8x1xi1> to vector<8x1xi1>
    %445 = vector.broadcast %444 : vector<8x1xi1> to vector<8x64xi1>
    %446 = vector.broadcast %cst_136 : f32 to vector<8x64xf32>
    %447 = arith.select %445, %443, %446 : vector<8x64xi1>, vector<8x64xf32>
    %448 = arith.addf %440, %447 : vector<8x64xf32>
    %449 = arith.mulf %448, %418 : vector<8x64xf32>
    %450 = vector.broadcast %385 : vector<8x1xf32> to vector<8x64xf32>
    %451 = arith.mulf %449, %450 : vector<8x64xf32>
    %452 = arith.addf %363, %451 : vector<8x64xf32>
    %c4_i32_137 = arith.constant 4 : i32
    %453 = tpu.iota {dimensions = array<i32: 1>} : vector<1x16xi32>
    %454 = vector.broadcast %c4_i32_137 : i32 to vector<1x16xi32>
    %455 = arith.cmpi eq, %453, %454 : vector<1x16xi32>
    %456 = arith.extui %455 : vector<1x16xi1> to vector<1x16xi32>
    %457 = arith.sitofp %456 : vector<1x16xi32> to vector<1x16xf32>
    %458 = tpu.iota {dimensions = array<i32: 0>} : vector<16x1xi32>
    %459 = vector.broadcast %c4_i32_137 : i32 to vector<16x1xi32>
    %460 = arith.cmpi eq, %458, %459 : vector<16x1xi32>
    %461 = arith.extui %460 : vector<16x1xi1> to vector<16x1xi32>
    %462 = arith.sitofp %461 : vector<16x1xi32> to vector<16x1xf32>
    %463 = vector.broadcast %462 : vector<16x1xf32> to vector<16x64xf32>
    %464 = arith.mulf %95, %463 : vector<16x64xf32>
    %cst_138 = arith.constant dense<0.000000e+00> : vector<64xf32>
    %465 = vector.multi_reduction <add>, %464, %cst_138 [0] : vector<16x64xf32> to vector<64xf32>
    %466 = vector.shape_cast %465 : vector<64xf32> to vector<1x64xf32>
    %467 = vector.broadcast %457 : vector<1x16xf32> to vector<8x16xf32>
    %468 = arith.mulf %92, %467 : vector<8x16xf32>
    %cst_139 = arith.constant dense<0.000000e+00> : vector<8xf32>
    %469 = vector.multi_reduction <add>, %468, %cst_139 [1] : vector<8x16xf32> to vector<8xf32>
    %470 = vector.shape_cast %469 : vector<8xf32> to vector<8x1xf32>
    %471 = vector.broadcast %457 : vector<1x16xf32> to vector<8x16xf32>
    %472 = arith.mulf %93, %471 : vector<8x16xf32>
    %cst_140 = arith.constant dense<0.000000e+00> : vector<8xf32>
    %473 = vector.multi_reduction <add>, %472, %cst_140 [1] : vector<8x16xf32> to vector<8xf32>
    %474 = vector.shape_cast %473 : vector<8xf32> to vector<8x1xf32>
    %475 = vector.broadcast %466 : vector<1x64xf32> to vector<8x64xf32>
    %476 = arith.mulf %91, %475 : vector<8x64xf32>
    %cst_141 = arith.constant -2.000000e+01 : f32
    %477 = vector.broadcast %cst_141 : f32 to vector<8x64xf32>
    %478 = arith.maximumf %476, %477 : vector<8x64xf32>
    %cst_142 = arith.constant 0.000000e+00 : f32
    %479 = vector.shape_cast %23 : vector<8x1xi1> to vector<8x1xi1>
    %480 = vector.broadcast %479 : vector<8x1xi1> to vector<8x64xi1>
    %481 = vector.broadcast %cst_142 : f32 to vector<8x64xf32>
    %482 = arith.select %480, %481, %478 : vector<8x64xi1>, vector<8x64xf32>
    %c1_i32_143 = arith.constant 1 : i32
    %483 = vector.broadcast %c1_i32_143 : i32 to vector<8x1xi32>
    %484 = arith.cmpi sge, %21, %483 : vector<8x1xi32>
    %c1_i32_144 = arith.constant 1 : i32
    %485 = tpu.dynamic_rotate %482 by %c1_i32_144 dim 0 : vector<8x64xf32>, i32 -> vector<8x64xf32>
    %cst_145 = arith.constant 0.000000e+00 : f32
    %486 = vector.shape_cast %484 : vector<8x1xi1> to vector<8x1xi1>
    %487 = vector.broadcast %486 : vector<8x1xi1> to vector<8x64xi1>
    %488 = vector.broadcast %cst_145 : f32 to vector<8x64xf32>
    %489 = arith.select %487, %485, %488 : vector<8x64xi1>, vector<8x64xf32>
    %490 = arith.addf %482, %489 : vector<8x64xf32>
    %c2_i32_146 = arith.constant 2 : i32
    %491 = vector.broadcast %c2_i32_146 : i32 to vector<8x1xi32>
    %492 = arith.cmpi sge, %21, %491 : vector<8x1xi32>
    %c2_i32_147 = arith.constant 2 : i32
    %493 = tpu.dynamic_rotate %490 by %c2_i32_147 dim 0 : vector<8x64xf32>, i32 -> vector<8x64xf32>
    %cst_148 = arith.constant 0.000000e+00 : f32
    %494 = vector.shape_cast %492 : vector<8x1xi1> to vector<8x1xi1>
    %495 = vector.broadcast %494 : vector<8x1xi1> to vector<8x64xi1>
    %496 = vector.broadcast %cst_148 : f32 to vector<8x64xf32>
    %497 = arith.select %495, %493, %496 : vector<8x64xi1>, vector<8x64xf32>
    %498 = arith.addf %490, %497 : vector<8x64xf32>
    %c4_i32_149 = arith.constant 4 : i32
    %499 = vector.broadcast %c4_i32_149 : i32 to vector<8x1xi32>
    %500 = arith.cmpi sge, %21, %499 : vector<8x1xi32>
    %c4_i32_150 = arith.constant 4 : i32
    %501 = tpu.dynamic_rotate %498 by %c4_i32_150 dim 0 : vector<8x64xf32>, i32 -> vector<8x64xf32>
    %cst_151 = arith.constant 0.000000e+00 : f32
    %502 = vector.shape_cast %500 : vector<8x1xi1> to vector<8x1xi1>
    %503 = vector.broadcast %502 : vector<8x1xi1> to vector<8x64xi1>
    %504 = vector.broadcast %cst_151 : f32 to vector<8x64xf32>
    %505 = arith.select %503, %501, %504 : vector<8x64xi1>, vector<8x64xf32>
    %506 = arith.addf %498, %505 : vector<8x64xf32>
    %507 = math.exp %506 : vector<8x64xf32>
    %508 = vector.broadcast %470 : vector<8x1xf32> to vector<8x64xf32>
    %509 = arith.mulf %94, %508 : vector<8x64xf32>
    %cst_152 = arith.constant 9.99999996E-13 : f32
    %510 = vector.broadcast %cst_152 : f32 to vector<8x64xf32>
    %511 = arith.addf %507, %510 : vector<8x64xf32>
    %512 = tpu.reciprocal %511 : vector<8x64xf32> -> vector<8x64xf32>
    %513 = arith.mulf %509, %512 : vector<8x64xf32>
    %c1_i32_153 = arith.constant 1 : i32
    %514 = vector.broadcast %c1_i32_153 : i32 to vector<8x1xi32>
    %515 = arith.cmpi sge, %21, %514 : vector<8x1xi32>
    %c1_i32_154 = arith.constant 1 : i32
    %516 = tpu.dynamic_rotate %513 by %c1_i32_154 dim 0 : vector<8x64xf32>, i32 -> vector<8x64xf32>
    %cst_155 = arith.constant 0.000000e+00 : f32
    %517 = vector.shape_cast %515 : vector<8x1xi1> to vector<8x1xi1>
    %518 = vector.broadcast %517 : vector<8x1xi1> to vector<8x64xi1>
    %519 = vector.broadcast %cst_155 : f32 to vector<8x64xf32>
    %520 = arith.select %518, %516, %519 : vector<8x64xi1>, vector<8x64xf32>
    %521 = arith.addf %513, %520 : vector<8x64xf32>
    %c2_i32_156 = arith.constant 2 : i32
    %522 = vector.broadcast %c2_i32_156 : i32 to vector<8x1xi32>
    %523 = arith.cmpi sge, %21, %522 : vector<8x1xi32>
    %c2_i32_157 = arith.constant 2 : i32
    %524 = tpu.dynamic_rotate %521 by %c2_i32_157 dim 0 : vector<8x64xf32>, i32 -> vector<8x64xf32>
    %cst_158 = arith.constant 0.000000e+00 : f32
    %525 = vector.shape_cast %523 : vector<8x1xi1> to vector<8x1xi1>
    %526 = vector.broadcast %525 : vector<8x1xi1> to vector<8x64xi1>
    %527 = vector.broadcast %cst_158 : f32 to vector<8x64xf32>
    %528 = arith.select %526, %524, %527 : vector<8x64xi1>, vector<8x64xf32>
    %529 = arith.addf %521, %528 : vector<8x64xf32>
    %c4_i32_159 = arith.constant 4 : i32
    %530 = vector.broadcast %c4_i32_159 : i32 to vector<8x1xi32>
    %531 = arith.cmpi sge, %21, %530 : vector<8x1xi32>
    %c4_i32_160 = arith.constant 4 : i32
    %532 = tpu.dynamic_rotate %529 by %c4_i32_160 dim 0 : vector<8x64xf32>, i32 -> vector<8x64xf32>
    %cst_161 = arith.constant 0.000000e+00 : f32
    %533 = vector.shape_cast %531 : vector<8x1xi1> to vector<8x1xi1>
    %534 = vector.broadcast %533 : vector<8x1xi1> to vector<8x64xi1>
    %535 = vector.broadcast %cst_161 : f32 to vector<8x64xf32>
    %536 = arith.select %534, %532, %535 : vector<8x64xi1>, vector<8x64xf32>
    %537 = arith.addf %529, %536 : vector<8x64xf32>
    %538 = arith.mulf %537, %507 : vector<8x64xf32>
    %539 = vector.broadcast %474 : vector<8x1xf32> to vector<8x64xf32>
    %540 = arith.mulf %538, %539 : vector<8x64xf32>
    %541 = arith.addf %452, %540 : vector<8x64xf32>
    %c5_i32 = arith.constant 5 : i32
    %542 = tpu.iota {dimensions = array<i32: 1>} : vector<1x16xi32>
    %543 = vector.broadcast %c5_i32 : i32 to vector<1x16xi32>
    %544 = arith.cmpi eq, %542, %543 : vector<1x16xi32>
    %545 = arith.extui %544 : vector<1x16xi1> to vector<1x16xi32>
    %546 = arith.sitofp %545 : vector<1x16xi32> to vector<1x16xf32>
    %547 = tpu.iota {dimensions = array<i32: 0>} : vector<16x1xi32>
    %548 = vector.broadcast %c5_i32 : i32 to vector<16x1xi32>
    %549 = arith.cmpi eq, %547, %548 : vector<16x1xi32>
    %550 = arith.extui %549 : vector<16x1xi1> to vector<16x1xi32>
    %551 = arith.sitofp %550 : vector<16x1xi32> to vector<16x1xf32>
    %552 = vector.broadcast %551 : vector<16x1xf32> to vector<16x64xf32>
    %553 = arith.mulf %95, %552 : vector<16x64xf32>
    %cst_162 = arith.constant dense<0.000000e+00> : vector<64xf32>
    %554 = vector.multi_reduction <add>, %553, %cst_162 [0] : vector<16x64xf32> to vector<64xf32>
    %555 = vector.shape_cast %554 : vector<64xf32> to vector<1x64xf32>
    %556 = vector.broadcast %546 : vector<1x16xf32> to vector<8x16xf32>
    %557 = arith.mulf %92, %556 : vector<8x16xf32>
    %cst_163 = arith.constant dense<0.000000e+00> : vector<8xf32>
    %558 = vector.multi_reduction <add>, %557, %cst_163 [1] : vector<8x16xf32> to vector<8xf32>
    %559 = vector.shape_cast %558 : vector<8xf32> to vector<8x1xf32>
    %560 = vector.broadcast %546 : vector<1x16xf32> to vector<8x16xf32>
    %561 = arith.mulf %93, %560 : vector<8x16xf32>
    %cst_164 = arith.constant dense<0.000000e+00> : vector<8xf32>
    %562 = vector.multi_reduction <add>, %561, %cst_164 [1] : vector<8x16xf32> to vector<8xf32>
    %563 = vector.shape_cast %562 : vector<8xf32> to vector<8x1xf32>
    %564 = vector.broadcast %555 : vector<1x64xf32> to vector<8x64xf32>
    %565 = arith.mulf %91, %564 : vector<8x64xf32>
    %cst_165 = arith.constant -2.000000e+01 : f32
    %566 = vector.broadcast %cst_165 : f32 to vector<8x64xf32>
    %567 = arith.maximumf %565, %566 : vector<8x64xf32>
    %cst_166 = arith.constant 0.000000e+00 : f32
    %568 = vector.shape_cast %23 : vector<8x1xi1> to vector<8x1xi1>
    %569 = vector.broadcast %568 : vector<8x1xi1> to vector<8x64xi1>
    %570 = vector.broadcast %cst_166 : f32 to vector<8x64xf32>
    %571 = arith.select %569, %570, %567 : vector<8x64xi1>, vector<8x64xf32>
    %c1_i32_167 = arith.constant 1 : i32
    %572 = vector.broadcast %c1_i32_167 : i32 to vector<8x1xi32>
    %573 = arith.cmpi sge, %21, %572 : vector<8x1xi32>
    %c1_i32_168 = arith.constant 1 : i32
    %574 = tpu.dynamic_rotate %571 by %c1_i32_168 dim 0 : vector<8x64xf32>, i32 -> vector<8x64xf32>
    %cst_169 = arith.constant 0.000000e+00 : f32
    %575 = vector.shape_cast %573 : vector<8x1xi1> to vector<8x1xi1>
    %576 = vector.broadcast %575 : vector<8x1xi1> to vector<8x64xi1>
    %577 = vector.broadcast %cst_169 : f32 to vector<8x64xf32>
    %578 = arith.select %576, %574, %577 : vector<8x64xi1>, vector<8x64xf32>
    %579 = arith.addf %571, %578 : vector<8x64xf32>
    %c2_i32_170 = arith.constant 2 : i32
    %580 = vector.broadcast %c2_i32_170 : i32 to vector<8x1xi32>
    %581 = arith.cmpi sge, %21, %580 : vector<8x1xi32>
    %c2_i32_171 = arith.constant 2 : i32
    %582 = tpu.dynamic_rotate %579 by %c2_i32_171 dim 0 : vector<8x64xf32>, i32 -> vector<8x64xf32>
    %cst_172 = arith.constant 0.000000e+00 : f32
    %583 = vector.shape_cast %581 : vector<8x1xi1> to vector<8x1xi1>
    %584 = vector.broadcast %583 : vector<8x1xi1> to vector<8x64xi1>
    %585 = vector.broadcast %cst_172 : f32 to vector<8x64xf32>
    %586 = arith.select %584, %582, %585 : vector<8x64xi1>, vector<8x64xf32>
    %587 = arith.addf %579, %586 : vector<8x64xf32>
    %c4_i32_173 = arith.constant 4 : i32
    %588 = vector.broadcast %c4_i32_173 : i32 to vector<8x1xi32>
    %589 = arith.cmpi sge, %21, %588 : vector<8x1xi32>
    %c4_i32_174 = arith.constant 4 : i32
    %590 = tpu.dynamic_rotate %587 by %c4_i32_174 dim 0 : vector<8x64xf32>, i32 -> vector<8x64xf32>
    %cst_175 = arith.constant 0.000000e+00 : f32
    %591 = vector.shape_cast %589 : vector<8x1xi1> to vector<8x1xi1>
    %592 = vector.broadcast %591 : vector<8x1xi1> to vector<8x64xi1>
    %593 = vector.broadcast %cst_175 : f32 to vector<8x64xf32>
    %594 = arith.select %592, %590, %593 : vector<8x64xi1>, vector<8x64xf32>
    %595 = arith.addf %587, %594 : vector<8x64xf32>
    %596 = math.exp %595 : vector<8x64xf32>
    %597 = vector.broadcast %559 : vector<8x1xf32> to vector<8x64xf32>
    %598 = arith.mulf %94, %597 : vector<8x64xf32>
    %cst_176 = arith.constant 9.99999996E-13 : f32
    %599 = vector.broadcast %cst_176 : f32 to vector<8x64xf32>
    %600 = arith.addf %596, %599 : vector<8x64xf32>
    %601 = tpu.reciprocal %600 : vector<8x64xf32> -> vector<8x64xf32>
    %602 = arith.mulf %598, %601 : vector<8x64xf32>
    %c1_i32_177 = arith.constant 1 : i32
    %603 = vector.broadcast %c1_i32_177 : i32 to vector<8x1xi32>
    %604 = arith.cmpi sge, %21, %603 : vector<8x1xi32>
    %c1_i32_178 = arith.constant 1 : i32
    %605 = tpu.dynamic_rotate %602 by %c1_i32_178 dim 0 : vector<8x64xf32>, i32 -> vector<8x64xf32>
    %cst_179 = arith.constant 0.000000e+00 : f32
    %606 = vector.shape_cast %604 : vector<8x1xi1> to vector<8x1xi1>
    %607 = vector.broadcast %606 : vector<8x1xi1> to vector<8x64xi1>
    %608 = vector.broadcast %cst_179 : f32 to vector<8x64xf32>
    %609 = arith.select %607, %605, %608 : vector<8x64xi1>, vector<8x64xf32>
    %610 = arith.addf %602, %609 : vector<8x64xf32>
    %c2_i32_180 = arith.constant 2 : i32
    %611 = vector.broadcast %c2_i32_180 : i32 to vector<8x1xi32>
    %612 = arith.cmpi sge, %21, %611 : vector<8x1xi32>
    %c2_i32_181 = arith.constant 2 : i32
    %613 = tpu.dynamic_rotate %610 by %c2_i32_181 dim 0 : vector<8x64xf32>, i32 -> vector<8x64xf32>
    %cst_182 = arith.constant 0.000000e+00 : f32
    %614 = vector.shape_cast %612 : vector<8x1xi1> to vector<8x1xi1>
    %615 = vector.broadcast %614 : vector<8x1xi1> to vector<8x64xi1>
    %616 = vector.broadcast %cst_182 : f32 to vector<8x64xf32>
    %617 = arith.select %615, %613, %616 : vector<8x64xi1>, vector<8x64xf32>
    %618 = arith.addf %610, %617 : vector<8x64xf32>
    %c4_i32_183 = arith.constant 4 : i32
    %619 = vector.broadcast %c4_i32_183 : i32 to vector<8x1xi32>
    %620 = arith.cmpi sge, %21, %619 : vector<8x1xi32>
    %c4_i32_184 = arith.constant 4 : i32
    %621 = tpu.dynamic_rotate %618 by %c4_i32_184 dim 0 : vector<8x64xf32>, i32 -> vector<8x64xf32>
    %cst_185 = arith.constant 0.000000e+00 : f32
    %622 = vector.shape_cast %620 : vector<8x1xi1> to vector<8x1xi1>
    %623 = vector.broadcast %622 : vector<8x1xi1> to vector<8x64xi1>
    %624 = vector.broadcast %cst_185 : f32 to vector<8x64xf32>
    %625 = arith.select %623, %621, %624 : vector<8x64xi1>, vector<8x64xf32>
    %626 = arith.addf %618, %625 : vector<8x64xf32>
    %627 = arith.mulf %626, %596 : vector<8x64xf32>
    %628 = vector.broadcast %563 : vector<8x1xf32> to vector<8x64xf32>
    %629 = arith.mulf %627, %628 : vector<8x64xf32>
    %630 = arith.addf %541, %629 : vector<8x64xf32>
    %c6_i32 = arith.constant 6 : i32
    %631 = tpu.iota {dimensions = array<i32: 1>} : vector<1x16xi32>
    %632 = vector.broadcast %c6_i32 : i32 to vector<1x16xi32>
    %633 = arith.cmpi eq, %631, %632 : vector<1x16xi32>
    %634 = arith.extui %633 : vector<1x16xi1> to vector<1x16xi32>
    %635 = arith.sitofp %634 : vector<1x16xi32> to vector<1x16xf32>
    %636 = tpu.iota {dimensions = array<i32: 0>} : vector<16x1xi32>
    %637 = vector.broadcast %c6_i32 : i32 to vector<16x1xi32>
    %638 = arith.cmpi eq, %636, %637 : vector<16x1xi32>
    %639 = arith.extui %638 : vector<16x1xi1> to vector<16x1xi32>
    %640 = arith.sitofp %639 : vector<16x1xi32> to vector<16x1xf32>
    %641 = vector.broadcast %640 : vector<16x1xf32> to vector<16x64xf32>
    %642 = arith.mulf %95, %641 : vector<16x64xf32>
    %cst_186 = arith.constant dense<0.000000e+00> : vector<64xf32>
    %643 = vector.multi_reduction <add>, %642, %cst_186 [0] : vector<16x64xf32> to vector<64xf32>
    %644 = vector.shape_cast %643 : vector<64xf32> to vector<1x64xf32>
    %645 = vector.broadcast %635 : vector<1x16xf32> to vector<8x16xf32>
    %646 = arith.mulf %92, %645 : vector<8x16xf32>
    %cst_187 = arith.constant dense<0.000000e+00> : vector<8xf32>
    %647 = vector.multi_reduction <add>, %646, %cst_187 [1] : vector<8x16xf32> to vector<8xf32>
    %648 = vector.shape_cast %647 : vector<8xf32> to vector<8x1xf32>
    %649 = vector.broadcast %635 : vector<1x16xf32> to vector<8x16xf32>
    %650 = arith.mulf %93, %649 : vector<8x16xf32>
    %cst_188 = arith.constant dense<0.000000e+00> : vector<8xf32>
    %651 = vector.multi_reduction <add>, %650, %cst_188 [1] : vector<8x16xf32> to vector<8xf32>
    %652 = vector.shape_cast %651 : vector<8xf32> to vector<8x1xf32>
    %653 = vector.broadcast %644 : vector<1x64xf32> to vector<8x64xf32>
    %654 = arith.mulf %91, %653 : vector<8x64xf32>
    %cst_189 = arith.constant -2.000000e+01 : f32
    %655 = vector.broadcast %cst_189 : f32 to vector<8x64xf32>
    %656 = arith.maximumf %654, %655 : vector<8x64xf32>
    %cst_190 = arith.constant 0.000000e+00 : f32
    %657 = vector.shape_cast %23 : vector<8x1xi1> to vector<8x1xi1>
    %658 = vector.broadcast %657 : vector<8x1xi1> to vector<8x64xi1>
    %659 = vector.broadcast %cst_190 : f32 to vector<8x64xf32>
    %660 = arith.select %658, %659, %656 : vector<8x64xi1>, vector<8x64xf32>
    %c1_i32_191 = arith.constant 1 : i32
    %661 = vector.broadcast %c1_i32_191 : i32 to vector<8x1xi32>
    %662 = arith.cmpi sge, %21, %661 : vector<8x1xi32>
    %c1_i32_192 = arith.constant 1 : i32
    %663 = tpu.dynamic_rotate %660 by %c1_i32_192 dim 0 : vector<8x64xf32>, i32 -> vector<8x64xf32>
    %cst_193 = arith.constant 0.000000e+00 : f32
    %664 = vector.shape_cast %662 : vector<8x1xi1> to vector<8x1xi1>
    %665 = vector.broadcast %664 : vector<8x1xi1> to vector<8x64xi1>
    %666 = vector.broadcast %cst_193 : f32 to vector<8x64xf32>
    %667 = arith.select %665, %663, %666 : vector<8x64xi1>, vector<8x64xf32>
    %668 = arith.addf %660, %667 : vector<8x64xf32>
    %c2_i32_194 = arith.constant 2 : i32
    %669 = vector.broadcast %c2_i32_194 : i32 to vector<8x1xi32>
    %670 = arith.cmpi sge, %21, %669 : vector<8x1xi32>
    %c2_i32_195 = arith.constant 2 : i32
    %671 = tpu.dynamic_rotate %668 by %c2_i32_195 dim 0 : vector<8x64xf32>, i32 -> vector<8x64xf32>
    %cst_196 = arith.constant 0.000000e+00 : f32
    %672 = vector.shape_cast %670 : vector<8x1xi1> to vector<8x1xi1>
    %673 = vector.broadcast %672 : vector<8x1xi1> to vector<8x64xi1>
    %674 = vector.broadcast %cst_196 : f32 to vector<8x64xf32>
    %675 = arith.select %673, %671, %674 : vector<8x64xi1>, vector<8x64xf32>
    %676 = arith.addf %668, %675 : vector<8x64xf32>
    %c4_i32_197 = arith.constant 4 : i32
    %677 = vector.broadcast %c4_i32_197 : i32 to vector<8x1xi32>
    %678 = arith.cmpi sge, %21, %677 : vector<8x1xi32>
    %c4_i32_198 = arith.constant 4 : i32
    %679 = tpu.dynamic_rotate %676 by %c4_i32_198 dim 0 : vector<8x64xf32>, i32 -> vector<8x64xf32>
    %cst_199 = arith.constant 0.000000e+00 : f32
    %680 = vector.shape_cast %678 : vector<8x1xi1> to vector<8x1xi1>
    %681 = vector.broadcast %680 : vector<8x1xi1> to vector<8x64xi1>
    %682 = vector.broadcast %cst_199 : f32 to vector<8x64xf32>
    %683 = arith.select %681, %679, %682 : vector<8x64xi1>, vector<8x64xf32>
    %684 = arith.addf %676, %683 : vector<8x64xf32>
    %685 = math.exp %684 : vector<8x64xf32>
    %686 = vector.broadcast %648 : vector<8x1xf32> to vector<8x64xf32>
    %687 = arith.mulf %94, %686 : vector<8x64xf32>
    %cst_200 = arith.constant 9.99999996E-13 : f32
    %688 = vector.broadcast %cst_200 : f32 to vector<8x64xf32>
    %689 = arith.addf %685, %688 : vector<8x64xf32>
    %690 = tpu.reciprocal %689 : vector<8x64xf32> -> vector<8x64xf32>
    %691 = arith.mulf %687, %690 : vector<8x64xf32>
    %c1_i32_201 = arith.constant 1 : i32
    %692 = vector.broadcast %c1_i32_201 : i32 to vector<8x1xi32>
    %693 = arith.cmpi sge, %21, %692 : vector<8x1xi32>
    %c1_i32_202 = arith.constant 1 : i32
    %694 = tpu.dynamic_rotate %691 by %c1_i32_202 dim 0 : vector<8x64xf32>, i32 -> vector<8x64xf32>
    %cst_203 = arith.constant 0.000000e+00 : f32
    %695 = vector.shape_cast %693 : vector<8x1xi1> to vector<8x1xi1>
    %696 = vector.broadcast %695 : vector<8x1xi1> to vector<8x64xi1>
    %697 = vector.broadcast %cst_203 : f32 to vector<8x64xf32>
    %698 = arith.select %696, %694, %697 : vector<8x64xi1>, vector<8x64xf32>
    %699 = arith.addf %691, %698 : vector<8x64xf32>
    %c2_i32_204 = arith.constant 2 : i32
    %700 = vector.broadcast %c2_i32_204 : i32 to vector<8x1xi32>
    %701 = arith.cmpi sge, %21, %700 : vector<8x1xi32>
    %c2_i32_205 = arith.constant 2 : i32
    %702 = tpu.dynamic_rotate %699 by %c2_i32_205 dim 0 : vector<8x64xf32>, i32 -> vector<8x64xf32>
    %cst_206 = arith.constant 0.000000e+00 : f32
    %703 = vector.shape_cast %701 : vector<8x1xi1> to vector<8x1xi1>
    %704 = vector.broadcast %703 : vector<8x1xi1> to vector<8x64xi1>
    %705 = vector.broadcast %cst_206 : f32 to vector<8x64xf32>
    %706 = arith.select %704, %702, %705 : vector<8x64xi1>, vector<8x64xf32>
    %707 = arith.addf %699, %706 : vector<8x64xf32>
    %c4_i32_207 = arith.constant 4 : i32
    %708 = vector.broadcast %c4_i32_207 : i32 to vector<8x1xi32>
    %709 = arith.cmpi sge, %21, %708 : vector<8x1xi32>
    %c4_i32_208 = arith.constant 4 : i32
    %710 = tpu.dynamic_rotate %707 by %c4_i32_208 dim 0 : vector<8x64xf32>, i32 -> vector<8x64xf32>
    %cst_209 = arith.constant 0.000000e+00 : f32
    %711 = vector.shape_cast %709 : vector<8x1xi1> to vector<8x1xi1>
    %712 = vector.broadcast %711 : vector<8x1xi1> to vector<8x64xi1>
    %713 = vector.broadcast %cst_209 : f32 to vector<8x64xf32>
    %714 = arith.select %712, %710, %713 : vector<8x64xi1>, vector<8x64xf32>
    %715 = arith.addf %707, %714 : vector<8x64xf32>
    %716 = arith.mulf %715, %685 : vector<8x64xf32>
    %717 = vector.broadcast %652 : vector<8x1xf32> to vector<8x64xf32>
    %718 = arith.mulf %716, %717 : vector<8x64xf32>
    %719 = arith.addf %630, %718 : vector<8x64xf32>
    %c7_i32 = arith.constant 7 : i32
    %720 = tpu.iota {dimensions = array<i32: 1>} : vector<1x16xi32>
    %721 = vector.broadcast %c7_i32 : i32 to vector<1x16xi32>
    %722 = arith.cmpi eq, %720, %721 : vector<1x16xi32>
    %723 = arith.extui %722 : vector<1x16xi1> to vector<1x16xi32>
    %724 = arith.sitofp %723 : vector<1x16xi32> to vector<1x16xf32>
    %725 = tpu.iota {dimensions = array<i32: 0>} : vector<16x1xi32>
    %726 = vector.broadcast %c7_i32 : i32 to vector<16x1xi32>
    %727 = arith.cmpi eq, %725, %726 : vector<16x1xi32>
    %728 = arith.extui %727 : vector<16x1xi1> to vector<16x1xi32>
    %729 = arith.sitofp %728 : vector<16x1xi32> to vector<16x1xf32>
    %730 = vector.broadcast %729 : vector<16x1xf32> to vector<16x64xf32>
    %731 = arith.mulf %95, %730 : vector<16x64xf32>
    %cst_210 = arith.constant dense<0.000000e+00> : vector<64xf32>
    %732 = vector.multi_reduction <add>, %731, %cst_210 [0] : vector<16x64xf32> to vector<64xf32>
    %733 = vector.shape_cast %732 : vector<64xf32> to vector<1x64xf32>
    %734 = vector.broadcast %724 : vector<1x16xf32> to vector<8x16xf32>
    %735 = arith.mulf %92, %734 : vector<8x16xf32>
    %cst_211 = arith.constant dense<0.000000e+00> : vector<8xf32>
    %736 = vector.multi_reduction <add>, %735, %cst_211 [1] : vector<8x16xf32> to vector<8xf32>
    %737 = vector.shape_cast %736 : vector<8xf32> to vector<8x1xf32>
    %738 = vector.broadcast %724 : vector<1x16xf32> to vector<8x16xf32>
    %739 = arith.mulf %93, %738 : vector<8x16xf32>
    %cst_212 = arith.constant dense<0.000000e+00> : vector<8xf32>
    %740 = vector.multi_reduction <add>, %739, %cst_212 [1] : vector<8x16xf32> to vector<8xf32>
    %741 = vector.shape_cast %740 : vector<8xf32> to vector<8x1xf32>
    %742 = vector.broadcast %733 : vector<1x64xf32> to vector<8x64xf32>
    %743 = arith.mulf %91, %742 : vector<8x64xf32>
    %cst_213 = arith.constant -2.000000e+01 : f32
    %744 = vector.broadcast %cst_213 : f32 to vector<8x64xf32>
    %745 = arith.maximumf %743, %744 : vector<8x64xf32>
    %cst_214 = arith.constant 0.000000e+00 : f32
    %746 = vector.shape_cast %23 : vector<8x1xi1> to vector<8x1xi1>
    %747 = vector.broadcast %746 : vector<8x1xi1> to vector<8x64xi1>
    %748 = vector.broadcast %cst_214 : f32 to vector<8x64xf32>
    %749 = arith.select %747, %748, %745 : vector<8x64xi1>, vector<8x64xf32>
    %c1_i32_215 = arith.constant 1 : i32
    %750 = vector.broadcast %c1_i32_215 : i32 to vector<8x1xi32>
    %751 = arith.cmpi sge, %21, %750 : vector<8x1xi32>
    %c1_i32_216 = arith.constant 1 : i32
    %752 = tpu.dynamic_rotate %749 by %c1_i32_216 dim 0 : vector<8x64xf32>, i32 -> vector<8x64xf32>
    %cst_217 = arith.constant 0.000000e+00 : f32
    %753 = vector.shape_cast %751 : vector<8x1xi1> to vector<8x1xi1>
    %754 = vector.broadcast %753 : vector<8x1xi1> to vector<8x64xi1>
    %755 = vector.broadcast %cst_217 : f32 to vector<8x64xf32>
    %756 = arith.select %754, %752, %755 : vector<8x64xi1>, vector<8x64xf32>
    %757 = arith.addf %749, %756 : vector<8x64xf32>
    %c2_i32_218 = arith.constant 2 : i32
    %758 = vector.broadcast %c2_i32_218 : i32 to vector<8x1xi32>
    %759 = arith.cmpi sge, %21, %758 : vector<8x1xi32>
    %c2_i32_219 = arith.constant 2 : i32
    %760 = tpu.dynamic_rotate %757 by %c2_i32_219 dim 0 : vector<8x64xf32>, i32 -> vector<8x64xf32>
    %cst_220 = arith.constant 0.000000e+00 : f32
    %761 = vector.shape_cast %759 : vector<8x1xi1> to vector<8x1xi1>
    %762 = vector.broadcast %761 : vector<8x1xi1> to vector<8x64xi1>
    %763 = vector.broadcast %cst_220 : f32 to vector<8x64xf32>
    %764 = arith.select %762, %760, %763 : vector<8x64xi1>, vector<8x64xf32>
    %765 = arith.addf %757, %764 : vector<8x64xf32>
    %c4_i32_221 = arith.constant 4 : i32
    %766 = vector.broadcast %c4_i32_221 : i32 to vector<8x1xi32>
    %767 = arith.cmpi sge, %21, %766 : vector<8x1xi32>
    %c4_i32_222 = arith.constant 4 : i32
    %768 = tpu.dynamic_rotate %765 by %c4_i32_222 dim 0 : vector<8x64xf32>, i32 -> vector<8x64xf32>
    %cst_223 = arith.constant 0.000000e+00 : f32
    %769 = vector.shape_cast %767 : vector<8x1xi1> to vector<8x1xi1>
    %770 = vector.broadcast %769 : vector<8x1xi1> to vector<8x64xi1>
    %771 = vector.broadcast %cst_223 : f32 to vector<8x64xf32>
    %772 = arith.select %770, %768, %771 : vector<8x64xi1>, vector<8x64xf32>
    %773 = arith.addf %765, %772 : vector<8x64xf32>
    %774 = math.exp %773 : vector<8x64xf32>
    %775 = vector.broadcast %737 : vector<8x1xf32> to vector<8x64xf32>
    %776 = arith.mulf %94, %775 : vector<8x64xf32>
    %cst_224 = arith.constant 9.99999996E-13 : f32
    %777 = vector.broadcast %cst_224 : f32 to vector<8x64xf32>
    %778 = arith.addf %774, %777 : vector<8x64xf32>
    %779 = tpu.reciprocal %778 : vector<8x64xf32> -> vector<8x64xf32>
    %780 = arith.mulf %776, %779 : vector<8x64xf32>
    %c1_i32_225 = arith.constant 1 : i32
    %781 = vector.broadcast %c1_i32_225 : i32 to vector<8x1xi32>
    %782 = arith.cmpi sge, %21, %781 : vector<8x1xi32>
    %c1_i32_226 = arith.constant 1 : i32
    %783 = tpu.dynamic_rotate %780 by %c1_i32_226 dim 0 : vector<8x64xf32>, i32 -> vector<8x64xf32>
    %cst_227 = arith.constant 0.000000e+00 : f32
    %784 = vector.shape_cast %782 : vector<8x1xi1> to vector<8x1xi1>
    %785 = vector.broadcast %784 : vector<8x1xi1> to vector<8x64xi1>
    %786 = vector.broadcast %cst_227 : f32 to vector<8x64xf32>
    %787 = arith.select %785, %783, %786 : vector<8x64xi1>, vector<8x64xf32>
    %788 = arith.addf %780, %787 : vector<8x64xf32>
    %c2_i32_228 = arith.constant 2 : i32
    %789 = vector.broadcast %c2_i32_228 : i32 to vector<8x1xi32>
    %790 = arith.cmpi sge, %21, %789 : vector<8x1xi32>
    %c2_i32_229 = arith.constant 2 : i32
    %791 = tpu.dynamic_rotate %788 by %c2_i32_229 dim 0 : vector<8x64xf32>, i32 -> vector<8x64xf32>
    %cst_230 = arith.constant 0.000000e+00 : f32
    %792 = vector.shape_cast %790 : vector<8x1xi1> to vector<8x1xi1>
    %793 = vector.broadcast %792 : vector<8x1xi1> to vector<8x64xi1>
    %794 = vector.broadcast %cst_230 : f32 to vector<8x64xf32>
    %795 = arith.select %793, %791, %794 : vector<8x64xi1>, vector<8x64xf32>
    %796 = arith.addf %788, %795 : vector<8x64xf32>
    %c4_i32_231 = arith.constant 4 : i32
    %797 = vector.broadcast %c4_i32_231 : i32 to vector<8x1xi32>
    %798 = arith.cmpi sge, %21, %797 : vector<8x1xi32>
    %c4_i32_232 = arith.constant 4 : i32
    %799 = tpu.dynamic_rotate %796 by %c4_i32_232 dim 0 : vector<8x64xf32>, i32 -> vector<8x64xf32>
    %cst_233 = arith.constant 0.000000e+00 : f32
    %800 = vector.shape_cast %798 : vector<8x1xi1> to vector<8x1xi1>
    %801 = vector.broadcast %800 : vector<8x1xi1> to vector<8x64xi1>
    %802 = vector.broadcast %cst_233 : f32 to vector<8x64xf32>
    %803 = arith.select %801, %799, %802 : vector<8x64xi1>, vector<8x64xf32>
    %804 = arith.addf %796, %803 : vector<8x64xf32>
    %805 = arith.mulf %804, %774 : vector<8x64xf32>
    %806 = vector.broadcast %741 : vector<8x1xf32> to vector<8x64xf32>
    %807 = arith.mulf %805, %806 : vector<8x64xf32>
    %808 = arith.addf %719, %807 : vector<8x64xf32>
    %c8_i32_234 = arith.constant 8 : i32
    %809 = tpu.iota {dimensions = array<i32: 1>} : vector<1x16xi32>
    %810 = vector.broadcast %c8_i32_234 : i32 to vector<1x16xi32>
    %811 = arith.cmpi eq, %809, %810 : vector<1x16xi32>
    %812 = arith.extui %811 : vector<1x16xi1> to vector<1x16xi32>
    %813 = arith.sitofp %812 : vector<1x16xi32> to vector<1x16xf32>
    %814 = tpu.iota {dimensions = array<i32: 0>} : vector<16x1xi32>
    %815 = vector.broadcast %c8_i32_234 : i32 to vector<16x1xi32>
    %816 = arith.cmpi eq, %814, %815 : vector<16x1xi32>
    %817 = arith.extui %816 : vector<16x1xi1> to vector<16x1xi32>
    %818 = arith.sitofp %817 : vector<16x1xi32> to vector<16x1xf32>
    %819 = vector.broadcast %818 : vector<16x1xf32> to vector<16x64xf32>
    %820 = arith.mulf %95, %819 : vector<16x64xf32>
    %cst_235 = arith.constant dense<0.000000e+00> : vector<64xf32>
    %821 = vector.multi_reduction <add>, %820, %cst_235 [0] : vector<16x64xf32> to vector<64xf32>
    %822 = vector.shape_cast %821 : vector<64xf32> to vector<1x64xf32>
    %823 = vector.broadcast %813 : vector<1x16xf32> to vector<8x16xf32>
    %824 = arith.mulf %92, %823 : vector<8x16xf32>
    %cst_236 = arith.constant dense<0.000000e+00> : vector<8xf32>
    %825 = vector.multi_reduction <add>, %824, %cst_236 [1] : vector<8x16xf32> to vector<8xf32>
    %826 = vector.shape_cast %825 : vector<8xf32> to vector<8x1xf32>
    %827 = vector.broadcast %813 : vector<1x16xf32> to vector<8x16xf32>
    %828 = arith.mulf %93, %827 : vector<8x16xf32>
    %cst_237 = arith.constant dense<0.000000e+00> : vector<8xf32>
    %829 = vector.multi_reduction <add>, %828, %cst_237 [1] : vector<8x16xf32> to vector<8xf32>
    %830 = vector.shape_cast %829 : vector<8xf32> to vector<8x1xf32>
    %831 = vector.broadcast %822 : vector<1x64xf32> to vector<8x64xf32>
    %832 = arith.mulf %91, %831 : vector<8x64xf32>
    %cst_238 = arith.constant -2.000000e+01 : f32
    %833 = vector.broadcast %cst_238 : f32 to vector<8x64xf32>
    %834 = arith.maximumf %832, %833 : vector<8x64xf32>
    %cst_239 = arith.constant 0.000000e+00 : f32
    %835 = vector.shape_cast %23 : vector<8x1xi1> to vector<8x1xi1>
    %836 = vector.broadcast %835 : vector<8x1xi1> to vector<8x64xi1>
    %837 = vector.broadcast %cst_239 : f32 to vector<8x64xf32>
    %838 = arith.select %836, %837, %834 : vector<8x64xi1>, vector<8x64xf32>
    %c1_i32_240 = arith.constant 1 : i32
    %839 = vector.broadcast %c1_i32_240 : i32 to vector<8x1xi32>
    %840 = arith.cmpi sge, %21, %839 : vector<8x1xi32>
    %c1_i32_241 = arith.constant 1 : i32
    %841 = tpu.dynamic_rotate %838 by %c1_i32_241 dim 0 : vector<8x64xf32>, i32 -> vector<8x64xf32>
    %cst_242 = arith.constant 0.000000e+00 : f32
    %842 = vector.shape_cast %840 : vector<8x1xi1> to vector<8x1xi1>
    %843 = vector.broadcast %842 : vector<8x1xi1> to vector<8x64xi1>
    %844 = vector.broadcast %cst_242 : f32 to vector<8x64xf32>
    %845 = arith.select %843, %841, %844 : vector<8x64xi1>, vector<8x64xf32>
    %846 = arith.addf %838, %845 : vector<8x64xf32>
    %c2_i32_243 = arith.constant 2 : i32
    %847 = vector.broadcast %c2_i32_243 : i32 to vector<8x1xi32>
    %848 = arith.cmpi sge, %21, %847 : vector<8x1xi32>
    %c2_i32_244 = arith.constant 2 : i32
    %849 = tpu.dynamic_rotate %846 by %c2_i32_244 dim 0 : vector<8x64xf32>, i32 -> vector<8x64xf32>
    %cst_245 = arith.constant 0.000000e+00 : f32
    %850 = vector.shape_cast %848 : vector<8x1xi1> to vector<8x1xi1>
    %851 = vector.broadcast %850 : vector<8x1xi1> to vector<8x64xi1>
    %852 = vector.broadcast %cst_245 : f32 to vector<8x64xf32>
    %853 = arith.select %851, %849, %852 : vector<8x64xi1>, vector<8x64xf32>
    %854 = arith.addf %846, %853 : vector<8x64xf32>
    %c4_i32_246 = arith.constant 4 : i32
    %855 = vector.broadcast %c4_i32_246 : i32 to vector<8x1xi32>
    %856 = arith.cmpi sge, %21, %855 : vector<8x1xi32>
    %c4_i32_247 = arith.constant 4 : i32
    %857 = tpu.dynamic_rotate %854 by %c4_i32_247 dim 0 : vector<8x64xf32>, i32 -> vector<8x64xf32>
    %cst_248 = arith.constant 0.000000e+00 : f32
    %858 = vector.shape_cast %856 : vector<8x1xi1> to vector<8x1xi1>
    %859 = vector.broadcast %858 : vector<8x1xi1> to vector<8x64xi1>
    %860 = vector.broadcast %cst_248 : f32 to vector<8x64xf32>
    %861 = arith.select %859, %857, %860 : vector<8x64xi1>, vector<8x64xf32>
    %862 = arith.addf %854, %861 : vector<8x64xf32>
    %863 = math.exp %862 : vector<8x64xf32>
    %864 = vector.broadcast %826 : vector<8x1xf32> to vector<8x64xf32>
    %865 = arith.mulf %94, %864 : vector<8x64xf32>
    %cst_249 = arith.constant 9.99999996E-13 : f32
    %866 = vector.broadcast %cst_249 : f32 to vector<8x64xf32>
    %867 = arith.addf %863, %866 : vector<8x64xf32>
    %868 = tpu.reciprocal %867 : vector<8x64xf32> -> vector<8x64xf32>
    %869 = arith.mulf %865, %868 : vector<8x64xf32>
    %c1_i32_250 = arith.constant 1 : i32
    %870 = vector.broadcast %c1_i32_250 : i32 to vector<8x1xi32>
    %871 = arith.cmpi sge, %21, %870 : vector<8x1xi32>
    %c1_i32_251 = arith.constant 1 : i32
    %872 = tpu.dynamic_rotate %869 by %c1_i32_251 dim 0 : vector<8x64xf32>, i32 -> vector<8x64xf32>
    %cst_252 = arith.constant 0.000000e+00 : f32
    %873 = vector.shape_cast %871 : vector<8x1xi1> to vector<8x1xi1>
    %874 = vector.broadcast %873 : vector<8x1xi1> to vector<8x64xi1>
    %875 = vector.broadcast %cst_252 : f32 to vector<8x64xf32>
    %876 = arith.select %874, %872, %875 : vector<8x64xi1>, vector<8x64xf32>
    %877 = arith.addf %869, %876 : vector<8x64xf32>
    %c2_i32_253 = arith.constant 2 : i32
    %878 = vector.broadcast %c2_i32_253 : i32 to vector<8x1xi32>
    %879 = arith.cmpi sge, %21, %878 : vector<8x1xi32>
    %c2_i32_254 = arith.constant 2 : i32
    %880 = tpu.dynamic_rotate %877 by %c2_i32_254 dim 0 : vector<8x64xf32>, i32 -> vector<8x64xf32>
    %cst_255 = arith.constant 0.000000e+00 : f32
    %881 = vector.shape_cast %879 : vector<8x1xi1> to vector<8x1xi1>
    %882 = vector.broadcast %881 : vector<8x1xi1> to vector<8x64xi1>
    %883 = vector.broadcast %cst_255 : f32 to vector<8x64xf32>
    %884 = arith.select %882, %880, %883 : vector<8x64xi1>, vector<8x64xf32>
    %885 = arith.addf %877, %884 : vector<8x64xf32>
    %c4_i32_256 = arith.constant 4 : i32
    %886 = vector.broadcast %c4_i32_256 : i32 to vector<8x1xi32>
    %887 = arith.cmpi sge, %21, %886 : vector<8x1xi32>
    %c4_i32_257 = arith.constant 4 : i32
    %888 = tpu.dynamic_rotate %885 by %c4_i32_257 dim 0 : vector<8x64xf32>, i32 -> vector<8x64xf32>
    %cst_258 = arith.constant 0.000000e+00 : f32
    %889 = vector.shape_cast %887 : vector<8x1xi1> to vector<8x1xi1>
    %890 = vector.broadcast %889 : vector<8x1xi1> to vector<8x64xi1>
    %891 = vector.broadcast %cst_258 : f32 to vector<8x64xf32>
    %892 = arith.select %890, %888, %891 : vector<8x64xi1>, vector<8x64xf32>
    %893 = arith.addf %885, %892 : vector<8x64xf32>
    %894 = arith.mulf %893, %863 : vector<8x64xf32>
    %895 = vector.broadcast %830 : vector<8x1xf32> to vector<8x64xf32>
    %896 = arith.mulf %894, %895 : vector<8x64xf32>
    %897 = arith.addf %808, %896 : vector<8x64xf32>
    %c9_i32 = arith.constant 9 : i32
    %898 = tpu.iota {dimensions = array<i32: 1>} : vector<1x16xi32>
    %899 = vector.broadcast %c9_i32 : i32 to vector<1x16xi32>
    %900 = arith.cmpi eq, %898, %899 : vector<1x16xi32>
    %901 = arith.extui %900 : vector<1x16xi1> to vector<1x16xi32>
    %902 = arith.sitofp %901 : vector<1x16xi32> to vector<1x16xf32>
    %903 = tpu.iota {dimensions = array<i32: 0>} : vector<16x1xi32>
    %904 = vector.broadcast %c9_i32 : i32 to vector<16x1xi32>
    %905 = arith.cmpi eq, %903, %904 : vector<16x1xi32>
    %906 = arith.extui %905 : vector<16x1xi1> to vector<16x1xi32>
    %907 = arith.sitofp %906 : vector<16x1xi32> to vector<16x1xf32>
    %908 = vector.broadcast %907 : vector<16x1xf32> to vector<16x64xf32>
    %909 = arith.mulf %95, %908 : vector<16x64xf32>
    %cst_259 = arith.constant dense<0.000000e+00> : vector<64xf32>
    %910 = vector.multi_reduction <add>, %909, %cst_259 [0] : vector<16x64xf32> to vector<64xf32>
    %911 = vector.shape_cast %910 : vector<64xf32> to vector<1x64xf32>
    %912 = vector.broadcast %902 : vector<1x16xf32> to vector<8x16xf32>
    %913 = arith.mulf %92, %912 : vector<8x16xf32>
    %cst_260 = arith.constant dense<0.000000e+00> : vector<8xf32>
    %914 = vector.multi_reduction <add>, %913, %cst_260 [1] : vector<8x16xf32> to vector<8xf32>
    %915 = vector.shape_cast %914 : vector<8xf32> to vector<8x1xf32>
    %916 = vector.broadcast %902 : vector<1x16xf32> to vector<8x16xf32>
    %917 = arith.mulf %93, %916 : vector<8x16xf32>
    %cst_261 = arith.constant dense<0.000000e+00> : vector<8xf32>
    %918 = vector.multi_reduction <add>, %917, %cst_261 [1] : vector<8x16xf32> to vector<8xf32>
    %919 = vector.shape_cast %918 : vector<8xf32> to vector<8x1xf32>
    %920 = vector.broadcast %911 : vector<1x64xf32> to vector<8x64xf32>
    %921 = arith.mulf %91, %920 : vector<8x64xf32>
    %cst_262 = arith.constant -2.000000e+01 : f32
    %922 = vector.broadcast %cst_262 : f32 to vector<8x64xf32>
    %923 = arith.maximumf %921, %922 : vector<8x64xf32>
    %cst_263 = arith.constant 0.000000e+00 : f32
    %924 = vector.shape_cast %23 : vector<8x1xi1> to vector<8x1xi1>
    %925 = vector.broadcast %924 : vector<8x1xi1> to vector<8x64xi1>
    %926 = vector.broadcast %cst_263 : f32 to vector<8x64xf32>
    %927 = arith.select %925, %926, %923 : vector<8x64xi1>, vector<8x64xf32>
    %c1_i32_264 = arith.constant 1 : i32
    %928 = vector.broadcast %c1_i32_264 : i32 to vector<8x1xi32>
    %929 = arith.cmpi sge, %21, %928 : vector<8x1xi32>
    %c1_i32_265 = arith.constant 1 : i32
    %930 = tpu.dynamic_rotate %927 by %c1_i32_265 dim 0 : vector<8x64xf32>, i32 -> vector<8x64xf32>
    %cst_266 = arith.constant 0.000000e+00 : f32
    %931 = vector.shape_cast %929 : vector<8x1xi1> to vector<8x1xi1>
    %932 = vector.broadcast %931 : vector<8x1xi1> to vector<8x64xi1>
    %933 = vector.broadcast %cst_266 : f32 to vector<8x64xf32>
    %934 = arith.select %932, %930, %933 : vector<8x64xi1>, vector<8x64xf32>
    %935 = arith.addf %927, %934 : vector<8x64xf32>
    %c2_i32_267 = arith.constant 2 : i32
    %936 = vector.broadcast %c2_i32_267 : i32 to vector<8x1xi32>
    %937 = arith.cmpi sge, %21, %936 : vector<8x1xi32>
    %c2_i32_268 = arith.constant 2 : i32
    %938 = tpu.dynamic_rotate %935 by %c2_i32_268 dim 0 : vector<8x64xf32>, i32 -> vector<8x64xf32>
    %cst_269 = arith.constant 0.000000e+00 : f32
    %939 = vector.shape_cast %937 : vector<8x1xi1> to vector<8x1xi1>
    %940 = vector.broadcast %939 : vector<8x1xi1> to vector<8x64xi1>
    %941 = vector.broadcast %cst_269 : f32 to vector<8x64xf32>
    %942 = arith.select %940, %938, %941 : vector<8x64xi1>, vector<8x64xf32>
    %943 = arith.addf %935, %942 : vector<8x64xf32>
    %c4_i32_270 = arith.constant 4 : i32
    %944 = vector.broadcast %c4_i32_270 : i32 to vector<8x1xi32>
    %945 = arith.cmpi sge, %21, %944 : vector<8x1xi32>
    %c4_i32_271 = arith.constant 4 : i32
    %946 = tpu.dynamic_rotate %943 by %c4_i32_271 dim 0 : vector<8x64xf32>, i32 -> vector<8x64xf32>
    %cst_272 = arith.constant 0.000000e+00 : f32
    %947 = vector.shape_cast %945 : vector<8x1xi1> to vector<8x1xi1>
    %948 = vector.broadcast %947 : vector<8x1xi1> to vector<8x64xi1>
    %949 = vector.broadcast %cst_272 : f32 to vector<8x64xf32>
    %950 = arith.select %948, %946, %949 : vector<8x64xi1>, vector<8x64xf32>
    %951 = arith.addf %943, %950 : vector<8x64xf32>
    %952 = math.exp %951 : vector<8x64xf32>
    %953 = vector.broadcast %915 : vector<8x1xf32> to vector<8x64xf32>
    %954 = arith.mulf %94, %953 : vector<8x64xf32>
    %cst_273 = arith.constant 9.99999996E-13 : f32
    %955 = vector.broadcast %cst_273 : f32 to vector<8x64xf32>
    %956 = arith.addf %952, %955 : vector<8x64xf32>
    %957 = tpu.reciprocal %956 : vector<8x64xf32> -> vector<8x64xf32>
    %958 = arith.mulf %954, %957 : vector<8x64xf32>
    %c1_i32_274 = arith.constant 1 : i32
    %959 = vector.broadcast %c1_i32_274 : i32 to vector<8x1xi32>
    %960 = arith.cmpi sge, %21, %959 : vector<8x1xi32>
    %c1_i32_275 = arith.constant 1 : i32
    %961 = tpu.dynamic_rotate %958 by %c1_i32_275 dim 0 : vector<8x64xf32>, i32 -> vector<8x64xf32>
    %cst_276 = arith.constant 0.000000e+00 : f32
    %962 = vector.shape_cast %960 : vector<8x1xi1> to vector<8x1xi1>
    %963 = vector.broadcast %962 : vector<8x1xi1> to vector<8x64xi1>
    %964 = vector.broadcast %cst_276 : f32 to vector<8x64xf32>
    %965 = arith.select %963, %961, %964 : vector<8x64xi1>, vector<8x64xf32>
    %966 = arith.addf %958, %965 : vector<8x64xf32>
    %c2_i32_277 = arith.constant 2 : i32
    %967 = vector.broadcast %c2_i32_277 : i32 to vector<8x1xi32>
    %968 = arith.cmpi sge, %21, %967 : vector<8x1xi32>
    %c2_i32_278 = arith.constant 2 : i32
    %969 = tpu.dynamic_rotate %966 by %c2_i32_278 dim 0 : vector<8x64xf32>, i32 -> vector<8x64xf32>
    %cst_279 = arith.constant 0.000000e+00 : f32
    %970 = vector.shape_cast %968 : vector<8x1xi1> to vector<8x1xi1>
    %971 = vector.broadcast %970 : vector<8x1xi1> to vector<8x64xi1>
    %972 = vector.broadcast %cst_279 : f32 to vector<8x64xf32>
    %973 = arith.select %971, %969, %972 : vector<8x64xi1>, vector<8x64xf32>
    %974 = arith.addf %966, %973 : vector<8x64xf32>
    %c4_i32_280 = arith.constant 4 : i32
    %975 = vector.broadcast %c4_i32_280 : i32 to vector<8x1xi32>
    %976 = arith.cmpi sge, %21, %975 : vector<8x1xi32>
    %c4_i32_281 = arith.constant 4 : i32
    %977 = tpu.dynamic_rotate %974 by %c4_i32_281 dim 0 : vector<8x64xf32>, i32 -> vector<8x64xf32>
    %cst_282 = arith.constant 0.000000e+00 : f32
    %978 = vector.shape_cast %976 : vector<8x1xi1> to vector<8x1xi1>
    %979 = vector.broadcast %978 : vector<8x1xi1> to vector<8x64xi1>
    %980 = vector.broadcast %cst_282 : f32 to vector<8x64xf32>
    %981 = arith.select %979, %977, %980 : vector<8x64xi1>, vector<8x64xf32>
    %982 = arith.addf %974, %981 : vector<8x64xf32>
    %983 = arith.mulf %982, %952 : vector<8x64xf32>
    %984 = vector.broadcast %919 : vector<8x1xf32> to vector<8x64xf32>
    %985 = arith.mulf %983, %984 : vector<8x64xf32>
    %986 = arith.addf %897, %985 : vector<8x64xf32>
    %c10_i32 = arith.constant 10 : i32
    %987 = tpu.iota {dimensions = array<i32: 1>} : vector<1x16xi32>
    %988 = vector.broadcast %c10_i32 : i32 to vector<1x16xi32>
    %989 = arith.cmpi eq, %987, %988 : vector<1x16xi32>
    %990 = arith.extui %989 : vector<1x16xi1> to vector<1x16xi32>
    %991 = arith.sitofp %990 : vector<1x16xi32> to vector<1x16xf32>
    %992 = tpu.iota {dimensions = array<i32: 0>} : vector<16x1xi32>
    %993 = vector.broadcast %c10_i32 : i32 to vector<16x1xi32>
    %994 = arith.cmpi eq, %992, %993 : vector<16x1xi32>
    %995 = arith.extui %994 : vector<16x1xi1> to vector<16x1xi32>
    %996 = arith.sitofp %995 : vector<16x1xi32> to vector<16x1xf32>
    %997 = vector.broadcast %996 : vector<16x1xf32> to vector<16x64xf32>
    %998 = arith.mulf %95, %997 : vector<16x64xf32>
    %cst_283 = arith.constant dense<0.000000e+00> : vector<64xf32>
    %999 = vector.multi_reduction <add>, %998, %cst_283 [0] : vector<16x64xf32> to vector<64xf32>
    %1000 = vector.shape_cast %999 : vector<64xf32> to vector<1x64xf32>
    %1001 = vector.broadcast %991 : vector<1x16xf32> to vector<8x16xf32>
    %1002 = arith.mulf %92, %1001 : vector<8x16xf32>
    %cst_284 = arith.constant dense<0.000000e+00> : vector<8xf32>
    %1003 = vector.multi_reduction <add>, %1002, %cst_284 [1] : vector<8x16xf32> to vector<8xf32>
    %1004 = vector.shape_cast %1003 : vector<8xf32> to vector<8x1xf32>
    %1005 = vector.broadcast %991 : vector<1x16xf32> to vector<8x16xf32>
    %1006 = arith.mulf %93, %1005 : vector<8x16xf32>
    %cst_285 = arith.constant dense<0.000000e+00> : vector<8xf32>
    %1007 = vector.multi_reduction <add>, %1006, %cst_285 [1] : vector<8x16xf32> to vector<8xf32>
    %1008 = vector.shape_cast %1007 : vector<8xf32> to vector<8x1xf32>
    %1009 = vector.broadcast %1000 : vector<1x64xf32> to vector<8x64xf32>
    %1010 = arith.mulf %91, %1009 : vector<8x64xf32>
    %cst_286 = arith.constant -2.000000e+01 : f32
    %1011 = vector.broadcast %cst_286 : f32 to vector<8x64xf32>
    %1012 = arith.maximumf %1010, %1011 : vector<8x64xf32>
    %cst_287 = arith.constant 0.000000e+00 : f32
    %1013 = vector.shape_cast %23 : vector<8x1xi1> to vector<8x1xi1>
    %1014 = vector.broadcast %1013 : vector<8x1xi1> to vector<8x64xi1>
    %1015 = vector.broadcast %cst_287 : f32 to vector<8x64xf32>
    %1016 = arith.select %1014, %1015, %1012 : vector<8x64xi1>, vector<8x64xf32>
    %c1_i32_288 = arith.constant 1 : i32
    %1017 = vector.broadcast %c1_i32_288 : i32 to vector<8x1xi32>
    %1018 = arith.cmpi sge, %21, %1017 : vector<8x1xi32>
    %c1_i32_289 = arith.constant 1 : i32
    %1019 = tpu.dynamic_rotate %1016 by %c1_i32_289 dim 0 : vector<8x64xf32>, i32 -> vector<8x64xf32>
    %cst_290 = arith.constant 0.000000e+00 : f32
    %1020 = vector.shape_cast %1018 : vector<8x1xi1> to vector<8x1xi1>
    %1021 = vector.broadcast %1020 : vector<8x1xi1> to vector<8x64xi1>
    %1022 = vector.broadcast %cst_290 : f32 to vector<8x64xf32>
    %1023 = arith.select %1021, %1019, %1022 : vector<8x64xi1>, vector<8x64xf32>
    %1024 = arith.addf %1016, %1023 : vector<8x64xf32>
    %c2_i32_291 = arith.constant 2 : i32
    %1025 = vector.broadcast %c2_i32_291 : i32 to vector<8x1xi32>
    %1026 = arith.cmpi sge, %21, %1025 : vector<8x1xi32>
    %c2_i32_292 = arith.constant 2 : i32
    %1027 = tpu.dynamic_rotate %1024 by %c2_i32_292 dim 0 : vector<8x64xf32>, i32 -> vector<8x64xf32>
    %cst_293 = arith.constant 0.000000e+00 : f32
    %1028 = vector.shape_cast %1026 : vector<8x1xi1> to vector<8x1xi1>
    %1029 = vector.broadcast %1028 : vector<8x1xi1> to vector<8x64xi1>
    %1030 = vector.broadcast %cst_293 : f32 to vector<8x64xf32>
    %1031 = arith.select %1029, %1027, %1030 : vector<8x64xi1>, vector<8x64xf32>
    %1032 = arith.addf %1024, %1031 : vector<8x64xf32>
    %c4_i32_294 = arith.constant 4 : i32
    %1033 = vector.broadcast %c4_i32_294 : i32 to vector<8x1xi32>
    %1034 = arith.cmpi sge, %21, %1033 : vector<8x1xi32>
    %c4_i32_295 = arith.constant 4 : i32
    %1035 = tpu.dynamic_rotate %1032 by %c4_i32_295 dim 0 : vector<8x64xf32>, i32 -> vector<8x64xf32>
    %cst_296 = arith.constant 0.000000e+00 : f32
    %1036 = vector.shape_cast %1034 : vector<8x1xi1> to vector<8x1xi1>
    %1037 = vector.broadcast %1036 : vector<8x1xi1> to vector<8x64xi1>
    %1038 = vector.broadcast %cst_296 : f32 to vector<8x64xf32>
    %1039 = arith.select %1037, %1035, %1038 : vector<8x64xi1>, vector<8x64xf32>
    %1040 = arith.addf %1032, %1039 : vector<8x64xf32>
    %1041 = math.exp %1040 : vector<8x64xf32>
    %1042 = vector.broadcast %1004 : vector<8x1xf32> to vector<8x64xf32>
    %1043 = arith.mulf %94, %1042 : vector<8x64xf32>
    %cst_297 = arith.constant 9.99999996E-13 : f32
    %1044 = vector.broadcast %cst_297 : f32 to vector<8x64xf32>
    %1045 = arith.addf %1041, %1044 : vector<8x64xf32>
    %1046 = tpu.reciprocal %1045 : vector<8x64xf32> -> vector<8x64xf32>
    %1047 = arith.mulf %1043, %1046 : vector<8x64xf32>
    %c1_i32_298 = arith.constant 1 : i32
    %1048 = vector.broadcast %c1_i32_298 : i32 to vector<8x1xi32>
    %1049 = arith.cmpi sge, %21, %1048 : vector<8x1xi32>
    %c1_i32_299 = arith.constant 1 : i32
    %1050 = tpu.dynamic_rotate %1047 by %c1_i32_299 dim 0 : vector<8x64xf32>, i32 -> vector<8x64xf32>
    %cst_300 = arith.constant 0.000000e+00 : f32
    %1051 = vector.shape_cast %1049 : vector<8x1xi1> to vector<8x1xi1>
    %1052 = vector.broadcast %1051 : vector<8x1xi1> to vector<8x64xi1>
    %1053 = vector.broadcast %cst_300 : f32 to vector<8x64xf32>
    %1054 = arith.select %1052, %1050, %1053 : vector<8x64xi1>, vector<8x64xf32>
    %1055 = arith.addf %1047, %1054 : vector<8x64xf32>
    %c2_i32_301 = arith.constant 2 : i32
    %1056 = vector.broadcast %c2_i32_301 : i32 to vector<8x1xi32>
    %1057 = arith.cmpi sge, %21, %1056 : vector<8x1xi32>
    %c2_i32_302 = arith.constant 2 : i32
    %1058 = tpu.dynamic_rotate %1055 by %c2_i32_302 dim 0 : vector<8x64xf32>, i32 -> vector<8x64xf32>
    %cst_303 = arith.constant 0.000000e+00 : f32
    %1059 = vector.shape_cast %1057 : vector<8x1xi1> to vector<8x1xi1>
    %1060 = vector.broadcast %1059 : vector<8x1xi1> to vector<8x64xi1>
    %1061 = vector.broadcast %cst_303 : f32 to vector<8x64xf32>
    %1062 = arith.select %1060, %1058, %1061 : vector<8x64xi1>, vector<8x64xf32>
    %1063 = arith.addf %1055, %1062 : vector<8x64xf32>
    %c4_i32_304 = arith.constant 4 : i32
    %1064 = vector.broadcast %c4_i32_304 : i32 to vector<8x1xi32>
    %1065 = arith.cmpi sge, %21, %1064 : vector<8x1xi32>
    %c4_i32_305 = arith.constant 4 : i32
    %1066 = tpu.dynamic_rotate %1063 by %c4_i32_305 dim 0 : vector<8x64xf32>, i32 -> vector<8x64xf32>
    %cst_306 = arith.constant 0.000000e+00 : f32
    %1067 = vector.shape_cast %1065 : vector<8x1xi1> to vector<8x1xi1>
    %1068 = vector.broadcast %1067 : vector<8x1xi1> to vector<8x64xi1>
    %1069 = vector.broadcast %cst_306 : f32 to vector<8x64xf32>
    %1070 = arith.select %1068, %1066, %1069 : vector<8x64xi1>, vector<8x64xf32>
    %1071 = arith.addf %1063, %1070 : vector<8x64xf32>
    %1072 = arith.mulf %1071, %1041 : vector<8x64xf32>
    %1073 = vector.broadcast %1008 : vector<8x1xf32> to vector<8x64xf32>
    %1074 = arith.mulf %1072, %1073 : vector<8x64xf32>
    %1075 = arith.addf %986, %1074 : vector<8x64xf32>
    %c11_i32 = arith.constant 11 : i32
    %1076 = tpu.iota {dimensions = array<i32: 1>} : vector<1x16xi32>
    %1077 = vector.broadcast %c11_i32 : i32 to vector<1x16xi32>
    %1078 = arith.cmpi eq, %1076, %1077 : vector<1x16xi32>
    %1079 = arith.extui %1078 : vector<1x16xi1> to vector<1x16xi32>
    %1080 = arith.sitofp %1079 : vector<1x16xi32> to vector<1x16xf32>
    %1081 = tpu.iota {dimensions = array<i32: 0>} : vector<16x1xi32>
    %1082 = vector.broadcast %c11_i32 : i32 to vector<16x1xi32>
    %1083 = arith.cmpi eq, %1081, %1082 : vector<16x1xi32>
    %1084 = arith.extui %1083 : vector<16x1xi1> to vector<16x1xi32>
    %1085 = arith.sitofp %1084 : vector<16x1xi32> to vector<16x1xf32>
    %1086 = vector.broadcast %1085 : vector<16x1xf32> to vector<16x64xf32>
    %1087 = arith.mulf %95, %1086 : vector<16x64xf32>
    %cst_307 = arith.constant dense<0.000000e+00> : vector<64xf32>
    %1088 = vector.multi_reduction <add>, %1087, %cst_307 [0] : vector<16x64xf32> to vector<64xf32>
    %1089 = vector.shape_cast %1088 : vector<64xf32> to vector<1x64xf32>
    %1090 = vector.broadcast %1080 : vector<1x16xf32> to vector<8x16xf32>
    %1091 = arith.mulf %92, %1090 : vector<8x16xf32>
    %cst_308 = arith.constant dense<0.000000e+00> : vector<8xf32>
    %1092 = vector.multi_reduction <add>, %1091, %cst_308 [1] : vector<8x16xf32> to vector<8xf32>
    %1093 = vector.shape_cast %1092 : vector<8xf32> to vector<8x1xf32>
    %1094 = vector.broadcast %1080 : vector<1x16xf32> to vector<8x16xf32>
    %1095 = arith.mulf %93, %1094 : vector<8x16xf32>
    %cst_309 = arith.constant dense<0.000000e+00> : vector<8xf32>
    %1096 = vector.multi_reduction <add>, %1095, %cst_309 [1] : vector<8x16xf32> to vector<8xf32>
    %1097 = vector.shape_cast %1096 : vector<8xf32> to vector<8x1xf32>
    %1098 = vector.broadcast %1089 : vector<1x64xf32> to vector<8x64xf32>
    %1099 = arith.mulf %91, %1098 : vector<8x64xf32>
    %cst_310 = arith.constant -2.000000e+01 : f32
    %1100 = vector.broadcast %cst_310 : f32 to vector<8x64xf32>
    %1101 = arith.maximumf %1099, %1100 : vector<8x64xf32>
    %cst_311 = arith.constant 0.000000e+00 : f32
    %1102 = vector.shape_cast %23 : vector<8x1xi1> to vector<8x1xi1>
    %1103 = vector.broadcast %1102 : vector<8x1xi1> to vector<8x64xi1>
    %1104 = vector.broadcast %cst_311 : f32 to vector<8x64xf32>
    %1105 = arith.select %1103, %1104, %1101 : vector<8x64xi1>, vector<8x64xf32>
    %c1_i32_312 = arith.constant 1 : i32
    %1106 = vector.broadcast %c1_i32_312 : i32 to vector<8x1xi32>
    %1107 = arith.cmpi sge, %21, %1106 : vector<8x1xi32>
    %c1_i32_313 = arith.constant 1 : i32
    %1108 = tpu.dynamic_rotate %1105 by %c1_i32_313 dim 0 : vector<8x64xf32>, i32 -> vector<8x64xf32>
    %cst_314 = arith.constant 0.000000e+00 : f32
    %1109 = vector.shape_cast %1107 : vector<8x1xi1> to vector<8x1xi1>
    %1110 = vector.broadcast %1109 : vector<8x1xi1> to vector<8x64xi1>
    %1111 = vector.broadcast %cst_314 : f32 to vector<8x64xf32>
    %1112 = arith.select %1110, %1108, %1111 : vector<8x64xi1>, vector<8x64xf32>
    %1113 = arith.addf %1105, %1112 : vector<8x64xf32>
    %c2_i32_315 = arith.constant 2 : i32
    %1114 = vector.broadcast %c2_i32_315 : i32 to vector<8x1xi32>
    %1115 = arith.cmpi sge, %21, %1114 : vector<8x1xi32>
    %c2_i32_316 = arith.constant 2 : i32
    %1116 = tpu.dynamic_rotate %1113 by %c2_i32_316 dim 0 : vector<8x64xf32>, i32 -> vector<8x64xf32>
    %cst_317 = arith.constant 0.000000e+00 : f32
    %1117 = vector.shape_cast %1115 : vector<8x1xi1> to vector<8x1xi1>
    %1118 = vector.broadcast %1117 : vector<8x1xi1> to vector<8x64xi1>
    %1119 = vector.broadcast %cst_317 : f32 to vector<8x64xf32>
    %1120 = arith.select %1118, %1116, %1119 : vector<8x64xi1>, vector<8x64xf32>
    %1121 = arith.addf %1113, %1120 : vector<8x64xf32>
    %c4_i32_318 = arith.constant 4 : i32
    %1122 = vector.broadcast %c4_i32_318 : i32 to vector<8x1xi32>
    %1123 = arith.cmpi sge, %21, %1122 : vector<8x1xi32>
    %c4_i32_319 = arith.constant 4 : i32
    %1124 = tpu.dynamic_rotate %1121 by %c4_i32_319 dim 0 : vector<8x64xf32>, i32 -> vector<8x64xf32>
    %cst_320 = arith.constant 0.000000e+00 : f32
    %1125 = vector.shape_cast %1123 : vector<8x1xi1> to vector<8x1xi1>
    %1126 = vector.broadcast %1125 : vector<8x1xi1> to vector<8x64xi1>
    %1127 = vector.broadcast %cst_320 : f32 to vector<8x64xf32>
    %1128 = arith.select %1126, %1124, %1127 : vector<8x64xi1>, vector<8x64xf32>
    %1129 = arith.addf %1121, %1128 : vector<8x64xf32>
    %1130 = math.exp %1129 : vector<8x64xf32>
    %1131 = vector.broadcast %1093 : vector<8x1xf32> to vector<8x64xf32>
    %1132 = arith.mulf %94, %1131 : vector<8x64xf32>
    %cst_321 = arith.constant 9.99999996E-13 : f32
    %1133 = vector.broadcast %cst_321 : f32 to vector<8x64xf32>
    %1134 = arith.addf %1130, %1133 : vector<8x64xf32>
    %1135 = tpu.reciprocal %1134 : vector<8x64xf32> -> vector<8x64xf32>
    %1136 = arith.mulf %1132, %1135 : vector<8x64xf32>
    %c1_i32_322 = arith.constant 1 : i32
    %1137 = vector.broadcast %c1_i32_322 : i32 to vector<8x1xi32>
    %1138 = arith.cmpi sge, %21, %1137 : vector<8x1xi32>
    %c1_i32_323 = arith.constant 1 : i32
    %1139 = tpu.dynamic_rotate %1136 by %c1_i32_323 dim 0 : vector<8x64xf32>, i32 -> vector<8x64xf32>
    %cst_324 = arith.constant 0.000000e+00 : f32
    %1140 = vector.shape_cast %1138 : vector<8x1xi1> to vector<8x1xi1>
    %1141 = vector.broadcast %1140 : vector<8x1xi1> to vector<8x64xi1>
    %1142 = vector.broadcast %cst_324 : f32 to vector<8x64xf32>
    %1143 = arith.select %1141, %1139, %1142 : vector<8x64xi1>, vector<8x64xf32>
    %1144 = arith.addf %1136, %1143 : vector<8x64xf32>
    %c2_i32_325 = arith.constant 2 : i32
    %1145 = vector.broadcast %c2_i32_325 : i32 to vector<8x1xi32>
    %1146 = arith.cmpi sge, %21, %1145 : vector<8x1xi32>
    %c2_i32_326 = arith.constant 2 : i32
    %1147 = tpu.dynamic_rotate %1144 by %c2_i32_326 dim 0 : vector<8x64xf32>, i32 -> vector<8x64xf32>
    %cst_327 = arith.constant 0.000000e+00 : f32
    %1148 = vector.shape_cast %1146 : vector<8x1xi1> to vector<8x1xi1>
    %1149 = vector.broadcast %1148 : vector<8x1xi1> to vector<8x64xi1>
    %1150 = vector.broadcast %cst_327 : f32 to vector<8x64xf32>
    %1151 = arith.select %1149, %1147, %1150 : vector<8x64xi1>, vector<8x64xf32>
    %1152 = arith.addf %1144, %1151 : vector<8x64xf32>
    %c4_i32_328 = arith.constant 4 : i32
    %1153 = vector.broadcast %c4_i32_328 : i32 to vector<8x1xi32>
    %1154 = arith.cmpi sge, %21, %1153 : vector<8x1xi32>
    %c4_i32_329 = arith.constant 4 : i32
    %1155 = tpu.dynamic_rotate %1152 by %c4_i32_329 dim 0 : vector<8x64xf32>, i32 -> vector<8x64xf32>
    %cst_330 = arith.constant 0.000000e+00 : f32
    %1156 = vector.shape_cast %1154 : vector<8x1xi1> to vector<8x1xi1>
    %1157 = vector.broadcast %1156 : vector<8x1xi1> to vector<8x64xi1>
    %1158 = vector.broadcast %cst_330 : f32 to vector<8x64xf32>
    %1159 = arith.select %1157, %1155, %1158 : vector<8x64xi1>, vector<8x64xf32>
    %1160 = arith.addf %1152, %1159 : vector<8x64xf32>
    %1161 = arith.mulf %1160, %1130 : vector<8x64xf32>
    %1162 = vector.broadcast %1097 : vector<8x1xf32> to vector<8x64xf32>
    %1163 = arith.mulf %1161, %1162 : vector<8x64xf32>
    %1164 = arith.addf %1075, %1163 : vector<8x64xf32>
    %c12_i32 = arith.constant 12 : i32
    %1165 = tpu.iota {dimensions = array<i32: 1>} : vector<1x16xi32>
    %1166 = vector.broadcast %c12_i32 : i32 to vector<1x16xi32>
    %1167 = arith.cmpi eq, %1165, %1166 : vector<1x16xi32>
    %1168 = arith.extui %1167 : vector<1x16xi1> to vector<1x16xi32>
    %1169 = arith.sitofp %1168 : vector<1x16xi32> to vector<1x16xf32>
    %1170 = tpu.iota {dimensions = array<i32: 0>} : vector<16x1xi32>
    %1171 = vector.broadcast %c12_i32 : i32 to vector<16x1xi32>
    %1172 = arith.cmpi eq, %1170, %1171 : vector<16x1xi32>
    %1173 = arith.extui %1172 : vector<16x1xi1> to vector<16x1xi32>
    %1174 = arith.sitofp %1173 : vector<16x1xi32> to vector<16x1xf32>
    %1175 = vector.broadcast %1174 : vector<16x1xf32> to vector<16x64xf32>
    %1176 = arith.mulf %95, %1175 : vector<16x64xf32>
    %cst_331 = arith.constant dense<0.000000e+00> : vector<64xf32>
    %1177 = vector.multi_reduction <add>, %1176, %cst_331 [0] : vector<16x64xf32> to vector<64xf32>
    %1178 = vector.shape_cast %1177 : vector<64xf32> to vector<1x64xf32>
    %1179 = vector.broadcast %1169 : vector<1x16xf32> to vector<8x16xf32>
    %1180 = arith.mulf %92, %1179 : vector<8x16xf32>
    %cst_332 = arith.constant dense<0.000000e+00> : vector<8xf32>
    %1181 = vector.multi_reduction <add>, %1180, %cst_332 [1] : vector<8x16xf32> to vector<8xf32>
    %1182 = vector.shape_cast %1181 : vector<8xf32> to vector<8x1xf32>
    %1183 = vector.broadcast %1169 : vector<1x16xf32> to vector<8x16xf32>
    %1184 = arith.mulf %93, %1183 : vector<8x16xf32>
    %cst_333 = arith.constant dense<0.000000e+00> : vector<8xf32>
    %1185 = vector.multi_reduction <add>, %1184, %cst_333 [1] : vector<8x16xf32> to vector<8xf32>
    %1186 = vector.shape_cast %1185 : vector<8xf32> to vector<8x1xf32>
    %1187 = vector.broadcast %1178 : vector<1x64xf32> to vector<8x64xf32>
    %1188 = arith.mulf %91, %1187 : vector<8x64xf32>
    %cst_334 = arith.constant -2.000000e+01 : f32
    %1189 = vector.broadcast %cst_334 : f32 to vector<8x64xf32>
    %1190 = arith.maximumf %1188, %1189 : vector<8x64xf32>
    %cst_335 = arith.constant 0.000000e+00 : f32
    %1191 = vector.shape_cast %23 : vector<8x1xi1> to vector<8x1xi1>
    %1192 = vector.broadcast %1191 : vector<8x1xi1> to vector<8x64xi1>
    %1193 = vector.broadcast %cst_335 : f32 to vector<8x64xf32>
    %1194 = arith.select %1192, %1193, %1190 : vector<8x64xi1>, vector<8x64xf32>
    %c1_i32_336 = arith.constant 1 : i32
    %1195 = vector.broadcast %c1_i32_336 : i32 to vector<8x1xi32>
    %1196 = arith.cmpi sge, %21, %1195 : vector<8x1xi32>
    %c1_i32_337 = arith.constant 1 : i32
    %1197 = tpu.dynamic_rotate %1194 by %c1_i32_337 dim 0 : vector<8x64xf32>, i32 -> vector<8x64xf32>
    %cst_338 = arith.constant 0.000000e+00 : f32
    %1198 = vector.shape_cast %1196 : vector<8x1xi1> to vector<8x1xi1>
    %1199 = vector.broadcast %1198 : vector<8x1xi1> to vector<8x64xi1>
    %1200 = vector.broadcast %cst_338 : f32 to vector<8x64xf32>
    %1201 = arith.select %1199, %1197, %1200 : vector<8x64xi1>, vector<8x64xf32>
    %1202 = arith.addf %1194, %1201 : vector<8x64xf32>
    %c2_i32_339 = arith.constant 2 : i32
    %1203 = vector.broadcast %c2_i32_339 : i32 to vector<8x1xi32>
    %1204 = arith.cmpi sge, %21, %1203 : vector<8x1xi32>
    %c2_i32_340 = arith.constant 2 : i32
    %1205 = tpu.dynamic_rotate %1202 by %c2_i32_340 dim 0 : vector<8x64xf32>, i32 -> vector<8x64xf32>
    %cst_341 = arith.constant 0.000000e+00 : f32
    %1206 = vector.shape_cast %1204 : vector<8x1xi1> to vector<8x1xi1>
    %1207 = vector.broadcast %1206 : vector<8x1xi1> to vector<8x64xi1>
    %1208 = vector.broadcast %cst_341 : f32 to vector<8x64xf32>
    %1209 = arith.select %1207, %1205, %1208 : vector<8x64xi1>, vector<8x64xf32>
    %1210 = arith.addf %1202, %1209 : vector<8x64xf32>
    %c4_i32_342 = arith.constant 4 : i32
    %1211 = vector.broadcast %c4_i32_342 : i32 to vector<8x1xi32>
    %1212 = arith.cmpi sge, %21, %1211 : vector<8x1xi32>
    %c4_i32_343 = arith.constant 4 : i32
    %1213 = tpu.dynamic_rotate %1210 by %c4_i32_343 dim 0 : vector<8x64xf32>, i32 -> vector<8x64xf32>
    %cst_344 = arith.constant 0.000000e+00 : f32
    %1214 = vector.shape_cast %1212 : vector<8x1xi1> to vector<8x1xi1>
    %1215 = vector.broadcast %1214 : vector<8x1xi1> to vector<8x64xi1>
    %1216 = vector.broadcast %cst_344 : f32 to vector<8x64xf32>
    %1217 = arith.select %1215, %1213, %1216 : vector<8x64xi1>, vector<8x64xf32>
    %1218 = arith.addf %1210, %1217 : vector<8x64xf32>
    %1219 = math.exp %1218 : vector<8x64xf32>
    %1220 = vector.broadcast %1182 : vector<8x1xf32> to vector<8x64xf32>
    %1221 = arith.mulf %94, %1220 : vector<8x64xf32>
    %cst_345 = arith.constant 9.99999996E-13 : f32
    %1222 = vector.broadcast %cst_345 : f32 to vector<8x64xf32>
    %1223 = arith.addf %1219, %1222 : vector<8x64xf32>
    %1224 = tpu.reciprocal %1223 : vector<8x64xf32> -> vector<8x64xf32>
    %1225 = arith.mulf %1221, %1224 : vector<8x64xf32>
    %c1_i32_346 = arith.constant 1 : i32
    %1226 = vector.broadcast %c1_i32_346 : i32 to vector<8x1xi32>
    %1227 = arith.cmpi sge, %21, %1226 : vector<8x1xi32>
    %c1_i32_347 = arith.constant 1 : i32
    %1228 = tpu.dynamic_rotate %1225 by %c1_i32_347 dim 0 : vector<8x64xf32>, i32 -> vector<8x64xf32>
    %cst_348 = arith.constant 0.000000e+00 : f32
    %1229 = vector.shape_cast %1227 : vector<8x1xi1> to vector<8x1xi1>
    %1230 = vector.broadcast %1229 : vector<8x1xi1> to vector<8x64xi1>
    %1231 = vector.broadcast %cst_348 : f32 to vector<8x64xf32>
    %1232 = arith.select %1230, %1228, %1231 : vector<8x64xi1>, vector<8x64xf32>
    %1233 = arith.addf %1225, %1232 : vector<8x64xf32>
    %c2_i32_349 = arith.constant 2 : i32
    %1234 = vector.broadcast %c2_i32_349 : i32 to vector<8x1xi32>
    %1235 = arith.cmpi sge, %21, %1234 : vector<8x1xi32>
    %c2_i32_350 = arith.constant 2 : i32
    %1236 = tpu.dynamic_rotate %1233 by %c2_i32_350 dim 0 : vector<8x64xf32>, i32 -> vector<8x64xf32>
    %cst_351 = arith.constant 0.000000e+00 : f32
    %1237 = vector.shape_cast %1235 : vector<8x1xi1> to vector<8x1xi1>
    %1238 = vector.broadcast %1237 : vector<8x1xi1> to vector<8x64xi1>
    %1239 = vector.broadcast %cst_351 : f32 to vector<8x64xf32>
    %1240 = arith.select %1238, %1236, %1239 : vector<8x64xi1>, vector<8x64xf32>
    %1241 = arith.addf %1233, %1240 : vector<8x64xf32>
    %c4_i32_352 = arith.constant 4 : i32
    %1242 = vector.broadcast %c4_i32_352 : i32 to vector<8x1xi32>
    %1243 = arith.cmpi sge, %21, %1242 : vector<8x1xi32>
    %c4_i32_353 = arith.constant 4 : i32
    %1244 = tpu.dynamic_rotate %1241 by %c4_i32_353 dim 0 : vector<8x64xf32>, i32 -> vector<8x64xf32>
    %cst_354 = arith.constant 0.000000e+00 : f32
    %1245 = vector.shape_cast %1243 : vector<8x1xi1> to vector<8x1xi1>
    %1246 = vector.broadcast %1245 : vector<8x1xi1> to vector<8x64xi1>
    %1247 = vector.broadcast %cst_354 : f32 to vector<8x64xf32>
    %1248 = arith.select %1246, %1244, %1247 : vector<8x64xi1>, vector<8x64xf32>
    %1249 = arith.addf %1241, %1248 : vector<8x64xf32>
    %1250 = arith.mulf %1249, %1219 : vector<8x64xf32>
    %1251 = vector.broadcast %1186 : vector<8x1xf32> to vector<8x64xf32>
    %1252 = arith.mulf %1250, %1251 : vector<8x64xf32>
    %1253 = arith.addf %1164, %1252 : vector<8x64xf32>
    %c13_i32 = arith.constant 13 : i32
    %1254 = tpu.iota {dimensions = array<i32: 1>} : vector<1x16xi32>
    %1255 = vector.broadcast %c13_i32 : i32 to vector<1x16xi32>
    %1256 = arith.cmpi eq, %1254, %1255 : vector<1x16xi32>
    %1257 = arith.extui %1256 : vector<1x16xi1> to vector<1x16xi32>
    %1258 = arith.sitofp %1257 : vector<1x16xi32> to vector<1x16xf32>
    %1259 = tpu.iota {dimensions = array<i32: 0>} : vector<16x1xi32>
    %1260 = vector.broadcast %c13_i32 : i32 to vector<16x1xi32>
    %1261 = arith.cmpi eq, %1259, %1260 : vector<16x1xi32>
    %1262 = arith.extui %1261 : vector<16x1xi1> to vector<16x1xi32>
    %1263 = arith.sitofp %1262 : vector<16x1xi32> to vector<16x1xf32>
    %1264 = vector.broadcast %1263 : vector<16x1xf32> to vector<16x64xf32>
    %1265 = arith.mulf %95, %1264 : vector<16x64xf32>
    %cst_355 = arith.constant dense<0.000000e+00> : vector<64xf32>
    %1266 = vector.multi_reduction <add>, %1265, %cst_355 [0] : vector<16x64xf32> to vector<64xf32>
    %1267 = vector.shape_cast %1266 : vector<64xf32> to vector<1x64xf32>
    %1268 = vector.broadcast %1258 : vector<1x16xf32> to vector<8x16xf32>
    %1269 = arith.mulf %92, %1268 : vector<8x16xf32>
    %cst_356 = arith.constant dense<0.000000e+00> : vector<8xf32>
    %1270 = vector.multi_reduction <add>, %1269, %cst_356 [1] : vector<8x16xf32> to vector<8xf32>
    %1271 = vector.shape_cast %1270 : vector<8xf32> to vector<8x1xf32>
    %1272 = vector.broadcast %1258 : vector<1x16xf32> to vector<8x16xf32>
    %1273 = arith.mulf %93, %1272 : vector<8x16xf32>
    %cst_357 = arith.constant dense<0.000000e+00> : vector<8xf32>
    %1274 = vector.multi_reduction <add>, %1273, %cst_357 [1] : vector<8x16xf32> to vector<8xf32>
    %1275 = vector.shape_cast %1274 : vector<8xf32> to vector<8x1xf32>
    %1276 = vector.broadcast %1267 : vector<1x64xf32> to vector<8x64xf32>
    %1277 = arith.mulf %91, %1276 : vector<8x64xf32>
    %cst_358 = arith.constant -2.000000e+01 : f32
    %1278 = vector.broadcast %cst_358 : f32 to vector<8x64xf32>
    %1279 = arith.maximumf %1277, %1278 : vector<8x64xf32>
    %cst_359 = arith.constant 0.000000e+00 : f32
    %1280 = vector.shape_cast %23 : vector<8x1xi1> to vector<8x1xi1>
    %1281 = vector.broadcast %1280 : vector<8x1xi1> to vector<8x64xi1>
    %1282 = vector.broadcast %cst_359 : f32 to vector<8x64xf32>
    %1283 = arith.select %1281, %1282, %1279 : vector<8x64xi1>, vector<8x64xf32>
    %c1_i32_360 = arith.constant 1 : i32
    %1284 = vector.broadcast %c1_i32_360 : i32 to vector<8x1xi32>
    %1285 = arith.cmpi sge, %21, %1284 : vector<8x1xi32>
    %c1_i32_361 = arith.constant 1 : i32
    %1286 = tpu.dynamic_rotate %1283 by %c1_i32_361 dim 0 : vector<8x64xf32>, i32 -> vector<8x64xf32>
    %cst_362 = arith.constant 0.000000e+00 : f32
    %1287 = vector.shape_cast %1285 : vector<8x1xi1> to vector<8x1xi1>
    %1288 = vector.broadcast %1287 : vector<8x1xi1> to vector<8x64xi1>
    %1289 = vector.broadcast %cst_362 : f32 to vector<8x64xf32>
    %1290 = arith.select %1288, %1286, %1289 : vector<8x64xi1>, vector<8x64xf32>
    %1291 = arith.addf %1283, %1290 : vector<8x64xf32>
    %c2_i32_363 = arith.constant 2 : i32
    %1292 = vector.broadcast %c2_i32_363 : i32 to vector<8x1xi32>
    %1293 = arith.cmpi sge, %21, %1292 : vector<8x1xi32>
    %c2_i32_364 = arith.constant 2 : i32
    %1294 = tpu.dynamic_rotate %1291 by %c2_i32_364 dim 0 : vector<8x64xf32>, i32 -> vector<8x64xf32>
    %cst_365 = arith.constant 0.000000e+00 : f32
    %1295 = vector.shape_cast %1293 : vector<8x1xi1> to vector<8x1xi1>
    %1296 = vector.broadcast %1295 : vector<8x1xi1> to vector<8x64xi1>
    %1297 = vector.broadcast %cst_365 : f32 to vector<8x64xf32>
    %1298 = arith.select %1296, %1294, %1297 : vector<8x64xi1>, vector<8x64xf32>
    %1299 = arith.addf %1291, %1298 : vector<8x64xf32>
    %c4_i32_366 = arith.constant 4 : i32
    %1300 = vector.broadcast %c4_i32_366 : i32 to vector<8x1xi32>
    %1301 = arith.cmpi sge, %21, %1300 : vector<8x1xi32>
    %c4_i32_367 = arith.constant 4 : i32
    %1302 = tpu.dynamic_rotate %1299 by %c4_i32_367 dim 0 : vector<8x64xf32>, i32 -> vector<8x64xf32>
    %cst_368 = arith.constant 0.000000e+00 : f32
    %1303 = vector.shape_cast %1301 : vector<8x1xi1> to vector<8x1xi1>
    %1304 = vector.broadcast %1303 : vector<8x1xi1> to vector<8x64xi1>
    %1305 = vector.broadcast %cst_368 : f32 to vector<8x64xf32>
    %1306 = arith.select %1304, %1302, %1305 : vector<8x64xi1>, vector<8x64xf32>
    %1307 = arith.addf %1299, %1306 : vector<8x64xf32>
    %1308 = math.exp %1307 : vector<8x64xf32>
    %1309 = vector.broadcast %1271 : vector<8x1xf32> to vector<8x64xf32>
    %1310 = arith.mulf %94, %1309 : vector<8x64xf32>
    %cst_369 = arith.constant 9.99999996E-13 : f32
    %1311 = vector.broadcast %cst_369 : f32 to vector<8x64xf32>
    %1312 = arith.addf %1308, %1311 : vector<8x64xf32>
    %1313 = tpu.reciprocal %1312 : vector<8x64xf32> -> vector<8x64xf32>
    %1314 = arith.mulf %1310, %1313 : vector<8x64xf32>
    %c1_i32_370 = arith.constant 1 : i32
    %1315 = vector.broadcast %c1_i32_370 : i32 to vector<8x1xi32>
    %1316 = arith.cmpi sge, %21, %1315 : vector<8x1xi32>
    %c1_i32_371 = arith.constant 1 : i32
    %1317 = tpu.dynamic_rotate %1314 by %c1_i32_371 dim 0 : vector<8x64xf32>, i32 -> vector<8x64xf32>
    %cst_372 = arith.constant 0.000000e+00 : f32
    %1318 = vector.shape_cast %1316 : vector<8x1xi1> to vector<8x1xi1>
    %1319 = vector.broadcast %1318 : vector<8x1xi1> to vector<8x64xi1>
    %1320 = vector.broadcast %cst_372 : f32 to vector<8x64xf32>
    %1321 = arith.select %1319, %1317, %1320 : vector<8x64xi1>, vector<8x64xf32>
    %1322 = arith.addf %1314, %1321 : vector<8x64xf32>
    %c2_i32_373 = arith.constant 2 : i32
    %1323 = vector.broadcast %c2_i32_373 : i32 to vector<8x1xi32>
    %1324 = arith.cmpi sge, %21, %1323 : vector<8x1xi32>
    %c2_i32_374 = arith.constant 2 : i32
    %1325 = tpu.dynamic_rotate %1322 by %c2_i32_374 dim 0 : vector<8x64xf32>, i32 -> vector<8x64xf32>
    %cst_375 = arith.constant 0.000000e+00 : f32
    %1326 = vector.shape_cast %1324 : vector<8x1xi1> to vector<8x1xi1>
    %1327 = vector.broadcast %1326 : vector<8x1xi1> to vector<8x64xi1>
    %1328 = vector.broadcast %cst_375 : f32 to vector<8x64xf32>
    %1329 = arith.select %1327, %1325, %1328 : vector<8x64xi1>, vector<8x64xf32>
    %1330 = arith.addf %1322, %1329 : vector<8x64xf32>
    %c4_i32_376 = arith.constant 4 : i32
    %1331 = vector.broadcast %c4_i32_376 : i32 to vector<8x1xi32>
    %1332 = arith.cmpi sge, %21, %1331 : vector<8x1xi32>
    %c4_i32_377 = arith.constant 4 : i32
    %1333 = tpu.dynamic_rotate %1330 by %c4_i32_377 dim 0 : vector<8x64xf32>, i32 -> vector<8x64xf32>
    %cst_378 = arith.constant 0.000000e+00 : f32
    %1334 = vector.shape_cast %1332 : vector<8x1xi1> to vector<8x1xi1>
    %1335 = vector.broadcast %1334 : vector<8x1xi1> to vector<8x64xi1>
    %1336 = vector.broadcast %cst_378 : f32 to vector<8x64xf32>
    %1337 = arith.select %1335, %1333, %1336 : vector<8x64xi1>, vector<8x64xf32>
    %1338 = arith.addf %1330, %1337 : vector<8x64xf32>
    %1339 = arith.mulf %1338, %1308 : vector<8x64xf32>
    %1340 = vector.broadcast %1275 : vector<8x1xf32> to vector<8x64xf32>
    %1341 = arith.mulf %1339, %1340 : vector<8x64xf32>
    %1342 = arith.addf %1253, %1341 : vector<8x64xf32>
    %c14_i32 = arith.constant 14 : i32
    %1343 = tpu.iota {dimensions = array<i32: 1>} : vector<1x16xi32>
    %1344 = vector.broadcast %c14_i32 : i32 to vector<1x16xi32>
    %1345 = arith.cmpi eq, %1343, %1344 : vector<1x16xi32>
    %1346 = arith.extui %1345 : vector<1x16xi1> to vector<1x16xi32>
    %1347 = arith.sitofp %1346 : vector<1x16xi32> to vector<1x16xf32>
    %1348 = tpu.iota {dimensions = array<i32: 0>} : vector<16x1xi32>
    %1349 = vector.broadcast %c14_i32 : i32 to vector<16x1xi32>
    %1350 = arith.cmpi eq, %1348, %1349 : vector<16x1xi32>
    %1351 = arith.extui %1350 : vector<16x1xi1> to vector<16x1xi32>
    %1352 = arith.sitofp %1351 : vector<16x1xi32> to vector<16x1xf32>
    %1353 = vector.broadcast %1352 : vector<16x1xf32> to vector<16x64xf32>
    %1354 = arith.mulf %95, %1353 : vector<16x64xf32>
    %cst_379 = arith.constant dense<0.000000e+00> : vector<64xf32>
    %1355 = vector.multi_reduction <add>, %1354, %cst_379 [0] : vector<16x64xf32> to vector<64xf32>
    %1356 = vector.shape_cast %1355 : vector<64xf32> to vector<1x64xf32>
    %1357 = vector.broadcast %1347 : vector<1x16xf32> to vector<8x16xf32>
    %1358 = arith.mulf %92, %1357 : vector<8x16xf32>
    %cst_380 = arith.constant dense<0.000000e+00> : vector<8xf32>
    %1359 = vector.multi_reduction <add>, %1358, %cst_380 [1] : vector<8x16xf32> to vector<8xf32>
    %1360 = vector.shape_cast %1359 : vector<8xf32> to vector<8x1xf32>
    %1361 = vector.broadcast %1347 : vector<1x16xf32> to vector<8x16xf32>
    %1362 = arith.mulf %93, %1361 : vector<8x16xf32>
    %cst_381 = arith.constant dense<0.000000e+00> : vector<8xf32>
    %1363 = vector.multi_reduction <add>, %1362, %cst_381 [1] : vector<8x16xf32> to vector<8xf32>
    %1364 = vector.shape_cast %1363 : vector<8xf32> to vector<8x1xf32>
    %1365 = vector.broadcast %1356 : vector<1x64xf32> to vector<8x64xf32>
    %1366 = arith.mulf %91, %1365 : vector<8x64xf32>
    %cst_382 = arith.constant -2.000000e+01 : f32
    %1367 = vector.broadcast %cst_382 : f32 to vector<8x64xf32>
    %1368 = arith.maximumf %1366, %1367 : vector<8x64xf32>
    %cst_383 = arith.constant 0.000000e+00 : f32
    %1369 = vector.shape_cast %23 : vector<8x1xi1> to vector<8x1xi1>
    %1370 = vector.broadcast %1369 : vector<8x1xi1> to vector<8x64xi1>
    %1371 = vector.broadcast %cst_383 : f32 to vector<8x64xf32>
    %1372 = arith.select %1370, %1371, %1368 : vector<8x64xi1>, vector<8x64xf32>
    %c1_i32_384 = arith.constant 1 : i32
    %1373 = vector.broadcast %c1_i32_384 : i32 to vector<8x1xi32>
    %1374 = arith.cmpi sge, %21, %1373 : vector<8x1xi32>
    %c1_i32_385 = arith.constant 1 : i32
    %1375 = tpu.dynamic_rotate %1372 by %c1_i32_385 dim 0 : vector<8x64xf32>, i32 -> vector<8x64xf32>
    %cst_386 = arith.constant 0.000000e+00 : f32
    %1376 = vector.shape_cast %1374 : vector<8x1xi1> to vector<8x1xi1>
    %1377 = vector.broadcast %1376 : vector<8x1xi1> to vector<8x64xi1>
    %1378 = vector.broadcast %cst_386 : f32 to vector<8x64xf32>
    %1379 = arith.select %1377, %1375, %1378 : vector<8x64xi1>, vector<8x64xf32>
    %1380 = arith.addf %1372, %1379 : vector<8x64xf32>
    %c2_i32_387 = arith.constant 2 : i32
    %1381 = vector.broadcast %c2_i32_387 : i32 to vector<8x1xi32>
    %1382 = arith.cmpi sge, %21, %1381 : vector<8x1xi32>
    %c2_i32_388 = arith.constant 2 : i32
    %1383 = tpu.dynamic_rotate %1380 by %c2_i32_388 dim 0 : vector<8x64xf32>, i32 -> vector<8x64xf32>
    %cst_389 = arith.constant 0.000000e+00 : f32
    %1384 = vector.shape_cast %1382 : vector<8x1xi1> to vector<8x1xi1>
    %1385 = vector.broadcast %1384 : vector<8x1xi1> to vector<8x64xi1>
    %1386 = vector.broadcast %cst_389 : f32 to vector<8x64xf32>
    %1387 = arith.select %1385, %1383, %1386 : vector<8x64xi1>, vector<8x64xf32>
    %1388 = arith.addf %1380, %1387 : vector<8x64xf32>
    %c4_i32_390 = arith.constant 4 : i32
    %1389 = vector.broadcast %c4_i32_390 : i32 to vector<8x1xi32>
    %1390 = arith.cmpi sge, %21, %1389 : vector<8x1xi32>
    %c4_i32_391 = arith.constant 4 : i32
    %1391 = tpu.dynamic_rotate %1388 by %c4_i32_391 dim 0 : vector<8x64xf32>, i32 -> vector<8x64xf32>
    %cst_392 = arith.constant 0.000000e+00 : f32
    %1392 = vector.shape_cast %1390 : vector<8x1xi1> to vector<8x1xi1>
    %1393 = vector.broadcast %1392 : vector<8x1xi1> to vector<8x64xi1>
    %1394 = vector.broadcast %cst_392 : f32 to vector<8x64xf32>
    %1395 = arith.select %1393, %1391, %1394 : vector<8x64xi1>, vector<8x64xf32>
    %1396 = arith.addf %1388, %1395 : vector<8x64xf32>
    %1397 = math.exp %1396 : vector<8x64xf32>
    %1398 = vector.broadcast %1360 : vector<8x1xf32> to vector<8x64xf32>
    %1399 = arith.mulf %94, %1398 : vector<8x64xf32>
    %cst_393 = arith.constant 9.99999996E-13 : f32
    %1400 = vector.broadcast %cst_393 : f32 to vector<8x64xf32>
    %1401 = arith.addf %1397, %1400 : vector<8x64xf32>
    %1402 = tpu.reciprocal %1401 : vector<8x64xf32> -> vector<8x64xf32>
    %1403 = arith.mulf %1399, %1402 : vector<8x64xf32>
    %c1_i32_394 = arith.constant 1 : i32
    %1404 = vector.broadcast %c1_i32_394 : i32 to vector<8x1xi32>
    %1405 = arith.cmpi sge, %21, %1404 : vector<8x1xi32>
    %c1_i32_395 = arith.constant 1 : i32
    %1406 = tpu.dynamic_rotate %1403 by %c1_i32_395 dim 0 : vector<8x64xf32>, i32 -> vector<8x64xf32>
    %cst_396 = arith.constant 0.000000e+00 : f32
    %1407 = vector.shape_cast %1405 : vector<8x1xi1> to vector<8x1xi1>
    %1408 = vector.broadcast %1407 : vector<8x1xi1> to vector<8x64xi1>
    %1409 = vector.broadcast %cst_396 : f32 to vector<8x64xf32>
    %1410 = arith.select %1408, %1406, %1409 : vector<8x64xi1>, vector<8x64xf32>
    %1411 = arith.addf %1403, %1410 : vector<8x64xf32>
    %c2_i32_397 = arith.constant 2 : i32
    %1412 = vector.broadcast %c2_i32_397 : i32 to vector<8x1xi32>
    %1413 = arith.cmpi sge, %21, %1412 : vector<8x1xi32>
    %c2_i32_398 = arith.constant 2 : i32
    %1414 = tpu.dynamic_rotate %1411 by %c2_i32_398 dim 0 : vector<8x64xf32>, i32 -> vector<8x64xf32>
    %cst_399 = arith.constant 0.000000e+00 : f32
    %1415 = vector.shape_cast %1413 : vector<8x1xi1> to vector<8x1xi1>
    %1416 = vector.broadcast %1415 : vector<8x1xi1> to vector<8x64xi1>
    %1417 = vector.broadcast %cst_399 : f32 to vector<8x64xf32>
    %1418 = arith.select %1416, %1414, %1417 : vector<8x64xi1>, vector<8x64xf32>
    %1419 = arith.addf %1411, %1418 : vector<8x64xf32>
    %c4_i32_400 = arith.constant 4 : i32
    %1420 = vector.broadcast %c4_i32_400 : i32 to vector<8x1xi32>
    %1421 = arith.cmpi sge, %21, %1420 : vector<8x1xi32>
    %c4_i32_401 = arith.constant 4 : i32
    %1422 = tpu.dynamic_rotate %1419 by %c4_i32_401 dim 0 : vector<8x64xf32>, i32 -> vector<8x64xf32>
    %cst_402 = arith.constant 0.000000e+00 : f32
    %1423 = vector.shape_cast %1421 : vector<8x1xi1> to vector<8x1xi1>
    %1424 = vector.broadcast %1423 : vector<8x1xi1> to vector<8x64xi1>
    %1425 = vector.broadcast %cst_402 : f32 to vector<8x64xf32>
    %1426 = arith.select %1424, %1422, %1425 : vector<8x64xi1>, vector<8x64xf32>
    %1427 = arith.addf %1419, %1426 : vector<8x64xf32>
    %1428 = arith.mulf %1427, %1397 : vector<8x64xf32>
    %1429 = vector.broadcast %1364 : vector<8x1xf32> to vector<8x64xf32>
    %1430 = arith.mulf %1428, %1429 : vector<8x64xf32>
    %1431 = arith.addf %1342, %1430 : vector<8x64xf32>
    %c15_i32 = arith.constant 15 : i32
    %1432 = tpu.iota {dimensions = array<i32: 1>} : vector<1x16xi32>
    %1433 = vector.broadcast %c15_i32 : i32 to vector<1x16xi32>
    %1434 = arith.cmpi eq, %1432, %1433 : vector<1x16xi32>
    %1435 = arith.extui %1434 : vector<1x16xi1> to vector<1x16xi32>
    %1436 = arith.sitofp %1435 : vector<1x16xi32> to vector<1x16xf32>
    %1437 = tpu.iota {dimensions = array<i32: 0>} : vector<16x1xi32>
    %1438 = vector.broadcast %c15_i32 : i32 to vector<16x1xi32>
    %1439 = arith.cmpi eq, %1437, %1438 : vector<16x1xi32>
    %1440 = arith.extui %1439 : vector<16x1xi1> to vector<16x1xi32>
    %1441 = arith.sitofp %1440 : vector<16x1xi32> to vector<16x1xf32>
    %1442 = vector.broadcast %1441 : vector<16x1xf32> to vector<16x64xf32>
    %1443 = arith.mulf %95, %1442 : vector<16x64xf32>
    %cst_403 = arith.constant dense<0.000000e+00> : vector<64xf32>
    %1444 = vector.multi_reduction <add>, %1443, %cst_403 [0] : vector<16x64xf32> to vector<64xf32>
    %1445 = vector.shape_cast %1444 : vector<64xf32> to vector<1x64xf32>
    %1446 = vector.broadcast %1436 : vector<1x16xf32> to vector<8x16xf32>
    %1447 = arith.mulf %92, %1446 : vector<8x16xf32>
    %cst_404 = arith.constant dense<0.000000e+00> : vector<8xf32>
    %1448 = vector.multi_reduction <add>, %1447, %cst_404 [1] : vector<8x16xf32> to vector<8xf32>
    %1449 = vector.shape_cast %1448 : vector<8xf32> to vector<8x1xf32>
    %1450 = vector.broadcast %1436 : vector<1x16xf32> to vector<8x16xf32>
    %1451 = arith.mulf %93, %1450 : vector<8x16xf32>
    %cst_405 = arith.constant dense<0.000000e+00> : vector<8xf32>
    %1452 = vector.multi_reduction <add>, %1451, %cst_405 [1] : vector<8x16xf32> to vector<8xf32>
    %1453 = vector.shape_cast %1452 : vector<8xf32> to vector<8x1xf32>
    %1454 = vector.broadcast %1445 : vector<1x64xf32> to vector<8x64xf32>
    %1455 = arith.mulf %91, %1454 : vector<8x64xf32>
    %cst_406 = arith.constant -2.000000e+01 : f32
    %1456 = vector.broadcast %cst_406 : f32 to vector<8x64xf32>
    %1457 = arith.maximumf %1455, %1456 : vector<8x64xf32>
    %cst_407 = arith.constant 0.000000e+00 : f32
    %1458 = vector.shape_cast %23 : vector<8x1xi1> to vector<8x1xi1>
    %1459 = vector.broadcast %1458 : vector<8x1xi1> to vector<8x64xi1>
    %1460 = vector.broadcast %cst_407 : f32 to vector<8x64xf32>
    %1461 = arith.select %1459, %1460, %1457 : vector<8x64xi1>, vector<8x64xf32>
    %c1_i32_408 = arith.constant 1 : i32
    %1462 = vector.broadcast %c1_i32_408 : i32 to vector<8x1xi32>
    %1463 = arith.cmpi sge, %21, %1462 : vector<8x1xi32>
    %c1_i32_409 = arith.constant 1 : i32
    %1464 = tpu.dynamic_rotate %1461 by %c1_i32_409 dim 0 : vector<8x64xf32>, i32 -> vector<8x64xf32>
    %cst_410 = arith.constant 0.000000e+00 : f32
    %1465 = vector.shape_cast %1463 : vector<8x1xi1> to vector<8x1xi1>
    %1466 = vector.broadcast %1465 : vector<8x1xi1> to vector<8x64xi1>
    %1467 = vector.broadcast %cst_410 : f32 to vector<8x64xf32>
    %1468 = arith.select %1466, %1464, %1467 : vector<8x64xi1>, vector<8x64xf32>
    %1469 = arith.addf %1461, %1468 : vector<8x64xf32>
    %c2_i32_411 = arith.constant 2 : i32
    %1470 = vector.broadcast %c2_i32_411 : i32 to vector<8x1xi32>
    %1471 = arith.cmpi sge, %21, %1470 : vector<8x1xi32>
    %c2_i32_412 = arith.constant 2 : i32
    %1472 = tpu.dynamic_rotate %1469 by %c2_i32_412 dim 0 : vector<8x64xf32>, i32 -> vector<8x64xf32>
    %cst_413 = arith.constant 0.000000e+00 : f32
    %1473 = vector.shape_cast %1471 : vector<8x1xi1> to vector<8x1xi1>
    %1474 = vector.broadcast %1473 : vector<8x1xi1> to vector<8x64xi1>
    %1475 = vector.broadcast %cst_413 : f32 to vector<8x64xf32>
    %1476 = arith.select %1474, %1472, %1475 : vector<8x64xi1>, vector<8x64xf32>
    %1477 = arith.addf %1469, %1476 : vector<8x64xf32>
    %c4_i32_414 = arith.constant 4 : i32
    %1478 = vector.broadcast %c4_i32_414 : i32 to vector<8x1xi32>
    %1479 = arith.cmpi sge, %21, %1478 : vector<8x1xi32>
    %c4_i32_415 = arith.constant 4 : i32
    %1480 = tpu.dynamic_rotate %1477 by %c4_i32_415 dim 0 : vector<8x64xf32>, i32 -> vector<8x64xf32>
    %cst_416 = arith.constant 0.000000e+00 : f32
    %1481 = vector.shape_cast %1479 : vector<8x1xi1> to vector<8x1xi1>
    %1482 = vector.broadcast %1481 : vector<8x1xi1> to vector<8x64xi1>
    %1483 = vector.broadcast %cst_416 : f32 to vector<8x64xf32>
    %1484 = arith.select %1482, %1480, %1483 : vector<8x64xi1>, vector<8x64xf32>
    %1485 = arith.addf %1477, %1484 : vector<8x64xf32>
    %1486 = math.exp %1485 : vector<8x64xf32>
    %1487 = vector.broadcast %1449 : vector<8x1xf32> to vector<8x64xf32>
    %1488 = arith.mulf %94, %1487 : vector<8x64xf32>
    %cst_417 = arith.constant 9.99999996E-13 : f32
    %1489 = vector.broadcast %cst_417 : f32 to vector<8x64xf32>
    %1490 = arith.addf %1486, %1489 : vector<8x64xf32>
    %1491 = tpu.reciprocal %1490 : vector<8x64xf32> -> vector<8x64xf32>
    %1492 = arith.mulf %1488, %1491 : vector<8x64xf32>
    %c1_i32_418 = arith.constant 1 : i32
    %1493 = vector.broadcast %c1_i32_418 : i32 to vector<8x1xi32>
    %1494 = arith.cmpi sge, %21, %1493 : vector<8x1xi32>
    %c1_i32_419 = arith.constant 1 : i32
    %1495 = tpu.dynamic_rotate %1492 by %c1_i32_419 dim 0 : vector<8x64xf32>, i32 -> vector<8x64xf32>
    %cst_420 = arith.constant 0.000000e+00 : f32
    %1496 = vector.shape_cast %1494 : vector<8x1xi1> to vector<8x1xi1>
    %1497 = vector.broadcast %1496 : vector<8x1xi1> to vector<8x64xi1>
    %1498 = vector.broadcast %cst_420 : f32 to vector<8x64xf32>
    %1499 = arith.select %1497, %1495, %1498 : vector<8x64xi1>, vector<8x64xf32>
    %1500 = arith.addf %1492, %1499 : vector<8x64xf32>
    %c2_i32_421 = arith.constant 2 : i32
    %1501 = vector.broadcast %c2_i32_421 : i32 to vector<8x1xi32>
    %1502 = arith.cmpi sge, %21, %1501 : vector<8x1xi32>
    %c2_i32_422 = arith.constant 2 : i32
    %1503 = tpu.dynamic_rotate %1500 by %c2_i32_422 dim 0 : vector<8x64xf32>, i32 -> vector<8x64xf32>
    %cst_423 = arith.constant 0.000000e+00 : f32
    %1504 = vector.shape_cast %1502 : vector<8x1xi1> to vector<8x1xi1>
    %1505 = vector.broadcast %1504 : vector<8x1xi1> to vector<8x64xi1>
    %1506 = vector.broadcast %cst_423 : f32 to vector<8x64xf32>
    %1507 = arith.select %1505, %1503, %1506 : vector<8x64xi1>, vector<8x64xf32>
    %1508 = arith.addf %1500, %1507 : vector<8x64xf32>
    %c4_i32_424 = arith.constant 4 : i32
    %1509 = vector.broadcast %c4_i32_424 : i32 to vector<8x1xi32>
    %1510 = arith.cmpi sge, %21, %1509 : vector<8x1xi32>
    %c4_i32_425 = arith.constant 4 : i32
    %1511 = tpu.dynamic_rotate %1508 by %c4_i32_425 dim 0 : vector<8x64xf32>, i32 -> vector<8x64xf32>
    %cst_426 = arith.constant 0.000000e+00 : f32
    %1512 = vector.shape_cast %1510 : vector<8x1xi1> to vector<8x1xi1>
    %1513 = vector.broadcast %1512 : vector<8x1xi1> to vector<8x64xi1>
    %1514 = vector.broadcast %cst_426 : f32 to vector<8x64xf32>
    %1515 = arith.select %1513, %1511, %1514 : vector<8x64xi1>, vector<8x64xf32>
    %1516 = arith.addf %1508, %1515 : vector<8x64xf32>
    %1517 = arith.mulf %1516, %1486 : vector<8x64xf32>
    %1518 = vector.broadcast %1453 : vector<8x1xf32> to vector<8x64xf32>
    %1519 = arith.mulf %1517, %1518 : vector<8x64xf32>
    %1520 = arith.addf %1431, %1519 : vector<8x64xf32>
    %c16_i32 = arith.constant 16 : i32
    %c0_427 = arith.constant 0 : index
    %c0_428 = arith.constant 0 : index
    %1521 = vector.load %arg9[%c0_427, %c0_428] : memref<1x64xf32, #tpu.memory_space<vmem>>, vector<1x64xf32>
    %1522 = vector.broadcast %1521 : vector<1x64xf32> to vector<8x64xf32>
    %1523 = arith.mulf %71, %1522 : vector<8x64xf32>
    %1524 = arith.addf %1520, %1523 : vector<8x64xf32>
    %cst_429 = arith.constant 0.000000e+00 : f32
    %1525 = vector.broadcast %cst_429 : f32 to vector<8x64xf32>
    %1526 = arith.subf %1525, %4 : vector<8x64xf32>
    %1527 = math.exp %1526 : vector<8x64xf32>
    %cst_430 = arith.constant 1.000000e+00 : f32
    %1528 = vector.broadcast %cst_430 : f32 to vector<8x64xf32>
    %1529 = arith.addf %1528, %1527 : vector<8x64xf32>
    %cst_431 = arith.constant 1.000000e+00 : f32
    %1530 = vector.broadcast %cst_431 : f32 to vector<8x64xf32>
    %1531 = arith.divf %1530, %1529 : vector<8x64xf32>
    %1532 = arith.mulf %4, %1531 : vector<8x64xf32>
    %1533 = arith.mulf %1524, %1532 : vector<8x64xf32>
    %1534 = arith.truncf %1533 : vector<8x64xf32> to vector<8x64xbf16>
    %c0_432 = arith.constant 0 : index
    %c0_433 = arith.constant 0 : index
    %1535 = vector.load %arg10[%c0_432, %c0_433] : memref<64x32xbf16, #tpu.memory_space<vmem>>, vector<64x32xbf16>
    %cst_434 = arith.constant dense<0.000000e+00> : vector<8x32xf32>
    %1536 = tpu.matmul %1534, %1535, %cst_434 {dimension_numbers = #tpu.dot_dimension_numbers<[1], [0], [0], [1], [0, 0, 1, 1], [], []>} : vector<8x64xbf16>, vector<64x32xbf16>, vector<8x32xf32> -> vector<8x32xf32>
    %c0_435 = arith.constant 0 : index
    %c0_436 = arith.constant 0 : index
    %1537 = vector.load %arg11[%c0_435, %c0_436] : memref<8x32xf32, #tpu.memory_space<vmem>>, vector<8x32xf32>
    tpu.vector_store %arg11[%c0_435, %c0_436], %1536 {strides = array<i32>} : memref<8x32xf32, #tpu.memory_space<vmem>>, vector<8x32xf32>,
    return
  }
  func.func @transform_0(%arg0: i32) -> (i32, i32) {
    %c0_i32 = arith.constant 0 : i32
    %c0_i32_0 = arith.constant 0 : i32
    return %arg0, %c0_i32 : i32, i32
  }
  func.func @transform_1(%arg0: i32) -> (i32, i32) {
    %c0_i32 = arith.constant 0 : i32
    %c0_i32_0 = arith.constant 0 : i32
    %c0_i32_1 = arith.constant 0 : i32
    return %c0_i32, %c0_i32_0 : i32, i32
  }
  func.func @transform_2(%arg0: i32) -> (i32, i32) {
    %c0_i32 = arith.constant 0 : i32
    %c0_i32_0 = arith.constant 0 : i32
    %c0_i32_1 = arith.constant 0 : i32
    return %c0_i32, %c0_i32_0 : i32, i32
  }
  func.func @transform_3(%arg0: i32) -> (i32, i32) {
    %c0_i32 = arith.constant 0 : i32
    %c0_i32_0 = arith.constant 0 : i32
    %c0_i32_1 = arith.constant 0 : i32
    return %c0_i32, %c0_i32_0 : i32, i32
  }
  func.func @transform_4(%arg0: i32) -> (i32, i32) {
    %c0_i32 = arith.constant 0 : i32
    %c0_i32_0 = arith.constant 0 : i32
    %c0_i32_1 = arith.constant 0 : i32
    return %c0_i32, %c0_i32_0 : i32, i32
  }
  func.func @transform_5(%arg0: i32) -> (i32, i32) {
    %c0_i32 = arith.constant 0 : i32
    %c0_i32_0 = arith.constant 0 : i32
    %c0_i32_1 = arith.constant 0 : i32
    return %c0_i32, %c0_i32_0 : i32, i32
  }
  func.func @transform_6(%arg0: i32) -> (i32, i32) {
    %c0_i32 = arith.constant 0 : i32
    %c0_i32_0 = arith.constant 0 : i32
    %c0_i32_1 = arith.constant 0 : i32
    return %c0_i32, %c0_i32_0 : i32, i32
  }
  func.func @transform_7(%arg0: i32) -> (i32, i32) {
    %c0_i32 = arith.constant 0 : i32
    %c0_i32_0 = arith.constant 0 : i32
    %c0_i32_1 = arith.constant 0 : i32
    return %c0_i32, %c0_i32_0 : i32, i32
  }
  func.func @transform_8(%arg0: i32) -> (i32, i32) {
    %c0_i32 = arith.constant 0 : i32
    %c0_i32_0 = arith.constant 0 : i32
    %c0_i32_1 = arith.constant 0 : i32
    return %c0_i32, %c0_i32_0 : i32, i32
  }
  func.func @transform_9(%arg0: i32) -> (i32, i32) {
    %c0_i32 = arith.constant 0 : i32
    %c0_i32_0 = arith.constant 0 : i32
    %c0_i32_1 = arith.constant 0 : i32
    return %c0_i32, %c0_i32_0 : i32, i32
  }
  func.func @transform_10(%arg0: i32) -> (i32, i32) {
    %c0_i32 = arith.constant 0 : i32
    %c0_i32_0 = arith.constant 0 : i32
    return %arg0, %c0_i32 : i32, i32
  }
}

</mosaic_0001>

<bundles_post_ra>
// kernel: tpu_custom_call.1
= control target key start
LH: loop header
LB: loop body
LE: loop exit
PB: predicated region body
PF: predicated region fallthrough
CT: control target
= control target key end

     0   :  { %s4102_s0 = inlined_call_operand.hbm [shape: bf16[16,32], index: 0, kind: input, shape index: {}]   ;;  %s4103_s1 = inlined_call_operand.vmem [shape: bf16[32,128], index: 1, kind: input, shape index: {}]   ;;  %s4104_s2 = inlined_call_operand.hbm [shape: f32[4,64], index: 2, kind: input, shape index: {}]   ;;  %s4105_s3 = inlined_call_operand.vmem [shape: f32[1,64], index: 3, kind: input, shape index: {}]   ;;  %s4106_s4 = inlined_call_operand.vmem [shape: bf16[64,128], index: 4, kind: input, shape index: {}]   ;;  %s4107_s5 = inlined_call_operand.vmem [shape: bf16[2,64], index: 5, kind: input, shape index: {}]   ;;  %s4108_s6 = inlined_call_operand.vmem [shape: f32[1,64], index: 6, kind: input, shape index: {}]   ;;  %s4109_s7 = inlined_call_operand.hbm [shape: f32[16,64], index: 7, kind: input, shape index: {}]   ;;  %s4110_s8 = inlined_call_operand.vmem [shape: f32[1,64], index: 8, kind: input, shape index: {}]   ;;  %s4111_s9 = inlined_call_operand.vmem [shape: bf16[64,32], index: 9, kind: input, shape index: {}]   ;;  %s4112_s10 = inlined_call_operand.hbm [shape: f32[16,32], index: 10, kind: output, shape index: {}]  }
   0x1   :  { %4122 = sst [smem:[#allocation16_spill]] %s4104_s2 }
   0x2   :  { %4123 = sst [smem:[#allocation17_spill]] %s4109_s7 }
   0x3   :  { %15 = vsyncpa [#allocation3], 0 }
   0x4   :  { %17 = vsyncpa [#allocation3 + $0x1], 0 }
   0x5   :  { %18 = vsyncpa [#allocation6], 0 }
   0x6   :  { %19 = vsyncpa [#allocation4], 0 }
   0x7   :  { %21 = vsyncpa [#allocation4 + $0x1], 0  ;;  %s2741_s13 = smov 0   ;;  %s2743_s14 = smov 0  }
   0x8   :  { %s2745_s15 = smov 0   ;;  %s2747_s16 = smov 0  }
   0x9 LB: > { %4124 = sst [smem:[#allocation12_spill]] %s2670_s15  ;;  %s2762_s17 = sadd.s32 4294967295, %s2674_s16   ;;  %s2674_s16 = sphi %s2747_s16, %s4229_s16   ;;  %s2670_s15 = sphi %s2745_s15, %s4226_s15   ;;  %s2666_s14 = sphi %s2743_s14, %s4228_s14   ;;  %s2662_s13 = sphi %s2741_s13, %s4227_s13  }
   0xa   : > { %s2173_s18 = sadd.s32 4294967294, %s2674_s16   ;;  %p47_p0 = scmp.ne.s32.totalorder %s2666_s14, %s2662_s13 }
   0xb   : > { %p48_p1 = scmp.eq.s32.totalorder %s2762_s17, 0  ;;  %p260_p2 = scmp.eq.s32.totalorder %s2762_s17, 1 }
   0xc   : > { %p266_p3 = scmp.eq.s32.totalorder %s2173_s18, 1  ;;  %p2174_p5 = scmp.ge.s32.totalorder %s2674_s16, 1 }
   0xd   : > { %p2771_p4 = por %p48_p1, %p47_p0  ;;  %p273_p7 = scmp.lt.s32.totalorder %s2674_s16, 3 }
   0xe   : > { %p2776_p6 = por %p266_p3, %p47_p0  ;;  %s4127_s2 = sld [smem:[#allocation16_spill]] }
   0xf   : > { %p2784_p8 = pnand %p2174_p5, %p273_p7  ;;  %s2676_s25 = smov [#allocation5]  }
  0x10   : > { %s290_s26 = sshll.u32 %s2676_s25, 4  ;;  %s4129_s7 = sld [smem:[#allocation17_spill]]  ;;  %s291_s26 = int_to_ptr.vmem [resolvable:$true] %s290_s26 }
  0x11   : > { %p2287_p10 = pneg %p2784_p8  ;;  %s2677_s30 = smov [#allocation7]  }
  0x12   : > { %s313_s11 = sshll.u32 %s2677_s30, 4  ;;  %s2678_s12 = smov 128   ;;  %s314_s11 = int_to_ptr.vmem [resolvable:$true] %s313_s11 }
  0x13   : > { %p2288_p11 = pnand %p2287_p10, %p48_p1  ;;  %s2679_s18 = smov 8  }
  0x14   : > { %s288_s23 = sshll.u32 %s4127_s2, 4  ;;  %s2797_s21 = sadd.s32 1, %s2674_s16   ;;  %s289_s23 = int_to_ptr.hbm [resolvable:$true] %s288_s23 }
  0x15   : > { %2290 = dma.hbm_to_vmem [thread:$0]  (!%p2288_p11), %s289_s23, 64, %s291_s26, [#allocation6]  }
  0x16   : > { %s311_s29 = sshll.u32 %s4129_s7, 4  ;;  %s31_s22 = ssub.s32 %s2674_s16, %s2797_s21  ;;  %s312_s29 = int_to_ptr.hbm [resolvable:$true] %s311_s29 }
  0x17   : > { %2293 = dma.hbm_to_vmem [thread:$0]  (!%p2288_p11), %s312_s29, 256, %s314_s11, [#allocation6], %s2678_s12, %s2678_s12, %s2679_s18  }
  0x18   : > { %p32_p12 = scmp.eq.s32.totalorder %s31_s22, 0  ;;  %s34_s25 = sadd.s32 1, %s2670_s15 }
  0x19   : > { %p41_p13 = scmp.ne.s32.totalorder %s2670_s15, %s2666_s14  ;;  %p42_p0 = scmp.eq.s32.totalorder %s2674_s16, 0 }
  0x1a   : > { %s2806_s27 = scalar_select %p32_p12, %s2670_s15, %s34_s25  }
  0x1b   : > { %p43_p3 = por %p42_p0, %p41_p13  ;;  %p2810_p5 = por %p260_p2, %p41_p13 }
  0x1c   : > { %4130 = sst [smem:[#allocation13_spill]] %s2806_s27  ;;  %p2304_p7 = scmp.lt.s32.totalorder %s2674_s16, 2 }
  0x1d   : > { %s333_s23 = sand.u32 1, %s2670_s15   ;;  %s2179_s29 = sshll.u32 %s2674_s16, 2 }
  0x1e   : > { %s2178_s26 = sshll.u32 %s333_s23, 2  ;;  %s341_s12 = scalar_lea.hbm %s4102_s0, %s2179_s29 }
  0x1f   : > { %s337_s18 = scalar_lea.vmem [#allocation2], %s2178_s26  ;;  %s343_s2 = sshll.u32 %s341_s12, 4  ;;  %s344_s2 = int_to_ptr.hbm [resolvable:$true] %s343_s2 }
  0x20   : > { %s345_s22 = sshll.u32 %s337_s18, 4  ;;  %p2820_p10 = pnand %p2304_p7, %p43_p3  ;;  %s346_s22 = int_to_ptr.vmem [resolvable:$true] %s345_s22 }
  0x21   : > { %s334_s7 = scalar_lea.sflag [#allocation3], %s333_s23  ;;  %s2574_s27 = sshra.s32 %s344_s2, 4  ;;  %s2575_s27 = int_to_ptr.hbm [resolvable:$true] %s2574_s27 }
  0x22   : > { %s2576_s15 = scalar_lea.hbm %s2575_s27, 4  ;;  %p2578_p11 = pneg %p2820_p10 }
  0x23   : > { %p2577_p2 = scmp.ne.s32.totalorder %s2575_s27, %s2576_s15  ;;  %s2581_s30 = scalar_lea.hbm %s4102_s0, 8 }
  0x24   : > { %p2582_p0 = scmp.lt.s32.totalorder %s2575_s27, %s4102_s0  ;;  %p2583_p3 = scmp.lt.s32.totalorder %s2581_s30, %s2576_s15 }
  0x25   : > { %p2579_p12 = pnand %p2578_p11, %p2577_p2 }
  0x26   : > { %p2584_p7 = por %p2583_p3, %p2582_p0 }
  0x27   : > { %p2580_p13 = pneg %p2579_p12 }
  0x29   : > { %p2585_p9 = pnand %p2584_p7, %p2580_p13 }
  0x2b   : > { %2588 = shalt.err (!%p2585_p9)
}
  0x2c   : > { %2297 = dma.hbm_to_vmem [thread:$0]  (!%p2820_p10), %s344_s2, 64, %s346_s22, %s334_s7  }
  0x2d   : > { %354 = sbr.rel (%p2784_p8) target bundleno = 961 (0x3c1), region = 60 }
  0x32   : > { %s2837_s23 = sand.u32 1, %s2666_s14  }
  0x33   : > { %s2181_s18 = sshll.u32 %s2837_s23, 2  ;;  %s357_s29 = scalar_lea.sflag [#allocation3], %s2837_s23 }
  0x34   : > { %s360_s26 = scalar_lea.vmem [#allocation2], %s2181_s18 }
  0x35   : > { %2649 = dma.done.wait (%p2771_p4), %s357_s29, 64  }
  0x36   : > { %2651 = vsyncadd (%p2771_p4), %s357_s29, 4294967232 }
  0x37   : > { %2653 = dma.done.wait (%p48_p1), [#allocation6], 320  }
  0x38   : > { %2655 = vsyncadd (%p48_p1), [#allocation6], 4294966976  ;;  %v2266_v0 = vld [vmem:[%s4103_s1 + $0x8] sm:$0xff]  ;;  %v2265_v1 = vld [vmem:[%s4103_s1] sm:$0xff]  ;;  %vm4118_vm0 = vcmask 261120   ;;  %v443_v3 = vlaneseq  ;;  %v4116_v6 = vmov 0.0  }
  0x39   : > { %436 = vmatpush.bf16.msra.mxu0 %v2266_v0  ;;  %v409_v2 = vld [vmem:[%s360_s26] sm:$0xf]  ;;  %v2270_v5 = vld [vmem:[%s4106_s4 + $0x18] sm:$0xff]  ;;  %v2269_v11 = vld [vmem:[%s4106_s4 + $0x10] sm:$0xff]  ;;  %s2681_s30 = smov 18   ;;  %s2682_s11 = smov 2  }
  0x3a   : > { %v2856_v4 = vand.u32 127, %v443_v3  ;;  %554 = vmatpush.bf16.msra.mxu1 %v2270_v5  ;;  %v2268_v16 = vld [vmem:[%s4106_s4 + $0x8] sm:$0xff]  ;;  %v2886_v19 = vshrl.u32 %v443_v3, 7  ;;  %v2267_v22 = vld [vmem:[%s4106_s4] sm:$0xff]  ;;  %s2683_s19 = smov 110   ;;  %s2684_s27 = smov 126  }
  0x3b   : > { %v2430_v25 = vld [vmem:[#allocation5] ss:$0 sm:$0xff]  ;;  %v2431_v29 = vld [vmem:[#allocation5 + $0x1] ss:$0 sm:$0xff]  ;;  %v2433_v30 = vld [vmem:[%s4105_s3] ss:$0 sm:$0xff] }
  0x3c   : > { %vm604_vm1 = vcmp.eq.s32.totalorder %v2856_v4, 0  ;;  %vm697_vm2 = vcmp.eq.s32.totalorder %v2856_v4, 1  ;;  %vm783_vm3 = vcmp.eq.s32.totalorder %v2856_v4, 2  ;;  %vm869_vm4 = vcmp.eq.s32.totalorder %v2856_v4, 3  ;;  %v2434_v34 = vld [vmem:[#allocation5 + $0x2] ss:$0 sm:$0xff] }
  0x3d   : > { %437 = vmatpush.bf16.msra.mxu0 %v2265_v1  ;;  %v2212_v7 = vsel %vm604_vm1, 1.0, %v4116_v6  ;;  %v2214_v8 = vsel %vm697_vm2, 1.0, %v4116_v6  ;;  %v2216_v9 = vsel %vm783_vm3, 1.0, %v4116_v6  ;;  %v2218_v10 = vsel %vm869_vm4, 1.0, %v4116_v6  ;;  %v2432_v37 = vld [vmem:[#allocation5 + $0x3] ss:$0 sm:$0xff] }
  0x3e   : > { %v2355_v12 = vpack.i.bf16 %v2214_v8, %v2212_v7  ;;  %v2360_v13 = vpack.i.bf16 %v2218_v10, %v2216_v9  ;;  %vm1127_vm5 = vcmp.eq.s32.totalorder %v2856_v4, 6  ;;  %vm1213_vm6 = vcmp.eq.s32.totalorder %v2856_v4, 7  ;;  %555 = vmatpush.bf16.msra.mxu1 %v2269_v11  ;;  %v564_v10 = vld [vmem:[%s4107_s5] sm:$0x1]  ;;  %s2184_s22 = sshll.u32 %s2837_s23, 3  ;;  %s2069_s26 = scalar_lea.sflag [#allocation4], %s2837_s23 }
  0x3f   : > { %vm955_vm7 = vcmp.eq.s32.totalorder %v2856_v4, 4  ;;  %vm1041_vm8 = vcmp.eq.s32.totalorder %v2856_v4, 5  ;;  %v2224_v14 = vsel %vm1127_vm5, 1.0, %v4116_v6  ;;  %v2226_v15 = vsel %vm1213_vm6, 1.0, %v4116_v6  ;;  %s407_s12 = scalar_lea.vmem [#allocation8], %s2184_s22  ;;  %s2624_s24 = scalar_lea.hbm %s4112_s10, 16 }
  0x40   : > { %2193 = vmatmul.msk.bf16.vlgmr.msra.gmra.mxu0 %vm4118_vm0, %v409_v2  ;;  %2356 = vrot.lane.b32.xlu1 %v2355_v12, %s2681_s30  ;;  %v2220_v17 = vsel %vm955_vm7, 1.0, %v4116_v6  ;;  %v2222_v18 = vsel %vm1041_vm8, 1.0, %v4116_v6  ;;  %v2385_v20 = vpack.i.bf16 %v2226_v15, %v2224_v14  ;;  %v2892_v23 = vand.u32 7, %v2886_v19  ;;  %s2081_s18 = sshll.u32 %s407_s12, 4  ;;  %s2082_s18 = int_to_ptr.vmem [resolvable:$true] %s2081_s18 }
  0x41   : > { %2361 = vrot.lane.b32.xlu2 %v2360_v13, %s2682_s11  ;;  %2351 = vrot.lane.b32.xlu0 %v2355_v12, %s2682_s11  ;;  %v2375_v21 = vpack.i.bf16 %v2222_v18, %v2220_v17  ;;  %vm1299_vm12 = vcmp.eq.s32.totalorder %v2856_v4, 8  ;;  %vm1385_vm13 = vcmp.eq.s32.totalorder %v2856_v4, 9  ;;  %vm1471_vm14 = vcmp.eq.s32.totalorder %v2856_v4, 10 }
  0x42   : > { %556 = vmatpush.bf16.msra.mxu1 %v2268_v16  ;;  %vm462_vm9 = vcmp.ge.s32.totalorder %v2892_v23, 3  ;;  %vm4121_vm10 = vcmp.ge.s32.totalorder %v2892_v23, 2  ;;  %vm480_vm11 = vcmp.ge.s32.totalorder %v2892_v23, 1  ;;  %v2228_v46 = vsel %vm1299_vm12, 1.0, %v4116_v6 }
  0x43   : > { %v2230_v47 = vsel %vm1385_vm13, 1.0, %v4116_v6  ;;  %vm1557_vm15 = vcmp.eq.s32.totalorder %v2856_v4, 11  ;;  %vm1643_vm1 = vcmp.eq.s32.totalorder %v2856_v4, 12  ;;  %vm1729_vm2 = vcmp.eq.s32.totalorder %v2856_v4, 13 }
  0x44   : > { %v2395_v49 = vpack.i.bf16 %v2230_v47, %v2228_v46  ;;  %v2232_v50 = vsel %vm1471_vm14, 1.0, %v4116_v6  ;;  %v2234_v51 = vsel %vm1557_vm15, 1.0, %v4116_v6  ;;  %v2236_v52 = vsel %vm1643_vm1, 1.0, %v4116_v6 }
  0x45   : > { %v2238_v53 = vsel %vm1729_vm2, 1.0, %v4116_v6  ;;  %v2400_v54 = vpack.i.bf16 %v2234_v51, %v2232_v50  ;;  %vm1815_vm3 = vcmp.eq.s32.totalorder %v2856_v4, 14  ;;  %vm1901_vm4 = vcmp.eq.s32.totalorder %v2856_v4, 15 }
  0x46   : > { %557 = vmatpush.bf16.msra.mxu1 %v2267_v22  ;;  %v2405_v55 = vpack.i.bf16 %v2238_v53, %v2236_v52  ;;  %v2240_v58 = vsel %vm1815_vm3, 1.0, %v4116_v6  ;;  %v2242_v59 = vsel %vm1901_vm4, 1.0, %v4116_v6  ;;  %vm573_vm12 = vcmask 1040384  }
  0x47   : > { %v2410_v60 = vpack.i.bf16 %v2242_v59, %v2240_v58  ;;  %v575_v11 = vsel %vm573_vm12, %v564_v10, 0  ;;  %vm569_vm13 = vcmask 15360   ;;  %vm4119_vm14 = vcmask 130048  }
  0x48   : > { %2366 = vrot.lane.b32.xlu1 %v2360_v13, %s2681_s30  ;;  %584 = vmatpush.bf16.msra.mxu2 %v575_v11  ;;  %vm608_vm15 = vcmp.eq.s32.totalorder %v2886_v19, 0  ;;  %vm700_vm1 = vcmp.eq.s32.totalorder %v2886_v19, 1  ;;  %vm958_vm2 = vcmp.eq.s32.totalorder %v2886_v19, 4  ;;  %vm786_vm3 = vcmp.eq.s32.totalorder %v2886_v19, 2 }
  0x49   : > { %2386 = vrot.lane.b32.xlu2 %v2385_v20, %s2681_s30  ;;  %2376 = vrot.lane.b32.xlu0 %v2375_v21, %s2681_s30  ;;  %vm872_vm4 = vcmp.eq.s32.totalorder %v2886_v19, 3  ;;  %vm457_vm12 = vcmp.eq.s32.totalorder %v2892_v23, 0 }
  0x50   : > { %2371 = vrot.lane.b32.xlu1 %v2375_v21, %s2682_s11 }
  0x51   : > { %2396 = vrot.lane.b32.xlu2 %v2395_v49, %s2681_s30  ;;  %2391 = vrot.lane.b32.xlu0 %v2395_v49, %s2682_s11 }
  0x58   : > { %2381 = vrot.lane.b32.xlu1 %v2385_v20, %s2682_s11 }
  0x59   : > { %2401 = vrot.lane.b32.xlu2 %v2400_v54, %s2682_s11  ;;  %2421 = vrot.lane.b32.xlu0 %v2405_v55, %s2681_s30 }
  0x60   : > { %2406 = vrot.lane.b32.xlu1 %v2405_v55, %s2682_s11 }
  0x61   : > { %2411 = vrot.lane.b32.xlu2 %v2410_v60, %s2682_s11 }
  0x69   : > { %2416 = vrot.lane.b32.xlu2 %v2400_v54, %s2681_s30 }
  0x71   : > { %2426 = vrot.lane.b32.xlu2 %v2410_v60, %s2681_s30  ;;  %s2685_s30 = smov 64  }
  0xb2   : > { %v2357_v12 = vpop.permute.xlu1 %2356 }
  0xb3   : > { %v2352_v14 = vpop.permute.xlu0 %2351  ;;  %v2359_v15 = vunpack.i.h.bf16 %v2357_v12  ;;  %v2358_v16 = vunpack.i.l.bf16 %v2357_v12 }
  0xb4   : > { %v2353_v17 = vunpack.i.l.bf16 %v2352_v14 }
  0xba   : > { %v2367_v13 = vpop.permute.xlu1 %2366 }
  0xbd   : > { %v2897_v24 = vpop.f32.mrf.mxu0 }
  0xbe   : > { %4133 = vst [vmem:[#allocation14_spill] sm:$0xff] %v2897_v24  ;;  %v463_v26 = vrot.slane %v2897_v24, 5  ;;  %v472_v27 = vrot.slane %v2897_v24, 6  ;;  %v481_v28 = vrot.slane %v2897_v24, 7  ;;  %v491_v42 = vmul.f32 %v2432_v37, %v2897_v24 }
  0xc0   : > { %v466_v31 = vsel %vm462_vm9, %v463_v26, 0.0  ;;  %v475_v32 = vsel %vm4121_vm10, %v472_v27, 0.0  ;;  %v484_v35 = vsel %vm480_vm11, %v481_v28, 0.0  ;;  %vm4120_vm9 = vcmask 523264   ;;  %v2362_v26 = vpop.permute.xlu2 %2361 }
  0xc1   : > { %v469_v33 = vmul.f32 %v2430_v25, %v466_v31  ;;  %v478_v36 = vmul.f32 %v2431_v29, %v475_v32  ;;  %v487_v41 = vmul.f32 %v2434_v34, %v484_v35  ;;  %v2364_v28 = vunpack.i.h.bf16 %v2362_v26  ;;  %v2377_v35 = vpop.permute.xlu0 %2376 }
  0xc2   : > { %v2372_v27 = vpop.permute.xlu1 %2371  ;;  %v2378_v37 = vunpack.i.l.bf16 %v2377_v35 }
  0xc3   : > { %v470_v38 = vadd.f32 %v2433_v30, %v469_v33  ;;  %v2373_v29 = vunpack.i.l.bf16 %v2372_v27  ;;  %v2354_v30 = vunpack.i.h.bf16 %v2352_v14 }
  0xc5   : > { %v441_v39 = vpop.f32.mrf.mxu0  ;;  %v479_v40 = vadd.f32 %v478_v36, %v470_v38  ;;  %v2369_v36 = vunpack.i.h.bf16 %v2367_v13  ;;  %v2363_v38 = vunpack.i.l.bf16 %v2362_v26 }
  0xc7   : > { %v488_v43 = vadd.f32 %v487_v41, %v479_v40 }
  0xc9   : > { %v492_v44 = vadd.f32 %v491_v42, %v488_v43  ;;  %v2387_v42 = vpop.permute.xlu2 %2386  ;;  %v2374_v43 = vunpack.i.h.bf16 %v2372_v27 }
  0xca   : > { %v2382_v49 = vpop.permute.xlu1 %2381  ;;  %v2389_v50 = vunpack.i.h.bf16 %v2387_v42  ;;  %v2388_v60 = vunpack.i.l.bf16 %v2387_v42  ;;  %v3022_v42 = vld [vmem:[#allocation7 + $0x8] sm:$0xff] }
  0xcb   : > { %v493_v45 = vsub.f32 0.0, %v492_v44  ;;  %v2384_v51 = vunpack.i.h.bf16 %v2382_v49  ;;  %v2383_v52 = vunpack.i.l.bf16 %v2382_v49  ;;  %v2217_v49 = vsel %vm786_vm3, 1.0, %v4116_v6 }
  0xcd   : > { %v494_v48 = vmul.f32 1.442695, %v493_v45  ;;  %v2368_v45 = vunpack.i.l.bf16 %v2367_v13 }
  0xcf   : > { %2437 = vpow2.f32 %v494_v48 }
  0xd1   : > { %v2397_v53 = vpop.permute.xlu2 %2396 }
  0xd2   : > { %v2398_v58 = vunpack.i.l.bf16 %v2397_v53 }
  0xd5   : > { %v2438_v56 = vpop.eup %2437 }
  0xd6   : > { %v496_v57 = vadd.f32 1.0, %v2438_v56 }
  0xd8   : > { %2439 = vrcp.f32 %v496_v57  ;;  %v508_v0 = vand.u32 2147483648, %v496_v57  ;;  %v506_v2 = vand.u32 2147483647, %v496_v57  ;;  %vm502_vm6 = vweird.f32 %v496_v57 }
  0xda   : > { %v509_v4 = vor.u32 1.1754944e-38, %v508_v0  ;;  %vm507_vm8 = vcmp.eq.f32.partialorder %v506_v2, 8.507059e+37 }
  0xde   : > { %v2440_v61 = vpop.eup %2439 }
  0xdf   : > { %v498_v62 = vmul.f32 %v2440_v61, %v496_v57  ;;  %vm503_vm5 = vweird.f32 %v2440_v61  ;;  %v2392_v57 = vpop.permute.xlu0 %2391 }
  0xe0   : > { %vm504_vm7 = vmor %vm502_vm6, %vm503_vm5  ;;  %v2393_v59 = vunpack.i.l.bf16 %v2392_v57  ;;  %vm1130_vm5 = vcmp.eq.s32.totalorder %v2886_v19, 6  ;;  %vm1044_vm6 = vcmp.eq.s32.totalorder %v2886_v19, 5 }
  0xe1   : > { %v499_v63 = vsub.f32 1.0, %v498_v62 }
  0xe3   : > { %v500_v1 = vmul.f32 %v2440_v61, %v499_v63 }
  0xe5   : > { %v501_v3 = vadd.f32 %v2440_v61, %v500_v1  ;;  %v2399_v1 = vunpack.i.h.bf16 %v2397_v53  ;;  %v2219_v53 = vsel %vm872_vm4, 1.0, %v4116_v6 }
  0xe7   : > { %v505_v5 = vsel %vm504_vm7, %v2440_v61, %v501_v3  ;;  %v2402_v61 = vpop.permute.xlu2 %2401  ;;  %v2394_v3 = vunpack.i.h.bf16 %v2392_v57  ;;  %v3001_v27 = vpop.permute.xlu0 %2421  ;;  %vm1216_vm7 = vcmp.eq.s32.totalorder %v2886_v19, 7 }
  0xe8   : > { %v510_v7 = vsel %vm507_vm8, %v509_v4, %v505_v5  ;;  %v2403_v2 = vunpack.i.l.bf16 %v2402_v61  ;;  %v2404_v11 = vunpack.i.h.bf16 %v2402_v61 }
  0xe9   : > { %v2938_v8 = vmul.f32 %v510_v7, %v492_v44  ;;  %v2379_v44 = vunpack.i.h.bf16 %v2377_v35  ;;  %v2407_v7 = vpop.permute.xlu1 %2406 }
  0xea   : > { %v2408_v12 = vunpack.i.l.bf16 %v2407_v7  ;;  %v2409_v13 = vunpack.i.h.bf16 %v2407_v7 }
  0xeb   : > { %4134 = vst [vmem:[#allocation15_spill] sm:$0xff] %v2938_v8  ;;  %v513_v9 = vpack.c.bf16 %v2938_v8, %v2938_v8 }
  0xed   : > { %2210 = vmatmul.msk.bf16.vlgmr.msra.gmra.mxu1 %vm4120_vm9, %v513_v9 }
  0xef   : > { %v2412_v10 = vpop.permute.xlu2 %2411 }
 0x16a   : > { %v2947_v18 = vpop.f32.mrf.mxu1 }
 0x16b   : > { %v732_v20 = vmul.f32 %v2359_v15, %v2947_v18  ;;  %v641_v21 = vmul.f32 %v2358_v16, %v2947_v18  ;;  %v629_v22 = vmul.f32 %v2353_v17, %v2947_v18  ;;  %v563_v25 = vpack.c.bf16 %v2947_v18, %v2947_v18 }
 0x16c   : > { %v893_v32 = vmul.f32 %v2364_v28, %v2947_v18  ;;  %v979_v33 = vmul.f32 %v2373_v29, %v2947_v18  ;;  %v721_v34 = vmul.f32 %v2354_v30, %v2947_v18  ;;  %v904_v39 = vmul.f32 %v2369_v36, %v2947_v18 }
 0x16d   : > { %734 = vrot.lane.b32.xlu1 %v732_v20, %s2683_s19  ;;  %643 = vrot.lane.b32.xlu2 %v641_v21, %s2683_s19  ;;  %v990_v40 = vmul.f32 %v2378_v37, %v2947_v18  ;;  %v807_v41 = vmul.f32 %v2363_v38, %v2947_v18  ;;  %v1076_v46 = vmul.f32 %v2379_v44, %v2947_v18  ;;  %v2414_v17 = vunpack.i.h.bf16 %v2412_v10  ;;  %v2417_v21 = vpop.permute.xlu2 %2416 }
 0x16e   : > { %631 = vrot.lane.b32.xlu0 %v629_v22, %s2684_s27  ;;  %2211 = vmatmul.msk.bf16.vlgmr.msra.gmra.mxu2 %vm569_vm13, %v563_v25  ;;  %v1065_v47 = vmul.f32 %v2374_v43, %v2947_v18  ;;  %v818_v48 = vmul.f32 %v2368_v45, %v2947_v18  ;;  %v1248_v54 = vmul.f32 %v2389_v50, %v2947_v18  ;;  %v2413_v20 = vunpack.i.l.bf16 %v2412_v10 }
 0x16f   : > { %v1237_v55 = vmul.f32 %v2384_v51, %v2947_v18  ;;  %v1151_v56 = vmul.f32 %v2383_v52, %v2947_v18  ;;  %v1334_v62 = vmul.f32 %v2398_v58, %v2947_v18  ;;  %v1323_v63 = vmul.f32 %v2393_v59, %v2947_v18 }
 0x170   : > { %v1162_v0 = vmul.f32 %v2388_v60, %v2947_v18  ;;  %v1495_v4 = vmul.f32 %v2403_v2, %v2947_v18  ;;  %v1420_v5 = vmul.f32 %v2399_v1, %v2947_v18  ;;  %v1409_v9 = vmul.f32 %v2394_v3, %v2947_v18 }
 0x171   : > { %v1667_v14 = vmul.f32 %v2408_v12, %v2947_v18  ;;  %v1581_v15 = vmul.f32 %v2404_v11, %v2947_v18  ;;  %v1753_v16 = vmul.f32 %v2409_v13, %v2947_v18  ;;  %v2418_v22 = vunpack.i.l.bf16 %v2417_v21 }
 0x172   : > { %v561_v31 = vpop.f32.mrf.mxu1  ;;  %v1925_v25 = vmul.f32 %v2414_v17, %v2947_v18  ;;  %v1839_v26 = vmul.f32 %v2413_v20, %v2947_v18  ;;  %v2419_v29 = vunpack.i.h.bf16 %v2417_v21  ;;  %v2423_v30 = vunpack.i.l.bf16 %v3001_v27 }
 0x173   : > { %v1506_v28 = vmul.f32 %v2418_v22, %v2947_v18  ;;  %v2215_v43 = vsel %vm700_vm1, 1.0, %v4116_v6  ;;  %v2221_v45 = vsel %vm958_vm2, 1.0, %v4116_v6  ;;  %vm660_vm13 = vcmp.ge.s32.totalorder %v2892_v23, 4 }
 0x174   : > { %v1678_v31 = vmul.f32 %v2423_v30, %v2947_v18 }
 0x175   : > { %895 = vrot.lane.b32.xlu1 %v893_v32, %s2684_s27  ;;  %981 = vrot.lane.b32.xlu2 %v979_v33, %s2684_s27  ;;  %v1592_v32 = vmul.f32 %v2419_v29, %v2947_v18  ;;  %v3012_v33 = vpop.permute.xlu2 %2426 }
 0x176   : > { %723 = vrot.lane.b32.xlu0 %v721_v34, %s2684_s27 }
 0x17d   : > { %906 = vrot.lane.b32.xlu1 %v904_v39, %s2683_s19  ;;  %992 = vrot.lane.b32.xlu2 %v990_v40, %s2683_s19  ;;  %v3018_v40 = vld [vmem:[#allocation7] sm:$0xff] }
 0x17e   : > { %809 = vrot.lane.b32.xlu0 %v807_v41, %s2684_s27  ;;  %v2213_v41 = vsel %vm608_vm15, 1.0, %v4116_v6  ;;  %v706_v52 = vmul.f32 %v2215_v43, %v3018_v40  ;;  %v792_v57 = vmul.f32 %v2217_v49, %v3018_v40  ;;  %v878_v60 = vmul.f32 %v2219_v53, %v3018_v40 }
 0x17f   : > { %v614_v44 = vmul.f32 %v2213_v41, %v3018_v40 }
 0x180   : > { %v794_v3 = vsel %vm4120_vm9, %v792_v57, 0.0  ;;  %v3071_v57 = vadd.s32 8, %v2886_v19 }
 0x182   : > { %vm1389_vm8 = vcmp.eq.s32.totalorder %v3071_v57, 9  ;;  %vm1303_vm15 = vcmp.eq.s32.totalorder %v3071_v57, 8  ;;  %vm1647_vm1 = vcmp.eq.s32.totalorder %v3071_v57, 12  ;;  %vm1475_vm0 = vcmp.eq.s32.totalorder %v3071_v57, 10 }
 0x185   : > { %1078 = vrot.lane.b32.xlu1 %v1076_v46, %s2683_s19  ;;  %1067 = vrot.lane.b32.xlu2 %v1065_v47, %s2684_s27 }
 0x186   : > { %820 = vrot.lane.b32.xlu0 %v818_v48, %s2683_s19  ;;  %v615_v48 = vmul.f32 0.0, %v3022_v42 }
 0x188   : > { %v617_v59 = vsel %vm4120_vm9, %v615_v48, 0.0 }
 0x189   : > { %v796_v17 = vadd.f32 %v794_v3, %v617_v59 }
 0x18d   : > { %1250 = vrot.lane.b32.xlu1 %v1248_v54, %s2683_s19  ;;  %1239 = vrot.lane.b32.xlu2 %v1237_v55, %s2684_s27  ;;  %v964_v54 = vmul.f32 %v2221_v45, %v3018_v40  ;;  %v2225_v55 = vsel %vm1130_vm5, 1.0, %v4116_v6  ;;  %vm1561_vm5 = vcmp.eq.s32.totalorder %v3071_v57, 11 }
 0x18e   : > { %1153 = vrot.lane.b32.xlu0 %v1151_v56, %s2684_s27  ;;  %v616_v56 = vsel %vm4120_vm9, %v614_v44, 0.0  ;;  %v1136_v61 = vmul.f32 %v2225_v55, %v3018_v40 }
 0x18f   : > { %v966_v1 = vsel %vm4120_vm9, %v964_v54, 0.0  ;;  %v618_v2 = vadd.f32 %v617_v59, %v616_v56 }
 0x190   : > { %v1138_v10 = vsel %vm4120_vm9, %v1136_v61, 0.0 }
 0x191   : > { %v619_v20 = vrot.slane %v618_v2, 4  ;;  %v1140_v22 = vadd.f32 %v1138_v10, %v617_v59 }
 0x195   : > { %1336 = vrot.lane.b32.xlu1 %v1334_v62, %s2683_s19  ;;  %1325 = vrot.lane.b32.xlu2 %v1323_v63, %s2684_s27  ;;  %v2223_v62 = vsel %vm1044_vm6, 1.0, %v4116_v6  ;;  %v708_v63 = vsel %vm4120_vm9, %v706_v52, 0.0 }
 0x196   : > { %1164 = vrot.lane.b32.xlu0 %v1162_v0, %s2683_s19  ;;  %v2435_v0 = vld [vmem:[%s4108_s6] ss:$0 sm:$0xff]  ;;  %v710_v7 = vadd.f32 %v708_v63, %v617_v59 }
 0x19d   : > { %1497 = vrot.lane.b32.xlu1 %v1495_v4, %s2684_s27  ;;  %1422 = vrot.lane.b32.xlu2 %v1420_v5, %s2683_s19  ;;  %v1050_v4 = vmul.f32 %v2223_v62, %v3018_v40 }
 0x19e   : > { %1411 = vrot.lane.b32.xlu0 %v1409_v9, %s2684_s27  ;;  %v880_v9 = vsel %vm4120_vm9, %v878_v60, 0.0 }
 0x19f   : > { %v882_v21 = vadd.f32 %v880_v9, %v617_v59 }
 0x1a5   : > { %1669 = vrot.lane.b32.xlu1 %v1667_v14, %s2684_s27  ;;  %1583 = vrot.lane.b32.xlu2 %v1581_v15, %s2684_s27  ;;  %v968_v14 = vadd.f32 %v966_v1, %v617_v59  ;;  %v2231_v1 = vsel %vm1389_vm8, 1.0, %v4116_v6 }
 0x1a6   : > { %1755 = vrot.lane.b32.xlu0 %v1753_v16, %s2684_s27 }
 0x1a7   : > { %v969_v29 = vrot.slane %v968_v14, 4 }
 0x1ad   : > { %1927 = vrot.lane.b32.xlu1 %v1925_v25, %s2684_s27  ;;  %1841 = vrot.lane.b32.xlu2 %v1839_v26, %s2684_s27  ;;  %v1052_v25 = vsel %vm4120_vm9, %v1050_v4, 0.0  ;;  %s2262_s27 = sshll.u32 %s2762_s17, 3 }
 0x1ae   : > { %1508 = vrot.lane.b32.xlu0 %v1506_v28, %s2683_s19  ;;  %v711_v28 = vrot.slane %v710_v7, 4  ;;  %v1054_v30 = vadd.f32 %v1052_v25, %v617_v59  ;;  %s2079_s11 = scalar_lea.hbm %s4112_s10, %s2262_s27 }
 0x1af   : > { %s2083_s29 = sshll.u32 %s2079_s11, 4  ;;  %s2084_s29 = int_to_ptr.hbm [resolvable:$true] %s2083_s29 }
 0x1b0   : > { %v712_v44 = vadd.f32 %v711_v28, %v710_v7  ;;  %v1055_v45 = vrot.slane %v1054_v30, 4  ;;  %s2618_s2 = sshra.s32 %s2084_s29, 4  ;;  %s2619_s2 = int_to_ptr.hbm [resolvable:$true] %s2618_s2 }
 0x1b1   : > { %s2620_s7 = scalar_lea.hbm %s2619_s2, 8  ;;  %p2625_p9 = scmp.lt.s32.totalorder %s2619_s2, %s4112_s10 }
 0x1b2   : > { %v713_v61 = vrot.slane %v712_v44, 2  ;;  %v1056_v62 = vadd.f32 %v1055_v45, %v1054_v30  ;;  %p2621_p1 = scmp.ne.s32.totalorder %s2619_s2, %s2620_s7  ;;  %p2626_p10 = scmp.lt.s32.totalorder %s2624_s24, %s2620_s7 }
 0x1b4   : > { %v714_v9 = vadd.f32 %v713_v61, %v712_v44  ;;  %v1057_v10 = vrot.slane %v1056_v62, 2  ;;  %p2622_p4 = pnand %p2621_p1, %p2810_p5  ;;  %p2627_p2 = por %p2626_p10, %p2625_p9 }
 0x1b5   : > { %1680 = vrot.lane.b32.xlu1 %v1678_v31, %s2683_s19  ;;  %1594 = vrot.lane.b32.xlu2 %v1592_v32, %s2683_s19 }
 0x1b6   : > { %v715_v30 = vrot.slane %v714_v9, 1  ;;  %p2623_p8 = pneg %p2622_p4 }
 0x1b8   : > { %p2628_p11 = pnand %p2627_p2, %p2623_p8 }
 0x1c7   : > { %v644_v34 = vpop.permute.xlu2 %643 }
 0x1c8   : > { %v646_v35 = vsel %vm4119_vm14, %v644_v34, 0.0  ;;  %v797_v34 = vrot.slane %v796_v17, 4 }
 0x1ca   : > { %v798_v52 = vadd.f32 %v797_v34, %v796_v17 }
 0x1cf   : > { %v982_v39 = vpop.permute.xlu2 %981 }
 0x1d0   : > { %v984_v12 = vsel %vm4119_vm14, %v982_v39, 0.0 }
 0x1d7   : > { %v3041_v58 = vpop.permute.xlu2 %992 }
 0x1d8   : > { %v995_v63 = vsel %vm4119_vm14, %v3041_v58, 0.0 }
 0x1de   : > { %647 = vadd.xlane.f32.xlu2 %v646_v35  ;;  %v2227_v35 = vsel %vm1216_vm7, 1.0, %v4116_v6  ;;  %vm1905_vm7 = vcmp.eq.s32.totalorder %v3071_v57, 15 }
 0x1df   : > { %v735_v36 = vpop.permute.xlu1 %734  ;;  %v3063_v31 = vpop.permute.xlu2 %1067  ;;  %v1222_v39 = vmul.f32 %v2227_v35, %v3018_v40 }
 0x1e0   : > { %v632_v37 = vpop.permute.xlu0 %631  ;;  %v737_v50 = vsel %vm4119_vm14, %v735_v36, 0.0  ;;  %v620_v36 = vadd.f32 %v619_v20, %v618_v2 }
 0x1e1   : > { %v635_v38 = vsel %vm4119_vm14, %v632_v37, 0.0  ;;  %v883_v37 = vrot.slane %v882_v21, 4 }
 0x1e2   : > { %636 = vadd.xlane.f32.xlu1 %v635_v38  ;;  %v1141_v38 = vrot.slane %v1140_v22, 4  ;;  %v621_v54 = vrot.slane %v620_v36, 2 }
 0x1e3   : > { %v884_v55 = vadd.f32 %v883_v37, %v882_v21 }
 0x1e4   : > { %v1142_v56 = vadd.f32 %v1141_v38, %v1140_v22  ;;  %v622_v2 = vadd.f32 %v621_v54, %v620_v36 }
 0x1e5   : > { %v885_v3 = vrot.slane %v884_v55, 2 }
 0x1e6   : > { %v1143_v4 = vrot.slane %v1142_v56, 2 }
 0x1e7   : > { %v896_v46 = vpop.permute.xlu1 %895  ;;  %v1240_v7 = vpop.permute.xlu2 %1239  ;;  %v886_v22 = vadd.f32 %v885_v3, %v884_v55 }
 0x1e8   : > { %v724_v47 = vpop.permute.xlu0 %723  ;;  %v898_v48 = vsel %vm4119_vm14, %v896_v46, 0.0  ;;  %v1144_v25 = vadd.f32 %v1143_v4, %v1142_v56 }
 0x1e9   : > { %v726_v51 = vsel %vm4119_vm14, %v724_v47, 0.0  ;;  %v887_v36 = vrot.slane %v886_v22, 1 }
 0x1ea   : > { %738 = vadd.xlane.f32.xlu1 %v737_v50  ;;  %727 = vadd.xlane.f32.xlu0 %v726_v51  ;;  %v970_v50 = vadd.f32 %v969_v29, %v968_v14  ;;  %v1224_v51 = vsel %vm4120_vm9, %v1222_v39, 0.0  ;;  %v623_v29 = vrot.slane %v622_v2, 1  ;;  %v1145_v37 = vrot.slane %v1144_v25, 1 }
 0x1eb   : > { %v1226_v53 = vadd.f32 %v1224_v51, %v617_v59  ;;  %v799_v59 = vrot.slane %v798_v52, 2 }
 0x1ec   : > { %v971_v46 = vrot.slane %v970_v50, 2  ;;  %v1146_v56 = vadd.f32 %v1145_v37, %v1144_v25 }
 0x1ed   : > { %v800_v21 = vadd.f32 %v799_v59, %v798_v52 }
 0x1ee   : > { %v972_v17 = vadd.f32 %v971_v46, %v970_v50  ;;  %v1242_v46 = vsel %vm4119_vm14, %v1240_v7, 0.0 }
 0x1ef   : > { %v907_v15 = vpop.permute.xlu1 %906  ;;  %v801_v35 = vrot.slane %v800_v21, 1  ;;  %v1326_v50 = vpop.permute.xlu2 %1325 }
 0x1f0   : > { %v810_v5 = vpop.permute.xlu0 %809  ;;  %v909_v14 = vsel %vm4119_vm14, %v907_v15, 0.0  ;;  %v973_v15 = vrot.slane %v972_v17, 1 }
 0x1f1   : > { %v586_v11 = vpop.f32.mrf.mxu2  ;;  %v812_v13 = vsel %vm4119_vm14, %v810_v5, 0.0  ;;  %v802_v55 = vadd.f32 %v801_v35, %v800_v21 }
 0x1f2   : > { %v3058_v16 = vadd.f32 %v2435_v0, %v586_v11  ;;  %985 = vadd.xlane.f32.xlu1 %v984_v12  ;;  %813 = vadd.xlane.f32.xlu2 %v812_v13  ;;  %v1227_v0 = vrot.slane %v1226_v53, 4  ;;  %v1308_v11 = vmul.f32 0.0, %v3018_v40  ;;  %v1395_v12 = vmul.f32 %v2231_v1, %v3022_v42 }
 0x1f4   : > { %v590_v26 = vand.u32 2147483647, %v3058_v16  ;;  %v1228_v20 = vadd.f32 %v1227_v0, %v1226_v53  ;;  %v3082_v28 = vsel %vm4120_vm9, %v1308_v11, 0.0  ;;  %v1397_v40 = vsel %vm4120_vm9, %v1395_v12, 0.0 }
 0x1f5   : > { %v1398_v38 = vadd.f32 %v1397_v40, %v3082_v28  ;;  %v597_v52 = vmax.f32 %v3058_v16, 0.0  ;;  %v1328_v16 = vsel %vm4119_vm14, %v1326_v50, 0.0 }
 0x1f6   : > { %v591_v32 = vsub.f32 0.0, %v590_v26  ;;  %v1058_v26 = vadd.f32 %v1057_v10, %v1056_v62  ;;  %v1229_v34 = vrot.slane %v1228_v20, 2 }
 0x1f7   : > { %v1079_v60 = vpop.permute.xlu1 %1078  ;;  %v1399_v61 = vrot.slane %v1398_v38, 4 }
 0x1f8   : > { %v592_v41 = vmul.f32 1.442695, %v591_v32  ;;  %v821_v43 = vpop.permute.xlu0 %820  ;;  %v1081_v45 = vsel %vm4119_vm14, %v1079_v60, 0.0  ;;  %v3091_v54 = vadd.f32 %v1229_v34, %v1228_v20 }
 0x1f9   : > { %v588_v47 = vpop.f32.mrf.mxu2  ;;  %v823_v49 = vsel %vm4119_vm14, %v821_v43, 0.0  ;;  %v1059_v43 = vrot.slane %v1058_v26, 1 }
 0x1fa   : > { %2441 = vpow2.f32 %v592_v41  ;;  %899 = vadd.xlane.f32.xlu2 %v898_v48  ;;  %824 = vadd.xlane.f32.xlu0 %v823_v49  ;;  %v1070_v41 = vsel %vm4119_vm14, %v3063_v31, 0.0  ;;  %v624_v47 = vadd.f32 %v623_v29, %v622_v2  ;;  %v716_v48 = vadd.f32 %v715_v30, %v714_v9 }
 0x1fb   : > { %v974_v49 = vadd.f32 %v973_v15, %v972_v17  ;;  %v888_v31 = vadd.f32 %v887_v36, %v886_v22  ;;  %v1060_v60 = vadd.f32 %v1059_v43, %v1058_v26  ;;  %v1231_v2 = vrot.slane %v3091_v54, 1 }
 0x1ff   : > { %v1251_v32 = vpop.permute.xlu1 %1250 }
 0x200   : > { %v2442_v5 = vpop.eup %2441  ;;  %v1154_v19 = vpop.permute.xlu0 %1153  ;;  %v1253_v53 = vsel %vm4119_vm14, %v1251_v32, 0.0 }
 0x201   : > { %v594_v13 = vadd.f32 1.0, %v2442_v5  ;;  %v1156_v58 = vsel %vm4119_vm14, %v1154_v19, 0.0  ;;  %v1400_v5 = vadd.f32 %v1399_v61, %v1398_v38 }
 0x202   : > { %910 = vadd.xlane.f32.xlu2 %v909_v14  ;;  %996 = vadd.xlane.f32.xlu0 %v995_v63 }
 0x203   : > { %2443 = vlog2.f32 %v594_v13  ;;  %1157 = vadd.xlane.f32.xlu1 %v1156_v58 }
 0x207   : > { %v1337_v19 = vpop.permute.xlu1 %1336 }
 0x208   : > { %v1165_v39 = vpop.permute.xlu0 %1164 }
 0x209   : > { %v2444_v44 = vpop.eup %2443  ;;  %v1167_v13 = vsel %vm4119_vm14, %v1165_v39, 0.0 }
 0x20a   : > { %v596_v51 = vmul.f32 0.6931472, %v2444_v44  ;;  %1071 = vadd.xlane.f32.xlu2 %v1070_v41  ;;  %1082 = vadd.xlane.f32.xlu0 %v1081_v45 }
 0x20b   : > { %1254 = vadd.xlane.f32.xlu1 %v1253_v53 }
 0x20c   : > { %v3093_v62 = vadd.f32 %v597_v52, %v596_v51  ;;  %v1423_v51 = vpop.permute.xlu2 %1422 }
 0x20e   : > { %v649_v63 = vmul.f32 %v624_v47, %v3093_v62  ;;  %v740_v0 = vmul.f32 %v716_v48, %v3093_v62  ;;  %v998_v1 = vmul.f32 %v974_v49, %v3093_v62  ;;  %v826_v59 = vmul.f32 %v802_v55, %v3093_v62 }
 0x20f   : > { %v912_v3 = vmul.f32 %v888_v31, %v3093_v62  ;;  %v1170_v4 = vmul.f32 %v1146_v56, %v3093_v62  ;;  %v1084_v12 = vmul.f32 %v1060_v60, %v3093_v62  ;;  %v1401_v31 = vrot.slane %v1400_v5, 2 }
 0x210   : > { %v1412_v9 = vpop.permute.xlu0 %1411  ;;  %v650_v7 = vmax.f32 %v649_v63, -20.0  ;;  %v741_v10 = vmax.f32 %v740_v0, -20.0  ;;  %v999_v11 = vmax.f32 %v998_v1, -20.0  ;;  %v827_v58 = vmax.f32 %v826_v59, -20.0  ;;  %v3135_v63 = vpop.permute.xlu1 %1497 }
 0x211   : > { %v1414_v14 = vsel %vm4119_vm14, %v1412_v9, 0.0  ;;  %v913_v17 = vmax.f32 %v912_v3, -20.0  ;;  %v1171_v25 = vmax.f32 %v1170_v4, -20.0  ;;  %v1085_v35 = vmax.f32 %v1084_v12, -20.0 }
 0x212   : > { %1243 = vadd.xlane.f32.xlu2 %v1242_v46  ;;  %1168 = vadd.xlane.f32.xlu0 %v1167_v13  ;;  %v653_v20 = vsel %vm457_vm12, 0.0, %v650_v7  ;;  %v742_v21 = vsel %vm457_vm12, 0.0, %v741_v10  ;;  %v1000_v22 = vsel %vm457_vm12, 0.0, %v999_v11  ;;  %v828_v30 = vsel %vm457_vm12, 0.0, %v827_v58 }
 0x213   : > { %1415 = vadd.xlane.f32.xlu1 %v1414_v14  ;;  %v654_v26 = vrot.slane %v653_v20, 7  ;;  %v743_v40 = vrot.slane %v742_v21, 7  ;;  %v1001_v29 = vrot.slane %v1000_v22, 7  ;;  %v829_v15 = vrot.slane %v828_v30, 7 }
 0x214   : > { %v914_v32 = vsel %vm457_vm12, 0.0, %v913_v17  ;;  %v1172_v34 = vsel %vm457_vm12, 0.0, %v1171_v25  ;;  %v1086_v50 = vsel %vm457_vm12, 0.0, %v1085_v35  ;;  %v1339_v56 = vsel %vm4119_vm14, %v1337_v19, 0.0 }
 0x215   : > { %v655_v36 = vsel %vm480_vm11, %v654_v26, 0.0  ;;  %v744_v37 = vsel %vm480_vm11, %v743_v40, 0.0  ;;  %v1002_v38 = vsel %vm480_vm11, %v1001_v29, 0.0  ;;  %v915_v39 = vrot.slane %v914_v32, 7  ;;  %v3155_v29 = vpop.permute.xlu2 %1583 }
 0x216   : > { %v656_v41 = vadd.f32 %v655_v36, %v653_v20  ;;  %v745_v43 = vadd.f32 %v744_v37, %v742_v21  ;;  %v1003_v44 = vadd.f32 %v1002_v38, %v1000_v22  ;;  %v830_v45 = vsel %vm480_vm11, %v829_v15, 0.0 }
 0x217   : > { %v831_v47 = vadd.f32 %v830_v45, %v828_v30  ;;  %v916_v48 = vsel %vm480_vm11, %v915_v39, 0.0  ;;  %v1173_v49 = vrot.slane %v1172_v34, 7  ;;  %v1232_v7 = vadd.f32 %v1231_v2, %v3091_v54 }
 0x218   : > { %v657_v52 = vrot.slane %v656_v41, 6  ;;  %v746_v53 = vrot.slane %v745_v43, 6  ;;  %v1004_v55 = vrot.slane %v1003_v44, 6  ;;  %v917_v60 = vadd.f32 %v916_v48, %v914_v32  ;;  %v3163_v38 = vpop.permute.xlu1 %1669 }
 0x219   : > { %v832_v61 = vrot.slane %v831_v47, 6  ;;  %v1174_v46 = vsel %vm480_vm11, %v1173_v49, 0.0  ;;  %v1402_v10 = vadd.f32 %v1401_v31, %v1400_v5  ;;  %v1087_v17 = vrot.slane %v1086_v50, 7 }
 0x21a   : > { %1340 = vadd.xlane.f32.xlu2 %v1339_v56  ;;  %1329 = vadd.xlane.f32.xlu0 %v1328_v16  ;;  %v658_v0 = vsel %vm4121_vm10, %v657_v52, 0.0  ;;  %v747_v1 = vsel %vm4121_vm10, %v746_v53, 0.0  ;;  %v1005_v59 = vsel %vm4121_vm10, %v1004_v55, 0.0  ;;  %v1175_v3 = vadd.f32 %v1174_v46, %v1172_v34 }
 0x21b   : > { %v659_v4 = vadd.f32 %v658_v0, %v656_v41  ;;  %v748_v19 = vadd.f32 %v747_v1, %v745_v43  ;;  %v833_v9 = vsel %vm4121_vm10, %v832_v61, 0.0  ;;  %v918_v16 = vrot.slane %v917_v60, 6 }
 0x21c   : > { %v1006_v13 = vadd.f32 %v1005_v59, %v1003_v44  ;;  %v834_v14 = vadd.f32 %v833_v9, %v831_v47  ;;  %v1176_v58 = vrot.slane %v1175_v3, 6  ;;  %v1256_v54 = vmul.f32 %v1232_v7, %v3093_v62 }
 0x21d   : > { %v661_v11 = vrot.slane %v659_v4, 4  ;;  %v749_v12 = vrot.slane %v748_v19, 4  ;;  %v919_v22 = vsel %vm4121_vm10, %v918_v16, 0.0  ;;  %v1403_v25 = vrot.slane %v1402_v10, 1 }
 0x21e   : > { %v1425_v5 = vsel %vm4119_vm14, %v1423_v51, 0.0  ;;  %v1007_v40 = vrot.slane %v1006_v13, 4  ;;  %v920_v15 = vadd.f32 %v919_v22, %v917_v60  ;;  %v1088_v32 = vsel %vm480_vm11, %v1087_v17, 0.0 }
 0x21f   : > { %v664_v20 = vsel %vm660_vm13, %v661_v11, 0.0  ;;  %v750_v21 = vsel %vm660_vm13, %v749_v12, 0.0  ;;  %v835_v34 = vrot.slane %v834_v14, 4  ;;  %v1177_v35 = vsel %vm4121_vm10, %v1176_v58, 0.0 }
 0x220   : > { %v665_v2 = vadd.f32 %v664_v20, %v659_v4  ;;  %v751_v26 = vadd.f32 %v750_v21, %v748_v19  ;;  %v1257_v36 = vmax.f32 %v1256_v54, -20.0  ;;  %v2429_v37 = vunpack.i.h.bf16 %v3012_v33  ;;  %v1756_v19 = vpop.permute.xlu0 %1755  ;;  %v1928_v11 = vpop.permute.xlu1 %1927 }
 0x221   : > { %v1404_v39 = vadd.f32 %v1403_v25, %v1402_v10  ;;  %v1008_v43 = vsel %vm660_vm13, %v1007_v40, 0.0  ;;  %v1089_v44 = vadd.f32 %v1088_v32, %v1086_v50  ;;  %v921_v47 = vrot.slane %v920_v15, 4 }
 0x222   : > { %1426 = vadd.xlane.f32.xlu0 %v1425_v5  ;;  %v666_v30 = vmul.f32 1.442695, %v665_v2  ;;  %v752_v41 = vmul.f32 1.442695, %v751_v26  ;;  %v1258_v45 = vsel %vm457_vm12, 0.0, %v1257_v36  ;;  %v1178_v48 = vadd.f32 %v1177_v35, %v1175_v3  ;;  %v1842_v3 = vpop.permute.xlu2 %1841 }
 0x223   : > { %v2229_v49 = vsel %vm1303_vm15, 1.0, %v4116_v6  ;;  %v836_v51 = vsel %vm660_vm13, %v835_v34, 0.0  ;;  %v1428_v52 = vmul.f32 %v1404_v39, %v3093_v62  ;;  %v1009_v53 = vadd.f32 %v1008_v43, %v1006_v13 }
 0x224   : > { %2445 = vpow2.f32 %v666_v30  ;;  %v1090_v55 = vrot.slane %v1089_v44, 6  ;;  %v1309_v56 = vmul.f32 %v2229_v49, %v3022_v42  ;;  %v1936_v50 = vmul.f32 %v2429_v37, %v2947_v18 }
 0x225   : > { %2447 = vpow2.f32 %v752_v41  ;;  %v1429_v31 = vmax.f32 %v1428_v52, -20.0  ;;  %v837_v61 = vadd.f32 %v836_v51, %v834_v14  ;;  %v922_v60 = vsel %vm660_vm13, %v921_v47, 0.0 }
 0x226   : > { %v1179_v46 = vrot.slane %v1178_v48, 4  ;;  %v2428_v59 = vunpack.i.l.bf16 %v3012_v33  ;;  %v1010_v4 = vmul.f32 1.442695, %v1009_v53  ;;  %v923_v9 = vadd.f32 %v922_v60, %v920_v15 }
 0x227   : > { %v3179_v0 = vsel %vm457_vm12, 0.0, %v1429_v31  ;;  %v1091_v7 = vsel %vm4121_vm10, %v1090_v55, 0.0  ;;  %v1259_v16 = vrot.slane %v1258_v45, 7  ;;  %v1311_v10 = vsel %vm4120_vm9, %v1309_v56, 0.0 }
 0x228   : > { %v838_v12 = vmul.f32 1.442695, %v837_v61  ;;  %v1180_v13 = vsel %vm660_vm13, %v1179_v46, 0.0  ;;  %v1993_v33 = vsub.f32 0.0, %v2897_v24  ;;  %v2424_v58 = vunpack.i.h.bf16 %v3001_v27  ;;  %v1509_v36 = vpop.permute.xlu0 %1508  ;;  %v1681_v43 = vpop.permute.xlu1 %1680 }
 0x229   : > { %v1850_v20 = vmul.f32 %v2428_v59, %v2947_v18  ;;  %2449 = vpow2.f32 %v1010_v4  ;;  %v1092_v21 = vadd.f32 %v1091_v7, %v1089_v44  ;;  %v1312_v22 = vadd.f32 %v1311_v10, %v3082_v28 }
 0x22a   : > { %v3181_v1 = vpop.eup %2445  ;;  %v924_v54 = vmul.f32 1.442695, %v923_v9  ;;  %v1181_v2 = vadd.f32 %v1180_v13, %v1178_v48  ;;  %v1260_v25 = vsel %vm480_vm11, %v1259_v16, 0.0  ;;  %2451 = vpow2.f32 %v838_v12  ;;  %v1595_v35 = vpop.permute.xlu2 %1594 }
 0x22b   : > { %v3190_v14 = vpop.eup %2447  ;;  %v3195_v17 = vadd.f32 1e-12, %v3181_v1  ;;  %v1994_v27 = vmul.f32 1.442695, %v1993_v33  ;;  %v1764_v26 = vmul.f32 %v2424_v58, %v2947_v18  ;;  %v1093_v40 = vrot.slane %v1092_v21, 4 }
 0x22c   : > { %1938 = vrot.lane.b32.xlu1 %v1936_v50, %s2683_s19  ;;  %v3203_v5 = vadd.f32 1e-12, %v3190_v14  ;;  %v1261_v30 = vadd.f32 %v1260_v25, %v1258_v45  ;;  %v1313_v15 = vrot.slane %v1312_v22, 4  ;;  %v1182_v32 = vmul.f32 1.442695, %v1181_v2 }
 0x22d   : > { %2453 = vrcp.f32 %v3195_v17  ;;  %v3213_v37 = vmul.f32 %v3093_v62, %v2938_v8  ;;  %v3217_v18 = vsel %vm4119_vm14, %v3155_v29, 0.0  ;;  %v3220_v39 = vsel %vm4119_vm14, %v1842_v3, 0.0 }
 0x22e   : > { %2455 = vpow2.f32 %v924_v54  ;;  %v1094_v44 = vsel %vm660_vm13, %v1093_v40, 0.0  ;;  %v1262_v45 = vrot.slane %v1261_v30, 6  ;;  %v1314_v47 = vadd.f32 %v1313_v15, %v1312_v22 }
 0x22f   : > { %v3207_v34 = vpop.eup %2449  ;;  %2457 = vrcp.f32 %v3203_v5  ;;  %v3231_v49 = vsel %vm4119_vm14, %v3135_v63, 0.0  ;;  %v3237_v51 = vsel %vm4119_vm14, %v1595_v35, 0.0  ;;  %v3241_v52 = vsel %vm4119_vm14, %v3163_v38, 0.0 }
 0x230   : > { %2459 = vpow2.f32 %v1994_v27  ;;  %v3222_v41 = vpop.eup %2451  ;;  %v3234_v29 = vadd.f32 1e-12, %v3207_v34  ;;  %v3244_v53 = vsel %vm4119_vm14, %v1928_v11, 0.0  ;;  %v3247_v55 = vsel %vm4119_vm14, %v1756_v19, 0.0 }
 0x231   : > { %2461 = vpow2.f32 %v1182_v32  ;;  %v3250_v63 = vsel %vm4119_vm14, %v1509_v36, 0.0  ;;  %v3255_v56 = vadd.f32 1e-12, %v3222_v41  ;;  %v3258_v50 = vsel %vm4119_vm14, %v1681_v43, 0.0 }
 0x232   : > { %1852 = vrot.lane.b32.xlu2 %v1850_v20, %s2683_s19  ;;  %v1095_v61 = vadd.f32 %v1094_v44, %v1092_v21  ;;  %v2237_v38 = vsel %vm1647_vm1, 1.0, %v4116_v6  ;;  %v1263_v59 = vsel %vm4121_vm10, %v1262_v45, 0.0  ;;  %v1431_v3 = vrot.slane %v3179_v0, 7 }
 0x233   : > { %v3227_v48 = vpop.eup %2453  ;;  %v1315_v4 = vrot.slane %v1314_v47, 2  ;;  %v679_v9 = vand.u32 2147483647, %v3195_v17  ;;  %v681_v7 = vand.u32 2147483648, %v3195_v17  ;;  %v767_v16 = vand.u32 2147483648, %v3203_v5 }
 0x234   : > { %v3252_v31 = vpop.eup %2455  ;;  %v671_v46 = vmul.f32 %v3227_v48, %v3195_v17  ;;  %2463 = vrcp.f32 %v3234_v29  ;;  %v765_v10 = vand.u32 2147483647, %v3203_v5  ;;  %v1025_v11 = vand.u32 2147483648, %v3234_v29 }
 0x235   : > { %v3261_v60 = vpop.eup %2457  ;;  %v3277_v12 = vadd.f32 1e-12, %v3252_v31  ;;  %v1653_v13 = vmul.f32 %v2237_v38, %v3022_v42  ;;  %2465 = vrcp.f32 %v3255_v56  ;;  %v1096_v20 = vmul.f32 1.442695, %v1095_v61 }
 0x236   : > { %1766 = vrot.lane.b32.xlu0 %v1764_v26, %s2683_s19  ;;  %v3268_v19 = vpop.eup %2459  ;;  %v757_v58 = vmul.f32 %v3261_v60, %v3203_v5  ;;  %v1264_v21 = vadd.f32 %v1263_v59, %v1261_v30  ;;  %v672_v22 = vsub.f32 1.0, %v671_v46  ;;  %v853_v54 = vand.u32 2147483648, %v3255_v56 }
 0x237   : > { %v3280_v33 = vpop.eup %2461  ;;  %v1432_v2 = vsel %vm480_vm11, %v1431_v3, 0.0  ;;  %v1316_v25 = vadd.f32 %v1315_v4, %v1314_v47  ;;  %v3288_v27 = vor.u32 1.1754944e-38, %v681_v7  ;;  %v3290_v26 = vor.u32 1.1754944e-38, %v767_v16 }
 0x238   : > { %v3294_v32 = vor.u32 1.1754944e-38, %v1025_v11  ;;  %2467 = vrcp.f32 %v3277_v12  ;;  %v3298_v30 = vadd.f32 1e-12, %v3280_v33  ;;  %v1433_v35 = vadd.f32 %v1432_v2, %v3179_v0 }
 0x239   : > { %vm676_vm2 = vweird.f32 %v3227_v48  ;;  %v758_v43 = vsub.f32 1.0, %v757_v58  ;;  %2469 = vpow2.f32 %v1096_v20  ;;  %v1265_v44 = vrot.slane %v1264_v21, 4 }
 0x23a   : > { %v3301_v36 = vpop.eup %2463  ;;  %v1317_v45 = vrot.slane %v1316_v25, 1  ;;  %v673_v47 = vmul.f32 %v3227_v48, %v672_v22  ;;  %v3305_v61 = vor.u32 1.1754944e-38, %v853_v54  ;;  %v1434_v38 = vrot.slane %v1433_v35, 6 }
 0x23b   : > { %v1655_v46 = vsel %vm4120_vm9, %v1653_v13, 0.0  ;;  %v3308_v59 = vpop.eup %2465  ;;  %vm675_vm3 = vweird.f32 %v3195_v17  ;;  %vm762_vm4 = vweird.f32 %v3261_v60  ;;  %v939_v3 = vand.u32 2147483648, %v3277_v12 }
 0x23c   : > { %v1015_v4 = vmul.f32 %v3301_v36, %v3234_v29  ;;  %2471 = vrcp.f32 %v3298_v30  ;;  %v1435_v7 = vsel %vm4121_vm10, %v1434_v38, 0.0  ;;  %v1318_v16 = vadd.f32 %v1317_v45, %v1316_v25  ;;  %vm3366_vm1 = vmor %vm675_vm3, %vm676_vm2 }
 0x23d   : > { %v759_v11 = vmul.f32 %v3261_v60, %v758_v43  ;;  %vm761_vm6 = vweird.f32 %v3203_v5  ;;  %v1266_v13 = vsel %vm660_vm13, %v1265_v44, 0.0  ;;  %v1436_v58 = vadd.f32 %v1435_v7, %v1433_v35 }
 0x23e   : > { %v1656_v20 = vadd.f32 %v1655_v46, %v3082_v28  ;;  %v3325_v22 = vpop.eup %2467  ;;  %v674_v54 = vadd.f32 %v3227_v48, %v673_v47  ;;  %v843_v2 = vmul.f32 %v3308_v59, %v3255_v56  ;;  %v1342_v38 = vmul.f32 %v1318_v16, %v3093_v62  ;;  %vm3382_vm2 = vmor %vm761_vm6, %vm762_vm4 }
 0x23f   : > { %v2235_v25 = vsel %vm1561_vm5, 1.0, %v4116_v6  ;;  %v3332_v43 = vpop.eup %2469  ;;  %v1437_v45 = vrot.slane %v1436_v58, 4  ;;  %vm3336_vm8 = vcmp.eq.f32.partialorder %v679_v9, 8.507059e+37  ;;  %v1016_v47 = vsub.f32 1.0, %v1015_v4 }
 0x240   : > { %v1657_v0 = vrot.slane %v1656_v20, 4  ;;  %v1567_v44 = vmul.f32 %v2235_v25, %v3022_v42  ;;  %v1267_v46 = vadd.f32 %v1266_v13, %v1264_v21  ;;  %v1343_v7 = vmax.f32 %v1342_v38, -20.0 }
 0x241   : > { %v2243_v15 = vsel %vm1905_vm7, 1.0, %v4116_v6  ;;  %vm3341_vm15 = vcmp.eq.f32.partialorder %v765_v10, 8.507059e+37  ;;  %v929_v40 = vmul.f32 %v3325_v22, %v3277_v12  ;;  %v760_v4 = vadd.f32 %v3261_v60, %v759_v11 }
 0x242   : > { %v1658_v8 = vadd.f32 %v1657_v0, %v1656_v20  ;;  %v1569_v25 = vsel %vm4120_vm9, %v1567_v44, 0.0  ;;  %v1911_v9 = vmul.f32 %v2243_v15, %v3022_v42  ;;  %v3349_v24 = vpop.eup %2471  ;;  %v3352_v21 = vor.u32 1.1754944e-38, %v939_v3 }
 0x243   : > { %v3355_v13 = vadd.f32 1e-12, %v3332_v43  ;;  %v1344_v10 = vsel %vm457_vm12, 0.0, %v1343_v7  ;;  %v1438_v38 = vsel %vm660_vm13, %v1437_v45, 0.0  ;;  %v1570_v44 = vadd.f32 %v1569_v25, %v3082_v28 }
 0x244   : > { %v1345_v0 = vrot.slane %v1344_v10, 7  ;;  %v1659_v20 = vrot.slane %v1658_v8, 2  ;;  %vm1020_vm5 = vweird.f32 %v3301_v36  ;;  %v844_v3 = vsub.f32 1.0, %v843_v2 }
 0x245   : > { %v1195_v11 = vand.u32 2147483647, %v3298_v30  ;;  %v1268_v7 = vmul.f32 1.442695, %v1267_v46  ;;  %v678_v45 = vsel %vm3366_vm1, %v3227_v48, %v674_v54  ;;  %v1017_v25 = vmul.f32 %v3301_v36, %v1016_v47 }
 0x246   : > { %vm1019_vm7 = vweird.f32 %v3234_v29  ;;  %v930_v6 = vsub.f32 1.0, %v929_v40  ;;  %v1913_v17 = vsel %vm4120_vm9, %v1911_v9, 0.0  ;;  %vm848_vm3 = vweird.f32 %v3308_v59 }
 0x247   : > { %v1187_v48 = vmul.f32 %v3349_v24, %v3298_v30  ;;  %v1439_v54 = vadd.f32 %v1438_v38, %v1436_v58  ;;  %v1346_v47 = vsel %vm480_vm11, %v1345_v0, 0.0  ;;  %v1660_v40 = vadd.f32 %v1659_v20, %v1658_v8  ;;  %vm3447_vm9 = vmor %vm1019_vm7, %vm1020_vm5 }
 0x248   : > { %v764_v46 = vsel %vm3382_vm2, %v3261_v60, %v760_v4  ;;  %vm934_vm1 = vweird.f32 %v3325_v22  ;;  %2473 = vrcp.f32 %v3355_v13  ;;  %v1347_v5 = vadd.f32 %v1346_v47, %v1344_v10 }
 0x249   : > { %v1571_v9 = vrot.slane %v1570_v44, 4  ;;  %vm847_vm4 = vweird.f32 %v3255_v56  ;;  %v1197_v15 = vand.u32 2147483648, %v3298_v30  ;;  %2475 = vpow2.f32 %v1268_v7 }
 0x24a   : > { %v1661_v58 = vrot.slane %v1660_v40, 1  ;;  %v1914_v38 = vadd.f32 %v1913_v17, %v3082_v28  ;;  %v683_v8 = vsel %vm3336_vm8, %v3288_v27, %v678_v45  ;;  %v845_v60 = vmul.f32 %v3308_v59, %v844_v3 }
 0x24b   : > { %vm933_vm6 = vweird.f32 %v3277_v12  ;;  %v1348_v4 = vrot.slane %v1347_v5, 6  ;;  %v1572_v0 = vadd.f32 %v1571_v9, %v1570_v44  ;;  %v3407_v10 = vsel %vm3341_vm15, %v3290_v26, %v764_v46 }
 0x24c   : > { %v1188_v20 = vsub.f32 1.0, %v1187_v48  ;;  %v1440_v7 = vmul.f32 1.442695, %v1439_v54  ;;  %v1662_v2 = vadd.f32 %v1661_v58, %v1660_v40  ;;  %v1018_v17 = vadd.f32 %v3301_v36, %v1017_v25 }
 0x24d   : > { %v4143_v35 = vand.u32 2147483647, %v3234_v29  ;;  %v931_v3 = vmul.f32 %v3325_v22, %v930_v6  ;;  %v1349_v44 = vsel %vm4121_vm10, %v1348_v4, 0.0  ;;  %v1573_v16 = vrot.slane %v1572_v0, 2 }
 0x24e   : > { %v4146_v45 = vand.u32 2147483647, %v3255_v56  ;;  %vm1191_vm2 = vweird.f32 %v3298_v30  ;;  %v1350_v48 = vadd.f32 %v1349_v44, %v1347_v5  ;;  %v1915_v54 = vrot.slane %v1914_v38, 4  ;;  %v3429_v6 = vpop.eup %2473 }
 0x24f   : > { %vm3412_vm8 = vcmp.eq.f32.partialorder %v4143_v35, 8.507059e+37  ;;  %v846_v40 = vadd.f32 %v3308_v59, %v845_v60  ;;  %v4149_v46 = vand.u32 2147483647, %v3277_v12  ;;  %v3438_v9 = vor.u32 1.1754944e-38, %v1197_v15 }
 0x250   : > { %vm3423_vm15 = vcmp.eq.f32.partialorder %v4146_v45, 8.507059e+37  ;;  %v1686_v58 = vmul.f32 %v1662_v2, %v3093_v62  ;;  %v1574_v4 = vadd.f32 %v1573_v16, %v1572_v0  ;;  %v1189_v35 = vmul.f32 %v3349_v24, %v1188_v20 }
 0x251   : > { %vm3434_vm14 = vcmp.eq.f32.partialorder %v4149_v46, 8.507059e+37  ;;  %2477 = vpow2.f32 %v1440_v7  ;;  %v1351_v44 = vrot.slane %v1350_v48, 4  ;;  %v1022_v15 = vsel %vm3447_vm9, %v3301_v36, %v1018_v17  ;;  %vm3467_vm9 = vmor %vm847_vm4, %vm848_vm3  ;;  %v3482_v45 = vpop.xlane.xlu2 %647 }
 0x252   : > { %v932_v0 = vadd.f32 %v3325_v22, %v931_v3  ;;  %vm1192_vm10 = vweird.f32 %v3349_v24  ;;  %v1916_v20 = vadd.f32 %v1915_v54, %v1914_v38  ;;  %vm3473_vm5 = vcmp.eq.f32.partialorder %v1195_v11, 8.507059e+37 }
 0x253   : > { %v1352_v16 = vsel %vm660_vm13, %v1351_v44, 0.0  ;;  %v1101_v17 = vmul.f32 %v3429_v6, %v3355_v13  ;;  %v1575_v3 = vrot.slane %v1574_v4, 1  ;;  %v850_v11 = vsel %vm3467_vm9, %v3308_v59, %v846_v40  ;;  %vm3522_vm7 = vmor %vm1191_vm2, %vm1192_vm10 }
 0x254   : > { %vm4163_vm10 = vcmp.ge.s32.totalorder %v2892_v23, 2  ;;  %vm4164_vm3 = vcmask 523264  }
 0x255   : > { %v637_v47 = vpop.xlane.xlu1 %636  ;;  %v1576_v40 = vadd.f32 %v1575_v3, %v1574_v4 }
 0x256   : > { %v668_v26 = vmul.f32 %v637_v47, %v3213_v37  ;;  %1673 = vadd.xlane.f32.xlu1 %v3241_v52  ;;  %v3441_v47 = vpop.eup %2475 }
 0x257   : > { %v3480_v38 = vadd.f32 1e-12, %v3441_v47 }
 0x258   : > { %v684_v5 = vmul.f32 %v683_v8, %v668_v26  ;;  %v4154_v8 = vmov 0.0   ;;  %v1687_v26 = vmax.f32 %v1686_v58, -20.0 }
 0x259   : > { %v2233_v29 = vsel %vm1475_vm0, 1.0, %v4154_v8  ;;  %vm3493_vm0 = vmor %vm933_vm6, %vm934_vm1  ;;  %2479 = vrcp.f32 %v3480_v38  ;;  %vm1106_vm1 = vweird.f32 %v3429_v6  ;;  %vm1277_vm9 = vweird.f32 %v3480_v38 }
 0x25a   : > { %v685_v2 = vrot.slane %v684_v5, 7  ;;  %v3500_v46 = vsel %vm457_vm12, 0.0, %v1687_v26  ;;  %v936_v59 = vsel %vm3493_vm0, %v3325_v22, %v932_v0  ;;  %v1481_v12 = vmul.f32 %v2233_v29, %v3022_v42  ;;  %vm4167_vm6 = vmmov %vm4163_vm10 }
 0x25b   : > { %1587 = vadd.xlane.f32.xlu2 %v3217_v18  ;;  %v1353_v18 = vadd.f32 %v1352_v16, %v1350_v48  ;;  %v1190_v48 = vadd.f32 %v3349_v24, %v1189_v35  ;;  %v1917_v26 = vrot.slane %v1916_v20, 2  ;;  %v855_v22 = vsel %vm3423_vm15, %v3305_v61, %v850_v11  ;;  %vm4170_vm15 = vmmov %vm4167_vm6 }
 0x25c   : > { %v686_v56 = vsel %vm480_vm11, %v685_v2, 0.0  ;;  %v3508_v2 = vpop.eup %2477  ;;  %v3532_v27 = vsel %vm3434_vm14, %v3352_v21, %v936_v59  ;;  %v1111_v61 = vand.u32 2147483648, %v3355_v13  ;;  %vm1105_vm14 = vweird.f32 %v3355_v13  ;;  %vm4171_vm2 = vmmov %vm4167_vm6 }
 0x25d   : > { %v687_v58 = vadd.f32 %v686_v56, %v684_v5  ;;  %v3502_v60 = vpop.xlane.xlu1 %738  ;;  %v728_v44 = vpop.xlane.xlu0 %727  ;;  %v1027_v5 = vsel %vm3412_vm8, %v3294_v32, %v1022_v15  ;;  %v1354_v16 = vmul.f32 1.442695, %v1353_v18  ;;  %v1194_v30 = vsel %vm3522_vm7, %v3349_v24, %v1190_v48  ;;  %vm3589_vm8 = vmor %vm1105_vm14, %vm1106_vm1 }
 0x25e   : > { %1931 = vadd.xlane.f32.xlu1 %v3244_v53  ;;  %v754_v35 = vmul.f32 %v728_v44, %v3213_v37  ;;  %v1102_v53 = vsub.f32 1.0, %v1101_v17  ;;  %v3541_v4 = vadd.f32 1e-12, %v3508_v2  ;;  %v1918_v21 = vadd.f32 %v1917_v26, %v1916_v20 }
 0x25f   : > { %v688_v36 = vrot.slane %v687_v58, 6  ;;  %2481 = vpow2.f32 %v1354_v16  ;;  %v1109_v0 = vand.u32 2147483647, %v3355_v13  ;;  %v3554_v3 = vsel %vm3473_vm5, %v3438_v9, %v1194_v30  ;;  %v3556_v20 = vpop.eup %2479 }
 0x260   : > { %v770_v32 = vmul.f32 %v3407_v10, %v754_v35  ;;  %1501 = vadd.xlane.f32.xlu0 %v3231_v49  ;;  %v1600_v10 = vmul.f32 %v1576_v40, %v3093_v62  ;;  %v1483_v49 = vsel %vm4164_vm3, %v1481_v12, 0.0  ;;  %v1103_v24 = vmul.f32 %v3429_v6, %v1102_v53  ;;  %vm4175_vm3 = vmmov %vm4171_vm2 }
 0x261   : > { %v689_v25 = vsel %vm4163_vm10, %v688_v36, 0.0  ;;  %v1112_v56 = vor.u32 1.1754944e-38, %v1111_v61  ;;  %2483 = vrcp.f32 %v3541_v4  ;;  %v1919_v59 = vrot.slane %v1918_v21, 1  ;;  %vm4174_vm10 = vmmov %vm4171_vm2 }
 0x262   : > { %v690_v15 = vadd.f32 %v689_v25, %v687_v58  ;;  %v771_v52 = vrot.slane %v770_v32, 7  ;;  %v1601_v29 = vmax.f32 %v1600_v10, -20.0  ;;  %v1484_v58 = vadd.f32 %v1483_v49, %v3082_v28 }
 0x263   : > { %1845 = vadd.xlane.f32.xlu2 %v3220_v39  ;;  %v1104_v35 = vadd.f32 %v3429_v6, %v1103_v24  ;;  %vm3571_vm4 = vcmp.eq.f32.partialorder %v1109_v0, 8.507059e+37  ;;  %v1281_v53 = vand.u32 2147483647, %v3480_v38  ;;  %v1689_v61 = vrot.slane %v3500_v46, 7 }
 0x264   : > { %v691_v17 = vrot.slane %v690_v15, 4  ;;  %v772_v18 = vsel %vm480_vm11, %v771_v52, 0.0  ;;  %v3561_v48 = vsel %vm457_vm12, 0.0, %v1601_v29  ;;  %v1485_v25 = vrot.slane %v1484_v58, 4 }
 0x265   : > { %v773_v39 = vadd.f32 %v772_v18, %v770_v32  ;;  %v986_v11 = vpop.xlane.xlu1 %985  ;;  %v814_v54 = vpop.xlane.xlu2 %813  ;;  %v1108_v52 = vsel %vm3589_vm8, %v3429_v6, %v1104_v35  ;;  %v1283_v24 = vand.u32 2147483648, %v3480_v38  ;;  %v1690_v6 = vsel %vm480_vm11, %v1689_v61, 0.0 }
 0x266   : > { %v692_v44 = vsel %vm660_vm13, %v691_v17, 0.0  ;;  %v1012_v9 = vmul.f32 %v986_v11, %v3213_v37  ;;  %v840_v7 = vmul.f32 %v814_v54, %v3213_v37  ;;  %1684 = vadd.xlane.f32.xlu1 %v3258_v50  ;;  %v3575_v26 = vpop.eup %2481  ;;  %v1273_v50 = vmul.f32 %v3556_v20, %v3480_v38 }
 0x267   : > { %v693_v40 = vadd.f32 %v692_v44, %v690_v15  ;;  %v774_v12 = vrot.slane %v773_v39, 6  ;;  %v3602_v0 = vadd.f32 1e-12, %v3575_v26  ;;  %v1486_v11 = vadd.f32 %v1485_v25, %v1484_v58 }
 0x268   : > { %v1028_v36 = vmul.f32 %v1027_v5, %v1012_v9  ;;  %v856_v42 = vmul.f32 %v855_v22, %v840_v7  ;;  %1759 = vadd.xlane.f32.xlu0 %v3247_v55  ;;  %v1920_v5 = vadd.f32 %v1919_v59, %v1918_v21  ;;  %v3593_v22 = vpop.eup %2483  ;;  %v1274_v17 = vsub.f32 1.0, %v1273_v50 }
 0x269   : > { %v775_v32 = vsel %vm4167_vm6, %v774_v12, 0.0  ;;  %v694_v30 = vmul.f32 %v3181_v1, %v693_v40  ;;  %v1445_v9 = vmul.f32 %v3593_v22, %v3541_v4  ;;  %2485 = vrcp.f32 %v3602_v0 }
 0x26a   : > { %v776_v10 = vadd.f32 %v775_v32, %v773_v39  ;;  %v1029_v49 = vrot.slane %v1028_v36, 7  ;;  %v857_v15 = vrot.slane %v856_v42, 7  ;;  %v1944_v7 = vmul.f32 %v1920_v5, %v3093_v62 }
 0x26b   : > { %1598 = vadd.xlane.f32.xlu2 %v3237_v51  ;;  %v695_v1 = vmul.f32 %v694_v30, %v3482_v45  ;;  %v3623_v58 = vsel %vm3571_vm4, %v1112_v56, %v1108_v52  ;;  %v1487_v61 = vrot.slane %v1486_v11, 2  ;;  %v1446_v56 = vsub.f32 1.0, %v1445_v9 }
 0x26c   : > { %v777_v13 = vrot.slane %v776_v10, 4  ;;  %v1030_v29 = vsel %vm480_vm11, %v1029_v49, 0.0  ;;  %v858_v21 = vsel %vm480_vm11, %v857_v15, 0.0  ;;  %vm1278_vm5 = vweird.f32 %v3556_v20 }
 0x26d   : > { %v1031_v51 = vadd.f32 %v1030_v29, %v1028_v36  ;;  %v859_v18 = vadd.f32 %v858_v21, %v856_v42  ;;  %v900_v45 = vpop.xlane.xlu2 %899  ;;  %v3608_v39 = vpop.xlane.xlu0 %824  ;;  %v3625_v36 = vor.u32 1.1754944e-38, %v1283_v24  ;;  %v1691_v42 = vadd.f32 %v1690_v6, %v3500_v46  ;;  %vm3680_vm1 = vmor %vm1277_vm9, %vm1278_vm5 }
 0x26e   : > { %v778_v54 = vsel %vm660_vm13, %v777_v13, 0.0  ;;  %v926_v44 = vmul.f32 %v900_v45, %v3213_v37  ;;  %vm1449_vm0 = vweird.f32 %v3541_v4  ;;  %v1488_v45 = vadd.f32 %v1487_v61, %v1486_v11  ;;  %vm4183_vm5 = vmmov %vm4175_vm3 }
 0x26f   : > { %v779_v59 = vadd.f32 %v778_v54, %v776_v10  ;;  %v1032_v40 = vrot.slane %v1031_v51, 6  ;;  %v860_v12 = vrot.slane %v859_v18, 6  ;;  %v1275_v10 = vmul.f32 %v3556_v20, %v1274_v17  ;;  %v3639_v5 = vpop.eup %2485 }
 0x270   : > { %v942_v35 = vmul.f32 %v3532_v27, %v926_v44  ;;  %1512 = vadd.xlane.f32.xlu0 %v3250_v63  ;;  %v1692_v55 = vrot.slane %v1691_v42, 6  ;;  %vm3657_vm7 = vcmp.eq.f32.partialorder %v1281_v53, 8.507059e+37  ;;  %v1603_v11 = vrot.slane %v3561_v48, 7 }
 0x271   : > { %v780_v50 = vmul.f32 %v3190_v14, %v779_v59  ;;  %v861_v32 = vsel %vm4170_vm15, %v860_v12, 0.0  ;;  %v1033_v30 = vsel %vm4171_vm2, %v1032_v40, 0.0  ;;  %v1945_v14 = vmax.f32 %v1944_v7, -20.0  ;;  %vm4182_vm15 = vmmov %vm4171_vm2 }
 0x272   : > { %v943_v27 = vrot.slane %v942_v35, 7  ;;  %v862_v25 = vadd.f32 %v861_v32, %v859_v18  ;;  %v1034_v63 = vadd.f32 %v1033_v30, %v1031_v51  ;;  %v1276_v59 = vadd.f32 %v3556_v20, %v1275_v10 }
 0x273   : > { %v781_v16 = vmul.f32 %v780_v50, %v3502_v60  ;;  %v1453_v60 = vand.u32 2147483647, %v3541_v4  ;;  %v3647_v21 = vsel %vm457_vm12, 0.0, %v1945_v14  ;;  %v1359_v40 = vmul.f32 %v3639_v5, %v3602_v0 }
 0x274   : > { %v944_v46 = vsel %vm480_vm11, %v943_v27, 0.0  ;;  %v863_v49 = vrot.slane %v862_v25, 4  ;;  %v1035_v15 = vrot.slane %v1034_v63, 4  ;;  %v1693_v12 = vsel %vm4174_vm10, %v1692_v55, 0.0  ;;  %vm4188_vm10 = vmmov %vm4175_vm3 }
 0x275   : > { %v945_v52 = vadd.f32 %v944_v46, %v942_v35  ;;  %v782_v24 = vadd.f32 %v781_v16, %v695_v1  ;;  %v3641_v13 = vpop.xlane.xlu2 %910  ;;  %v997_v29 = vpop.xlane.xlu0 %996  ;;  %v1447_v1 = vmul.f32 %v3593_v22, %v1446_v56  ;;  %vm1450_vm14 = vweird.f32 %v3593_v22 }
 0x276   : > { %v864_v17 = vsel %vm660_vm13, %v863_v49, 0.0  ;;  %v1158_v51 = vpop.xlane.xlu1 %1157  ;;  %v1036_v18 = vsel %vm660_vm13, %v1035_v15, 0.0  ;;  %v1455_v27 = vand.u32 2147483648, %v3541_v4  ;;  %v1280_v16 = vsel %vm3680_vm1, %v3556_v20, %v1276_v59  ;;  %vm3708_vm6 = vmor %vm1449_vm0, %vm1450_vm14 }
 0x277   : > { %v946_v6 = vrot.slane %v945_v52, 6  ;;  %v865_v54 = vadd.f32 %v864_v17, %v862_v25  ;;  %v1184_v44 = vmul.f32 %v1158_v51, %v3213_v37  ;;  %v1037_v9 = vadd.f32 %v1036_v18, %v1034_v63  ;;  %vm4190_vm14 = vmmov %vm4183_vm5 }
 0x278   : > { %v1448_v61 = vadd.f32 %v3593_v22, %v1447_v1  ;;  %vm3687_vm4 = vcmp.eq.f32.partialorder %v1453_v60, 8.507059e+37  ;;  %v1360_v15 = vsub.f32 1.0, %v1359_v40  ;;  %v1604_v55 = vsel %vm480_vm11, %v1603_v11, 0.0  ;;  %vm4191_vm1 = vmmov %vm4183_vm5 }
 0x279   : > { %v866_v35 = vmul.f32 %v3222_v41, %v865_v54  ;;  %v947_v50 = vsel %vm4175_vm3, %v946_v6, 0.0  ;;  %v1200_v53 = vmul.f32 %v3554_v3, %v1184_v44  ;;  %v1038_v32 = vmul.f32 %v3207_v34, %v1037_v9 }
 0x27a   : > { %v948_v30 = vadd.f32 %v947_v50, %v945_v52  ;;  %v1489_v34 = vrot.slane %v1488_v45, 1  ;;  %v1452_v51 = vsel %vm3708_vm6, %v3593_v22, %v1448_v61  ;;  %v1947_v18 = vrot.slane %v3647_v21, 7  ;;  %vm4192_vm6 = vmmov %vm4191_vm1 }
 0x27b   : > { %v867_v25 = vmul.f32 %v866_v35, %v3608_v39  ;;  %v1201_v63 = vrot.slane %v1200_v53, 7  ;;  %v1039_v56 = vmul.f32 %v1038_v32, %v997_v29  ;;  %v3691_v39 = vadd.f32 %v1693_v12, %v1691_v42 }
 0x27c   : > { %v949_v3 = vrot.slane %v948_v30, 4  ;;  %v1490_v1 = vadd.f32 %v1489_v34, %v1488_v45  ;;  %v1285_v4 = vsel %vm3657_vm7, %v3625_v36, %v1280_v16  ;;  %v3721_v44 = vadd.f32 %v1604_v55, %v3561_v48 }
 0x27d   : > { %v868_v14 = vadd.f32 %v867_v25, %v782_v24  ;;  %v1202_v38 = vsel %vm480_vm11, %v1201_v63, 0.0  ;;  %v1072_v46 = vpop.xlane.xlu2 %1071  ;;  %v3695_v49 = vpop.xlane.xlu0 %1082  ;;  %v1456_v24 = vor.u32 1.1754944e-38, %v1455_v27  ;;  %v1361_v59 = vmul.f32 %v3639_v5, %v1360_v15 }
 0x27e   : > { %v950_v20 = vsel %vm660_vm13, %v949_v3, 0.0  ;;  %v1203_v52 = vadd.f32 %v1202_v38, %v1200_v53  ;;  %v1098_v29 = vmul.f32 %v1072_v46, %v3213_v37  ;;  %v3702_v60 = vpop.xlane.xlu1 %1254  ;;  %v1695_v40 = vrot.slane %v3691_v39, 4 }
 0x27f   : > { %v951_v17 = vadd.f32 %v950_v20, %v948_v30  ;;  %vm1819_vm8 = vcmp.eq.s32.totalorder %v3071_v57, 14  ;;  %v1457_v45 = vsel %vm3687_vm4, %v1456_v24, %v1452_v51  ;;  %v1514_v36 = vmul.f32 %v1490_v1, %v3093_v62 }
 0x280   : > { %v1204_v6 = vrot.slane %v1203_v52, 6  ;;  %v1114_v54 = vmul.f32 %v3623_v58, %v1098_v29  ;;  %v1948_v12 = vsel %vm480_vm11, %v1947_v18, 0.0  ;;  %vm1364_vm2 = vweird.f32 %v3639_v5 }
 0x281   : > { %v952_v9 = vmul.f32 %v3252_v31, %v951_v17  ;;  %v1367_v31 = vand.u32 2147483647, %v3602_v0  ;;  %v1606_v35 = vrot.slane %v3721_v44, 6  ;;  %v1515_v50 = vmax.f32 %v1514_v36, -20.0 }
 0x282   : > { %v1115_v22 = vrot.slane %v1114_v54, 7  ;;  %v1205_v58 = vsel %vm4182_vm15, %v1204_v6, 0.0  ;;  %v1949_v41 = vadd.f32 %v1948_v12, %v3647_v21  ;;  %v2241_v3 = vsel %vm1819_vm8, 1.0, %v4154_v8  ;;  %vm4193_vm8 = vmmov %vm4191_vm1 }
 0x283   : > { %v953_v48 = vmul.f32 %v952_v9, %v3641_v13  ;;  %v1206_v7 = vadd.f32 %v1205_v58, %v1203_v52  ;;  %v1362_v13 = vadd.f32 %v3639_v5, %v1361_v59  ;;  %v1516_v34 = vsel %vm457_vm12, 0.0, %v1515_v50 }
 0x284   : > { %v1116_v11 = vsel %vm480_vm11, %v1115_v22, 0.0  ;;  %vm1363_vm9 = vweird.f32 %v3602_v0  ;;  %v1369_v21 = vand.u32 2147483648, %v3602_v0  ;;  %v3757_v52 = vsel %vm660_vm13, %v1695_v40, 0.0 }
 0x285   : > { %v954_v53 = vadd.f32 %v953_v48, %v868_v14  ;;  %v1117_v32 = vadd.f32 %v1116_v11, %v1114_v54  ;;  %v1244_v30 = vpop.xlane.xlu2 %1243  ;;  %v1169_v61 = vpop.xlane.xlu0 %1168  ;;  %v1207_v27 = vrot.slane %v1206_v7, 4  ;;  %vm3765_vm0 = vmor %vm1363_vm9, %vm1364_vm2  ;;  %vm3769_vm7 = vcmp.eq.f32.partialorder %v1367_v31, 8.507059e+37 }
 0x286   : > { %v1270_v25 = vmul.f32 %v1244_v30, %v3213_v37  ;;  %v1416_v63 = vpop.xlane.xlu1 %1415  ;;  %v1366_v1 = vsel %vm3765_vm0, %v3639_v5, %v1362_v13  ;;  %v1607_v6 = vsel %vm4188_vm10, %v1606_v35, 0.0  ;;  %v1950_v54 = vrot.slane %v1949_v41, 6  ;;  %vm4195_vm2 = vmmov %vm4191_vm1 }
 0x287   : > { %v1040_v16 = vadd.f32 %v1039_v56, %v954_v53  ;;  %v1118_v10 = vrot.slane %v1117_v32, 6  ;;  %v1442_v14 = vmul.f32 %v1416_v63, %v3213_v37  ;;  %v1208_v38 = vsel %vm660_vm13, %v1207_v27, 0.0  ;;  %v3759_v56 = vld [vmem:[#allocation7 + $0x8] sm:$0xff] }
 0x288   : > { %v1286_v46 = vmul.f32 %v1285_v4, %v1270_v25  ;;  %v1209_v15 = vadd.f32 %v1208_v38, %v1206_v7  ;;  %v1825_v29 = vmul.f32 %v3759_v56, %v2241_v3  ;;  %v1517_v59 = vrot.slane %v1516_v34, 7 }
 0x289   : > { %v1119_v55 = vsel %vm4183_vm5, %v1118_v10, 0.0  ;;  %v1458_v20 = vmul.f32 %v1457_v45, %v1442_v14  ;;  %v1370_v36 = vor.u32 1.1754944e-38, %v1369_v21  ;;  %vm4189_vm3 = vcmask 523264  }
 0x28a   : > { %v1120_v42 = vadd.f32 %v1119_v55, %v1117_v32  ;;  %v1287_v24 = vrot.slane %v1286_v46, 7  ;;  %v1210_v17 = vmul.f32 %v3280_v33, %v1209_v15  ;;  %v1827_v5 = vsel %vm4189_vm3, %v1825_v29, 0.0  ;;  %vm4196_vm9 = vmmov %vm4189_vm3 }
 0x28b   : > { %v1459_v18 = vrot.slane %v1458_v20, 7  ;;  %v1608_v12 = vadd.f32 %v1607_v6, %v3721_v44  ;;  %v1371_v50 = vsel %vm3769_vm7, %v1370_v36, %v1366_v1  ;;  %v1951_v53 = vsel %vm4190_vm14, %v1950_v54, 0.0  ;;  %vm4199_vm3 = vmmov %vm4191_vm1 }
 0x28c   : > { %v1121_v33 = vrot.slane %v1120_v42, 4  ;;  %v1288_v4 = vsel %vm480_vm11, %v1287_v24, 0.0  ;;  %v1211_v9 = vmul.f32 %v1210_v17, %v1169_v61  ;;  %v1518_v61 = vsel %vm480_vm11, %v1517_v59, 0.0 }
 0x28d   : > { %v1289_v40 = vadd.f32 %v1288_v4, %v1286_v46  ;;  %v1460_v22 = vsel %vm480_vm11, %v1459_v18, 0.0  ;;  %v3782_v45 = vpop.xlane.xlu2 %1340  ;;  %v1330_v58 = vpop.xlane.xlu0 %1329  ;;  %v1828_v27 = vadd.f32 %v1827_v5, %v3082_v28  ;;  %v1519_v25 = vadd.f32 %v1518_v61, %v1516_v34 }
 0x28e   : > { %v1122_v48 = vsel %vm660_vm13, %v1121_v33, 0.0  ;;  %v1461_v7 = vadd.f32 %v1460_v22, %v1458_v20  ;;  %v1356_v31 = vmul.f32 %v1330_v58, %v3213_v37  ;;  %vm1733_vm4 = vcmp.eq.s32.totalorder %v3071_v57, 13 }
 0x28f   : > { %v1123_v11 = vadd.f32 %v1122_v48, %v1120_v42  ;;  %v1290_v35 = vrot.slane %v1289_v40, 6  ;;  %v1952_v14 = vadd.f32 %v1951_v53, %v1949_v41  ;;  %v1609_v15 = vrot.slane %v1608_v12, 4 }
 0x290   : > { %v1462_v32 = vrot.slane %v1461_v7, 6  ;;  %v1372_v30 = vmul.f32 %v1371_v50, %v1356_v31  ;;  %v1520_v21 = vrot.slane %v1519_v25, 6  ;;  %v1829_v20 = vrot.slane %v1828_v27, 4 }
 0x291   : > { %v1124_v13 = vmul.f32 %v3332_v43, %v1123_v11  ;;  %v1291_v44 = vsel %vm4191_vm1, %v1290_v35, 0.0  ;;  %v2239_v34 = vsel %vm1733_vm4, 1.0, %v4154_v8  ;;  %vm4194_vm15 = vcmask 130048  }
 0x292   : > { %v1292_v63 = vadd.f32 %v1291_v44, %v1289_v40  ;;  %v1373_v3 = vrot.slane %v1372_v30, 7  ;;  %v1463_v10 = vsel %vm4192_vm6, %v1462_v32, 0.0  ;;  %v1521_v17 = vsel %vm4193_vm8, %v1520_v21, 0.0  ;;  %vm4197_vm5 = vmmov %vm4194_vm15 }
 0x293   : > { %v1125_v38 = vmul.f32 %v1124_v13, %v3695_v49  ;;  %v1464_v46 = vadd.f32 %v1463_v10, %v1461_v7  ;;  %v1953_v0 = vrot.slane %v1952_v14, 4  ;;  %v1522_v51 = vadd.f32 %v1521_v17, %v1519_v25  ;;  %vm4198_vm0 = vmmov %vm4197_vm5 }
 0x294   : > { %v1293_v55 = vrot.slane %v1292_v63, 4  ;;  %v1374_v43 = vsel %vm480_vm11, %v1373_v3, 0.0  ;;  %v1697_v59 = vadd.f32 %v3757_v52, %v3691_v39  ;;  %v1830_v40 = vadd.f32 %v1829_v20, %v1828_v27 }
 0x295   : > { %v1126_v29 = vadd.f32 %v1125_v38, %v1040_v16  ;;  %v1375_v57 = vadd.f32 %v1374_v43, %v1372_v30  ;;  %v1853_v42 = vpop.permute.xlu2 %1852  ;;  %v1465_v24 = vrot.slane %v1464_v46, 4  ;;  %v3814_v16 = vadd.f32 1.0, %v3268_v19  ;;  %v1427_v5 = vpop.xlane.xlu0 %1426 }
 0x296   : > { %v1294_v49 = vsel %vm660_vm13, %v1293_v55, 0.0  ;;  %v1855_v41 = vsel %vm4194_vm15, %v1853_v42, 0.0  ;;  %v1610_v58 = vsel %vm660_vm13, %v1609_v15, 0.0  ;;  %v1739_v36 = vmul.f32 %v3759_v56, %v2239_v34 }
 0x297   : > { %v1295_v18 = vadd.f32 %v1294_v49, %v1292_v63  ;;  %v1212_v1 = vadd.f32 %v1211_v9, %v1126_v29  ;;  %v1376_v6 = vrot.slane %v1375_v57, 6  ;;  %v1466_v8 = vsel %vm660_vm13, %v1465_v24, 0.0  ;;  %1856 = vadd.xlane.f32.xlu2 %v1855_v41 }
 0x298   : > { %v1467_v54 = vadd.f32 %v1466_v8, %v1464_v46  ;;  %v1523_v48 = vrot.slane %v1522_v51, 4  ;;  %2487 = vrcp.f32 %v3814_v16  ;;  %v1698_v31 = vmul.f32 1.442695, %v1697_v59 }
 0x299   : > { %v1296_v33 = vmul.f32 %v3441_v47, %v1295_v18  ;;  %v1377_v4 = vsel %vm4195_vm2, %v1376_v6, 0.0  ;;  %v1954_v47 = vsel %vm660_vm13, %v1953_v0, 0.0  ;;  %v1611_v11 = vadd.f32 %v1610_v58, %v1608_v12 }
 0x29a   : > { %v1378_v22 = vadd.f32 %v1377_v4, %v1375_v57  ;;  %v1468_v9 = vmul.f32 %v3508_v2, %v1467_v54  ;;  %v1831_v2 = vrot.slane %v1830_v40, 2  ;;  %v1955_v56 = vadd.f32 %v1954_v47, %v1952_v14 }
 0x29b   : > { %v1297_v19 = vmul.f32 %v1296_v33, %v3702_v60  ;;  %v1741_v60 = vsel %vm4196_vm9, %v1739_v36, 0.0  ;;  %v1524_v30 = vsel %vm660_vm13, %v1523_v48, 0.0  ;;  %2489 = vpow2.f32 %v1698_v31 }
 0x29c   : > { %v1379_v7 = vrot.slane %v1378_v22, 4  ;;  %v1469_v39 = vmul.f32 %v1468_v9, %v1427_v5  ;;  %v1832_v61 = vadd.f32 %v1831_v2, %v1830_v40  ;;  %v1742_v27 = vadd.f32 %v1741_v60, %v3082_v28 }
 0x29d   : > { %v1298_v52 = vadd.f32 %v1297_v19, %v1212_v1  ;;  %v1612_v13 = vmul.f32 1.442695, %v1611_v11  ;;  %v1525_v25 = vadd.f32 %v1524_v30, %v1522_v51  ;;  %v1956_v14 = vmul.f32 1.442695, %v1955_v56 }
 0x29e   : > { %v1380_v35 = vsel %vm660_vm13, %v1379_v7, 0.0  ;;  %v1939_v50 = vpop.permute.xlu1 %1938  ;;  %v3837_v44 = vpop.eup %2487  ;;  %v1833_v63 = vrot.slane %v1832_v61, 1  ;;  %v1743_v3 = vrot.slane %v1742_v27, 4  ;;  %vm2002_vm7 = vweird.f32 %v3814_v16 }
 0x29f   : > { %v1381_v53 = vadd.f32 %v1380_v35, %v1378_v22  ;;  %v1941_v32 = vsel %vm4197_vm5, %v1939_v50, 0.0  ;;  %2491 = vpow2.f32 %v1612_v13  ;;  %v1998_v21 = vmul.f32 %v3837_v44, %v3814_v16  ;;  %v4200_v13 = vld [vmem:[#allocation14_spill] sm:$0xff] }
 0x2a0   : > { %1942 = vadd.xlane.f32.xlu1 %v1941_v32  ;;  %v1834_v38 = vadd.f32 %v1833_v63, %v1832_v61  ;;  %v1744_v46 = vadd.f32 %v1743_v3, %v1742_v27  ;;  %v1526_v28 = vmul.f32 1.442695, %v1525_v25  ;;  %2493 = vpow2.f32 %v1956_v14 }
 0x2a1   : > { %v1382_v12 = vmul.f32 %v3575_v26, %v1381_v53  ;;  %v3843_v43 = vpop.eup %2489  ;;  %v1999_v42 = vsub.f32 1.0, %v1998_v21  ;;  %vm2003_vm10 = vweird.f32 %v3837_v44  ;;  %v2008_v58 = vand.u32 2147483648, %v3814_v16 }
 0x2a2   : > { %v1858_v26 = vmul.f32 %v1834_v38, %v3093_v62  ;;  %v1745_v55 = vrot.slane %v1744_v46, 2  ;;  %v3849_v24 = vadd.f32 1e-12, %v3843_v43  ;;  %2495 = vpow2.f32 %v1526_v28  ;;  %vm2004_vm14 = vmor %vm2002_vm7, %vm2003_vm10 }
 0x2a3   : > { %v1383_v10 = vmul.f32 %v1382_v12, %v3782_v45  ;;  %v2000_v1 = vmul.f32 %v3837_v44, %v1999_v42  ;;  %v2006_v47 = vand.u32 2147483647, %v3814_v16  ;;  %v2009_v11 = vor.u32 1.1754944e-38, %v2008_v58 }
 0x2a4   : > { %v1859_v29 = vmax.f32 %v1858_v26, -20.0  ;;  %v1746_v45 = vadd.f32 %v1745_v55, %v1744_v46  ;;  %2497 = vrcp.f32 %v3849_v24  ;;  %vm1707_vm6 = vweird.f32 %v3849_v24 }
 0x2a5   : > { %v1384_v15 = vadd.f32 %v1383_v10, %v1298_v52  ;;  %v3851_v17 = vpop.eup %2491  ;;  %v2001_v9 = vadd.f32 %v3837_v44, %v2000_v1 }
 0x2a6   : > { %v1860_v49 = vsel %vm457_vm12, 0.0, %v1859_v29  ;;  %v1747_v41 = vrot.slane %v1746_v45, 1  ;;  %v3855_v51 = vpop.eup %2493  ;;  %v3860_v6 = vadd.f32 1e-12, %v3851_v17 }
 0x2a7   : > { %v3845_v20 = vadd.f32 %v1469_v39, %v1384_v15  ;;  %v1861_v0 = vrot.slane %v1860_v49, 7  ;;  %v3868_v59 = vadd.f32 1e-12, %v3855_v51  ;;  %v2005_v39 = vsel %vm2004_vm14, %v3837_v44, %v2001_v9 }
 0x2a8   : > { %v1767_v34 = vpop.permute.xlu0 %1766  ;;  %v1748_v18 = vadd.f32 %v1747_v41, %v1746_v45  ;;  %v3865_v4 = vpop.eup %2495  ;;  %2499 = vrcp.f32 %v3860_v6  ;;  %v1711_v45 = vand.u32 2147483647, %v3849_v24  ;;  %vm1621_vm9 = vweird.f32 %v3860_v6 }
 0x2a9   : > { %v1769_v57 = vsel %vm4198_vm0, %v1767_v34, 0.0  ;;  %v1862_v8 = vsel %vm480_vm11, %v1861_v0, 0.0  ;;  %v3876_v36 = vadd.f32 1e-12, %v3865_v4  ;;  %2501 = vrcp.f32 %v3868_v59 }
 0x2aa   : > { %1770 = vadd.xlane.f32.xlu0 %v1769_v57  ;;  %v1863_v54 = vadd.f32 %v1862_v8, %v1860_v49  ;;  %v1772_v33 = vmul.f32 %v1748_v18, %v3093_v62  ;;  %v3882_v5 = vpop.eup %2497  ;;  %v1713_v57 = vand.u32 2147483648, %v3849_v24  ;;  %v1625_v18 = vand.u32 2147483647, %v3860_v6 }
 0x2ab   : > { %v1703_v2 = vmul.f32 %v3882_v5, %v3849_v24  ;;  %2503 = vrcp.f32 %v3876_v36  ;;  %vm1708_vm4 = vweird.f32 %v3882_v5  ;;  %vm1712_vm2 = vcmp.eq.f32.partialorder %v1711_v45, 8.507059e+37 }
 0x2ac   : > { %v1864_v40 = vrot.slane %v1863_v54, 6  ;;  %v1773_v22 = vmax.f32 %v1772_v33, -20.0  ;;  %vm3924_vm8 = vmor %vm1707_vm6, %vm1708_vm4  ;;  %v1714_v24 = vor.u32 1.1754944e-38, %v1713_v57  ;;  %v1971_v9 = vand.u32 2147483648, %v3868_v59 }
 0x2ad   : > { %v1704_v30 = vsub.f32 1.0, %v1703_v2  ;;  %vm3946_vm7 = vcmp.eq.f32.partialorder %v1625_v18, 8.507059e+37  ;;  %vm1965_vm10 = vweird.f32 %v3868_v59 }
 0x2ae   : > { %v1865_v62 = vsel %vm4199_vm3, %v1864_v40, 0.0  ;;  %v1774_v19 = vsel %vm457_vm12, 0.0, %v1773_v22  ;;  %v3892_v50 = vpop.eup %2499  ;;  %vm2007_vm12 = vcmp.eq.f32.partialorder %v2006_v47, 8.507059e+37  ;;  %v1627_v40 = vand.u32 2147483648, %v3860_v6 }
 0x2af   : > { %v1866_v48 = vadd.f32 %v1865_v62, %v1863_v54  ;;  %v1775_v7 = vrot.slane %v1774_v19, 7  ;;  %v2010_v56 = vsel %vm2007_vm12, %v2009_v11, %v2005_v39  ;;  %v3896_v32 = vpop.eup %2501  ;;  %v1617_v61 = vmul.f32 %v3892_v50, %v3860_v6 }
 0x2b0   : > { %v2012_v44 = vmul.f32 %v2010_v56, %v4200_v13  ;;  %v1961_v3 = vmul.f32 %v3896_v32, %v3868_v59  ;;  %v1705_v14 = vmul.f32 %v3882_v5, %v1704_v30  ;;  %vm1622_vm15 = vweird.f32 %v3892_v50 }
 0x2b1   : > { %v1867_v52 = vrot.slane %v1866_v48, 4  ;;  %v1776_v31 = vsel %vm480_vm11, %v1775_v7, 0.0  ;;  %v3903_v63 = vpop.eup %2503  ;;  %v1618_v38 = vsub.f32 1.0, %v1617_v61  ;;  %vm1966_vm5 = vweird.f32 %v3896_v32  ;;  %vm3942_vm0 = vmor %vm1621_vm9, %vm1622_vm15 }
 0x2b2   : > { %v1777_v35 = vadd.f32 %v1776_v31, %v1774_v19  ;;  %v1531_v46 = vmul.f32 %v3903_v63, %v3876_v36  ;;  %v1962_v21 = vsub.f32 1.0, %v1961_v3  ;;  %v1706_v55 = vadd.f32 %v3882_v5, %v1705_v14  ;;  %vm3958_vm3 = vmor %vm1965_vm10, %vm1966_vm5 }
 0x2b3   : > { %v1868_v16 = vsel %vm660_vm13, %v1867_v52, 0.0  ;;  %v1619_v34 = vmul.f32 %v3892_v50, %v1618_v38  ;;  %v1539_v7 = vand.u32 2147483647, %v3876_v36  ;;  %vm1536_vm14 = vweird.f32 %v3903_v63 }
 0x2b4   : > { %v1869_v60 = vadd.f32 %v1868_v16, %v1866_v48  ;;  %v1778_v53 = vrot.slane %v1777_v35, 6  ;;  %v1532_v42 = vsub.f32 1.0, %v1531_v46  ;;  %v1963_v41 = vmul.f32 %v3896_v32, %v1962_v21 }
 0x2b5   : > { %v1710_v1 = vsel %vm3924_vm8, %v3882_v5, %v1706_v55  ;;  %v1620_v8 = vadd.f32 %v3892_v50, %v1619_v34  ;;  %v1969_v48 = vand.u32 2147483647, %v3868_v59  ;;  %vm1535_vm12 = vweird.f32 %v3876_v36 }
 0x2b6   : > { %v1870_v27 = vmul.f32 1.442695, %v1869_v60  ;;  %v1779_v12 = vsel %vm4191_vm1, %v1778_v53, 0.0  ;;  %v1533_v54 = vmul.f32 %v3903_v63, %v1532_v42  ;;  %v1964_v22 = vadd.f32 %v3896_v32, %v1963_v41  ;;  %vm3977_vm4 = vmor %vm1535_vm12, %vm1536_vm14 }
 0x2b7   : > { %v1780_v25 = vadd.f32 %v1779_v12, %v1777_v35  ;;  %v1715_v62 = vsel %vm1712_vm2, %v1714_v24, %v1710_v1  ;;  %v1624_v6 = vsel %vm3942_vm0, %v3892_v50, %v1620_v8  ;;  %v1628_v35 = vor.u32 1.1754944e-38, %v1627_v40 }
 0x2b8   : > { %2505 = vpow2.f32 %v1870_v27  ;;  %v1534_v11 = vadd.f32 %v3903_v63, %v1533_v54  ;;  %v1968_v59 = vsel %vm3958_vm3, %v3896_v32, %v1964_v22  ;;  %v1972_v50 = vor.u32 1.1754944e-38, %v1971_v9 }
 0x2b9   : > { %v1781_v10 = vrot.slane %v1780_v25, 4  ;;  %v1541_v53 = vand.u32 2147483648, %v3876_v36  ;;  %v1629_v61 = vsel %vm3946_vm7, %v1628_v35, %v1624_v6  ;;  %vm1970_vm1 = vcmp.eq.f32.partialorder %v1969_v48, 8.507059e+37 }
 0x2ba   : > { %v1973_v13 = vsel %vm1970_vm1, %v1972_v50, %v1968_v59  ;;  %v1538_v36 = vsel %vm3977_vm4, %v3903_v63, %v1534_v11  ;;  %vm3986_vm6 = vcmp.eq.f32.partialorder %v1539_v7, 8.507059e+37  ;;  %vm4215_vm9 = vcmp.ge.s32.totalorder %v2892_v23, 2  ;;  %v2271_v23 = vld [vmem:[%s4111_s9] sm:$0xff] }
 0x2bb   : > { %v1782_v15 = vsel %vm660_vm13, %v1781_v10, 0.0  ;;  %v1542_v46 = vor.u32 1.1754944e-38, %v1541_v53  ;;  %vm4216_vm7 = vmmov %vm4215_vm9 }
 0x2bc   : > { %v1783_v28 = vadd.f32 %v1782_v15, %v1780_v25  ;;  %vm4217_vm12 = vmmov %vm4216_vm7 }
 0x2bd   : > { %v1543_v42 = vsel %vm3986_vm6, %v1542_v46, %v1538_v36  ;;  %vm4218_vm1 = vmmov %vm4216_vm7  ;;  %vm4223_vm6 = vcmask 261120  }
 0x2be   : > { %2014 = vrot.lane.b32.xlu0 %v2012_v44, %s2685_s30  ;;  %v3912_v26 = vpop.eup %2505  ;;  %v1784_v29 = vmul.f32 1.442695, %v1783_v28  ;;  %vm4219_vm4 = vmmov %vm4218_vm1 }
 0x2bf   : > { %v3920_v49 = vadd.f32 1e-12, %v3912_v26 }
 0x2c0   : > { %2507 = vpow2.f32 %v1784_v29 }
 0x2c1   : > { %2509 = vrcp.f32 %v3920_v49  ;;  %vm1879_vm15 = vweird.f32 %v3920_v49  ;;  %v1885_v15 = vand.u32 2147483648, %v3920_v49  ;;  %v1883_v34 = vand.u32 2147483647, %v3920_v49 }
 0x2c3   : > { %vm1884_vm5 = vcmp.eq.f32.partialorder %v1883_v34, 8.507059e+37 }
 0x2c6   : > { %v3950_v47 = vpop.eup %2507 }
 0x2c7   : > { %v2510_v39 = vpop.eup %2509  ;;  %v3965_v2 = vadd.f32 1e-12, %v3950_v47 }
 0x2c8   : > { %v1875_v16 = vmul.f32 %v2510_v39, %v3920_v49  ;;  %vm1880_vm8 = vweird.f32 %v2510_v39 }
 0x2c9   : > { %v1674_v33 = vpop.xlane.xlu1 %1673  ;;  %2511 = vrcp.f32 %v3965_v2  ;;  %vm3997_vm2 = vmor %vm1879_vm15, %vm1880_vm8  ;;  %v1799_v7 = vand.u32 2147483648, %v3965_v2  ;;  %vm1793_vm10 = vweird.f32 %v3965_v2 }
 0x2ca   : > { %v1700_v58 = vmul.f32 %v1674_v33, %v3213_v37  ;;  %v1876_v32 = vsub.f32 1.0, %v1875_v16  ;;  %v1886_v33 = vor.u32 1.1754944e-38, %v1885_v15 }
 0x2cc   : > { %v1716_v52 = vmul.f32 %v1715_v62, %v1700_v58  ;;  %v1877_v14 = vmul.f32 %v2510_v39, %v1876_v32 }
 0x2ce   : > { %v1717_v56 = vrot.slane %v1716_v52, 7  ;;  %v1588_v60 = vpop.xlane.xlu2 %1587  ;;  %v1878_v63 = vadd.f32 %v2510_v39, %v1877_v14 }
 0x2cf   : > { %v1614_v30 = vmul.f32 %v1588_v60, %v3213_v37  ;;  %v2512_v29 = vpop.eup %2511 }
 0x2d0   : > { %v1718_v12 = vsel %vm480_vm11, %v1717_v56, 0.0  ;;  %v1882_v18 = vsel %vm3997_vm2, %v2510_v39, %v1878_v63  ;;  %v1789_v1 = vmul.f32 %v2512_v29, %v3965_v2  ;;  %vm1794_vm0 = vweird.f32 %v2512_v29 }
 0x2d1   : > { %v1719_v25 = vadd.f32 %v1718_v12, %v1716_v52  ;;  %v1630_v3 = vmul.f32 %v1629_v61, %v1614_v30  ;;  %v1932_v10 = vpop.xlane.xlu1 %1931  ;;  %v1887_v19 = vsel %vm1884_vm5, %v1886_v33, %v1882_v18  ;;  %v1797_v52 = vand.u32 2147483647, %v3965_v2  ;;  %vm1795_vm3 = vmor %vm1793_vm10, %vm1794_vm0 }
 0x2d2   : > { %v1958_v38 = vmul.f32 %v1932_v10, %v3213_v37  ;;  %v1790_v9 = vsub.f32 1.0, %v1789_v1  ;;  %v1800_v61 = vor.u32 1.1754944e-38, %v1799_v7 }
 0x2d3   : > { %v1720_v21 = vrot.slane %v1719_v25, 6  ;;  %v1631_v28 = vrot.slane %v1630_v3, 7  ;;  %v1502_v55 = vpop.xlane.xlu0 %1501  ;;  %vm1798_vm14 = vcmp.eq.f32.partialorder %v1797_v52, 8.507059e+37 }
 0x2d4   : > { %v1974_v45 = vmul.f32 %v1973_v13, %v1958_v38  ;;  %v1528_v57 = vmul.f32 %v1502_v55, %v3213_v37  ;;  %v1791_v48 = vmul.f32 %v2512_v29, %v1790_v9 }
 0x2d5   : > { %v1632_v0 = vsel %vm480_vm11, %v1631_v28, 0.0  ;;  %v1721_v49 = vsel %vm4215_vm9, %v1720_v21, 0.0 }
 0x2d6   : > { %v1633_v8 = vadd.f32 %v1632_v0, %v1630_v3  ;;  %v1544_v24 = vmul.f32 %v1543_v42, %v1528_v57  ;;  %v1846_v54 = vpop.xlane.xlu2 %1845  ;;  %v1722_v22 = vadd.f32 %v1721_v49, %v1719_v25  ;;  %v1792_v60 = vadd.f32 %v2512_v29, %v1791_v48 }
 0x2d7   : > { %v1872_v40 = vmul.f32 %v1846_v54, %v3213_v37  ;;  %v1975_v38 = vrot.slane %v1974_v45, 7 }
 0x2d8   : > { %v1634_v58 = vrot.slane %v1633_v8, 6  ;;  %v1545_v62 = vrot.slane %v1544_v24, 7  ;;  %v1723_v6 = vrot.slane %v1722_v22, 4  ;;  %v1796_v32 = vsel %vm1795_vm3, %v2512_v29, %v1792_v60 }
 0x2d9   : > { %v1888_v5 = vmul.f32 %v1887_v19, %v1872_v40  ;;  %v1801_v36 = vsel %vm1798_vm14, %v1800_v61, %v1796_v32  ;;  %v1976_v28 = vsel %vm480_vm11, %v1975_v38, 0.0  ;;  %v1685_v19 = vpop.xlane.xlu1 %1684  ;;  %v2436_v32 = vld [vmem:[%s4110_s8] ss:$0 sm:$0xff] }
 0x2da   : > { %v1546_v39 = vsel %vm480_vm11, %v1545_v62, 0.0  ;;  %v1635_v31 = vsel %vm4216_vm7, %v1634_v58, 0.0  ;;  %v1724_v59 = vsel %vm660_vm13, %v1723_v6, 0.0  ;;  %v1977_v57 = vadd.f32 %v1976_v28, %v1974_v45 }
 0x2db   : > { %v1547_v11 = vadd.f32 %v1546_v39, %v1544_v24  ;;  %v1889_v35 = vrot.slane %v1888_v5, 7  ;;  %v1760_v50 = vpop.xlane.xlu0 %1759  ;;  %v1725_v16 = vadd.f32 %v1724_v59, %v1722_v22  ;;  %v1636_v53 = vadd.f32 %v1635_v31, %v1633_v8  ;;  %v2274_v31 = vld [vmem:[%s4111_s9 + $0x18] sm:$0xff]  ;;  %v2272_v59 = vld [vmem:[%s4111_s9 + $0x8] sm:$0xff] }
 0x2dc   : > { %v1786_v56 = vmul.f32 %v1760_v50, %v3213_v37  ;;  %v1978_v8 = vrot.slane %v1977_v57, 6  ;;  %2058 = vmatpush.bf16.msra.mxu3 %v2274_v31 }
 0x2dd   : > { %v1548_v30 = vrot.slane %v1547_v11, 6  ;;  %v1726_v27 = vmul.f32 %v3843_v43, %v1725_v16  ;;  %v1637_v12 = vrot.slane %v1636_v53, 4  ;;  %v1890_v13 = vsel %vm480_vm11, %v1889_v35, 0.0  ;;  %v2273_v35 = vld [vmem:[%s4111_s9 + $0x10] sm:$0xff] }
 0x2de   : > { %v1802_v44 = vmul.f32 %v1801_v36, %v1786_v56  ;;  %v1891_v10 = vadd.f32 %v1890_v13, %v1888_v5  ;;  %v1599_v42 = vpop.xlane.xlu2 %1598  ;;  %v1979_v45 = vsel %vm4219_vm4, %v1978_v8, 0.0 }
 0x2df   : > { %v1549_v2 = vsel %vm4217_vm12, %v1548_v30, 0.0  ;;  %v1638_v37 = vsel %vm660_vm13, %v1637_v12, 0.0  ;;  %v1980_v40 = vadd.f32 %v1979_v45, %v1977_v57  ;;  %v1727_v5 = vmul.f32 %v1726_v27, %v1685_v19  ;;  %v4221_v12 = vld [vmem:[#allocation15_spill] sm:$0xff] }
 0x2e0   : > { %v1639_v25 = vadd.f32 %v1638_v37, %v1636_v53  ;;  %v1550_v3 = vadd.f32 %v1549_v2, %v1547_v11  ;;  %v1892_v15 = vrot.slane %v1891_v10, 6  ;;  %v1803_v49 = vrot.slane %v1802_v44, 7  ;;  %2059 = vmatpush.bf16.msra.mxu3 %v2273_v35 }
 0x2e1   : > { %v1981_v9 = vrot.slane %v1980_v40, 4  ;;  %v1991_v13 = vmul.f32 %v2436_v32, %v4221_v12 }
 0x2e2   : > { %v1640_v14 = vmul.f32 %v3851_v17, %v1639_v25  ;;  %v1551_v43 = vrot.slane %v1550_v3, 4  ;;  %v1893_v29 = vsel %vm4218_vm1, %v1892_v15, 0.0 }
 0x2e3   : > { %v1513_v63 = vpop.xlane.xlu0 %1512  ;;  %v1894_v17 = vadd.f32 %v1893_v29, %v1891_v10 }
 0x2e4   : > { %v1552_v46 = vsel %vm660_vm13, %v1551_v43, 0.0  ;;  %v1641_v41 = vmul.f32 %v1640_v14, %v1599_v42  ;;  %2060 = vmatpush.bf16.msra.mxu3 %v2272_v59 }
 0x2e5   : > { %v1553_v21 = vadd.f32 %v1552_v46, %v1550_v3  ;;  %v1895_v18 = vrot.slane %v1894_v17, 4 }
 0x2e7   : > { %v1554_v55 = vmul.f32 %v3865_v4, %v1553_v21  ;;  %v1896_v24 = vsel %vm660_vm13, %v1895_v18, 0.0  ;;  %v1804_v4 = vsel %vm480_vm11, %v1803_v49, 0.0  ;;  %vm4220_vm11 = vmmov %vm4218_vm1 }
 0x2e8   : > { %v1897_v54 = vadd.f32 %v1896_v24, %v1894_v17  ;;  %v1805_v22 = vadd.f32 %v1804_v4, %v1802_v44  ;;  %2061 = vmatpush.bf16.msra.mxu3 %v2271_v23 }
 0x2e9   : > { %v1555_v34 = vmul.f32 %v1554_v55, %v1513_v63 }
 0x2ea   : > { %v1898_v33 = vmul.f32 %v3912_v26, %v1897_v54  ;;  %v1806_v58 = vrot.slane %v1805_v22, 6 }
 0x2eb   : > { %v1556_v0 = vadd.f32 %v1555_v34, %v3845_v20  ;;  %v1982_v20 = vsel %vm660_vm13, %v1981_v9, 0.0 }
 0x2ec   : > { %v1983_v62 = vadd.f32 %v1982_v20, %v1980_v40  ;;  %v1807_v7 = vsel %vm4220_vm11, %v1806_v58, 0.0 }
 0x2ed   : > { %v1642_v1 = vadd.f32 %v1641_v41, %v1556_v0  ;;  %v1808_v26 = vadd.f32 %v1807_v7, %v1805_v22 }
 0x2ee   : > { %v1984_v6 = vmul.f32 %v3855_v51, %v1983_v62 }
 0x2ef   : > { %v1728_v48 = vadd.f32 %v1727_v5, %v1642_v1  ;;  %v1809_v39 = vrot.slane %v1808_v26, 4 }
 0x2f1   : > { %v1810_v52 = vsel %vm660_vm13, %v1809_v39, 0.0  ;;  %vm4222_vm13 = vcmask 523264  }
 0x2f2   : > { %v1811_v11 = vadd.f32 %v1810_v52, %v1808_v26 }
 0x2f4   : > { %v1812_v51 = vmul.f32 %v3950_v47, %v1811_v11 }
 0x30a   : > { %v1857_v50 = vpop.xlane.xlu2 %1856 }
 0x30b   : > { %v1899_v53 = vmul.f32 %v1898_v33, %v1857_v50 }
 0x313   : > { %v1943_v60 = vpop.xlane.xlu1 %1942 }
 0x314   : > { %v1985_v47 = vmul.f32 %v1984_v6, %v1943_v60 }
 0x31d   : > { %v1771_v16 = vpop.xlane.xlu0 %1770 }
 0x31e   : > { %v1813_v56 = vmul.f32 %v1812_v51, %v1771_v16 }
 0x320   : > { %v1814_v30 = vadd.f32 %v1813_v56, %v1728_v48 }
 0x322   : > { %v1900_v61 = vadd.f32 %v1899_v53, %v1814_v30 }
 0x324   : > { %v1986_v27 = vadd.f32 %v1985_v47, %v1900_v61 }
 0x326   : > { %v1992_v36 = vadd.f32 %v1991_v13, %v1986_v27 }
 0x330   : > { %v2015_v2 = vpop.permute.xlu0 %2014 }
 0x331   : > { %v2017_v44 = vmul.f32 %v2015_v2, %v1992_v36 }
 0x333   : > { %v2018_v37 = vpack.c.bf16 %v2017_v44, %v2017_v44 }
 0x335   : > { %2260 = vmatmul.msk.bf16.vlgmr.msra.gmra.mxu3 %vm4222_vm13, %v2018_v37 }
 0x3b8   : > { %v2063_v25 = vpop.f32.mrf.mxu3 }
 0x3b9   : > { %2067 = vst.msk [vmem:[%s407_s12] sm:$0xff] %vm4223_vm6, %v2063_v25 }
 0x3ba   : > { %2631 = shalt.err (!%p2628_p11)
}
 0x3bb   : > { %2285 = dma.vmem_to_hbm [thread:$0]  (%p2810_p5), %s2082_s18, 128, %s2084_s29, %s2069_s26  }
 0x3c0   : > { %v2065_v3 = vpop.f32.mrf.mxu3 }
 0x3c1 PF: > { %s2095_s23 = sand.u32 1, %s2662_s13   ;;  %p4224_p12 = scmp.ge.s32.totalorder %s2674_s16, 2 }
 0x3c2   : > { %s2096_s22 = scalar_lea.sflag [#allocation4], %s2095_s23 }
 0x3c3   : > { %p2299_p13 = pnand %p4224_p12, %p2776_p6 }
 0x3c5   : > { %p2300_p0 = pneg %p2299_p13 }
 0x3c7   : > { %2657 = dma.done.wait (%p2300_p0), %s2096_s22, 128  }
 0x3c8   : > { %2659 = vsyncadd (%p2300_p0), %s2096_s22, 4294967168  ;;  %s4225_s25 = sld [smem:[#allocation12_spill]]  ;;  %p24_p3 = scmp.ge.s32.totalorder %s2797_s21, 4  }
 0x3c9   : > { %s4226_s15 = sld [smem:[#allocation13_spill]]  ;;  %s4227_s13 = smov %s2666_s14 }
 0x3ca   : > { %s4229_s16 = smov %s2797_s21  ;;  %26 = sbr.rel (!%p24_p3) target bundleno = 9 (0x9), region = 113 }
 0x3ce   : > { %s4228_s14 = smov %s4225_s25 }
 0x3cf   :  { %2102 = vsyncpa [#allocation3], 1 }
 0x3d0   :  { %2104 = vsyncpa [#allocation3 + $0x1], 1 }
 0x3d1   :  { %2105 = vsyncpa [#allocation6], 1 }
 0x3d2   :  { %2106 = vsyncpa [#allocation4], 1 }
 0x3d3   :  { %2108 = vsyncpa [#allocation4 + $0x1], 1 }

// kernel: tpu_custom_call.1
= control target key start
LH: loop header
LB: loop body
LE: loop exit
PB: predicated region body
PF: predicated region fallthrough
CT: control target
= control target key end

     0   :  { %s4102_s0 = inlined_call_operand.hbm [shape: bf16[16,32], index: 0, kind: input, shape index: {}]   ;;  %s4103_s1 = inlined_call_operand.vmem [shape: bf16[32,128], index: 1, kind: input, shape index: {}]   ;;  %s4104_s2 = inlined_call_operand.hbm [shape: f32[4,64], index: 2, kind: input, shape index: {}]   ;;  %s4105_s3 = inlined_call_operand.vmem [shape: f32[1,64], index: 3, kind: input, shape index: {}]   ;;  %s4106_s4 = inlined_call_operand.vmem [shape: bf16[64,128], index: 4, kind: input, shape index: {}]   ;;  %s4107_s5 = inlined_call_operand.vmem [shape: bf16[2,64], index: 5, kind: input, shape index: {}]   ;;  %s4108_s6 = inlined_call_operand.vmem [shape: f32[1,64], index: 6, kind: input, shape index: {}]   ;;  %s4109_s7 = inlined_call_operand.hbm [shape: f32[16,64], index: 7, kind: input, shape index: {}]   ;;  %s4110_s8 = inlined_call_operand.vmem [shape: f32[1,64], index: 8, kind: input, shape index: {}]   ;;  %s4111_s9 = inlined_call_operand.vmem [shape: bf16[64,32], index: 9, kind: input, shape index: {}]   ;;  %s4112_s10 = inlined_call_operand.hbm [shape: f32[16,32], index: 10, kind: output, shape index: {}]  }
   0x1   :  { %4122 = sst [smem:[#allocation16_spill]] %s4104_s2 }
   0x2   :  { %4123 = sst [smem:[#allocation17_spill]] %s4109_s7 }
   0x3   :  { %15 = vsyncpa [#allocation3], 0 }
   0x4   :  { %17 = vsyncpa [#allocation3 + $0x1], 0 }
   0x5   :  { %18 = vsyncpa [#allocation6], 0 }
   0x6   :  { %19 = vsyncpa [#allocation4], 0 }
   0x7   :  { %21 = vsyncpa [#allocation4 + $0x1], 0  ;;  %s2741_s13 = smov 0   ;;  %s2743_s14 = smov 0  }
   0x8   :  { %s2745_s15 = smov 0   ;;  %s2747_s16 = smov 0  }
   0x9 LB: > { %4124 = sst [smem:[#allocation12_spill]] %s2670_s15  ;;  %s2762_s17 = sadd.s32 4294967295, %s2674_s16   ;;  %s2674_s16 = sphi %s2747_s16, %s4229_s16   ;;  %s2670_s15 = sphi %s2745_s15, %s4226_s15   ;;  %s2666_s14 = sphi %s2743_s14, %s4228_s14   ;;  %s2662_s13 = sphi %s2741_s13, %s4227_s13  }
   0xa   : > { %s2173_s18 = sadd.s32 4294967294, %s2674_s16   ;;  %p47_p0 = scmp.ne.s32.totalorder %s2666_s14, %s2662_s13 }
   0xb   : > { %p48_p1 = scmp.eq.s32.totalorder %s2762_s17, 0  ;;  %p260_p2 = scmp.eq.s32.totalorder %s2762_s17, 1 }
   0xc   : > { %p266_p3 = scmp.eq.s32.totalorder %s2173_s18, 1  ;;  %p2174_p5 = scmp.ge.s32.totalorder %s2674_s16, 1 }
   0xd   : > { %p2771_p4 = por %p48_p1, %p47_p0  ;;  %p273_p7 = scmp.lt.s32.totalorder %s2674_s16, 3 }
   0xe   : > { %p2776_p6 = por %p266_p3, %p47_p0  ;;  %s4127_s2 = sld [smem:[#allocation16_spill]] }
   0xf   : > { %p2784_p8 = pnand %p2174_p5, %p273_p7  ;;  %s2676_s25 = smov [#allocation5]  }
  0x10   : > { %s290_s26 = sshll.u32 %s2676_s25, 4  ;;  %s4129_s7 = sld [smem:[#allocation17_spill]]  ;;  %s291_s26 = int_to_ptr.vmem [resolvable:$true] %s290_s26 }
  0x11   : > { %p2287_p10 = pneg %p2784_p8  ;;  %s2677_s30 = smov [#allocation7]  }
  0x12   : > { %s313_s11 = sshll.u32 %s2677_s30, 4  ;;  %s2678_s12 = smov 128   ;;  %s314_s11 = int_to_ptr.vmem [resolvable:$true] %s313_s11 }
  0x13   : > { %p2288_p11 = pnand %p2287_p10, %p48_p1  ;;  %s2679_s18 = smov 8  }
  0x14   : > { %s288_s23 = sshll.u32 %s4127_s2, 4  ;;  %s2797_s21 = sadd.s32 1, %s2674_s16   ;;  %s289_s23 = int_to_ptr.hbm [resolvable:$true] %s288_s23 }
  0x15   : > { %2290 = dma.hbm_to_vmem [thread:$0]  (!%p2288_p11), %s289_s23, 64, %s291_s26, [#allocation6]  }
  0x16   : > { %s311_s29 = sshll.u32 %s4129_s7, 4  ;;  %s31_s22 = ssub.s32 %s2674_s16, %s2797_s21  ;;  %s312_s29 = int_to_ptr.hbm [resolvable:$true] %s311_s29 }
  0x17   : > { %2293 = dma.hbm_to_vmem [thread:$0]  (!%p2288_p11), %s312_s29, 256, %s314_s11, [#allocation6], %s2678_s12, %s2678_s12, %s2679_s18  }
  0x18   : > { %p32_p12 = scmp.eq.s32.totalorder %s31_s22, 0  ;;  %s34_s25 = sadd.s32 1, %s2670_s15 }
  0x19   : > { %p41_p13 = scmp.ne.s32.totalorder %s2670_s15, %s2666_s14  ;;  %p42_p0 = scmp.eq.s32.totalorder %s2674_s16, 0 }
  0x1a   : > { %s2806_s27 = scalar_select %p32_p12, %s2670_s15, %s34_s25  }
  0x1b   : > { %p43_p3 = por %p42_p0, %p41_p13  ;;  %p2810_p5 = por %p260_p2, %p41_p13 }
  0x1c   : > { %4130 = sst [smem:[#allocation13_spill]] %s2806_s27  ;;  %p2304_p7 = scmp.lt.s32.totalorder %s2674_s16, 2 }
  0x1d   : > { %s333_s23 = sand.u32 1, %s2670_s15   ;;  %s2179_s29 = sshll.u32 %s2674_s16, 2 }
  0x1e   : > { %s2178_s26 = sshll.u32 %s333_s23, 2  ;;  %s341_s12 = scalar_lea.hbm %s4102_s0, %s2179_s29 }
  0x1f   : > { %s337_s18 = scalar_lea.vmem [#allocation2], %s2178_s26  ;;  %s343_s2 = sshll.u32 %s341_s12, 4  ;;  %s344_s2 = int_to_ptr.hbm [resolvable:$true] %s343_s2 }
  0x20   : > { %s345_s22 = sshll.u32 %s337_s18, 4  ;;  %p2820_p10 = pnand %p2304_p7, %p43_p3  ;;  %s346_s22 = int_to_ptr.vmem [resolvable:$true] %s345_s22 }
  0x21   : > { %s334_s7 = scalar_lea.sflag [#allocation3], %s333_s23  ;;  %s2574_s27 = sshra.s32 %s344_s2, 4  ;;  %s2575_s27 = int_to_ptr.hbm [resolvable:$true] %s2574_s27 }
  0x22   : > { %s2576_s15 = scalar_lea.hbm %s2575_s27, 4  ;;  %p2578_p11 = pneg %p2820_p10 }
  0x23   : > { %p2577_p2 = scmp.ne.s32.totalorder %s2575_s27, %s2576_s15  ;;  %s2581_s30 = scalar_lea.hbm %s4102_s0, 8 }
  0x24   : > { %p2582_p0 = scmp.lt.s32.totalorder %s2575_s27, %s4102_s0  ;;  %p2583_p3 = scmp.lt.s32.totalorder %s2581_s30, %s2576_s15 }
  0x25   : > { %p2579_p12 = pnand %p2578_p11, %p2577_p2 }
  0x26   : > { %p2584_p7 = por %p2583_p3, %p2582_p0 }
  0x27   : > { %p2580_p13 = pneg %p2579_p12 }
  0x29   : > { %p2585_p9 = pnand %p2584_p7, %p2580_p13 }
  0x2b   : > { %2588 = shalt.err (!%p2585_p9)
}
  0x2c   : > { %2297 = dma.hbm_to_vmem [thread:$0]  (!%p2820_p10), %s344_s2, 64, %s346_s22, %s334_s7  }
  0x2d   : > { %354 = sbr.rel (%p2784_p8) target bundleno = 961 (0x3c1), region = 60 }
  0x32   : > { %s2837_s23 = sand.u32 1, %s2666_s14  }
  0x33   : > { %s2181_s18 = sshll.u32 %s2837_s23, 2  ;;  %s357_s29 = scalar_lea.sflag [#allocation3], %s2837_s23 }
  0x34   : > { %s360_s26 = scalar_lea.vmem [#allocation2], %s2181_s18 }
  0x35   : > { %2649 = dma.done.wait (%p2771_p4), %s357_s29, 64  }
  0x36   : > { %2651 = vsyncadd (%p2771_p4), %s357_s29, 4294967232 }
  0x37   : > { %2653 = dma.done.wait (%p48_p1), [#allocation6], 320  }
  0x38   : > { %2655 = vsyncadd (%p48_p1), [#allocation6], 4294966976  ;;  %v2266_v0 = vld [vmem:[%s4103_s1 + $0x8] sm:$0xff]  ;;  %v2265_v1 = vld [vmem:[%s4103_s1] sm:$0xff]  ;;  %vm4118_vm0 = vcmask 261120   ;;  %v443_v3 = vlaneseq  ;;  %v4116_v6 = vmov 0.0  }
  0x39   : > { %436 = vmatpush.bf16.msra.mxu0 %v2266_v0  ;;  %v409_v2 = vld [vmem:[%s360_s26] sm:$0xf]  ;;  %v2270_v5 = vld [vmem:[%s4106_s4 + $0x18] sm:$0xff]  ;;  %v2269_v11 = vld [vmem:[%s4106_s4 + $0x10] sm:$0xff]  ;;  %s2681_s30 = smov 18   ;;  %s2682_s11 = smov 2  }
  0x3a   : > { %v2856_v4 = vand.u32 127, %v443_v3  ;;  %554 = vmatpush.bf16.msra.mxu1 %v2270_v5  ;;  %v2268_v16 = vld [vmem:[%s4106_s4 + $0x8] sm:$0xff]  ;;  %v2886_v19 = vshrl.u32 %v443_v3, 7  ;;  %v2267_v22 = vld [vmem:[%s4106_s4] sm:$0xff]  ;;  %s2683_s19 = smov 110   ;;  %s2684_s27 = smov 126  }
  0x3b   : > { %v2430_v25 = vld [vmem:[#allocation5] ss:$0 sm:$0xff]  ;;  %v2431_v29 = vld [vmem:[#allocation5 + $0x1] ss:$0 sm:$0xff]  ;;  %v2433_v30 = vld [vmem:[%s4105_s3] ss:$0 sm:$0xff] }
  0x3c   : > { %vm604_vm1 = vcmp.eq.s32.totalorder %v2856_v4, 0  ;;  %vm697_vm2 = vcmp.eq.s32.totalorder %v2856_v4, 1  ;;  %vm783_vm3 = vcmp.eq.s32.totalorder %v2856_v4, 2  ;;  %vm869_vm4 = vcmp.eq.s32.totalorder %v2856_v4, 3  ;;  %v2434_v34 = vld [vmem:[#allocation5 + $0x2] ss:$0 sm:$0xff] }
  0x3d   : > { %437 = vmatpush.bf16.msra.mxu0 %v2265_v1  ;;  %v2212_v7 = vsel %vm604_vm1, 1.0, %v4116_v6  ;;  %v2214_v8 = vsel %vm697_vm2, 1.0, %v4116_v6  ;;  %v2216_v9 = vsel %vm783_vm3, 1.0, %v4116_v6  ;;  %v2218_v10 = vsel %vm869_vm4, 1.0, %v4116_v6  ;;  %v2432_v37 = vld [vmem:[#allocation5 + $0x3] ss:$0 sm:$0xff] }
  0x3e   : > { %v2355_v12 = vpack.i.bf16 %v2214_v8, %v2212_v7  ;;  %v2360_v13 = vpack.i.bf16 %v2218_v10, %v2216_v9  ;;  %vm1127_vm5 = vcmp.eq.s32.totalorder %v2856_v4, 6  ;;  %vm1213_vm6 = vcmp.eq.s32.totalorder %v2856_v4, 7  ;;  %555 = vmatpush.bf16.msra.mxu1 %v2269_v11  ;;  %v564_v10 = vld [vmem:[%s4107_s5] sm:$0x1]  ;;  %s2184_s22 = sshll.u32 %s2837_s23, 3  ;;  %s2069_s26 = scalar_lea.sflag [#allocation4], %s2837_s23 }
  0x3f   : > { %vm955_vm7 = vcmp.eq.s32.totalorder %v2856_v4, 4  ;;  %vm1041_vm8 = vcmp.eq.s32.totalorder %v2856_v4, 5  ;;  %v2224_v14 = vsel %vm1127_vm5, 1.0, %v4116_v6  ;;  %v2226_v15 = vsel %vm1213_vm6, 1.0, %v4116_v6  ;;  %s407_s12 = scalar_lea.vmem [#allocation8], %s2184_s22  ;;  %s2624_s24 = scalar_lea.hbm %s4112_s10, 16 }
  0x40   : > { %2193 = vmatmul.msk.bf16.vlgmr.msra.gmra.mxu0 %vm4118_vm0, %v409_v2  ;;  %2356 = vrot.lane.b32.xlu1 %v2355_v12, %s2681_s30  ;;  %v2220_v17 = vsel %vm955_vm7, 1.0, %v4116_v6  ;;  %v2222_v18 = vsel %vm1041_vm8, 1.0, %v4116_v6  ;;  %v2385_v20 = vpack.i.bf16 %v2226_v15, %v2224_v14  ;;  %v2892_v23 = vand.u32 7, %v2886_v19  ;;  %s2081_s18 = sshll.u32 %s407_s12, 4  ;;  %s2082_s18 = int_to_ptr.vmem [resolvable:$true] %s2081_s18 }
  0x41   : > { %2361 = vrot.lane.b32.xlu2 %v2360_v13, %s2682_s11  ;;  %2351 = vrot.lane.b32.xlu0 %v2355_v12, %s2682_s11  ;;  %v2375_v21 = vpack.i.bf16 %v2222_v18, %v2220_v17  ;;  %vm1299_vm12 = vcmp.eq.s32.totalorder %v2856_v4, 8  ;;  %vm1385_vm13 = vcmp.eq.s32.totalorder %v2856_v4, 9  ;;  %vm1471_vm14 = vcmp.eq.s32.totalorder %v2856_v4, 10 }
  0x42   : > { %556 = vmatpush.bf16.msra.mxu1 %v2268_v16  ;;  %vm462_vm9 = vcmp.ge.s32.totalorder %v2892_v23, 3  ;;  %vm4121_vm10 = vcmp.ge.s32.totalorder %v2892_v23, 2  ;;  %vm480_vm11 = vcmp.ge.s32.totalorder %v2892_v23, 1  ;;  %v2228_v46 = vsel %vm1299_vm12, 1.0, %v4116_v6 }
  0x43   : > { %v2230_v47 = vsel %vm1385_vm13, 1.0, %v4116_v6  ;;  %vm1557_vm15 = vcmp.eq.s32.totalorder %v2856_v4, 11  ;;  %vm1643_vm1 = vcmp.eq.s32.totalorder %v2856_v4, 12  ;;  %vm1729_vm2 = vcmp.eq.s32.totalorder %v2856_v4, 13 }
  0x44   : > { %v2395_v49 = vpack.i.bf16 %v2230_v47, %v2228_v46  ;;  %v2232_v50 = vsel %vm1471_vm14, 1.0, %v4116_v6  ;;  %v2234_v51 = vsel %vm1557_vm15, 1.0, %v4116_v6  ;;  %v2236_v52 = vsel %vm1643_vm1, 1.0, %v4116_v6 }
  0x45   : > { %v2238_v53 = vsel %vm1729_vm2, 1.0, %v4116_v6  ;;  %v2400_v54 = vpack.i.bf16 %v2234_v51, %v2232_v50  ;;  %vm1815_vm3 = vcmp.eq.s32.totalorder %v2856_v4, 14  ;;  %vm1901_vm4 = vcmp.eq.s32.totalorder %v2856_v4, 15 }
  0x46   : > { %557 = vmatpush.bf16.msra.mxu1 %v2267_v22  ;;  %v2405_v55 = vpack.i.bf16 %v2238_v53, %v2236_v52  ;;  %v2240_v58 = vsel %vm1815_vm3, 1.0, %v4116_v6  ;;  %v2242_v59 = vsel %vm1901_vm4, 1.0, %v4116_v6  ;;  %vm573_vm12 = vcmask 1040384  }
  0x47   : > { %v2410_v60 = vpack.i.bf16 %v2242_v59, %v2240_v58  ;;  %v575_v11 = vsel %vm573_vm12, %v564_v10, 0  ;;  %vm569_vm13 = vcmask 15360   ;;  %vm4119_vm14 = vcmask 130048  }
  0x48   : > { %2366 = vrot.lane.b32.xlu1 %v2360_v13, %s2681_s30  ;;  %584 = vmatpush.bf16.msra.mxu2 %v575_v11  ;;  %vm608_vm15 = vcmp.eq.s32.totalorder %v2886_v19, 0  ;;  %vm700_vm1 = vcmp.eq.s32.totalorder %v2886_v19, 1  ;;  %vm958_vm2 = vcmp.eq.s32.totalorder %v2886_v19, 4  ;;  %vm786_vm3 = vcmp.eq.s32.totalorder %v2886_v19, 2 }
  0x49   : > { %2386 = vrot.lane.b32.xlu2 %v2385_v20, %s2681_s30  ;;  %2376 = vrot.lane.b32.xlu0 %v2375_v21, %s2681_s30  ;;  %vm872_vm4 = vcmp.eq.s32.totalorder %v2886_v19, 3  ;;  %vm457_vm12 = vcmp.eq.s32.totalorder %v2892_v23, 0 }
  0x50   : > { %2371 = vrot.lane.b32.xlu1 %v2375_v21, %s2682_s11 }
  0x51   : > { %2396 = vrot.lane.b32.xlu2 %v2395_v49, %s2681_s30  ;;  %2391 = vrot.lane.b32.xlu0 %v2395_v49, %s2682_s11 }
  0x58   : > { %2381 = vrot.lane.b32.xlu1 %v2385_v20, %s2682_s11 }
  0x59   : > { %2401 = vrot.lane.b32.xlu2 %v2400_v54, %s2682_s11  ;;  %2421 = vrot.lane.b32.xlu0 %v2405_v55, %s2681_s30 }
  0x60   : > { %2406 = vrot.lane.b32.xlu1 %v2405_v55, %s2682_s11 }
  0x61   : > { %2411 = vrot.lane.b32.xlu2 %v2410_v60, %s2682_s11 }
  0x69   : > { %2416 = vrot.lane.b32.xlu2 %v2400_v54, %s2681_s30 }
  0x71   : > { %2426 = vrot.lane.b32.xlu2 %v2410_v60, %s2681_s30  ;;  %s2685_s30 = smov 64  }
  0xb2   : > { %v2357_v12 = vpop.permute.xlu1 %2356 }
  0xb3   : > { %v2352_v14 = vpop.permute.xlu0 %2351  ;;  %v2359_v15 = vunpack.i.h.bf16 %v2357_v12  ;;  %v2358_v16 = vunpack.i.l.bf16 %v2357_v12 }
  0xb4   : > { %v2353_v17 = vunpack.i.l.bf16 %v2352_v14 }
  0xba   : > { %v2367_v13 = vpop.permute.xlu1 %2366 }
  0xbd   : > { %v2897_v24 = vpop.f32.mrf.mxu0 }
  0xbe   : > { %4133 = vst [vmem:[#allocation14_spill] sm:$0xff] %v2897_v24  ;;  %v463_v26 = vrot.slane %v2897_v24, 5  ;;  %v472_v27 = vrot.slane %v2897_v24, 6  ;;  %v481_v28 = vrot.slane %v2897_v24, 7  ;;  %v491_v42 = vmul.f32 %v2432_v37, %v2897_v24 }
  0xc0   : > { %v466_v31 = vsel %vm462_vm9, %v463_v26, 0.0  ;;  %v475_v32 = vsel %vm4121_vm10, %v472_v27, 0.0  ;;  %v484_v35 = vsel %vm480_vm11, %v481_v28, 0.0  ;;  %vm4120_vm9 = vcmask 523264   ;;  %v2362_v26 = vpop.permute.xlu2 %2361 }
  0xc1   : > { %v469_v33 = vmul.f32 %v2430_v25, %v466_v31  ;;  %v478_v36 = vmul.f32 %v2431_v29, %v475_v32  ;;  %v487_v41 = vmul.f32 %v2434_v34, %v484_v35  ;;  %v2364_v28 = vunpack.i.h.bf16 %v2362_v26  ;;  %v2377_v35 = vpop.permute.xlu0 %2376 }
  0xc2   : > { %v2372_v27 = vpop.permute.xlu1 %2371  ;;  %v2378_v37 = vunpack.i.l.bf16 %v2377_v35 }
  0xc3   : > { %v470_v38 = vadd.f32 %v2433_v30, %v469_v33  ;;  %v2373_v29 = vunpack.i.l.bf16 %v2372_v27  ;;  %v2354_v30 = vunpack.i.h.bf16 %v2352_v14 }
  0xc5   : > { %v441_v39 = vpop.f32.mrf.mxu0  ;;  %v479_v40 = vadd.f32 %v478_v36, %v470_v38  ;;  %v2369_v36 = vunpack.i.h.bf16 %v2367_v13  ;;  %v2363_v38 = vunpack.i.l.bf16 %v2362_v26 }
  0xc7   : > { %v488_v43 = vadd.f32 %v487_v41, %v479_v40 }
  0xc9   : > { %v492_v44 = vadd.f32 %v491_v42, %v488_v43  ;;  %v2387_v42 = vpop.permute.xlu2 %2386  ;;  %v2374_v43 = vunpack.i.h.bf16 %v2372_v27 }
  0xca   : > { %v2382_v49 = vpop.permute.xlu1 %2381  ;;  %v2389_v50 = vunpack.i.h.bf16 %v2387_v42  ;;  %v2388_v60 = vunpack.i.l.bf16 %v2387_v42  ;;  %v3022_v42 = vld [vmem:[#allocation7 + $0x8] sm:$0xff] }
  0xcb   : > { %v493_v45 = vsub.f32 0.0, %v492_v44  ;;  %v2384_v51 = vunpack.i.h.bf16 %v2382_v49  ;;  %v2383_v52 = vunpack.i.l.bf16 %v2382_v49  ;;  %v2217_v49 = vsel %vm786_vm3, 1.0, %v4116_v6 }
  0xcd   : > { %v494_v48 = vmul.f32 1.442695, %v493_v45  ;;  %v2368_v45 = vunpack.i.l.bf16 %v2367_v13 }
  0xcf   : > { %2437 = vpow2.f32 %v494_v48 }
  0xd1   : > { %v2397_v53 = vpop.permute.xlu2 %2396 }
  0xd2   : > { %v2398_v58 = vunpack.i.l.bf16 %v2397_v53 }
  0xd5   : > { %v2438_v56 = vpop.eup %2437 }
  0xd6   : > { %v496_v57 = vadd.f32 1.0, %v2438_v56 }
  0xd8   : > { %2439 = vrcp.f32 %v496_v57  ;;  %v508_v0 = vand.u32 2147483648, %v496_v57  ;;  %v506_v2 = vand.u32 2147483647, %v496_v57  ;;  %vm502_vm6 = vweird.f32 %v496_v57 }
  0xda   : > { %v509_v4 = vor.u32 1.1754944e-38, %v508_v0  ;;  %vm507_vm8 = vcmp.eq.f32.partialorder %v506_v2, 8.507059e+37 }
  0xde   : > { %v2440_v61 = vpop.eup %2439 }
  0xdf   : > { %v498_v62 = vmul.f32 %v2440_v61, %v496_v57  ;;  %vm503_vm5 = vweird.f32 %v2440_v61  ;;  %v2392_v57 = vpop.permute.xlu0 %2391 }
  0xe0   : > { %vm504_vm7 = vmor %vm502_vm6, %vm503_vm5  ;;  %v2393_v59 = vunpack.i.l.bf16 %v2392_v57  ;;  %vm1130_vm5 = vcmp.eq.s32.totalorder %v2886_v19, 6  ;;  %vm1044_vm6 = vcmp.eq.s32.totalorder %v2886_v19, 5 }
  0xe1   : > { %v499_v63 = vsub.f32 1.0, %v498_v62 }
  0xe3   : > { %v500_v1 = vmul.f32 %v2440_v61, %v499_v63 }
  0xe5   : > { %v501_v3 = vadd.f32 %v2440_v61, %v500_v1  ;;  %v2399_v1 = vunpack.i.h.bf16 %v2397_v53  ;;  %v2219_v53 = vsel %vm872_vm4, 1.0, %v4116_v6 }
  0xe7   : > { %v505_v5 = vsel %vm504_vm7, %v2440_v61, %v501_v3  ;;  %v2402_v61 = vpop.permute.xlu2 %2401  ;;  %v2394_v3 = vunpack.i.h.bf16 %v2392_v57  ;;  %v3001_v27 = vpop.permute.xlu0 %2421  ;;  %vm1216_vm7 = vcmp.eq.s32.totalorder %v2886_v19, 7 }
  0xe8   : > { %v510_v7 = vsel %vm507_vm8, %v509_v4, %v505_v5  ;;  %v2403_v2 = vunpack.i.l.bf16 %v2402_v61  ;;  %v2404_v11 = vunpack.i.h.bf16 %v2402_v61 }
  0xe9   : > { %v2938_v8 = vmul.f32 %v510_v7, %v492_v44  ;;  %v2379_v44 = vunpack.i.h.bf16 %v2377_v35  ;;  %v2407_v7 = vpop.permute.xlu1 %2406 }
  0xea   : > { %v2408_v12 = vunpack.i.l.bf16 %v2407_v7  ;;  %v2409_v13 = vunpack.i.h.bf16 %v2407_v7 }
  0xeb   : > { %4134 = vst [vmem:[#allocation15_spill] sm:$0xff] %v2938_v8  ;;  %v513_v9 = vpack.c.bf16 %v2938_v8, %v2938_v8 }
  0xed   : > { %2210 = vmatmul.msk.bf16.vlgmr.msra.gmra.mxu1 %vm4120_vm9, %v513_v9 }
  0xef   : > { %v2412_v10 = vpop.permute.xlu2 %2411 }
 0x16a   : > { %v2947_v18 = vpop.f32.mrf.mxu1 }
 0x16b   : > { %v732_v20 = vmul.f32 %v2359_v15, %v2947_v18  ;;  %v641_v21 = vmul.f32 %v2358_v16, %v2947_v18  ;;  %v629_v22 = vmul.f32 %v2353_v17, %v2947_v18  ;;  %v563_v25 = vpack.c.bf16 %v2947_v18, %v2947_v18 }
 0x16c   : > { %v893_v32 = vmul.f32 %v2364_v28, %v2947_v18  ;;  %v979_v33 = vmul.f32 %v2373_v29, %v2947_v18  ;;  %v721_v34 = vmul.f32 %v2354_v30, %v2947_v18  ;;  %v904_v39 = vmul.f32 %v2369_v36, %v2947_v18 }
 0x16d   : > { %734 = vrot.lane.b32.xlu1 %v732_v20, %s2683_s19  ;;  %643 = vrot.lane.b32.xlu2 %v641_v21, %s2683_s19  ;;  %v990_v40 = vmul.f32 %v2378_v37, %v2947_v18  ;;  %v807_v41 = vmul.f32 %v2363_v38, %v2947_v18  ;;  %v1076_v46 = vmul.f32 %v2379_v44, %v2947_v18  ;;  %v2414_v17 = vunpack.i.h.bf16 %v2412_v10  ;;  %v2417_v21 = vpop.permute.xlu2 %2416 }
 0x16e   : > { %631 = vrot.lane.b32.xlu0 %v629_v22, %s2684_s27  ;;  %2211 = vmatmul.msk.bf16.vlgmr.msra.gmra.mxu2 %vm569_vm13, %v563_v25  ;;  %v1065_v47 = vmul.f32 %v2374_v43, %v2947_v18  ;;  %v818_v48 = vmul.f32 %v2368_v45, %v2947_v18  ;;  %v1248_v54 = vmul.f32 %v2389_v50, %v2947_v18  ;;  %v2413_v20 = vunpack.i.l.bf16 %v2412_v10 }
 0x16f   : > { %v1237_v55 = vmul.f32 %v2384_v51, %v2947_v18  ;;  %v1151_v56 = vmul.f32 %v2383_v52, %v2947_v18  ;;  %v1334_v62 = vmul.f32 %v2398_v58, %v2947_v18  ;;  %v1323_v63 = vmul.f32 %v2393_v59, %v2947_v18 }
 0x170   : > { %v1162_v0 = vmul.f32 %v2388_v60, %v2947_v18  ;;  %v1495_v4 = vmul.f32 %v2403_v2, %v2947_v18  ;;  %v1420_v5 = vmul.f32 %v2399_v1, %v2947_v18  ;;  %v1409_v9 = vmul.f32 %v2394_v3, %v2947_v18 }
 0x171   : > { %v1667_v14 = vmul.f32 %v2408_v12, %v2947_v18  ;;  %v1581_v15 = vmul.f32 %v2404_v11, %v2947_v18  ;;  %v1753_v16 = vmul.f32 %v2409_v13, %v2947_v18  ;;  %v2418_v22 = vunpack.i.l.bf16 %v2417_v21 }
 0x172   : > { %v561_v31 = vpop.f32.mrf.mxu1  ;;  %v1925_v25 = vmul.f32 %v2414_v17, %v2947_v18  ;;  %v1839_v26 = vmul.f32 %v2413_v20, %v2947_v18  ;;  %v2419_v29 = vunpack.i.h.bf16 %v2417_v21  ;;  %v2423_v30 = vunpack.i.l.bf16 %v3001_v27 }
 0x173   : > { %v1506_v28 = vmul.f32 %v2418_v22, %v2947_v18  ;;  %v2215_v43 = vsel %vm700_vm1, 1.0, %v4116_v6  ;;  %v2221_v45 = vsel %vm958_vm2, 1.0, %v4116_v6  ;;  %vm660_vm13 = vcmp.ge.s32.totalorder %v2892_v23, 4 }
 0x174   : > { %v1678_v31 = vmul.f32 %v2423_v30, %v2947_v18 }
 0x175   : > { %895 = vrot.lane.b32.xlu1 %v893_v32, %s2684_s27  ;;  %981 = vrot.lane.b32.xlu2 %v979_v33, %s2684_s27  ;;  %v1592_v32 = vmul.f32 %v2419_v29, %v2947_v18  ;;  %v3012_v33 = vpop.permute.xlu2 %2426 }
 0x176   : > { %723 = vrot.lane.b32.xlu0 %v721_v34, %s2684_s27 }
 0x17d   : > { %906 = vrot.lane.b32.xlu1 %v904_v39, %s2683_s19  ;;  %992 = vrot.lane.b32.xlu2 %v990_v40, %s2683_s19  ;;  %v3018_v40 = vld [vmem:[#allocation7] sm:$0xff] }
 0x17e   : > { %809 = vrot.lane.b32.xlu0 %v807_v41, %s2684_s27  ;;  %v2213_v41 = vsel %vm608_vm15, 1.0, %v4116_v6  ;;  %v706_v52 = vmul.f32 %v2215_v43, %v3018_v40  ;;  %v792_v57 = vmul.f32 %v2217_v49, %v3018_v40  ;;  %v878_v60 = vmul.f32 %v2219_v53, %v3018_v40 }
 0x17f   : > { %v614_v44 = vmul.f32 %v2213_v41, %v3018_v40 }
 0x180   : > { %v794_v3 = vsel %vm4120_vm9, %v792_v57, 0.0  ;;  %v3071_v57 = vadd.s32 8, %v2886_v19 }
 0x182   : > { %vm1389_vm8 = vcmp.eq.s32.totalorder %v3071_v57, 9  ;;  %vm1303_vm15 = vcmp.eq.s32.totalorder %v3071_v57, 8  ;;  %vm1647_vm1 = vcmp.eq.s32.totalorder %v3071_v57, 12  ;;  %vm1475_vm0 = vcmp.eq.s32.totalorder %v3071_v57, 10 }
 0x185   : > { %1078 = vrot.lane.b32.xlu1 %v1076_v46, %s2683_s19  ;;  %1067 = vrot.lane.b32.xlu2 %v1065_v47, %s2684_s27 }
 0x186   : > { %820 = vrot.lane.b32.xlu0 %v818_v48, %s2683_s19  ;;  %v615_v48 = vmul.f32 0.0, %v3022_v42 }
 0x188   : > { %v617_v59 = vsel %vm4120_vm9, %v615_v48, 0.0 }
 0x189   : > { %v796_v17 = vadd.f32 %v794_v3, %v617_v59 }
 0x18d   : > { %1250 = vrot.lane.b32.xlu1 %v1248_v54, %s2683_s19  ;;  %1239 = vrot.lane.b32.xlu2 %v1237_v55, %s2684_s27  ;;  %v964_v54 = vmul.f32 %v2221_v45, %v3018_v40  ;;  %v2225_v55 = vsel %vm1130_vm5, 1.0, %v4116_v6  ;;  %vm1561_vm5 = vcmp.eq.s32.totalorder %v3071_v57, 11 }
 0x18e   : > { %1153 = vrot.lane.b32.xlu0 %v1151_v56, %s2684_s27  ;;  %v616_v56 = vsel %vm4120_vm9, %v614_v44, 0.0  ;;  %v1136_v61 = vmul.f32 %v2225_v55, %v3018_v40 }
 0x18f   : > { %v966_v1 = vsel %vm4120_vm9, %v964_v54, 0.0  ;;  %v618_v2 = vadd.f32 %v617_v59, %v616_v56 }
 0x190   : > { %v1138_v10 = vsel %vm4120_vm9, %v1136_v61, 0.0 }
 0x191   : > { %v619_v20 = vrot.slane %v618_v2, 4  ;;  %v1140_v22 = vadd.f32 %v1138_v10, %v617_v59 }
 0x195   : > { %1336 = vrot.lane.b32.xlu1 %v1334_v62, %s2683_s19  ;;  %1325 = vrot.lane.b32.xlu2 %v1323_v63, %s2684_s27  ;;  %v2223_v62 = vsel %vm1044_vm6, 1.0, %v4116_v6  ;;  %v708_v63 = vsel %vm4120_vm9, %v706_v52, 0.0 }
 0x196   : > { %1164 = vrot.lane.b32.xlu0 %v1162_v0, %s2683_s19  ;;  %v2435_v0 = vld [vmem:[%s4108_s6] ss:$0 sm:$0xff]  ;;  %v710_v7 = vadd.f32 %v708_v63, %v617_v59 }
 0x19d   : > { %1497 = vrot.lane.b32.xlu1 %v1495_v4, %s2684_s27  ;;  %1422 = vrot.lane.b32.xlu2 %v1420_v5, %s2683_s19  ;;  %v1050_v4 = vmul.f32 %v2223_v62, %v3018_v40 }
 0x19e   : > { %1411 = vrot.lane.b32.xlu0 %v1409_v9, %s2684_s27  ;;  %v880_v9 = vsel %vm4120_vm9, %v878_v60, 0.0 }
 0x19f   : > { %v882_v21 = vadd.f32 %v880_v9, %v617_v59 }
 0x1a5   : > { %1669 = vrot.lane.b32.xlu1 %v1667_v14, %s2684_s27  ;;  %1583 = vrot.lane.b32.xlu2 %v1581_v15, %s2684_s27  ;;  %v968_v14 = vadd.f32 %v966_v1, %v617_v59  ;;  %v2231_v1 = vsel %vm1389_vm8, 1.0, %v4116_v6 }
 0x1a6   : > { %1755 = vrot.lane.b32.xlu0 %v1753_v16, %s2684_s27 }
 0x1a7   : > { %v969_v29 = vrot.slane %v968_v14, 4 }
 0x1ad   : > { %1927 = vrot.lane.b32.xlu1 %v1925_v25, %s2684_s27  ;;  %1841 = vrot.lane.b32.xlu2 %v1839_v26, %s2684_s27  ;;  %v1052_v25 = vsel %vm4120_vm9, %v1050_v4, 0.0  ;;  %s2262_s27 = sshll.u32 %s2762_s17, 3 }
 0x1ae   : > { %1508 = vrot.lane.b32.xlu0 %v1506_v28, %s2683_s19  ;;  %v711_v28 = vrot.slane %v710_v7, 4  ;;  %v1054_v30 = vadd.f32 %v1052_v25, %v617_v59  ;;  %s2079_s11 = scalar_lea.hbm %s4112_s10, %s2262_s27 }
 0x1af   : > { %s2083_s29 = sshll.u32 %s2079_s11, 4  ;;  %s2084_s29 = int_to_ptr.hbm [resolvable:$true] %s2083_s29 }
 0x1b0   : > { %v712_v44 = vadd.f32 %v711_v28, %v710_v7  ;;  %v1055_v45 = vrot.slane %v1054_v30, 4  ;;  %s2618_s2 = sshra.s32 %s2084_s29, 4  ;;  %s2619_s2 = int_to_ptr.hbm [resolvable:$true] %s2618_s2 }
 0x1b1   : > { %s2620_s7 = scalar_lea.hbm %s2619_s2, 8  ;;  %p2625_p9 = scmp.lt.s32.totalorder %s2619_s2, %s4112_s10 }
 0x1b2   : > { %v713_v61 = vrot.slane %v712_v44, 2  ;;  %v1056_v62 = vadd.f32 %v1055_v45, %v1054_v30  ;;  %p2621_p1 = scmp.ne.s32.totalorder %s2619_s2, %s2620_s7  ;;  %p2626_p10 = scmp.lt.s32.totalorder %s2624_s24, %s2620_s7 }
 0x1b4   : > { %v714_v9 = vadd.f32 %v713_v61, %v712_v44  ;;  %v1057_v10 = vrot.slane %v1056_v62, 2  ;;  %p2622_p4 = pnand %p2621_p1, %p2810_p5  ;;  %p2627_p2 = por %p2626_p10, %p2625_p9 }
 0x1b5   : > { %1680 = vrot.lane.b32.xlu1 %v1678_v31, %s2683_s19  ;;  %1594 = vrot.lane.b32.xlu2 %v1592_v32, %s2683_s19 }
 0x1b6   : > { %v715_v30 = vrot.slane %v714_v9, 1  ;;  %p2623_p8 = pneg %p2622_p4 }
 0x1b8   : > { %p2628_p11 = pnand %p2627_p2, %p2623_p8 }
 0x1c7   : > { %v644_v34 = vpop.permute.xlu2 %643 }
 0x1c8   : > { %v646_v35 = vsel %vm4119_vm14, %v644_v34, 0.0  ;;  %v797_v34 = vrot.slane %v796_v17, 4 }
 0x1ca   : > { %v798_v52 = vadd.f32 %v797_v34, %v796_v17 }
 0x1cf   : > { %v982_v39 = vpop.permute.xlu2 %981 }
 0x1d0   : > { %v984_v12 = vsel %vm4119_vm14, %v982_v39, 0.0 }
 0x1d7   : > { %v3041_v58 = vpop.permute.xlu2 %992 }
 0x1d8   : > { %v995_v63 = vsel %vm4119_vm14, %v3041_v58, 0.0 }
 0x1de   : > { %647 = vadd.xlane.f32.xlu2 %v646_v35  ;;  %v2227_v35 = vsel %vm1216_vm7, 1.0, %v4116_v6  ;;  %vm1905_vm7 = vcmp.eq.s32.totalorder %v3071_v57, 15 }
 0x1df   : > { %v735_v36 = vpop.permute.xlu1 %734  ;;  %v3063_v31 = vpop.permute.xlu2 %1067  ;;  %v1222_v39 = vmul.f32 %v2227_v35, %v3018_v40 }
 0x1e0   : > { %v632_v37 = vpop.permute.xlu0 %631  ;;  %v737_v50 = vsel %vm4119_vm14, %v735_v36, 0.0  ;;  %v620_v36 = vadd.f32 %v619_v20, %v618_v2 }
 0x1e1   : > { %v635_v38 = vsel %vm4119_vm14, %v632_v37, 0.0  ;;  %v883_v37 = vrot.slane %v882_v21, 4 }
 0x1e2   : > { %636 = vadd.xlane.f32.xlu1 %v635_v38  ;;  %v1141_v38 = vrot.slane %v1140_v22, 4  ;;  %v621_v54 = vrot.slane %v620_v36, 2 }
 0x1e3   : > { %v884_v55 = vadd.f32 %v883_v37, %v882_v21 }
 0x1e4   : > { %v1142_v56 = vadd.f32 %v1141_v38, %v1140_v22  ;;  %v622_v2 = vadd.f32 %v621_v54, %v620_v36 }
 0x1e5   : > { %v885_v3 = vrot.slane %v884_v55, 2 }
 0x1e6   : > { %v1143_v4 = vrot.slane %v1142_v56, 2 }
 0x1e7   : > { %v896_v46 = vpop.permute.xlu1 %895  ;;  %v1240_v7 = vpop.permute.xlu2 %1239  ;;  %v886_v22 = vadd.f32 %v885_v3, %v884_v55 }
 0x1e8   : > { %v724_v47 = vpop.permute.xlu0 %723  ;;  %v898_v48 = vsel %vm4119_vm14, %v896_v46, 0.0  ;;  %v1144_v25 = vadd.f32 %v1143_v4, %v1142_v56 }
 0x1e9   : > { %v726_v51 = vsel %vm4119_vm14, %v724_v47, 0.0  ;;  %v887_v36 = vrot.slane %v886_v22, 1 }
 0x1ea   : > { %738 = vadd.xlane.f32.xlu1 %v737_v50  ;;  %727 = vadd.xlane.f32.xlu0 %v726_v51  ;;  %v970_v50 = vadd.f32 %v969_v29, %v968_v14  ;;  %v1224_v51 = vsel %vm4120_vm9, %v1222_v39, 0.0  ;;  %v623_v29 = vrot.slane %v622_v2, 1  ;;  %v1145_v37 = vrot.slane %v1144_v25, 1 }
 0x1eb   : > { %v1226_v53 = vadd.f32 %v1224_v51, %v617_v59  ;;  %v799_v59 = vrot.slane %v798_v52, 2 }
 0x1ec   : > { %v971_v46 = vrot.slane %v970_v50, 2  ;;  %v1146_v56 = vadd.f32 %v1145_v37, %v1144_v25 }
 0x1ed   : > { %v800_v21 = vadd.f32 %v799_v59, %v798_v52 }
 0x1ee   : > { %v972_v17 = vadd.f32 %v971_v46, %v970_v50  ;;  %v1242_v46 = vsel %vm4119_vm14, %v1240_v7, 0.0 }
 0x1ef   : > { %v907_v15 = vpop.permute.xlu1 %906  ;;  %v801_v35 = vrot.slane %v800_v21, 1  ;;  %v1326_v50 = vpop.permute.xlu2 %1325 }
 0x1f0   : > { %v810_v5 = vpop.permute.xlu0 %809  ;;  %v909_v14 = vsel %vm4119_vm14, %v907_v15, 0.0  ;;  %v973_v15 = vrot.slane %v972_v17, 1 }
 0x1f1   : > { %v586_v11 = vpop.f32.mrf.mxu2  ;;  %v812_v13 = vsel %vm4119_vm14, %v810_v5, 0.0  ;;  %v802_v55 = vadd.f32 %v801_v35, %v800_v21 }
 0x1f2   : > { %v3058_v16 = vadd.f32 %v2435_v0, %v586_v11  ;;  %985 = vadd.xlane.f32.xlu1 %v984_v12  ;;  %813 = vadd.xlane.f32.xlu2 %v812_v13  ;;  %v1227_v0 = vrot.slane %v1226_v53, 4  ;;  %v1308_v11 = vmul.f32 0.0, %v3018_v40  ;;  %v1395_v12 = vmul.f32 %v2231_v1, %v3022_v42 }
 0x1f4   : > { %v590_v26 = vand.u32 2147483647, %v3058_v16  ;;  %v1228_v20 = vadd.f32 %v1227_v0, %v1226_v53  ;;  %v3082_v28 = vsel %vm4120_vm9, %v1308_v11, 0.0  ;;  %v1397_v40 = vsel %vm4120_vm9, %v1395_v12, 0.0 }
 0x1f5   : > { %v1398_v38 = vadd.f32 %v1397_v40, %v3082_v28  ;;  %v597_v52 = vmax.f32 %v3058_v16, 0.0  ;;  %v1328_v16 = vsel %vm4119_vm14, %v1326_v50, 0.0 }
 0x1f6   : > { %v591_v32 = vsub.f32 0.0, %v590_v26  ;;  %v1058_v26 = vadd.f32 %v1057_v10, %v1056_v62  ;;  %v1229_v34 = vrot.slane %v1228_v20, 2 }
 0x1f7   : > { %v1079_v60 = vpop.permute.xlu1 %1078  ;;  %v1399_v61 = vrot.slane %v1398_v38, 4 }
 0x1f8   : > { %v592_v41 = vmul.f32 1.442695, %v591_v32  ;;  %v821_v43 = vpop.permute.xlu0 %820  ;;  %v1081_v45 = vsel %vm4119_vm14, %v1079_v60, 0.0  ;;  %v3091_v54 = vadd.f32 %v1229_v34, %v1228_v20 }
 0x1f9   : > { %v588_v47 = vpop.f32.mrf.mxu2  ;;  %v823_v49 = vsel %vm4119_vm14, %v821_v43, 0.0  ;;  %v1059_v43 = vrot.slane %v1058_v26, 1 }
 0x1fa   : > { %2441 = vpow2.f32 %v592_v41  ;;  %899 = vadd.xlane.f32.xlu2 %v898_v48  ;;  %824 = vadd.xlane.f32.xlu0 %v823_v49  ;;  %v1070_v41 = vsel %vm4119_vm14, %v3063_v31, 0.0  ;;  %v624_v47 = vadd.f32 %v623_v29, %v622_v2  ;;  %v716_v48 = vadd.f32 %v715_v30, %v714_v9 }
 0x1fb   : > { %v974_v49 = vadd.f32 %v973_v15, %v972_v17  ;;  %v888_v31 = vadd.f32 %v887_v36, %v886_v22  ;;  %v1060_v60 = vadd.f32 %v1059_v43, %v1058_v26  ;;  %v1231_v2 = vrot.slane %v3091_v54, 1 }
 0x1ff   : > { %v1251_v32 = vpop.permute.xlu1 %1250 }
 0x200   : > { %v2442_v5 = vpop.eup %2441  ;;  %v1154_v19 = vpop.permute.xlu0 %1153  ;;  %v1253_v53 = vsel %vm4119_vm14, %v1251_v32, 0.0 }
 0x201   : > { %v594_v13 = vadd.f32 1.0, %v2442_v5  ;;  %v1156_v58 = vsel %vm4119_vm14, %v1154_v19, 0.0  ;;  %v1400_v5 = vadd.f32 %v1399_v61, %v1398_v38 }
 0x202   : > { %910 = vadd.xlane.f32.xlu2 %v909_v14  ;;  %996 = vadd.xlane.f32.xlu0 %v995_v63 }
 0x203   : > { %2443 = vlog2.f32 %v594_v13  ;;  %1157 = vadd.xlane.f32.xlu1 %v1156_v58 }
 0x207   : > { %v1337_v19 = vpop.permute.xlu1 %1336 }
 0x208   : > { %v1165_v39 = vpop.permute.xlu0 %1164 }
 0x209   : > { %v2444_v44 = vpop.eup %2443  ;;  %v1167_v13 = vsel %vm4119_vm14, %v1165_v39, 0.0 }
 0x20a   : > { %v596_v51 = vmul.f32 0.6931472, %v2444_v44  ;;  %1071 = vadd.xlane.f32.xlu2 %v1070_v41  ;;  %1082 = vadd.xlane.f32.xlu0 %v1081_v45 }
 0x20b   : > { %1254 = vadd.xlane.f32.xlu1 %v1253_v53 }
 0x20c   : > { %v3093_v62 = vadd.f32 %v597_v52, %v596_v51  ;;  %v1423_v51 = vpop.permute.xlu2 %1422 }
 0x20e   : > { %v649_v63 = vmul.f32 %v624_v47, %v3093_v62  ;;  %v740_v0 = vmul.f32 %v716_v48, %v3093_v62  ;;  %v998_v1 = vmul.f32 %v974_v49, %v3093_v62  ;;  %v826_v59 = vmul.f32 %v802_v55, %v3093_v62 }
 0x20f   : > { %v912_v3 = vmul.f32 %v888_v31, %v3093_v62  ;;  %v1170_v4 = vmul.f32 %v1146_v56, %v3093_v62  ;;  %v1084_v12 = vmul.f32 %v1060_v60, %v3093_v62  ;;  %v1401_v31 = vrot.slane %v1400_v5, 2 }
 0x210   : > { %v1412_v9 = vpop.permute.xlu0 %1411  ;;  %v650_v7 = vmax.f32 %v649_v63, -20.0  ;;  %v741_v10 = vmax.f32 %v740_v0, -20.0  ;;  %v999_v11 = vmax.f32 %v998_v1, -20.0  ;;  %v827_v58 = vmax.f32 %v826_v59, -20.0  ;;  %v3135_v63 = vpop.permute.xlu1 %1497 }
 0x211   : > { %v1414_v14 = vsel %vm4119_vm14, %v1412_v9, 0.0  ;;  %v913_v17 = vmax.f32 %v912_v3, -20.0  ;;  %v1171_v25 = vmax.f32 %v1170_v4, -20.0  ;;  %v1085_v35 = vmax.f32 %v1084_v12, -20.0 }
 0x212   : > { %1243 = vadd.xlane.f32.xlu2 %v1242_v46  ;;  %1168 = vadd.xlane.f32.xlu0 %v1167_v13  ;;  %v653_v20 = vsel %vm457_vm12, 0.0, %v650_v7  ;;  %v742_v21 = vsel %vm457_vm12, 0.0, %v741_v10  ;;  %v1000_v22 = vsel %vm457_vm12, 0.0, %v999_v11  ;;  %v828_v30 = vsel %vm457_vm12, 0.0, %v827_v58 }
 0x213   : > { %1415 = vadd.xlane.f32.xlu1 %v1414_v14  ;;  %v654_v26 = vrot.slane %v653_v20, 7  ;;  %v743_v40 = vrot.slane %v742_v21, 7  ;;  %v1001_v29 = vrot.slane %v1000_v22, 7  ;;  %v829_v15 = vrot.slane %v828_v30, 7 }
 0x214   : > { %v914_v32 = vsel %vm457_vm12, 0.0, %v913_v17  ;;  %v1172_v34 = vsel %vm457_vm12, 0.0, %v1171_v25  ;;  %v1086_v50 = vsel %vm457_vm12, 0.0, %v1085_v35  ;;  %v1339_v56 = vsel %vm4119_vm14, %v1337_v19, 0.0 }
 0x215   : > { %v655_v36 = vsel %vm480_vm11, %v654_v26, 0.0  ;;  %v744_v37 = vsel %vm480_vm11, %v743_v40, 0.0  ;;  %v1002_v38 = vsel %vm480_vm11, %v1001_v29, 0.0  ;;  %v915_v39 = vrot.slane %v914_v32, 7  ;;  %v3155_v29 = vpop.permute.xlu2 %1583 }
 0x216   : > { %v656_v41 = vadd.f32 %v655_v36, %v653_v20  ;;  %v745_v43 = vadd.f32 %v744_v37, %v742_v21  ;;  %v1003_v44 = vadd.f32 %v1002_v38, %v1000_v22  ;;  %v830_v45 = vsel %vm480_vm11, %v829_v15, 0.0 }
 0x217   : > { %v831_v47 = vadd.f32 %v830_v45, %v828_v30  ;;  %v916_v48 = vsel %vm480_vm11, %v915_v39, 0.0  ;;  %v1173_v49 = vrot.slane %v1172_v34, 7  ;;  %v1232_v7 = vadd.f32 %v1231_v2, %v3091_v54 }
 0x218   : > { %v657_v52 = vrot.slane %v656_v41, 6  ;;  %v746_v53 = vrot.slane %v745_v43, 6  ;;  %v1004_v55 = vrot.slane %v1003_v44, 6  ;;  %v917_v60 = vadd.f32 %v916_v48, %v914_v32  ;;  %v3163_v38 = vpop.permute.xlu1 %1669 }
 0x219   : > { %v832_v61 = vrot.slane %v831_v47, 6  ;;  %v1174_v46 = vsel %vm480_vm11, %v1173_v49, 0.0  ;;  %v1402_v10 = vadd.f32 %v1401_v31, %v1400_v5  ;;  %v1087_v17 = vrot.slane %v1086_v50, 7 }
 0x21a   : > { %1340 = vadd.xlane.f32.xlu2 %v1339_v56  ;;  %1329 = vadd.xlane.f32.xlu0 %v1328_v16  ;;  %v658_v0 = vsel %vm4121_vm10, %v657_v52, 0.0  ;;  %v747_v1 = vsel %vm4121_vm10, %v746_v53, 0.0  ;;  %v1005_v59 = vsel %vm4121_vm10, %v1004_v55, 0.0  ;;  %v1175_v3 = vadd.f32 %v1174_v46, %v1172_v34 }
 0x21b   : > { %v659_v4 = vadd.f32 %v658_v0, %v656_v41  ;;  %v748_v19 = vadd.f32 %v747_v1, %v745_v43  ;;  %v833_v9 = vsel %vm4121_vm10, %v832_v61, 0.0  ;;  %v918_v16 = vrot.slane %v917_v60, 6 }
 0x21c   : > { %v1006_v13 = vadd.f32 %v1005_v59, %v1003_v44  ;;  %v834_v14 = vadd.f32 %v833_v9, %v831_v47  ;;  %v1176_v58 = vrot.slane %v1175_v3, 6  ;;  %v1256_v54 = vmul.f32 %v1232_v7, %v3093_v62 }
 0x21d   : > { %v661_v11 = vrot.slane %v659_v4, 4  ;;  %v749_v12 = vrot.slane %v748_v19, 4  ;;  %v919_v22 = vsel %vm4121_vm10, %v918_v16, 0.0  ;;  %v1403_v25 = vrot.slane %v1402_v10, 1 }
 0x21e   : > { %v1425_v5 = vsel %vm4119_vm14, %v1423_v51, 0.0  ;;  %v1007_v40 = vrot.slane %v1006_v13, 4  ;;  %v920_v15 = vadd.f32 %v919_v22, %v917_v60  ;;  %v1088_v32 = vsel %vm480_vm11, %v1087_v17, 0.0 }
 0x21f   : > { %v664_v20 = vsel %vm660_vm13, %v661_v11, 0.0  ;;  %v750_v21 = vsel %vm660_vm13, %v749_v12, 0.0  ;;  %v835_v34 = vrot.slane %v834_v14, 4  ;;  %v1177_v35 = vsel %vm4121_vm10, %v1176_v58, 0.0 }
 0x220   : > { %v665_v2 = vadd.f32 %v664_v20, %v659_v4  ;;  %v751_v26 = vadd.f32 %v750_v21, %v748_v19  ;;  %v1257_v36 = vmax.f32 %v1256_v54, -20.0  ;;  %v2429_v37 = vunpack.i.h.bf16 %v3012_v33  ;;  %v1756_v19 = vpop.permute.xlu0 %1755  ;;  %v1928_v11 = vpop.permute.xlu1 %1927 }
 0x221   : > { %v1404_v39 = vadd.f32 %v1403_v25, %v1402_v10  ;;  %v1008_v43 = vsel %vm660_vm13, %v1007_v40, 0.0  ;;  %v1089_v44 = vadd.f32 %v1088_v32, %v1086_v50  ;;  %v921_v47 = vrot.slane %v920_v15, 4 }
 0x222   : > { %1426 = vadd.xlane.f32.xlu0 %v1425_v5  ;;  %v666_v30 = vmul.f32 1.442695, %v665_v2  ;;  %v752_v41 = vmul.f32 1.442695, %v751_v26  ;;  %v1258_v45 = vsel %vm457_vm12, 0.0, %v1257_v36  ;;  %v1178_v48 = vadd.f32 %v1177_v35, %v1175_v3  ;;  %v1842_v3 = vpop.permute.xlu2 %1841 }
 0x223   : > { %v2229_v49 = vsel %vm1303_vm15, 1.0, %v4116_v6  ;;  %v836_v51 = vsel %vm660_vm13, %v835_v34, 0.0  ;;  %v1428_v52 = vmul.f32 %v1404_v39, %v3093_v62  ;;  %v1009_v53 = vadd.f32 %v1008_v43, %v1006_v13 }
 0x224   : > { %2445 = vpow2.f32 %v666_v30  ;;  %v1090_v55 = vrot.slane %v1089_v44, 6  ;;  %v1309_v56 = vmul.f32 %v2229_v49, %v3022_v42  ;;  %v1936_v50 = vmul.f32 %v2429_v37, %v2947_v18 }
 0x225   : > { %2447 = vpow2.f32 %v752_v41  ;;  %v1429_v31 = vmax.f32 %v1428_v52, -20.0  ;;  %v837_v61 = vadd.f32 %v836_v51, %v834_v14  ;;  %v922_v60 = vsel %vm660_vm13, %v921_v47, 0.0 }
 0x226   : > { %v1179_v46 = vrot.slane %v1178_v48, 4  ;;  %v2428_v59 = vunpack.i.l.bf16 %v3012_v33  ;;  %v1010_v4 = vmul.f32 1.442695, %v1009_v53  ;;  %v923_v9 = vadd.f32 %v922_v60, %v920_v15 }
 0x227   : > { %v3179_v0 = vsel %vm457_vm12, 0.0, %v1429_v31  ;;  %v1091_v7 = vsel %vm4121_vm10, %v1090_v55, 0.0  ;;  %v1259_v16 = vrot.slane %v1258_v45, 7  ;;  %v1311_v10 = vsel %vm4120_vm9, %v1309_v56, 0.0 }
 0x228   : > { %v838_v12 = vmul.f32 1.442695, %v837_v61  ;;  %v1180_v13 = vsel %vm660_vm13, %v1179_v46, 0.0  ;;  %v1993_v33 = vsub.f32 0.0, %v2897_v24  ;;  %v2424_v58 = vunpack.i.h.bf16 %v3001_v27  ;;  %v1509_v36 = vpop.permute.xlu0 %1508  ;;  %v1681_v43 = vpop.permute.xlu1 %1680 }
 0x229   : > { %v1850_v20 = vmul.f32 %v2428_v59, %v2947_v18  ;;  %2449 = vpow2.f32 %v1010_v4  ;;  %v1092_v21 = vadd.f32 %v1091_v7, %v1089_v44  ;;  %v1312_v22 = vadd.f32 %v1311_v10, %v3082_v28 }
 0x22a   : > { %v3181_v1 = vpop.eup %2445  ;;  %v924_v54 = vmul.f32 1.442695, %v923_v9  ;;  %v1181_v2 = vadd.f32 %v1180_v13, %v1178_v48  ;;  %v1260_v25 = vsel %vm480_vm11, %v1259_v16, 0.0  ;;  %2451 = vpow2.f32 %v838_v12  ;;  %v1595_v35 = vpop.permute.xlu2 %1594 }
 0x22b   : > { %v3190_v14 = vpop.eup %2447  ;;  %v3195_v17 = vadd.f32 1e-12, %v3181_v1  ;;  %v1994_v27 = vmul.f32 1.442695, %v1993_v33  ;;  %v1764_v26 = vmul.f32 %v2424_v58, %v2947_v18  ;;  %v1093_v40 = vrot.slane %v1092_v21, 4 }
 0x22c   : > { %1938 = vrot.lane.b32.xlu1 %v1936_v50, %s2683_s19  ;;  %v3203_v5 = vadd.f32 1e-12, %v3190_v14  ;;  %v1261_v30 = vadd.f32 %v1260_v25, %v1258_v45  ;;  %v1313_v15 = vrot.slane %v1312_v22, 4  ;;  %v1182_v32 = vmul.f32 1.442695, %v1181_v2 }
 0x22d   : > { %2453 = vrcp.f32 %v3195_v17  ;;  %v3213_v37 = vmul.f32 %v3093_v62, %v2938_v8  ;;  %v3217_v18 = vsel %vm4119_vm14, %v3155_v29, 0.0  ;;  %v3220_v39 = vsel %vm4119_vm14, %v1842_v3, 0.0 }
 0x22e   : > { %2455 = vpow2.f32 %v924_v54  ;;  %v1094_v44 = vsel %vm660_vm13, %v1093_v40, 0.0  ;;  %v1262_v45 = vrot.slane %v1261_v30, 6  ;;  %v1314_v47 = vadd.f32 %v1313_v15, %v1312_v22 }
 0x22f   : > { %v3207_v34 = vpop.eup %2449  ;;  %2457 = vrcp.f32 %v3203_v5  ;;  %v3231_v49 = vsel %vm4119_vm14, %v3135_v63, 0.0  ;;  %v3237_v51 = vsel %vm4119_vm14, %v1595_v35, 0.0  ;;  %v3241_v52 = vsel %vm4119_vm14, %v3163_v38, 0.0 }
 0x230   : > { %2459 = vpow2.f32 %v1994_v27  ;;  %v3222_v41 = vpop.eup %2451  ;;  %v3234_v29 = vadd.f32 1e-12, %v3207_v34  ;;  %v3244_v53 = vsel %vm4119_vm14, %v1928_v11, 0.0  ;;  %v3247_v55 = vsel %vm4119_vm14, %v1756_v19, 0.0 }
 0x231   : > { %2461 = vpow2.f32 %v1182_v32  ;;  %v3250_v63 = vsel %vm4119_vm14, %v1509_v36, 0.0  ;;  %v3255_v56 = vadd.f32 1e-12, %v3222_v41  ;;  %v3258_v50 = vsel %vm4119_vm14, %v1681_v43, 0.0 }
 0x232   : > { %1852 = vrot.lane.b32.xlu2 %v1850_v20, %s2683_s19  ;;  %v1095_v61 = vadd.f32 %v1094_v44, %v1092_v21  ;;  %v2237_v38 = vsel %vm1647_vm1, 1.0, %v4116_v6  ;;  %v1263_v59 = vsel %vm4121_vm10, %v1262_v45, 0.0  ;;  %v1431_v3 = vrot.slane %v3179_v0, 7 }
 0x233   : > { %v3227_v48 = vpop.eup %2453  ;;  %v1315_v4 = vrot.slane %v1314_v47, 2  ;;  %v679_v9 = vand.u32 2147483647, %v3195_v17  ;;  %v681_v7 = vand.u32 2147483648, %v3195_v17  ;;  %v767_v16 = vand.u32 2147483648, %v3203_v5 }
 0x234   : > { %v3252_v31 = vpop.eup %2455  ;;  %v671_v46 = vmul.f32 %v3227_v48, %v3195_v17  ;;  %2463 = vrcp.f32 %v3234_v29  ;;  %v765_v10 = vand.u32 2147483647, %v3203_v5  ;;  %v1025_v11 = vand.u32 2147483648, %v3234_v29 }
 0x235   : > { %v3261_v60 = vpop.eup %2457  ;;  %v3277_v12 = vadd.f32 1e-12, %v3252_v31  ;;  %v1653_v13 = vmul.f32 %v2237_v38, %v3022_v42  ;;  %2465 = vrcp.f32 %v3255_v56  ;;  %v1096_v20 = vmul.f32 1.442695, %v1095_v61 }
 0x236   : > { %1766 = vrot.lane.b32.xlu0 %v1764_v26, %s2683_s19  ;;  %v3268_v19 = vpop.eup %2459  ;;  %v757_v58 = vmul.f32 %v3261_v60, %v3203_v5  ;;  %v1264_v21 = vadd.f32 %v1263_v59, %v1261_v30  ;;  %v672_v22 = vsub.f32 1.0, %v671_v46  ;;  %v853_v54 = vand.u32 2147483648, %v3255_v56 }
 0x237   : > { %v3280_v33 = vpop.eup %2461  ;;  %v1432_v2 = vsel %vm480_vm11, %v1431_v3, 0.0  ;;  %v1316_v25 = vadd.f32 %v1315_v4, %v1314_v47  ;;  %v3288_v27 = vor.u32 1.1754944e-38, %v681_v7  ;;  %v3290_v26 = vor.u32 1.1754944e-38, %v767_v16 }
 0x238   : > { %v3294_v32 = vor.u32 1.1754944e-38, %v1025_v11  ;;  %2467 = vrcp.f32 %v3277_v12  ;;  %v3298_v30 = vadd.f32 1e-12, %v3280_v33  ;;  %v1433_v35 = vadd.f32 %v1432_v2, %v3179_v0 }
 0x239   : > { %vm676_vm2 = vweird.f32 %v3227_v48  ;;  %v758_v43 = vsub.f32 1.0, %v757_v58  ;;  %2469 = vpow2.f32 %v1096_v20  ;;  %v1265_v44 = vrot.slane %v1264_v21, 4 }
 0x23a   : > { %v3301_v36 = vpop.eup %2463  ;;  %v1317_v45 = vrot.slane %v1316_v25, 1  ;;  %v673_v47 = vmul.f32 %v3227_v48, %v672_v22  ;;  %v3305_v61 = vor.u32 1.1754944e-38, %v853_v54  ;;  %v1434_v38 = vrot.slane %v1433_v35, 6 }
 0x23b   : > { %v1655_v46 = vsel %vm4120_vm9, %v1653_v13, 0.0  ;;  %v3308_v59 = vpop.eup %2465  ;;  %vm675_vm3 = vweird.f32 %v3195_v17  ;;  %vm762_vm4 = vweird.f32 %v3261_v60  ;;  %v939_v3 = vand.u32 2147483648, %v3277_v12 }
 0x23c   : > { %v1015_v4 = vmul.f32 %v3301_v36, %v3234_v29  ;;  %2471 = vrcp.f32 %v3298_v30  ;;  %v1435_v7 = vsel %vm4121_vm10, %v1434_v38, 0.0  ;;  %v1318_v16 = vadd.f32 %v1317_v45, %v1316_v25  ;;  %vm3366_vm1 = vmor %vm675_vm3, %vm676_vm2 }
 0x23d   : > { %v759_v11 = vmul.f32 %v3261_v60, %v758_v43  ;;  %vm761_vm6 = vweird.f32 %v3203_v5  ;;  %v1266_v13 = vsel %vm660_vm13, %v1265_v44, 0.0  ;;  %v1436_v58 = vadd.f32 %v1435_v7, %v1433_v35 }
 0x23e   : > { %v1656_v20 = vadd.f32 %v1655_v46, %v3082_v28  ;;  %v3325_v22 = vpop.eup %2467  ;;  %v674_v54 = vadd.f32 %v3227_v48, %v673_v47  ;;  %v843_v2 = vmul.f32 %v3308_v59, %v3255_v56  ;;  %v1342_v38 = vmul.f32 %v1318_v16, %v3093_v62  ;;  %vm3382_vm2 = vmor %vm761_vm6, %vm762_vm4 }
 0x23f   : > { %v2235_v25 = vsel %vm1561_vm5, 1.0, %v4116_v6  ;;  %v3332_v43 = vpop.eup %2469  ;;  %v1437_v45 = vrot.slane %v1436_v58, 4  ;;  %vm3336_vm8 = vcmp.eq.f32.partialorder %v679_v9, 8.507059e+37  ;;  %v1016_v47 = vsub.f32 1.0, %v1015_v4 }
 0x240   : > { %v1657_v0 = vrot.slane %v1656_v20, 4  ;;  %v1567_v44 = vmul.f32 %v2235_v25, %v3022_v42  ;;  %v1267_v46 = vadd.f32 %v1266_v13, %v1264_v21  ;;  %v1343_v7 = vmax.f32 %v1342_v38, -20.0 }
 0x241   : > { %v2243_v15 = vsel %vm1905_vm7, 1.0, %v4116_v6  ;;  %vm3341_vm15 = vcmp.eq.f32.partialorder %v765_v10, 8.507059e+37  ;;  %v929_v40 = vmul.f32 %v3325_v22, %v3277_v12  ;;  %v760_v4 = vadd.f32 %v3261_v60, %v759_v11 }
 0x242   : > { %v1658_v8 = vadd.f32 %v1657_v0, %v1656_v20  ;;  %v1569_v25 = vsel %vm4120_vm9, %v1567_v44, 0.0  ;;  %v1911_v9 = vmul.f32 %v2243_v15, %v3022_v42  ;;  %v3349_v24 = vpop.eup %2471  ;;  %v3352_v21 = vor.u32 1.1754944e-38, %v939_v3 }
 0x243   : > { %v3355_v13 = vadd.f32 1e-12, %v3332_v43  ;;  %v1344_v10 = vsel %vm457_vm12, 0.0, %v1343_v7  ;;  %v1438_v38 = vsel %vm660_vm13, %v1437_v45, 0.0  ;;  %v1570_v44 = vadd.f32 %v1569_v25, %v3082_v28 }
 0x244   : > { %v1345_v0 = vrot.slane %v1344_v10, 7  ;;  %v1659_v20 = vrot.slane %v1658_v8, 2  ;;  %vm1020_vm5 = vweird.f32 %v3301_v36  ;;  %v844_v3 = vsub.f32 1.0, %v843_v2 }
 0x245   : > { %v1195_v11 = vand.u32 2147483647, %v3298_v30  ;;  %v1268_v7 = vmul.f32 1.442695, %v1267_v46  ;;  %v678_v45 = vsel %vm3366_vm1, %v3227_v48, %v674_v54  ;;  %v1017_v25 = vmul.f32 %v3301_v36, %v1016_v47 }
 0x246   : > { %vm1019_vm7 = vweird.f32 %v3234_v29  ;;  %v930_v6 = vsub.f32 1.0, %v929_v40  ;;  %v1913_v17 = vsel %vm4120_vm9, %v1911_v9, 0.0  ;;  %vm848_vm3 = vweird.f32 %v3308_v59 }
 0x247   : > { %v1187_v48 = vmul.f32 %v3349_v24, %v3298_v30  ;;  %v1439_v54 = vadd.f32 %v1438_v38, %v1436_v58  ;;  %v1346_v47 = vsel %vm480_vm11, %v1345_v0, 0.0  ;;  %v1660_v40 = vadd.f32 %v1659_v20, %v1658_v8  ;;  %vm3447_vm9 = vmor %vm1019_vm7, %vm1020_vm5 }
 0x248   : > { %v764_v46 = vsel %vm3382_vm2, %v3261_v60, %v760_v4  ;;  %vm934_vm1 = vweird.f32 %v3325_v22  ;;  %2473 = vrcp.f32 %v3355_v13  ;;  %v1347_v5 = vadd.f32 %v1346_v47, %v1344_v10 }
 0x249   : > { %v1571_v9 = vrot.slane %v1570_v44, 4  ;;  %vm847_vm4 = vweird.f32 %v3255_v56  ;;  %v1197_v15 = vand.u32 2147483648, %v3298_v30  ;;  %2475 = vpow2.f32 %v1268_v7 }
 0x24a   : > { %v1661_v58 = vrot.slane %v1660_v40, 1  ;;  %v1914_v38 = vadd.f32 %v1913_v17, %v3082_v28  ;;  %v683_v8 = vsel %vm3336_vm8, %v3288_v27, %v678_v45  ;;  %v845_v60 = vmul.f32 %v3308_v59, %v844_v3 }
 0x24b   : > { %vm933_vm6 = vweird.f32 %v3277_v12  ;;  %v1348_v4 = vrot.slane %v1347_v5, 6  ;;  %v1572_v0 = vadd.f32 %v1571_v9, %v1570_v44  ;;  %v3407_v10 = vsel %vm3341_vm15, %v3290_v26, %v764_v46 }
 0x24c   : > { %v1188_v20 = vsub.f32 1.0, %v1187_v48  ;;  %v1440_v7 = vmul.f32 1.442695, %v1439_v54  ;;  %v1662_v2 = vadd.f32 %v1661_v58, %v1660_v40  ;;  %v1018_v17 = vadd.f32 %v3301_v36, %v1017_v25 }
 0x24d   : > { %v4143_v35 = vand.u32 2147483647, %v3234_v29  ;;  %v931_v3 = vmul.f32 %v3325_v22, %v930_v6  ;;  %v1349_v44 = vsel %vm4121_vm10, %v1348_v4, 0.0  ;;  %v1573_v16 = vrot.slane %v1572_v0, 2 }
 0x24e   : > { %v4146_v45 = vand.u32 2147483647, %v3255_v56  ;;  %vm1191_vm2 = vweird.f32 %v3298_v30  ;;  %v1350_v48 = vadd.f32 %v1349_v44, %v1347_v5  ;;  %v1915_v54 = vrot.slane %v1914_v38, 4  ;;  %v3429_v6 = vpop.eup %2473 }
 0x24f   : > { %vm3412_vm8 = vcmp.eq.f32.partialorder %v4143_v35, 8.507059e+37  ;;  %v846_v40 = vadd.f32 %v3308_v59, %v845_v60  ;;  %v4149_v46 = vand.u32 2147483647, %v3277_v12  ;;  %v3438_v9 = vor.u32 1.1754944e-38, %v1197_v15 }
 0x250   : > { %vm3423_vm15 = vcmp.eq.f32.partialorder %v4146_v45, 8.507059e+37  ;;  %v1686_v58 = vmul.f32 %v1662_v2, %v3093_v62  ;;  %v1574_v4 = vadd.f32 %v1573_v16, %v1572_v0  ;;  %v1189_v35 = vmul.f32 %v3349_v24, %v1188_v20 }
 0x251   : > { %vm3434_vm14 = vcmp.eq.f32.partialorder %v4149_v46, 8.507059e+37  ;;  %2477 = vpow2.f32 %v1440_v7  ;;  %v1351_v44 = vrot.slane %v1350_v48, 4  ;;  %v1022_v15 = vsel %vm3447_vm9, %v3301_v36, %v1018_v17  ;;  %vm3467_vm9 = vmor %vm847_vm4, %vm848_vm3  ;;  %v3482_v45 = vpop.xlane.xlu2 %647 }
 0x252   : > { %v932_v0 = vadd.f32 %v3325_v22, %v931_v3  ;;  %vm1192_vm10 = vweird.f32 %v3349_v24  ;;  %v1916_v20 = vadd.f32 %v1915_v54, %v1914_v38  ;;  %vm3473_vm5 = vcmp.eq.f32.partialorder %v1195_v11, 8.507059e+37 }
 0x253   : > { %v1352_v16 = vsel %vm660_vm13, %v1351_v44, 0.0  ;;  %v1101_v17 = vmul.f32 %v3429_v6, %v3355_v13  ;;  %v1575_v3 = vrot.slane %v1574_v4, 1  ;;  %v850_v11 = vsel %vm3467_vm9, %v3308_v59, %v846_v40  ;;  %vm3522_vm7 = vmor %vm1191_vm2, %vm1192_vm10 }
 0x254   : > { %vm4163_vm10 = vcmp.ge.s32.totalorder %v2892_v23, 2  ;;  %vm4164_vm3 = vcmask 523264  }
 0x255   : > { %v637_v47 = vpop.xlane.xlu1 %636  ;;  %v1576_v40 = vadd.f32 %v1575_v3, %v1574_v4 }
 0x256   : > { %v668_v26 = vmul.f32 %v637_v47, %v3213_v37  ;;  %1673 = vadd.xlane.f32.xlu1 %v3241_v52  ;;  %v3441_v47 = vpop.eup %2475 }
 0x257   : > { %v3480_v38 = vadd.f32 1e-12, %v3441_v47 }
 0x258   : > { %v684_v5 = vmul.f32 %v683_v8, %v668_v26  ;;  %v4154_v8 = vmov 0.0   ;;  %v1687_v26 = vmax.f32 %v1686_v58, -20.0 }
 0x259   : > { %v2233_v29 = vsel %vm1475_vm0, 1.0, %v4154_v8  ;;  %vm3493_vm0 = vmor %vm933_vm6, %vm934_vm1  ;;  %2479 = vrcp.f32 %v3480_v38  ;;  %vm1106_vm1 = vweird.f32 %v3429_v6  ;;  %vm1277_vm9 = vweird.f32 %v3480_v38 }
 0x25a   : > { %v685_v2 = vrot.slane %v684_v5, 7  ;;  %v3500_v46 = vsel %vm457_vm12, 0.0, %v1687_v26  ;;  %v936_v59 = vsel %vm3493_vm0, %v3325_v22, %v932_v0  ;;  %v1481_v12 = vmul.f32 %v2233_v29, %v3022_v42  ;;  %vm4167_vm6 = vmmov %vm4163_vm10 }
 0x25b   : > { %1587 = vadd.xlane.f32.xlu2 %v3217_v18  ;;  %v1353_v18 = vadd.f32 %v1352_v16, %v1350_v48  ;;  %v1190_v48 = vadd.f32 %v3349_v24, %v1189_v35  ;;  %v1917_v26 = vrot.slane %v1916_v20, 2  ;;  %v855_v22 = vsel %vm3423_vm15, %v3305_v61, %v850_v11  ;;  %vm4170_vm15 = vmmov %vm4167_vm6 }
 0x25c   : > { %v686_v56 = vsel %vm480_vm11, %v685_v2, 0.0  ;;  %v3508_v2 = vpop.eup %2477  ;;  %v3532_v27 = vsel %vm3434_vm14, %v3352_v21, %v936_v59  ;;  %v1111_v61 = vand.u32 2147483648, %v3355_v13  ;;  %vm1105_vm14 = vweird.f32 %v3355_v13  ;;  %vm4171_vm2 = vmmov %vm4167_vm6 }
 0x25d   : > { %v687_v58 = vadd.f32 %v686_v56, %v684_v5  ;;  %v3502_v60 = vpop.xlane.xlu1 %738  ;;  %v728_v44 = vpop.xlane.xlu0 %727  ;;  %v1027_v5 = vsel %vm3412_vm8, %v3294_v32, %v1022_v15  ;;  %v1354_v16 = vmul.f32 1.442695, %v1353_v18  ;;  %v1194_v30 = vsel %vm3522_vm7, %v3349_v24, %v1190_v48  ;;  %vm3589_vm8 = vmor %vm1105_vm14, %vm1106_vm1 }
 0x25e   : > { %1931 = vadd.xlane.f32.xlu1 %v3244_v53  ;;  %v754_v35 = vmul.f32 %v728_v44, %v3213_v37  ;;  %v1102_v53 = vsub.f32 1.0, %v1101_v17  ;;  %v3541_v4 = vadd.f32 1e-12, %v3508_v2  ;;  %v1918_v21 = vadd.f32 %v1917_v26, %v1916_v20 }
 0x25f   : > { %v688_v36 = vrot.slane %v687_v58, 6  ;;  %2481 = vpow2.f32 %v1354_v16  ;;  %v1109_v0 = vand.u32 2147483647, %v3355_v13  ;;  %v3554_v3 = vsel %vm3473_vm5, %v3438_v9, %v1194_v30  ;;  %v3556_v20 = vpop.eup %2479 }
 0x260   : > { %v770_v32 = vmul.f32 %v3407_v10, %v754_v35  ;;  %1501 = vadd.xlane.f32.xlu0 %v3231_v49  ;;  %v1600_v10 = vmul.f32 %v1576_v40, %v3093_v62  ;;  %v1483_v49 = vsel %vm4164_vm3, %v1481_v12, 0.0  ;;  %v1103_v24 = vmul.f32 %v3429_v6, %v1102_v53  ;;  %vm4175_vm3 = vmmov %vm4171_vm2 }
 0x261   : > { %v689_v25 = vsel %vm4163_vm10, %v688_v36, 0.0  ;;  %v1112_v56 = vor.u32 1.1754944e-38, %v1111_v61  ;;  %2483 = vrcp.f32 %v3541_v4  ;;  %v1919_v59 = vrot.slane %v1918_v21, 1  ;;  %vm4174_vm10 = vmmov %vm4171_vm2 }
 0x262   : > { %v690_v15 = vadd.f32 %v689_v25, %v687_v58  ;;  %v771_v52 = vrot.slane %v770_v32, 7  ;;  %v1601_v29 = vmax.f32 %v1600_v10, -20.0  ;;  %v1484_v58 = vadd.f32 %v1483_v49, %v3082_v28 }
 0x263   : > { %1845 = vadd.xlane.f32.xlu2 %v3220_v39  ;;  %v1104_v35 = vadd.f32 %v3429_v6, %v1103_v24  ;;  %vm3571_vm4 = vcmp.eq.f32.partialorder %v1109_v0, 8.507059e+37  ;;  %v1281_v53 = vand.u32 2147483647, %v3480_v38  ;;  %v1689_v61 = vrot.slane %v3500_v46, 7 }
 0x264   : > { %v691_v17 = vrot.slane %v690_v15, 4  ;;  %v772_v18 = vsel %vm480_vm11, %v771_v52, 0.0  ;;  %v3561_v48 = vsel %vm457_vm12, 0.0, %v1601_v29  ;;  %v1485_v25 = vrot.slane %v1484_v58, 4 }
 0x265   : > { %v773_v39 = vadd.f32 %v772_v18, %v770_v32  ;;  %v986_v11 = vpop.xlane.xlu1 %985  ;;  %v814_v54 = vpop.xlane.xlu2 %813  ;;  %v1108_v52 = vsel %vm3589_vm8, %v3429_v6, %v1104_v35  ;;  %v1283_v24 = vand.u32 2147483648, %v3480_v38  ;;  %v1690_v6 = vsel %vm480_vm11, %v1689_v61, 0.0 }
 0x266   : > { %v692_v44 = vsel %vm660_vm13, %v691_v17, 0.0  ;;  %v1012_v9 = vmul.f32 %v986_v11, %v3213_v37  ;;  %v840_v7 = vmul.f32 %v814_v54, %v3213_v37  ;;  %1684 = vadd.xlane.f32.xlu1 %v3258_v50  ;;  %v3575_v26 = vpop.eup %2481  ;;  %v1273_v50 = vmul.f32 %v3556_v20, %v3480_v38 }
 0x267   : > { %v693_v40 = vadd.f32 %v692_v44, %v690_v15  ;;  %v774_v12 = vrot.slane %v773_v39, 6  ;;  %v3602_v0 = vadd.f32 1e-12, %v3575_v26  ;;  %v1486_v11 = vadd.f32 %v1485_v25, %v1484_v58 }
 0x268   : > { %v1028_v36 = vmul.f32 %v1027_v5, %v1012_v9  ;;  %v856_v42 = vmul.f32 %v855_v22, %v840_v7  ;;  %1759 = vadd.xlane.f32.xlu0 %v3247_v55  ;;  %v1920_v5 = vadd.f32 %v1919_v59, %v1918_v21  ;;  %v3593_v22 = vpop.eup %2483  ;;  %v1274_v17 = vsub.f32 1.0, %v1273_v50 }
 0x269   : > { %v775_v32 = vsel %vm4167_vm6, %v774_v12, 0.0  ;;  %v694_v30 = vmul.f32 %v3181_v1, %v693_v40  ;;  %v1445_v9 = vmul.f32 %v3593_v22, %v3541_v4  ;;  %2485 = vrcp.f32 %v3602_v0 }
 0x26a   : > { %v776_v10 = vadd.f32 %v775_v32, %v773_v39  ;;  %v1029_v49 = vrot.slane %v1028_v36, 7  ;;  %v857_v15 = vrot.slane %v856_v42, 7  ;;  %v1944_v7 = vmul.f32 %v1920_v5, %v3093_v62 }
 0x26b   : > { %1598 = vadd.xlane.f32.xlu2 %v3237_v51  ;;  %v695_v1 = vmul.f32 %v694_v30, %v3482_v45  ;;  %v3623_v58 = vsel %vm3571_vm4, %v1112_v56, %v1108_v52  ;;  %v1487_v61 = vrot.slane %v1486_v11, 2  ;;  %v1446_v56 = vsub.f32 1.0, %v1445_v9 }
 0x26c   : > { %v777_v13 = vrot.slane %v776_v10, 4  ;;  %v1030_v29 = vsel %vm480_vm11, %v1029_v49, 0.0  ;;  %v858_v21 = vsel %vm480_vm11, %v857_v15, 0.0  ;;  %vm1278_vm5 = vweird.f32 %v3556_v20 }
 0x26d   : > { %v1031_v51 = vadd.f32 %v1030_v29, %v1028_v36  ;;  %v859_v18 = vadd.f32 %v858_v21, %v856_v42  ;;  %v900_v45 = vpop.xlane.xlu2 %899  ;;  %v3608_v39 = vpop.xlane.xlu0 %824  ;;  %v3625_v36 = vor.u32 1.1754944e-38, %v1283_v24  ;;  %v1691_v42 = vadd.f32 %v1690_v6, %v3500_v46  ;;  %vm3680_vm1 = vmor %vm1277_vm9, %vm1278_vm5 }
 0x26e   : > { %v778_v54 = vsel %vm660_vm13, %v777_v13, 0.0  ;;  %v926_v44 = vmul.f32 %v900_v45, %v3213_v37  ;;  %vm1449_vm0 = vweird.f32 %v3541_v4  ;;  %v1488_v45 = vadd.f32 %v1487_v61, %v1486_v11  ;;  %vm4183_vm5 = vmmov %vm4175_vm3 }
 0x26f   : > { %v779_v59 = vadd.f32 %v778_v54, %v776_v10  ;;  %v1032_v40 = vrot.slane %v1031_v51, 6  ;;  %v860_v12 = vrot.slane %v859_v18, 6  ;;  %v1275_v10 = vmul.f32 %v3556_v20, %v1274_v17  ;;  %v3639_v5 = vpop.eup %2485 }
 0x270   : > { %v942_v35 = vmul.f32 %v3532_v27, %v926_v44  ;;  %1512 = vadd.xlane.f32.xlu0 %v3250_v63  ;;  %v1692_v55 = vrot.slane %v1691_v42, 6  ;;  %vm3657_vm7 = vcmp.eq.f32.partialorder %v1281_v53, 8.507059e+37  ;;  %v1603_v11 = vrot.slane %v3561_v48, 7 }
 0x271   : > { %v780_v50 = vmul.f32 %v3190_v14, %v779_v59  ;;  %v861_v32 = vsel %vm4170_vm15, %v860_v12, 0.0  ;;  %v1033_v30 = vsel %vm4171_vm2, %v1032_v40, 0.0  ;;  %v1945_v14 = vmax.f32 %v1944_v7, -20.0  ;;  %vm4182_vm15 = vmmov %vm4171_vm2 }
 0x272   : > { %v943_v27 = vrot.slane %v942_v35, 7  ;;  %v862_v25 = vadd.f32 %v861_v32, %v859_v18  ;;  %v1034_v63 = vadd.f32 %v1033_v30, %v1031_v51  ;;  %v1276_v59 = vadd.f32 %v3556_v20, %v1275_v10 }
 0x273   : > { %v781_v16 = vmul.f32 %v780_v50, %v3502_v60  ;;  %v1453_v60 = vand.u32 2147483647, %v3541_v4  ;;  %v3647_v21 = vsel %vm457_vm12, 0.0, %v1945_v14  ;;  %v1359_v40 = vmul.f32 %v3639_v5, %v3602_v0 }
 0x274   : > { %v944_v46 = vsel %vm480_vm11, %v943_v27, 0.0  ;;  %v863_v49 = vrot.slane %v862_v25, 4  ;;  %v1035_v15 = vrot.slane %v1034_v63, 4  ;;  %v1693_v12 = vsel %vm4174_vm10, %v1692_v55, 0.0  ;;  %vm4188_vm10 = vmmov %vm4175_vm3 }
 0x275   : > { %v945_v52 = vadd.f32 %v944_v46, %v942_v35  ;;  %v782_v24 = vadd.f32 %v781_v16, %v695_v1  ;;  %v3641_v13 = vpop.xlane.xlu2 %910  ;;  %v997_v29 = vpop.xlane.xlu0 %996  ;;  %v1447_v1 = vmul.f32 %v3593_v22, %v1446_v56  ;;  %vm1450_vm14 = vweird.f32 %v3593_v22 }
 0x276   : > { %v864_v17 = vsel %vm660_vm13, %v863_v49, 0.0  ;;  %v1158_v51 = vpop.xlane.xlu1 %1157  ;;  %v1036_v18 = vsel %vm660_vm13, %v1035_v15, 0.0  ;;  %v1455_v27 = vand.u32 2147483648, %v3541_v4  ;;  %v1280_v16 = vsel %vm3680_vm1, %v3556_v20, %v1276_v59  ;;  %vm3708_vm6 = vmor %vm1449_vm0, %vm1450_vm14 }
 0x277   : > { %v946_v6 = vrot.slane %v945_v52, 6  ;;  %v865_v54 = vadd.f32 %v864_v17, %v862_v25  ;;  %v1184_v44 = vmul.f32 %v1158_v51, %v3213_v37  ;;  %v1037_v9 = vadd.f32 %v1036_v18, %v1034_v63  ;;  %vm4190_vm14 = vmmov %vm4183_vm5 }
 0x278   : > { %v1448_v61 = vadd.f32 %v3593_v22, %v1447_v1  ;;  %vm3687_vm4 = vcmp.eq.f32.partialorder %v1453_v60, 8.507059e+37  ;;  %v1360_v15 = vsub.f32 1.0, %v1359_v40  ;;  %v1604_v55 = vsel %vm480_vm11, %v1603_v11, 0.0  ;;  %vm4191_vm1 = vmmov %vm4183_vm5 }
 0x279   : > { %v866_v35 = vmul.f32 %v3222_v41, %v865_v54  ;;  %v947_v50 = vsel %vm4175_vm3, %v946_v6, 0.0  ;;  %v1200_v53 = vmul.f32 %v3554_v3, %v1184_v44  ;;  %v1038_v32 = vmul.f32 %v3207_v34, %v1037_v9 }
 0x27a   : > { %v948_v30 = vadd.f32 %v947_v50, %v945_v52  ;;  %v1489_v34 = vrot.slane %v1488_v45, 1  ;;  %v1452_v51 = vsel %vm3708_vm6, %v3593_v22, %v1448_v61  ;;  %v1947_v18 = vrot.slane %v3647_v21, 7  ;;  %vm4192_vm6 = vmmov %vm4191_vm1 }
 0x27b   : > { %v867_v25 = vmul.f32 %v866_v35, %v3608_v39  ;;  %v1201_v63 = vrot.slane %v1200_v53, 7  ;;  %v1039_v56 = vmul.f32 %v1038_v32, %v997_v29  ;;  %v3691_v39 = vadd.f32 %v1693_v12, %v1691_v42 }
 0x27c   : > { %v949_v3 = vrot.slane %v948_v30, 4  ;;  %v1490_v1 = vadd.f32 %v1489_v34, %v1488_v45  ;;  %v1285_v4 = vsel %vm3657_vm7, %v3625_v36, %v1280_v16  ;;  %v3721_v44 = vadd.f32 %v1604_v55, %v3561_v48 }
 0x27d   : > { %v868_v14 = vadd.f32 %v867_v25, %v782_v24  ;;  %v1202_v38 = vsel %vm480_vm11, %v1201_v63, 0.0  ;;  %v1072_v46 = vpop.xlane.xlu2 %1071  ;;  %v3695_v49 = vpop.xlane.xlu0 %1082  ;;  %v1456_v24 = vor.u32 1.1754944e-38, %v1455_v27  ;;  %v1361_v59 = vmul.f32 %v3639_v5, %v1360_v15 }
 0x27e   : > { %v950_v20 = vsel %vm660_vm13, %v949_v3, 0.0  ;;  %v1203_v52 = vadd.f32 %v1202_v38, %v1200_v53  ;;  %v1098_v29 = vmul.f32 %v1072_v46, %v3213_v37  ;;  %v3702_v60 = vpop.xlane.xlu1 %1254  ;;  %v1695_v40 = vrot.slane %v3691_v39, 4 }
 0x27f   : > { %v951_v17 = vadd.f32 %v950_v20, %v948_v30  ;;  %vm1819_vm8 = vcmp.eq.s32.totalorder %v3071_v57, 14  ;;  %v1457_v45 = vsel %vm3687_vm4, %v1456_v24, %v1452_v51  ;;  %v1514_v36 = vmul.f32 %v1490_v1, %v3093_v62 }
 0x280   : > { %v1204_v6 = vrot.slane %v1203_v52, 6  ;;  %v1114_v54 = vmul.f32 %v3623_v58, %v1098_v29  ;;  %v1948_v12 = vsel %vm480_vm11, %v1947_v18, 0.0  ;;  %vm1364_vm2 = vweird.f32 %v3639_v5 }
 0x281   : > { %v952_v9 = vmul.f32 %v3252_v31, %v951_v17  ;;  %v1367_v31 = vand.u32 2147483647, %v3602_v0  ;;  %v1606_v35 = vrot.slane %v3721_v44, 6  ;;  %v1515_v50 = vmax.f32 %v1514_v36, -20.0 }
 0x282   : > { %v1115_v22 = vrot.slane %v1114_v54, 7  ;;  %v1205_v58 = vsel %vm4182_vm15, %v1204_v6, 0.0  ;;  %v1949_v41 = vadd.f32 %v1948_v12, %v3647_v21  ;;  %v2241_v3 = vsel %vm1819_vm8, 1.0, %v4154_v8  ;;  %vm4193_vm8 = vmmov %vm4191_vm1 }
 0x283   : > { %v953_v48 = vmul.f32 %v952_v9, %v3641_v13  ;;  %v1206_v7 = vadd.f32 %v1205_v58, %v1203_v52  ;;  %v1362_v13 = vadd.f32 %v3639_v5, %v1361_v59  ;;  %v1516_v34 = vsel %vm457_vm12, 0.0, %v1515_v50 }
 0x284   : > { %v1116_v11 = vsel %vm480_vm11, %v1115_v22, 0.0  ;;  %vm1363_vm9 = vweird.f32 %v3602_v0  ;;  %v1369_v21 = vand.u32 2147483648, %v3602_v0  ;;  %v3757_v52 = vsel %vm660_vm13, %v1695_v40, 0.0 }
 0x285   : > { %v954_v53 = vadd.f32 %v953_v48, %v868_v14  ;;  %v1117_v32 = vadd.f32 %v1116_v11, %v1114_v54  ;;  %v1244_v30 = vpop.xlane.xlu2 %1243  ;;  %v1169_v61 = vpop.xlane.xlu0 %1168  ;;  %v1207_v27 = vrot.slane %v1206_v7, 4  ;;  %vm3765_vm0 = vmor %vm1363_vm9, %vm1364_vm2  ;;  %vm3769_vm7 = vcmp.eq.f32.partialorder %v1367_v31, 8.507059e+37 }
 0x286   : > { %v1270_v25 = vmul.f32 %v1244_v30, %v3213_v37  ;;  %v1416_v63 = vpop.xlane.xlu1 %1415  ;;  %v1366_v1 = vsel %vm3765_vm0, %v3639_v5, %v1362_v13  ;;  %v1607_v6 = vsel %vm4188_vm10, %v1606_v35, 0.0  ;;  %v1950_v54 = vrot.slane %v1949_v41, 6  ;;  %vm4195_vm2 = vmmov %vm4191_vm1 }
 0x287   : > { %v1040_v16 = vadd.f32 %v1039_v56, %v954_v53  ;;  %v1118_v10 = vrot.slane %v1117_v32, 6  ;;  %v1442_v14 = vmul.f32 %v1416_v63, %v3213_v37  ;;  %v1208_v38 = vsel %vm660_vm13, %v1207_v27, 0.0  ;;  %v3759_v56 = vld [vmem:[#allocation7 + $0x8] sm:$0xff] }
 0x288   : > { %v1286_v46 = vmul.f32 %v1285_v4, %v1270_v25  ;;  %v1209_v15 = vadd.f32 %v1208_v38, %v1206_v7  ;;  %v1825_v29 = vmul.f32 %v3759_v56, %v2241_v3  ;;  %v1517_v59 = vrot.slane %v1516_v34, 7 }
 0x289   : > { %v1119_v55 = vsel %vm4183_vm5, %v1118_v10, 0.0  ;;  %v1458_v20 = vmul.f32 %v1457_v45, %v1442_v14  ;;  %v1370_v36 = vor.u32 1.1754944e-38, %v1369_v21  ;;  %vm4189_vm3 = vcmask 523264  }
 0x28a   : > { %v1120_v42 = vadd.f32 %v1119_v55, %v1117_v32  ;;  %v1287_v24 = vrot.slane %v1286_v46, 7  ;;  %v1210_v17 = vmul.f32 %v3280_v33, %v1209_v15  ;;  %v1827_v5 = vsel %vm4189_vm3, %v1825_v29, 0.0  ;;  %vm4196_vm9 = vmmov %vm4189_vm3 }
 0x28b   : > { %v1459_v18 = vrot.slane %v1458_v20, 7  ;;  %v1608_v12 = vadd.f32 %v1607_v6, %v3721_v44  ;;  %v1371_v50 = vsel %vm3769_vm7, %v1370_v36, %v1366_v1  ;;  %v1951_v53 = vsel %vm4190_vm14, %v1950_v54, 0.0  ;;  %vm4199_vm3 = vmmov %vm4191_vm1 }
 0x28c   : > { %v1121_v33 = vrot.slane %v1120_v42, 4  ;;  %v1288_v4 = vsel %vm480_vm11, %v1287_v24, 0.0  ;;  %v1211_v9 = vmul.f32 %v1210_v17, %v1169_v61  ;;  %v1518_v61 = vsel %vm480_vm11, %v1517_v59, 0.0 }
 0x28d   : > { %v1289_v40 = vadd.f32 %v1288_v4, %v1286_v46  ;;  %v1460_v22 = vsel %vm480_vm11, %v1459_v18, 0.0  ;;  %v3782_v45 = vpop.xlane.xlu2 %1340  ;;  %v1330_v58 = vpop.xlane.xlu0 %1329  ;;  %v1828_v27 = vadd.f32 %v1827_v5, %v3082_v28  ;;  %v1519_v25 = vadd.f32 %v1518_v61, %v1516_v34 }
 0x28e   : > { %v1122_v48 = vsel %vm660_vm13, %v1121_v33, 0.0  ;;  %v1461_v7 = vadd.f32 %v1460_v22, %v1458_v20  ;;  %v1356_v31 = vmul.f32 %v1330_v58, %v3213_v37  ;;  %vm1733_vm4 = vcmp.eq.s32.totalorder %v3071_v57, 13 }
 0x28f   : > { %v1123_v11 = vadd.f32 %v1122_v48, %v1120_v42  ;;  %v1290_v35 = vrot.slane %v1289_v40, 6  ;;  %v1952_v14 = vadd.f32 %v1951_v53, %v1949_v41  ;;  %v1609_v15 = vrot.slane %v1608_v12, 4 }
 0x290   : > { %v1462_v32 = vrot.slane %v1461_v7, 6  ;;  %v1372_v30 = vmul.f32 %v1371_v50, %v1356_v31  ;;  %v1520_v21 = vrot.slane %v1519_v25, 6  ;;  %v1829_v20 = vrot.slane %v1828_v27, 4 }
 0x291   : > { %v1124_v13 = vmul.f32 %v3332_v43, %v1123_v11  ;;  %v1291_v44 = vsel %vm4191_vm1, %v1290_v35, 0.0  ;;  %v2239_v34 = vsel %vm1733_vm4, 1.0, %v4154_v8  ;;  %vm4194_vm15 = vcmask 130048  }
 0x292   : > { %v1292_v63 = vadd.f32 %v1291_v44, %v1289_v40  ;;  %v1373_v3 = vrot.slane %v1372_v30, 7  ;;  %v1463_v10 = vsel %vm4192_vm6, %v1462_v32, 0.0  ;;  %v1521_v17 = vsel %vm4193_vm8, %v1520_v21, 0.0  ;;  %vm4197_vm5 = vmmov %vm4194_vm15 }
 0x293   : > { %v1125_v38 = vmul.f32 %v1124_v13, %v3695_v49  ;;  %v1464_v46 = vadd.f32 %v1463_v10, %v1461_v7  ;;  %v1953_v0 = vrot.slane %v1952_v14, 4  ;;  %v1522_v51 = vadd.f32 %v1521_v17, %v1519_v25  ;;  %vm4198_vm0 = vmmov %vm4197_vm5 }
 0x294   : > { %v1293_v55 = vrot.slane %v1292_v63, 4  ;;  %v1374_v43 = vsel %vm480_vm11, %v1373_v3, 0.0  ;;  %v1697_v59 = vadd.f32 %v3757_v52, %v3691_v39  ;;  %v1830_v40 = vadd.f32 %v1829_v20, %v1828_v27 }
 0x295   : > { %v1126_v29 = vadd.f32 %v1125_v38, %v1040_v16  ;;  %v1375_v57 = vadd.f32 %v1374_v43, %v1372_v30  ;;  %v1853_v42 = vpop.permute.xlu2 %1852  ;;  %v1465_v24 = vrot.slane %v1464_v46, 4  ;;  %v3814_v16 = vadd.f32 1.0, %v3268_v19  ;;  %v1427_v5 = vpop.xlane.xlu0 %1426 }
 0x296   : > { %v1294_v49 = vsel %vm660_vm13, %v1293_v55, 0.0  ;;  %v1855_v41 = vsel %vm4194_vm15, %v1853_v42, 0.0  ;;  %v1610_v58 = vsel %vm660_vm13, %v1609_v15, 0.0  ;;  %v1739_v36 = vmul.f32 %v3759_v56, %v2239_v34 }
 0x297   : > { %v1295_v18 = vadd.f32 %v1294_v49, %v1292_v63  ;;  %v1212_v1 = vadd.f32 %v1211_v9, %v1126_v29  ;;  %v1376_v6 = vrot.slane %v1375_v57, 6  ;;  %v1466_v8 = vsel %vm660_vm13, %v1465_v24, 0.0  ;;  %1856 = vadd.xlane.f32.xlu2 %v1855_v41 }
 0x298   : > { %v1467_v54 = vadd.f32 %v1466_v8, %v1464_v46  ;;  %v1523_v48 = vrot.slane %v1522_v51, 4  ;;  %2487 = vrcp.f32 %v3814_v16  ;;  %v1698_v31 = vmul.f32 1.442695, %v1697_v59 }
 0x299   : > { %v1296_v33 = vmul.f32 %v3441_v47, %v1295_v18  ;;  %v1377_v4 = vsel %vm4195_vm2, %v1376_v6, 0.0  ;;  %v1954_v47 = vsel %vm660_vm13, %v1953_v0, 0.0  ;;  %v1611_v11 = vadd.f32 %v1610_v58, %v1608_v12 }
 0x29a   : > { %v1378_v22 = vadd.f32 %v1377_v4, %v1375_v57  ;;  %v1468_v9 = vmul.f32 %v3508_v2, %v1467_v54  ;;  %v1831_v2 = vrot.slane %v1830_v40, 2  ;;  %v1955_v56 = vadd.f32 %v1954_v47, %v1952_v14 }
 0x29b   : > { %v1297_v19 = vmul.f32 %v1296_v33, %v3702_v60  ;;  %v1741_v60 = vsel %vm4196_vm9, %v1739_v36, 0.0  ;;  %v1524_v30 = vsel %vm660_vm13, %v1523_v48, 0.0  ;;  %2489 = vpow2.f32 %v1698_v31 }
 0x29c   : > { %v1379_v7 = vrot.slane %v1378_v22, 4  ;;  %v1469_v39 = vmul.f32 %v1468_v9, %v1427_v5  ;;  %v1832_v61 = vadd.f32 %v1831_v2, %v1830_v40  ;;  %v1742_v27 = vadd.f32 %v1741_v60, %v3082_v28 }
 0x29d   : > { %v1298_v52 = vadd.f32 %v1297_v19, %v1212_v1  ;;  %v1612_v13 = vmul.f32 1.442695, %v1611_v11  ;;  %v1525_v25 = vadd.f32 %v1524_v30, %v1522_v51  ;;  %v1956_v14 = vmul.f32 1.442695, %v1955_v56 }
 0x29e   : > { %v1380_v35 = vsel %vm660_vm13, %v1379_v7, 0.0  ;;  %v1939_v50 = vpop.permute.xlu1 %1938  ;;  %v3837_v44 = vpop.eup %2487  ;;  %v1833_v63 = vrot.slane %v1832_v61, 1  ;;  %v1743_v3 = vrot.slane %v1742_v27, 4  ;;  %vm2002_vm7 = vweird.f32 %v3814_v16 }
 0x29f   : > { %v1381_v53 = vadd.f32 %v1380_v35, %v1378_v22  ;;  %v1941_v32 = vsel %vm4197_vm5, %v1939_v50, 0.0  ;;  %2491 = vpow2.f32 %v1612_v13  ;;  %v1998_v21 = vmul.f32 %v3837_v44, %v3814_v16  ;;  %v4200_v13 = vld [vmem:[#allocation14_spill] sm:$0xff] }
 0x2a0   : > { %1942 = vadd.xlane.f32.xlu1 %v1941_v32  ;;  %v1834_v38 = vadd.f32 %v1833_v63, %v1832_v61  ;;  %v1744_v46 = vadd.f32 %v1743_v3, %v1742_v27  ;;  %v1526_v28 = vmul.f32 1.442695, %v1525_v25  ;;  %2493 = vpow2.f32 %v1956_v14 }
 0x2a1   : > { %v1382_v12 = vmul.f32 %v3575_v26, %v1381_v53  ;;  %v3843_v43 = vpop.eup %2489  ;;  %v1999_v42 = vsub.f32 1.0, %v1998_v21  ;;  %vm2003_vm10 = vweird.f32 %v3837_v44  ;;  %v2008_v58 = vand.u32 2147483648, %v3814_v16 }
 0x2a2   : > { %v1858_v26 = vmul.f32 %v1834_v38, %v3093_v62  ;;  %v1745_v55 = vrot.slane %v1744_v46, 2  ;;  %v3849_v24 = vadd.f32 1e-12, %v3843_v43  ;;  %2495 = vpow2.f32 %v1526_v28  ;;  %vm2004_vm14 = vmor %vm2002_vm7, %vm2003_vm10 }
 0x2a3   : > { %v1383_v10 = vmul.f32 %v1382_v12, %v3782_v45  ;;  %v2000_v1 = vmul.f32 %v3837_v44, %v1999_v42  ;;  %v2006_v47 = vand.u32 2147483647, %v3814_v16  ;;  %v2009_v11 = vor.u32 1.1754944e-38, %v2008_v58 }
 0x2a4   : > { %v1859_v29 = vmax.f32 %v1858_v26, -20.0  ;;  %v1746_v45 = vadd.f32 %v1745_v55, %v1744_v46  ;;  %2497 = vrcp.f32 %v3849_v24  ;;  %vm1707_vm6 = vweird.f32 %v3849_v24 }
 0x2a5   : > { %v1384_v15 = vadd.f32 %v1383_v10, %v1298_v52  ;;  %v3851_v17 = vpop.eup %2491  ;;  %v2001_v9 = vadd.f32 %v3837_v44, %v2000_v1 }
 0x2a6   : > { %v1860_v49 = vsel %vm457_vm12, 0.0, %v1859_v29  ;;  %v1747_v41 = vrot.slane %v1746_v45, 1  ;;  %v3855_v51 = vpop.eup %2493  ;;  %v3860_v6 = vadd.f32 1e-12, %v3851_v17 }
 0x2a7   : > { %v3845_v20 = vadd.f32 %v1469_v39, %v1384_v15  ;;  %v1861_v0 = vrot.slane %v1860_v49, 7  ;;  %v3868_v59 = vadd.f32 1e-12, %v3855_v51  ;;  %v2005_v39 = vsel %vm2004_vm14, %v3837_v44, %v2001_v9 }
 0x2a8   : > { %v1767_v34 = vpop.permute.xlu0 %1766  ;;  %v1748_v18 = vadd.f32 %v1747_v41, %v1746_v45  ;;  %v3865_v4 = vpop.eup %2495  ;;  %2499 = vrcp.f32 %v3860_v6  ;;  %v1711_v45 = vand.u32 2147483647, %v3849_v24  ;;  %vm1621_vm9 = vweird.f32 %v3860_v6 }
 0x2a9   : > { %v1769_v57 = vsel %vm4198_vm0, %v1767_v34, 0.0  ;;  %v1862_v8 = vsel %vm480_vm11, %v1861_v0, 0.0  ;;  %v3876_v36 = vadd.f32 1e-12, %v3865_v4  ;;  %2501 = vrcp.f32 %v3868_v59 }
 0x2aa   : > { %1770 = vadd.xlane.f32.xlu0 %v1769_v57  ;;  %v1863_v54 = vadd.f32 %v1862_v8, %v1860_v49  ;;  %v1772_v33 = vmul.f32 %v1748_v18, %v3093_v62  ;;  %v3882_v5 = vpop.eup %2497  ;;  %v1713_v57 = vand.u32 2147483648, %v3849_v24  ;;  %v1625_v18 = vand.u32 2147483647, %v3860_v6 }
 0x2ab   : > { %v1703_v2 = vmul.f32 %v3882_v5, %v3849_v24  ;;  %2503 = vrcp.f32 %v3876_v36  ;;  %vm1708_vm4 = vweird.f32 %v3882_v5  ;;  %vm1712_vm2 = vcmp.eq.f32.partialorder %v1711_v45, 8.507059e+37 }
 0x2ac   : > { %v1864_v40 = vrot.slane %v1863_v54, 6  ;;  %v1773_v22 = vmax.f32 %v1772_v33, -20.0  ;;  %vm3924_vm8 = vmor %vm1707_vm6, %vm1708_vm4  ;;  %v1714_v24 = vor.u32 1.1754944e-38, %v1713_v57  ;;  %v1971_v9 = vand.u32 2147483648, %v3868_v59 }
 0x2ad   : > { %v1704_v30 = vsub.f32 1.0, %v1703_v2  ;;  %vm3946_vm7 = vcmp.eq.f32.partialorder %v1625_v18, 8.507059e+37  ;;  %vm1965_vm10 = vweird.f32 %v3868_v59 }
 0x2ae   : > { %v1865_v62 = vsel %vm4199_vm3, %v1864_v40, 0.0  ;;  %v1774_v19 = vsel %vm457_vm12, 0.0, %v1773_v22  ;;  %v3892_v50 = vpop.eup %2499  ;;  %vm2007_vm12 = vcmp.eq.f32.partialorder %v2006_v47, 8.507059e+37  ;;  %v1627_v40 = vand.u32 2147483648, %v3860_v6 }
 0x2af   : > { %v1866_v48 = vadd.f32 %v1865_v62, %v1863_v54  ;;  %v1775_v7 = vrot.slane %v1774_v19, 7  ;;  %v2010_v56 = vsel %vm2007_vm12, %v2009_v11, %v2005_v39  ;;  %v3896_v32 = vpop.eup %2501  ;;  %v1617_v61 = vmul.f32 %v3892_v50, %v3860_v6 }
 0x2b0   : > { %v2012_v44 = vmul.f32 %v2010_v56, %v4200_v13  ;;  %v1961_v3 = vmul.f32 %v3896_v32, %v3868_v59  ;;  %v1705_v14 = vmul.f32 %v3882_v5, %v1704_v30  ;;  %vm1622_vm15 = vweird.f32 %v3892_v50 }
 0x2b1   : > { %v1867_v52 = vrot.slane %v1866_v48, 4  ;;  %v1776_v31 = vsel %vm480_vm11, %v1775_v7, 0.0  ;;  %v3903_v63 = vpop.eup %2503  ;;  %v1618_v38 = vsub.f32 1.0, %v1617_v61  ;;  %vm1966_vm5 = vweird.f32 %v3896_v32  ;;  %vm3942_vm0 = vmor %vm1621_vm9, %vm1622_vm15 }
 0x2b2   : > { %v1777_v35 = vadd.f32 %v1776_v31, %v1774_v19  ;;  %v1531_v46 = vmul.f32 %v3903_v63, %v3876_v36  ;;  %v1962_v21 = vsub.f32 1.0, %v1961_v3  ;;  %v1706_v55 = vadd.f32 %v3882_v5, %v1705_v14  ;;  %vm3958_vm3 = vmor %vm1965_vm10, %vm1966_vm5 }
 0x2b3   : > { %v1868_v16 = vsel %vm660_vm13, %v1867_v52, 0.0  ;;  %v1619_v34 = vmul.f32 %v3892_v50, %v1618_v38  ;;  %v1539_v7 = vand.u32 2147483647, %v3876_v36  ;;  %vm1536_vm14 = vweird.f32 %v3903_v63 }
 0x2b4   : > { %v1869_v60 = vadd.f32 %v1868_v16, %v1866_v48  ;;  %v1778_v53 = vrot.slane %v1777_v35, 6  ;;  %v1532_v42 = vsub.f32 1.0, %v1531_v46  ;;  %v1963_v41 = vmul.f32 %v3896_v32, %v1962_v21 }
 0x2b5   : > { %v1710_v1 = vsel %vm3924_vm8, %v3882_v5, %v1706_v55  ;;  %v1620_v8 = vadd.f32 %v3892_v50, %v1619_v34  ;;  %v1969_v48 = vand.u32 2147483647, %v3868_v59  ;;  %vm1535_vm12 = vweird.f32 %v3876_v36 }
 0x2b6   : > { %v1870_v27 = vmul.f32 1.442695, %v1869_v60  ;;  %v1779_v12 = vsel %vm4191_vm1, %v1778_v53, 0.0  ;;  %v1533_v54 = vmul.f32 %v3903_v63, %v1532_v42  ;;  %v1964_v22 = vadd.f32 %v3896_v32, %v1963_v41  ;;  %vm3977_vm4 = vmor %vm1535_vm12, %vm1536_vm14 }
 0x2b7   : > { %v1780_v25 = vadd.f32 %v1779_v12, %v1777_v35  ;;  %v1715_v62 = vsel %vm1712_vm2, %v1714_v24, %v1710_v1  ;;  %v1624_v6 = vsel %vm3942_vm0, %v3892_v50, %v1620_v8  ;;  %v1628_v35 = vor.u32 1.1754944e-38, %v1627_v40 }
 0x2b8   : > { %2505 = vpow2.f32 %v1870_v27  ;;  %v1534_v11 = vadd.f32 %v3903_v63, %v1533_v54  ;;  %v1968_v59 = vsel %vm3958_vm3, %v3896_v32, %v1964_v22  ;;  %v1972_v50 = vor.u32 1.1754944e-38, %v1971_v9 }
 0x2b9   : > { %v1781_v10 = vrot.slane %v1780_v25, 4  ;;  %v1541_v53 = vand.u32 2147483648, %v3876_v36  ;;  %v1629_v61 = vsel %vm3946_vm7, %v1628_v35, %v1624_v6  ;;  %vm1970_vm1 = vcmp.eq.f32.partialorder %v1969_v48, 8.507059e+37 }
 0x2ba   : > { %v1973_v13 = vsel %vm1970_vm1, %v1972_v50, %v1968_v59  ;;  %v1538_v36 = vsel %vm3977_vm4, %v3903_v63, %v1534_v11  ;;  %vm3986_vm6 = vcmp.eq.f32.partialorder %v1539_v7, 8.507059e+37  ;;  %vm4215_vm9 = vcmp.ge.s32.totalorder %v2892_v23, 2  ;;  %v2271_v23 = vld [vmem:[%s4111_s9] sm:$0xff] }
 0x2bb   : > { %v1782_v15 = vsel %vm660_vm13, %v1781_v10, 0.0  ;;  %v1542_v46 = vor.u32 1.1754944e-38, %v1541_v53  ;;  %vm4216_vm7 = vmmov %vm4215_vm9 }
 0x2bc   : > { %v1783_v28 = vadd.f32 %v1782_v15, %v1780_v25  ;;  %vm4217_vm12 = vmmov %vm4216_vm7 }
 0x2bd   : > { %v1543_v42 = vsel %vm3986_vm6, %v1542_v46, %v1538_v36  ;;  %vm4218_vm1 = vmmov %vm4216_vm7  ;;  %vm4223_vm6 = vcmask 261120  }
 0x2be   : > { %2014 = vrot.lane.b32.xlu0 %v2012_v44, %s2685_s30  ;;  %v3912_v26 = vpop.eup %2505  ;;  %v1784_v29 = vmul.f32 1.442695, %v1783_v28  ;;  %vm4219_vm4 = vmmov %vm4218_vm1 }
 0x2bf   : > { %v3920_v49 = vadd.f32 1e-12, %v3912_v26 }
 0x2c0   : > { %2507 = vpow2.f32 %v1784_v29 }
 0x2c1   : > { %2509 = vrcp.f32 %v3920_v49  ;;  %vm1879_vm15 = vweird.f32 %v3920_v49  ;;  %v1885_v15 = vand.u32 2147483648, %v3920_v49  ;;  %v1883_v34 = vand.u32 2147483647, %v3920_v49 }
 0x2c3   : > { %vm1884_vm5 = vcmp.eq.f32.partialorder %v1883_v34, 8.507059e+37 }
 0x2c6   : > { %v3950_v47 = vpop.eup %2507 }
 0x2c7   : > { %v2510_v39 = vpop.eup %2509  ;;  %v3965_v2 = vadd.f32 1e-12, %v3950_v47 }
 0x2c8   : > { %v1875_v16 = vmul.f32 %v2510_v39, %v3920_v49  ;;  %vm1880_vm8 = vweird.f32 %v2510_v39 }
 0x2c9   : > { %v1674_v33 = vpop.xlane.xlu1 %1673  ;;  %2511 = vrcp.f32 %v3965_v2  ;;  %vm3997_vm2 = vmor %vm1879_vm15, %vm1880_vm8  ;;  %v1799_v7 = vand.u32 2147483648, %v3965_v2  ;;  %vm1793_vm10 = vweird.f32 %v3965_v2 }
 0x2ca   : > { %v1700_v58 = vmul.f32 %v1674_v33, %v3213_v37  ;;  %v1876_v32 = vsub.f32 1.0, %v1875_v16  ;;  %v1886_v33 = vor.u32 1.1754944e-38, %v1885_v15 }
 0x2cc   : > { %v1716_v52 = vmul.f32 %v1715_v62, %v1700_v58  ;;  %v1877_v14 = vmul.f32 %v2510_v39, %v1876_v32 }
 0x2ce   : > { %v1717_v56 = vrot.slane %v1716_v52, 7  ;;  %v1588_v60 = vpop.xlane.xlu2 %1587  ;;  %v1878_v63 = vadd.f32 %v2510_v39, %v1877_v14 }
 0x2cf   : > { %v1614_v30 = vmul.f32 %v1588_v60, %v3213_v37  ;;  %v2512_v29 = vpop.eup %2511 }
 0x2d0   : > { %v1718_v12 = vsel %vm480_vm11, %v1717_v56, 0.0  ;;  %v1882_v18 = vsel %vm3997_vm2, %v2510_v39, %v1878_v63  ;;  %v1789_v1 = vmul.f32 %v2512_v29, %v3965_v2  ;;  %vm1794_vm0 = vweird.f32 %v2512_v29 }
 0x2d1   : > { %v1719_v25 = vadd.f32 %v1718_v12, %v1716_v52  ;;  %v1630_v3 = vmul.f32 %v1629_v61, %v1614_v30  ;;  %v1932_v10 = vpop.xlane.xlu1 %1931  ;;  %v1887_v19 = vsel %vm1884_vm5, %v1886_v33, %v1882_v18  ;;  %v1797_v52 = vand.u32 2147483647, %v3965_v2  ;;  %vm1795_vm3 = vmor %vm1793_vm10, %vm1794_vm0 }
 0x2d2   : > { %v1958_v38 = vmul.f32 %v1932_v10, %v3213_v37  ;;  %v1790_v9 = vsub.f32 1.0, %v1789_v1  ;;  %v1800_v61 = vor.u32 1.1754944e-38, %v1799_v7 }
 0x2d3   : > { %v1720_v21 = vrot.slane %v1719_v25, 6  ;;  %v1631_v28 = vrot.slane %v1630_v3, 7  ;;  %v1502_v55 = vpop.xlane.xlu0 %1501  ;;  %vm1798_vm14 = vcmp.eq.f32.partialorder %v1797_v52, 8.507059e+37 }
 0x2d4   : > { %v1974_v45 = vmul.f32 %v1973_v13, %v1958_v38  ;;  %v1528_v57 = vmul.f32 %v1502_v55, %v3213_v37  ;;  %v1791_v48 = vmul.f32 %v2512_v29, %v1790_v9 }
 0x2d5   : > { %v1632_v0 = vsel %vm480_vm11, %v1631_v28, 0.0  ;;  %v1721_v49 = vsel %vm4215_vm9, %v1720_v21, 0.0 }
 0x2d6   : > { %v1633_v8 = vadd.f32 %v1632_v0, %v1630_v3  ;;  %v1544_v24 = vmul.f32 %v1543_v42, %v1528_v57  ;;  %v1846_v54 = vpop.xlane.xlu2 %1845  ;;  %v1722_v22 = vadd.f32 %v1721_v49, %v1719_v25  ;;  %v1792_v60 = vadd.f32 %v2512_v29, %v1791_v48 }
 0x2d7   : > { %v1872_v40 = vmul.f32 %v1846_v54, %v3213_v37  ;;  %v1975_v38 = vrot.slane %v1974_v45, 7 }
 0x2d8   : > { %v1634_v58 = vrot.slane %v1633_v8, 6  ;;  %v1545_v62 = vrot.slane %v1544_v24, 7  ;;  %v1723_v6 = vrot.slane %v1722_v22, 4  ;;  %v1796_v32 = vsel %vm1795_vm3, %v2512_v29, %v1792_v60 }
 0x2d9   : > { %v1888_v5 = vmul.f32 %v1887_v19, %v1872_v40  ;;  %v1801_v36 = vsel %vm1798_vm14, %v1800_v61, %v1796_v32  ;;  %v1976_v28 = vsel %vm480_vm11, %v1975_v38, 0.0  ;;  %v1685_v19 = vpop.xlane.xlu1 %1684  ;;  %v2436_v32 = vld [vmem:[%s4110_s8] ss:$0 sm:$0xff] }
 0x2da   : > { %v1546_v39 = vsel %vm480_vm11, %v1545_v62, 0.0  ;;  %v1635_v31 = vsel %vm4216_vm7, %v1634_v58, 0.0  ;;  %v1724_v59 = vsel %vm660_vm13, %v1723_v6, 0.0  ;;  %v1977_v57 = vadd.f32 %v1976_v28, %v1974_v45 }
 0x2db   : > { %v1547_v11 = vadd.f32 %v1546_v39, %v1544_v24  ;;  %v1889_v35 = vrot.slane %v1888_v5, 7  ;;  %v1760_v50 = vpop.xlane.xlu0 %1759  ;;  %v1725_v16 = vadd.f32 %v1724_v59, %v1722_v22  ;;  %v1636_v53 = vadd.f32 %v1635_v31, %v1633_v8  ;;  %v2274_v31 = vld [vmem:[%s4111_s9 + $0x18] sm:$0xff]  ;;  %v2272_v59 = vld [vmem:[%s4111_s9 + $0x8] sm:$0xff] }
 0x2dc   : > { %v1786_v56 = vmul.f32 %v1760_v50, %v3213_v37  ;;  %v1978_v8 = vrot.slane %v1977_v57, 6  ;;  %2058 = vmatpush.bf16.msra.mxu3 %v2274_v31 }
 0x2dd   : > { %v1548_v30 = vrot.slane %v1547_v11, 6  ;;  %v1726_v27 = vmul.f32 %v3843_v43, %v1725_v16  ;;  %v1637_v12 = vrot.slane %v1636_v53, 4  ;;  %v1890_v13 = vsel %vm480_vm11, %v1889_v35, 0.0  ;;  %v2273_v35 = vld [vmem:[%s4111_s9 + $0x10] sm:$0xff] }
 0x2de   : > { %v1802_v44 = vmul.f32 %v1801_v36, %v1786_v56  ;;  %v1891_v10 = vadd.f32 %v1890_v13, %v1888_v5  ;;  %v1599_v42 = vpop.xlane.xlu2 %1598  ;;  %v1979_v45 = vsel %vm4219_vm4, %v1978_v8, 0.0 }
 0x2df   : > { %v1549_v2 = vsel %vm4217_vm12, %v1548_v30, 0.0  ;;  %v1638_v37 = vsel %vm660_vm13, %v1637_v12, 0.0  ;;  %v1980_v40 = vadd.f32 %v1979_v45, %v1977_v57  ;;  %v1727_v5 = vmul.f32 %v1726_v27, %v1685_v19  ;;  %v4221_v12 = vld [vmem:[#allocation15_spill] sm:$0xff] }
 0x2e0   : > { %v1639_v25 = vadd.f32 %v1638_v37, %v1636_v53  ;;  %v1550_v3 = vadd.f32 %v1549_v2, %v1547_v11  ;;  %v1892_v15 = vrot.slane %v1891_v10, 6  ;;  %v1803_v49 = vrot.slane %v1802_v44, 7  ;;  %2059 = vmatpush.bf16.msra.mxu3 %v2273_v35 }
 0x2e1   : > { %v1981_v9 = vrot.slane %v1980_v40, 4  ;;  %v1991_v13 = vmul.f32 %v2436_v32, %v4221_v12 }
 0x2e2   : > { %v1640_v14 = vmul.f32 %v3851_v17, %v1639_v25  ;;  %v1551_v43 = vrot.slane %v1550_v3, 4  ;;  %v1893_v29 = vsel %vm4218_vm1, %v1892_v15, 0.0 }
 0x2e3   : > { %v1513_v63 = vpop.xlane.xlu0 %1512  ;;  %v1894_v17 = vadd.f32 %v1893_v29, %v1891_v10 }
 0x2e4   : > { %v1552_v46 = vsel %vm660_vm13, %v1551_v43, 0.0  ;;  %v1641_v41 = vmul.f32 %v1640_v14, %v1599_v42  ;;  %2060 = vmatpush.bf16.msra.mxu3 %v2272_v59 }
 0x2e5   : > { %v1553_v21 = vadd.f32 %v1552_v46, %v1550_v3  ;;  %v1895_v18 = vrot.slane %v1894_v17, 4 }
 0x2e7   : > { %v1554_v55 = vmul.f32 %v3865_v4, %v1553_v21  ;;  %v1896_v24 = vsel %vm660_vm13, %v1895_v18, 0.0  ;;  %v1804_v4 = vsel %vm480_vm11, %v1803_v49, 0.0  ;;  %vm4220_vm11 = vmmov %vm4218_vm1 }
 0x2e8   : > { %v1897_v54 = vadd.f32 %v1896_v24, %v1894_v17  ;;  %v1805_v22 = vadd.f32 %v1804_v4, %v1802_v44  ;;  %2061 = vmatpush.bf16.msra.mxu3 %v2271_v23 }
 0x2e9   : > { %v1555_v34 = vmul.f32 %v1554_v55, %v1513_v63 }
 0x2ea   : > { %v1898_v33 = vmul.f32 %v3912_v26, %v1897_v54  ;;  %v1806_v58 = vrot.slane %v1805_v22, 6 }
 0x2eb   : > { %v1556_v0 = vadd.f32 %v1555_v34, %v3845_v20  ;;  %v1982_v20 = vsel %vm660_vm13, %v1981_v9, 0.0 }
 0x2ec   : > { %v1983_v62 = vadd.f32 %v1982_v20, %v1980_v40  ;;  %v1807_v7 = vsel %vm4220_vm11, %v1806_v58, 0.0 }
 0x2ed   : > { %v1642_v1 = vadd.f32 %v1641_v41, %v1556_v0  ;;  %v1808_v26 = vadd.f32 %v1807_v7, %v1805_v22 }
 0x2ee   : > { %v1984_v6 = vmul.f32 %v3855_v51, %v1983_v62 }
 0x2ef   : > { %v1728_v48 = vadd.f32 %v1727_v5, %v1642_v1  ;;  %v1809_v39 = vrot.slane %v1808_v26, 4 }
 0x2f1   : > { %v1810_v52 = vsel %vm660_vm13, %v1809_v39, 0.0  ;;  %vm4222_vm13 = vcmask 523264  }
 0x2f2   : > { %v1811_v11 = vadd.f32 %v1810_v52, %v1808_v26 }
 0x2f4   : > { %v1812_v51 = vmul.f32 %v3950_v47, %v1811_v11 }
 0x30a   : > { %v1857_v50 = vpop.xlane.xlu2 %1856 }
 0x30b   : > { %v1899_v53 = vmul.f32 %v1898_v33, %v1857_v50 }
 0x313   : > { %v1943_v60 = vpop.xlane.xlu1 %1942 }
 0x314   : > { %v1985_v47 = vmul.f32 %v1984_v6, %v1943_v60 }
 0x31d   : > { %v1771_v16 = vpop.xlane.xlu0 %1770 }
 0x31e   : > { %v1813_v56 = vmul.f32 %v1812_v51, %v1771_v16 }
 0x320   : > { %v1814_v30 = vadd.f32 %v1813_v56, %v1728_v48 }
 0x322   : > { %v1900_v61 = vadd.f32 %v1899_v53, %v1814_v30 }
 0x324   : > { %v1986_v27 = vadd.f32 %v1985_v47, %v1900_v61 }
 0x326   : > { %v1992_v36 = vadd.f32 %v1991_v13, %v1986_v27 }
 0x330   : > { %v2015_v2 = vpop.permute.xlu0 %2014 }
 0x331   : > { %v2017_v44 = vmul.f32 %v2015_v2, %v1992_v36 }
 0x333   : > { %v2018_v37 = vpack.c.bf16 %v2017_v44, %v2017_v44 }
 0x335   : > { %2260 = vmatmul.msk.bf16.vlgmr.msra.gmra.mxu3 %vm4222_vm13, %v2018_v37 }
 0x3b8   : > { %v2063_v25 = vpop.f32.mrf.mxu3 }
 0x3b9   : > { %2067 = vst.msk [vmem:[%s407_s12] sm:$0xff] %vm4223_vm6, %v2063_v25 }
 0x3ba   : > { %2631 = shalt.err (!%p2628_p11)
}
 0x3bb   : > { %2285 = dma.vmem_to_hbm [thread:$0]  (%p2810_p5), %s2082_s18, 128, %s2084_s29, %s2069_s26  }
 0x3c0   : > { %v2065_v3 = vpop.f32.mrf.mxu3 }
 0x3c1 PF: > { %s2095_s23 = sand.u32 1, %s2662_s13   ;;  %p4224_p12 = scmp.ge.s32.totalorder %s2674_s16, 2 }
 0x3c2   : > { %s2096_s22 = scalar_lea.sflag [#allocation4], %s2095_s23 }
 0x3c3   : > { %p2299_p13 = pnand %p4224_p12, %p2776_p6 }
 0x3c5   : > { %p2300_p0 = pneg %p2299_p13 }
 0x3c7   : > { %2657 = dma.done.wait (%p2300_p0), %s2096_s22, 128  }
 0x3c8   : > { %2659 = vsyncadd (%p2300_p0), %s2096_s22, 4294967168  ;;  %s4225_s25 = sld [smem:[#allocation12_spill]]  ;;  %p24_p3 = scmp.ge.s32.totalorder %s2797_s21, 4  }
 0x3c9   : > { %s4226_s15 = sld [smem:[#allocation13_spill]]  ;;  %s4227_s13 = smov %s2666_s14 }
 0x3ca   : > { %s4229_s16 = smov %s2797_s21  ;;  %26 = sbr.rel (!%p24_p3) target bundleno = 9 (0x9), region = 113 }
 0x3ce   : > { %s4228_s14 = smov %s4225_s25 }
 0x3cf   :  { %2102 = vsyncpa [#allocation3], 1 }
 0x3d0   :  { %2104 = vsyncpa [#allocation3 + $0x1], 1 }
 0x3d1   :  { %2105 = vsyncpa [#allocation6], 1 }
 0x3d2   :  { %2106 = vsyncpa [#allocation4], 1 }
 0x3d3   :  { %2108 = vsyncpa [#allocation4 + $0x1], 1 }

</bundles_post_ra>
